<compile_context>
chip_gen: v7x
topology: tpu7x:2x2x1
jax: 0.10.0
libtpu: 0.0.40
codegen_flags: <defaults>
</compile_context>

<pallas_src>
import functools
import math

import jax
import jax.numpy as jnp
from jax.experimental import pallas as pl
from jax.experimental.pallas import tpu as pltpu

_TP_MAX = 512                      # row tile (measured ~85% HBM roofline vs 63% at 256)
_TK_MAX = 2048                     # K tile for the non-resident fallback
_W_RESIDENT_BYTES = 16 * 1024 * 1024   # budget for (double-buffered) resident weights
_PATCH_TILE_BYTES = 24 * 1024 * 1024   # budget for the double-buffered patch tile
_VMEM_LIMIT = 48 * 1024 * 1024         # explicit scoped-VMEM limit (safe on v5e/v6e/v7x)
_PASSB_ROWS = 2048                     # row tile for the standalone BN-apply pass


def _round_up(x, m):
    return ((x + m - 1) // m) * m


# --------------------------------------------------------------------------
# Kernels — weight-resident path (grid = (npt,), weights DMA'd once)
# --------------------------------------------------------------------------
def _conv_bias_act_kernel(p_ref, w_ref, b_ref, o_ref, *, use_act):
    """Full-K matmul (bf16 MXU, f32 acc) + bias + optional LeakyReLU(0.2)."""
    x = jnp.dot(p_ref[...], w_ref[...], preferred_element_type=jnp.float32)
    x = x + b_ref[...]
    if use_act:
        x = jnp.where(x >= 0, x, 0.2 * x)
    o_ref[...] = x.astype(o_ref.dtype)


def _conv_bn_act_fused_kernel(p_ref, w_ref, g_ref, bta_ref, o_ref, *, use_act, inv_p):
    """Single-tile fusion: conv + exact train-mode BN (biased var) + LeakyReLU.

    Valid only when the single row tile contains every real row (npt == 1);
    padded rows are exact zeros so dividing by the real P (inv_p) is exact.
    """
    y = jnp.dot(p_ref[...], w_ref[...], preferred_element_type=jnp.float32)
    mean = jnp.sum(y, axis=0, keepdims=True) * inv_p
    var = jnp.maximum(jnp.sum(y * y, axis=0, keepdims=True) * inv_p - mean * mean, 0.0)
    scale = g_ref[...] * jax.lax.rsqrt(var + 1e-5)
    shift = bta_ref[...] - mean * scale
    x = y * scale + shift
    if use_act:
        x = jnp.where(x >= 0, x, 0.2 * x)
    o_ref[...] = x.astype(o_ref.dtype)


def _conv_stats_kernel(p_ref, w_ref, y_ref, sum_ref, sq_ref):
    """Pass A: conv emitting bf16 pre-BN activations + per-row-tile partial
    sum / sum-of-squares (one (1,1,Cout_pad) slab per grid step -> the row axis
    can be 'parallel' and megacore-shard on v7x)."""
    y = jnp.dot(p_ref[...], w_ref[...], preferred_element_type=jnp.float32)
    y_ref[...] = y.astype(y_ref.dtype)
    sum_ref[...] = jnp.sum(y, axis=0, keepdims=True).reshape(1, 1, -1)
    sq_ref[...] = jnp.sum(y * y, axis=0, keepdims=True).reshape(1, 1, -1)


def _bn_act_kernel(y_ref, scale_ref, shift_ref, o_ref, *, use_act):
    """Pass B: fused pre-folded BatchNorm (x*scale + shift) + LeakyReLU(0.2)."""
    x = y_ref[...].astype(jnp.float32) * scale_ref[...] + shift_ref[...]
    if use_act:
        x = jnp.where(x >= 0, x, 0.2 * x)
    o_ref[...] = x.astype(o_ref.dtype)


# --------------------------------------------------------------------------
# Kernels — K-tiled fallback (only used when the weight cannot stay resident)
# --------------------------------------------------------------------------
def _conv_bias_act_kernel_kt(p_ref, w_ref, b_ref, o_ref, acc_ref, *, use_act):
    kj = pl.program_id(1)

    @pl.when(kj == 0)
    def _():
        acc_ref[...] = jnp.zeros_like(acc_ref)

    acc_ref[...] += jnp.dot(p_ref[...], w_ref[...],
                            preferred_element_type=jnp.float32)

    @pl.when(kj == pl.num_programs(1) - 1)
    def _():
        x = acc_ref[...] + b_ref[...]
        if use_act:
            x = jnp.where(x >= 0, x, 0.2 * x)
        o_ref[...] = x.astype(o_ref.dtype)


def _conv_stats_kernel_kt(p_ref, w_ref, y_ref, sum_ref, sq_ref, acc_ref):
    kj = pl.program_id(1)

    @pl.when(kj == 0)
    def _():
        acc_ref[...] = jnp.zeros_like(acc_ref)

    acc_ref[...] += jnp.dot(p_ref[...], w_ref[...],
                            preferred_element_type=jnp.float32)

    @pl.when(kj == pl.num_programs(1) - 1)
    def _():
        y = acc_ref[...]
        y_ref[...] = y.astype(y_ref.dtype)
        sum_ref[...] = jnp.sum(y, axis=0, keepdims=True).reshape(1, 1, -1)
        sq_ref[...] = jnp.sum(y * y, axis=0, keepdims=True).reshape(1, 1, -1)


# --------------------------------------------------------------------------
# BN fold (tiny JAX epilogue) + standalone pass-B apply with large bf16 tiles
# --------------------------------------------------------------------------
def _fold_and_apply_bn(y, sums, sqs, P, layer, TP, npt):
    Ppad, Cout_pad = y.shape
    ssum = jnp.sum(sums, axis=0)                   # (1, Cout_pad)
    ssq = jnp.sum(sqs, axis=0)
    mean = ssum / P
    var = jnp.maximum(ssq / P - mean * mean, 0.0)  # exact biased train-mode var
    scale = layer["gamma"] * jax.lax.rsqrt(var + 1e-5)
    shift = layer["beta"] - mean * scale

    TPB = TP
    for m in (8, 4, 2):
        if npt % m == 0 and TP * m <= _PASSB_ROWS:
            TPB = TP * m
            break
    nb = Ppad // TPB

    return pl.pallas_call(
        functools.partial(_bn_act_kernel, use_act=layer["act"]),
        out_shape=jax.ShapeDtypeStruct((Ppad, Cout_pad), jnp.bfloat16),
        grid=(nb,),
        in_specs=[pl.BlockSpec((TPB, Cout_pad), lambda i: (i, 0)),
                  pl.BlockSpec((1, Cout_pad), lambda i: (0, 0)),
                  pl.BlockSpec((1, Cout_pad), lambda i: (0, 0))],
        out_specs=pl.BlockSpec((TPB, Cout_pad), lambda i: (i, 0)),
        compiler_params=pltpu.CompilerParams(
            dimension_semantics=("parallel",),
            vmem_limit_bytes=_VMEM_LIMIT),
    )(y, scale, shift)


# --------------------------------------------------------------------------
# One conv (+BN +LeakyReLU) layer
# --------------------------------------------------------------------------
def _conv_block(x_nhwc, layer):
    N, H, W, Cin = x_nhwc.shape
    ksz, stride, pad = 4, layer["stride"], 1
    Ho = (H + 2 * pad - ksz) // stride + 1
    Wo = (W + 2 * pad - ksz) // stride + 1
    Cout, Cout_pad = layer["Cout"], layer["Cout_pad"]
    Cin_pack, K = layer["Cin_pack"], layer["K"]

    # --- im2col glue (plain JAX). Channels padded BEFORE the stack so K is a
    #     natural multiple of 128 and no pad copy of the patch matrix is needed.
    x = x_nhwc.astype(jnp.bfloat16)
    if Cin < Cin_pack:
        x = jnp.pad(x, ((0, 0), (0, 0), (0, 0), (0, Cin_pack - Cin)))
    xp = jnp.pad(x, ((0, 0), (pad, pad), (pad, pad), (0, 0)))
    cols = []
    for di in range(ksz):
        for dj in range(ksz):
            cols.append(xp[:, di:di + Ho * stride:stride,
                           dj:dj + Wo * stride:stride, :])
    P = N * Ho * Wo
    patches = jnp.stack(cols, axis=3).reshape(P, K)   # bf16, K % 128 == 0

    TP = min(_TP_MAX, _round_up(P, 8))
    # Keep the double-buffered patch tile within a comfortable VMEM share.
    while TP > 64 and 4 * TP * K > _PATCH_TILE_BYTES:
        TP = max(64, _round_up(TP // 2, 8))
    Ppad = _round_up(P, TP)
    if Ppad > P:
        patches = jnp.pad(patches, ((0, Ppad - P), (0, 0)))
    npt = Ppad // TP

    wmat = layer["wmat"]                               # (K, Cout_pad) bf16
    resident = 2 * (K * Cout_pad * 2) <= _W_RESIDENT_BYTES
    cparams_1d = pltpu.CompilerParams(dimension_semantics=("parallel",),
                                      vmem_limit_bytes=_VMEM_LIMIT)

    if resident:
        p_spec = pl.BlockSpec((TP, K), lambda i: (i, 0))
        w_spec = pl.BlockSpec((K, Cout_pad), lambda i: (0, 0))   # DMA'd once
        y_spec = pl.BlockSpec((TP, Cout_pad), lambda i: (i, 0))
        vec_spec = pl.BlockSpec((1, Cout_pad), lambda i: (0, 0))

        if layer["norm"]:
            if npt == 1:
                # ---- fully fused conv + BN(stats+apply) + LeakyReLU ----------
                out = pl.pallas_call(
                    functools.partial(_conv_bn_act_fused_kernel,
                                      use_act=layer["act"], inv_p=1.0 / P),
                    out_shape=jax.ShapeDtypeStruct((Ppad, Cout_pad), jnp.bfloat16),
                    grid=(1,),
                    in_specs=[p_spec, w_spec, vec_spec, vec_spec],
                    out_specs=y_spec,
                    compiler_params=cparams_1d,
                )(patches, wmat, layer["gamma"], layer["beta"])
            else:
                # ---- pass A: conv + per-tile partial stats (row-parallel) ----
                y, sums, sqs = pl.pallas_call(
                    _conv_stats_kernel,
                    out_shape=(jax.ShapeDtypeStruct((Ppad, Cout_pad), jnp.bfloat16),
                               jax.ShapeDtypeStruct((npt, 1, Cout_pad), jnp.float32),
                               jax.ShapeDtypeStruct((npt, 1, Cout_pad), jnp.float32)),
                    grid=(npt,),
                    in_specs=[p_spec, w_spec],
                    out_specs=(y_spec,
                               pl.BlockSpec((1, 1, Cout_pad), lambda i: (i, 0, 0)),
                               pl.BlockSpec((1, 1, Cout_pad), lambda i: (i, 0, 0))),
                    compiler_params=cparams_1d,
                )(patches, wmat)
                out = _fold_and_apply_bn(y, sums, sqs, P, layer, TP, npt)
        else:
            # ---- fused conv + bias + (optional) LeakyReLU, row-parallel ------
            out = pl.pallas_call(
                functools.partial(_conv_bias_act_kernel, use_act=layer["act"]),
                out_shape=jax.ShapeDtypeStruct((Ppad, Cout_pad), jnp.bfloat16),
                grid=(npt,),
                in_specs=[p_spec, w_spec, vec_spec],
                out_specs=y_spec,
                compiler_params=cparams_1d,
            )(patches, wmat, layer["bias"])
    else:
        # ---- K-tiled fallback (weights too large to keep resident) -----------
        TK = math.gcd(K, _TK_MAX)
        nkt = K // TK
        p_spec = pl.BlockSpec((TP, TK), lambda i, j: (i, j))
        w_spec = pl.BlockSpec((TK, Cout_pad), lambda i, j: (j, 0))
        y_spec = pl.BlockSpec((TP, Cout_pad), lambda i, j: (i, 0))
        vec_spec = pl.BlockSpec((1, Cout_pad), lambda i, j: (0, 0))
        kparams = pltpu.CompilerParams(
            dimension_semantics=("parallel", "arbitrary"),
            vmem_limit_bytes=_VMEM_LIMIT)

        if layer["norm"]:
            y, sums, sqs = pl.pallas_call(
                _conv_stats_kernel_kt,
                out_shape=(jax.ShapeDtypeStruct((Ppad, Cout_pad), jnp.bfloat16),
                           jax.ShapeDtypeStruct((npt, 1, Cout_pad), jnp.float32),
                           jax.ShapeDtypeStruct((npt, 1, Cout_pad), jnp.float32)),
                grid=(npt, nkt),
                in_specs=[p_spec, w_spec],
                out_specs=(y_spec,
                           pl.BlockSpec((1, 1, Cout_pad), lambda i, j: (i, 0, 0)),
                           pl.BlockSpec((1, 1, Cout_pad), lambda i, j: (i, 0, 0))),
                scratch_shapes=[pltpu.VMEM((TP, Cout_pad), jnp.float32)],
                compiler_params=kparams,
            )(patches, wmat)
            out = _fold_and_apply_bn(y, sums, sqs, P, layer, TP, npt)
        else:
            out = pl.pallas_call(
                functools.partial(_conv_bias_act_kernel_kt, use_act=layer["act"]),
                out_shape=jax.ShapeDtypeStruct((Ppad, Cout_pad), jnp.bfloat16),
                grid=(npt, nkt),
                in_specs=[p_spec, w_spec, vec_spec],
                out_specs=y_spec,
                scratch_shapes=[pltpu.VMEM((TP, Cout_pad), jnp.float32)],
                compiler_params=kparams,
            )(patches, wmat, layer["bias"])

    return out[:P, :Cout].reshape(N, Ho, Wo, Cout)


# --------------------------------------------------------------------------
# Params (deterministic, matching init_weights(init='norm', gain=0.02)),
# pre-packed once into MXU-friendly (K, Cout_pad) bf16 layout.
# --------------------------------------------------------------------------
def init_patch_discriminator_params(key, input_c=3, num_filters=64, n_down=3,
                                    gain=0.02):
    # (ni, nf, stride, norm, act) exactly as PatchDiscriminator.__init__ builds.
    cfg = [(input_c, num_filters, 2, False, True)]
    for i in range(n_down):
        cfg.append((num_filters * 2 ** i, num_filters * 2 ** (i + 1),
                    1 if i == n_down - 1 else 2, True, True))
    cfg.append((num_filters * 2 ** n_down, 1, 1, False, False))

    params = []
    for (ni, nf, s, norm, act) in cfg:
        key, kw, kg = jax.random.split(key, 3)
        w = gain * jax.random.normal(kw, (nf, ni, 4, 4), jnp.float32)  # N(0,0.02)
        Cin_pack = _round_up(ni, 8)          # layer 0: 3 -> 8 so K = 128
        K = 16 * Cin_pack                    # always a multiple of 128
        Cout_pad = _round_up(nf, 128)
        # (Cout, Cin, kh, kw) -> pad Cin -> (kh*kw*Cin_pack, Cout) -> pad Cout.
        wp = jnp.pad(w, ((0, 0), (0, Cin_pack - ni), (0, 0), (0, 0)))
        wmat = jnp.transpose(wp, (2, 3, 1, 0)).reshape(K, nf)
        wmat = jnp.pad(wmat, ((0, 0), (0, Cout_pad - nf))).astype(jnp.bfloat16)

        layer = dict(wmat=wmat, Cin=ni, Cin_pack=Cin_pack, K=K,
                     Cout=nf, Cout_pad=Cout_pad, stride=s, norm=norm, act=act)
        if norm:
            # BatchNorm2d: weight ~ N(1, 0.02), bias = 0; conv has bias=False.
            gamma = 1.0 + gain * jax.random.normal(kg, (nf,), jnp.float32)
            layer["gamma"] = jnp.pad(gamma, (0, Cout_pad - nf),
                                     constant_values=1.0).reshape(1, Cout_pad)
            layer["beta"] = jnp.zeros((1, Cout_pad), jnp.float32)
        else:
            layer["bias"] = jnp.zeros((1, Cout_pad), jnp.float32)  # conv bias init 0
        params.append(layer)
    return params


def patch_discriminator_forward(params, x_nchw):
    x = jnp.transpose(x_nchw, (0, 2, 3, 1))                  # NCHW -> NHWC
    for layer in params:
        x = _conv_block(x, layer)
    return jnp.transpose(x, (0, 3, 1, 2)).astype(jnp.float32)  # NHWC -> NCHW


if __name__ == "__main__":
    key = jax.random.PRNGKey(0)
    kx, kx2, kp = jax.random.split(key, 3)

    params = init_patch_discriminator_params(kp, input_c=3, num_filters=64, n_down=3)
    fwd = jax.jit(lambda inp: patch_discriminator_forward(params, inp))

    # Small input (input_c=3 = L + ab, spatial 32): exercises the fully fused
    # single-tile conv+BN+LeakyReLU kernels. 32 -> 16 -> 8 -> 4 -> 3 -> 2.
    x = jax.random.normal(kx, (2, 3, 32, 32), jnp.float32)
    out = jax.block_until_ready(fwd(x))
    assert out.shape == (2, 1, 2, 2), out.shape
    assert bool(jnp.all(jnp.isfinite(out)))

    # Larger input: exercises the multi-row-tile (row-parallel) conv kernel and
    # the two-pass BN path (partial stats + fold + pass-B apply).
    x2 = jax.random.normal(kx2, (1, 3, 128, 128), jnp.float32)
    out2 = jax.block_until_ready(fwd(x2))
    assert out2.shape == (1, 1, 14, 14), out2.shape
    assert bool(jnp.all(jnp.isfinite(out2)))

    print("KERNEL_OK")
</pallas_src>

<mosaic_0001>
module attributes {stable_mosaic.version = 11 : i64} {
  func.func @_conv_bias_act_kernel(%arg0: i32, %arg1: memref<512x128xbf16, #tpu.memory_space<vmem>>, %arg2: memref<128x128xbf16, #tpu.memory_space<vmem>>, %arg3: memref<1x128xf32, #tpu.memory_space<vmem>>, %arg4: memref<512x128xbf16, #tpu.memory_space<vmem>>) attributes {dimension_semantics = [#tpu.dimension_semantics<parallel>], iteration_bounds = array<i64: 1>, scalar_prefetch = 0 : i64, scratch_operands = 0 : i64, tpu.core_type = #tpu.core_type<tc>, window_params = [{transform_indices = @transform_0, window_bounds = array<i64: 512, 128>}, {pipeline_mode = #tpu.pipeline_mode<synchronous>, transform_indices = @transform_1, window_bounds = array<i64: 128, 128>}, {pipeline_mode = #tpu.pipeline_mode<synchronous>, transform_indices = @transform_2, window_bounds = array<i64: 1, 128>}, {transform_indices = @transform_3, window_bounds = array<i64: 512, 128>}]} {
    %c0 = arith.constant 0 : index
    %c0_0 = arith.constant 0 : index
    %0 = vector.load %arg1[%c0, %c0_0] : memref<512x128xbf16, #tpu.memory_space<vmem>>, vector<512x128xbf16>
    %c0_1 = arith.constant 0 : index
    %c0_2 = arith.constant 0 : index
    %1 = vector.load %arg2[%c0_1, %c0_2] : memref<128x128xbf16, #tpu.memory_space<vmem>>, vector<128x128xbf16>
    %cst = arith.constant dense<0.000000e+00> : vector<512x128xf32>
    %2 = tpu.matmul %0, %1, %cst {dimension_numbers = #tpu.dot_dimension_numbers<[1], [0], [0], [1], [0, 0, 1, 1], [], []>} : vector<512x128xbf16>, vector<128x128xbf16>, vector<512x128xf32> -> vector<512x128xf32>
    %c0_3 = arith.constant 0 : index
    %c0_4 = arith.constant 0 : index
    %3 = vector.load %arg3[%c0_3, %c0_4] : memref<1x128xf32, #tpu.memory_space<vmem>>, vector<1x128xf32>
    %4 = vector.broadcast %3 : vector<1x128xf32> to vector<512x128xf32>
    %5 = arith.addf %2, %4 : vector<512x128xf32>
    %cst_5 = arith.constant 0.000000e+00 : f32
    %6 = vector.broadcast %cst_5 : f32 to vector<512x128xf32>
    %7 = arith.cmpf oge, %5, %6 : vector<512x128xf32>
    %cst_6 = arith.constant 2.000000e-01 : f32
    %8 = vector.broadcast %cst_6 : f32 to vector<512x128xf32>
    %9 = arith.mulf %8, %5 : vector<512x128xf32>
    %10 = arith.select %7, %5, %9 : vector<512x128xi1>, vector<512x128xf32>
    %11 = arith.truncf %10 : vector<512x128xf32> to vector<512x128xbf16>
    %c0_7 = arith.constant 0 : index
    %c0_8 = arith.constant 0 : index
    %12 = vector.load %arg4[%c0_7, %c0_8] : memref<512x128xbf16, #tpu.memory_space<vmem>>, vector<512x128xbf16>
    tpu.vector_store %arg4[%c0_7, %c0_8], %11 {strides = array<i32>} : memref<512x128xbf16, #tpu.memory_space<vmem>>, vector<512x128xbf16>,
    return
  }
  func.func @transform_0(%arg0: i32) -> (i32, i32) {
    %c0_i32 = arith.constant 0 : i32
    %c0_i32_0 = arith.constant 0 : i32
    return %arg0, %c0_i32 : i32, i32
  }
  func.func @transform_1(%arg0: i32) -> (i32, i32) {
    %c0_i32 = arith.constant 0 : i32
    %c0_i32_0 = arith.constant 0 : i32
    %c0_i32_1 = arith.constant 0 : i32
    return %c0_i32, %c0_i32_0 : i32, i32
  }
  func.func @transform_2(%arg0: i32) -> (i32, i32) {
    %c0_i32 = arith.constant 0 : i32
    %c0_i32_0 = arith.constant 0 : i32
    %c0_i32_1 = arith.constant 0 : i32
    return %c0_i32, %c0_i32_0 : i32, i32
  }
  func.func @transform_3(%arg0: i32) -> (i32, i32) {
    %c0_i32 = arith.constant 0 : i32
    %c0_i32_0 = arith.constant 0 : i32
    return %arg0, %c0_i32 : i32, i32
  }
}

module attributes {stable_mosaic.version = 11 : i64} {
  func.func @_conv_bn_act_fused_kernel(%arg0: i32, %arg1: memref<128x1024xbf16, #tpu.memory_space<vmem>>, %arg2: memref<1024x128xbf16, #tpu.memory_space<vmem>>, %arg3: memref<1x128xf32, #tpu.memory_space<vmem>>, %arg4: memref<1x128xf32, #tpu.memory_space<vmem>>, %arg5: memref<128x128xbf16, #tpu.memory_space<vmem>>) attributes {dimension_semantics = [#tpu.dimension_semantics<parallel>], iteration_bounds = array<i64: 1>, scalar_prefetch = 0 : i64, scratch_operands = 0 : i64, tpu.core_type = #tpu.core_type<tc>, window_params = [{transform_indices = @transform_0, window_bounds = array<i64: 128, 1024>}, {pipeline_mode = #tpu.pipeline_mode<synchronous>, transform_indices = @transform_1, window_bounds = array<i64: 1024, 128>}, {pipeline_mode = #tpu.pipeline_mode<synchronous>, transform_indices = @transform_2, window_bounds = array<i64: 1, 128>}, {pipeline_mode = #tpu.pipeline_mode<synchronous>, transform_indices = @transform_3, window_bounds = array<i64: 1, 128>}, {transform_indices = @transform_4, window_bounds = array<i64: 128, 128>}]} {
    %c0 = arith.constant 0 : index
    %c0_0 = arith.constant 0 : index
    %0 = vector.load %arg1[%c0, %c0_0] : memref<128x1024xbf16, #tpu.memory_space<vmem>>, vector<128x1024xbf16>
    %c0_1 = arith.constant 0 : index
    %c0_2 = arith.constant 0 : index
    %1 = vector.load %arg2[%c0_1, %c0_2] : memref<1024x128xbf16, #tpu.memory_space<vmem>>, vector<1024x128xbf16>
    %cst = arith.constant dense<0.000000e+00> : vector<128x128xf32>
    %2 = tpu.matmul %0, %1, %cst {dimension_numbers = #tpu.dot_dimension_numbers<[1], [0], [0], [1], [0, 0, 1, 1], [], []>} : vector<128x1024xbf16>, vector<1024x128xbf16>, vector<128x128xf32> -> vector<128x128xf32>
    %cst_3 = arith.constant dense<0.000000e+00> : vector<128xf32>
    %3 = vector.multi_reduction <add>, %2, %cst_3 [0] : vector<128x128xf32> to vector<128xf32>
    %4 = vector.shape_cast %3 : vector<128xf32> to vector<1x128xf32>
    %cst_4 = arith.constant 7.812500e-03 : f32
    %5 = vector.broadcast %cst_4 : f32 to vector<1x128xf32>
    %6 = arith.mulf %4, %5 : vector<1x128xf32>
    %7 = arith.mulf %2, %2 : vector<128x128xf32>
    %cst_5 = arith.constant dense<0.000000e+00> : vector<128xf32>
    %8 = vector.multi_reduction <add>, %7, %cst_5 [0] : vector<128x128xf32> to vector<128xf32>
    %9 = vector.shape_cast %8 : vector<128xf32> to vector<1x128xf32>
    %cst_6 = arith.constant 7.812500e-03 : f32
    %10 = vector.broadcast %cst_6 : f32 to vector<1x128xf32>
    %11 = arith.mulf %9, %10 : vector<1x128xf32>
    %12 = arith.mulf %6, %6 : vector<1x128xf32>
    %13 = arith.subf %11, %12 : vector<1x128xf32>
    %cst_7 = arith.constant 0.000000e+00 : f32
    %14 = vector.broadcast %cst_7 : f32 to vector<1x128xf32>
    %15 = arith.maximumf %13, %14 : vector<1x128xf32>
    %c0_8 = arith.constant 0 : index
    %c0_9 = arith.constant 0 : index
    %16 = vector.load %arg3[%c0_8, %c0_9] : memref<1x128xf32, #tpu.memory_space<vmem>>, vector<1x128xf32>
    %cst_10 = arith.constant 9.99999974E-6 : f32
    %17 = vector.broadcast %cst_10 : f32 to vector<1x128xf32>
    %18 = arith.addf %15, %17 : vector<1x128xf32>
    %19 = math.rsqrt %18 : vector<1x128xf32>
    %20 = arith.mulf %16, %19 : vector<1x128xf32>
    %c0_11 = arith.constant 0 : index
    %c0_12 = arith.constant 0 : index
    %21 = vector.load %arg4[%c0_11, %c0_12] : memref<1x128xf32, #tpu.memory_space<vmem>>, vector<1x128xf32>
    %22 = arith.mulf %6, %20 : vector<1x128xf32>
    %23 = arith.subf %21, %22 : vector<1x128xf32>
    %24 = vector.broadcast %20 : vector<1x128xf32> to vector<128x128xf32>
    %25 = arith.mulf %2, %24 : vector<128x128xf32>
    %26 = vector.broadcast %23 : vector<1x128xf32> to vector<128x128xf32>
    %27 = arith.addf %25, %26 : vector<128x128xf32>
    %cst_13 = arith.constant 0.000000e+00 : f32
    %28 = vector.broadcast %cst_13 : f32 to vector<128x128xf32>
    %29 = arith.cmpf oge, %27, %28 : vector<128x128xf32>
    %cst_14 = arith.constant 2.000000e-01 : f32
    %30 = vector.broadcast %cst_14 : f32 to vector<128x128xf32>
    %31 = arith.mulf %30, %27 : vector<128x128xf32>
    %32 = arith.select %29, %27, %31 : vector<128x128xi1>, vector<128x128xf32>
    %33 = arith.truncf %32 : vector<128x128xf32> to vector<128x128xbf16>
    %c0_15 = arith.constant 0 : index
    %c0_16 = arith.constant 0 : index
    %34 = vector.load %arg5[%c0_15, %c0_16] : memref<128x128xbf16, #tpu.memory_space<vmem>>, vector<128x128xbf16>
    tpu.vector_store %arg5[%c0_15, %c0_16], %33 {strides = array<i32>} : memref<128x128xbf16, #tpu.memory_space<vmem>>, vector<128x128xbf16>,
    return
  }
  func.func @transform_0(%arg0: i32) -> (i32, i32) {
    %c0_i32 = arith.constant 0 : i32
    %c0_i32_0 = arith.constant 0 : i32
    return %arg0, %c0_i32 : i32, i32
  }
  func.func @transform_1(%arg0: i32) -> (i32, i32) {
    %c0_i32 = arith.constant 0 : i32
    %c0_i32_0 = arith.constant 0 : i32
    %c0_i32_1 = arith.constant 0 : i32
    return %c0_i32, %c0_i32_0 : i32, i32
  }
  func.func @transform_2(%arg0: i32) -> (i32, i32) {
    %c0_i32 = arith.constant 0 : i32
    %c0_i32_0 = arith.constant 0 : i32
    %c0_i32_1 = arith.constant 0 : i32
    return %c0_i32, %c0_i32_0 : i32, i32
  }
  func.func @transform_3(%arg0: i32) -> (i32, i32) {
    %c0_i32 = arith.constant 0 : i32
    %c0_i32_0 = arith.constant 0 : i32
    %c0_i32_1 = arith.constant 0 : i32
    return %c0_i32, %c0_i32_0 : i32, i32
  }
  func.func @transform_4(%arg0: i32) -> (i32, i32) {
    %c0_i32 = arith.constant 0 : i32
    %c0_i32_0 = arith.constant 0 : i32
    return %arg0, %c0_i32 : i32, i32
  }
}

module attributes {stable_mosaic.version = 11 : i64} {
  func.func @_conv_bn_act_fused_kernel(%arg0: i32, %arg1: memref<32x2048xbf16, #tpu.memory_space<vmem>>, %arg2: memref<2048x256xbf16, #tpu.memory_space<vmem>>, %arg3: memref<1x256xf32, #tpu.memory_space<vmem>>, %arg4: memref<1x256xf32, #tpu.memory_space<vmem>>, %arg5: memref<32x256xbf16, #tpu.memory_space<vmem>>) attributes {dimension_semantics = [#tpu.dimension_semantics<parallel>], iteration_bounds = array<i64: 1>, scalar_prefetch = 0 : i64, scratch_operands = 0 : i64, tpu.core_type = #tpu.core_type<tc>, window_params = [{transform_indices = @transform_0, window_bounds = array<i64: 32, 2048>}, {pipeline_mode = #tpu.pipeline_mode<synchronous>, transform_indices = @transform_1, window_bounds = array<i64: 2048, 256>}, {pipeline_mode = #tpu.pipeline_mode<synchronous>, transform_indices = @transform_2, window_bounds = array<i64: 1, 256>}, {pipeline_mode = #tpu.pipeline_mode<synchronous>, transform_indices = @transform_3, window_bounds = array<i64: 1, 256>}, {transform_indices = @transform_4, window_bounds = array<i64: 32, 256>}]} {
    %c0 = arith.constant 0 : index
    %c0_0 = arith.constant 0 : index
    %0 = vector.load %arg1[%c0, %c0_0] : memref<32x2048xbf16, #tpu.memory_space<vmem>>, vector<32x2048xbf16>
    %c0_1 = arith.constant 0 : index
    %c0_2 = arith.constant 0 : index
    %1 = vector.load %arg2[%c0_1, %c0_2] : memref<2048x256xbf16, #tpu.memory_space<vmem>>, vector<2048x256xbf16>
    %cst = arith.constant dense<0.000000e+00> : vector<32x256xf32>
    %2 = tpu.matmul %0, %1, %cst {dimension_numbers = #tpu.dot_dimension_numbers<[1], [0], [0], [1], [0, 0, 1, 1], [], []>} : vector<32x2048xbf16>, vector<2048x256xbf16>, vector<32x256xf32> -> vector<32x256xf32>
    %cst_3 = arith.constant dense<0.000000e+00> : vector<256xf32>
    %3 = vector.multi_reduction <add>, %2, %cst_3 [0] : vector<32x256xf32> to vector<256xf32>
    %4 = vector.shape_cast %3 : vector<256xf32> to vector<1x256xf32>
    %cst_4 = arith.constant 3.125000e-02 : f32
    %5 = vector.broadcast %cst_4 : f32 to vector<1x256xf32>
    %6 = arith.mulf %4, %5 : vector<1x256xf32>
    %7 = arith.mulf %2, %2 : vector<32x256xf32>
    %cst_5 = arith.constant dense<0.000000e+00> : vector<256xf32>
    %8 = vector.multi_reduction <add>, %7, %cst_5 [0] : vector<32x256xf32> to vector<256xf32>
    %9 = vector.shape_cast %8 : vector<256xf32> to vector<1x256xf32>
    %cst_6 = arith.constant 3.125000e-02 : f32
    %10 = vector.broadcast %cst_6 : f32 to vector<1x256xf32>
    %11 = arith.mulf %9, %10 : vector<1x256xf32>
    %12 = arith.mulf %6, %6 : vector<1x256xf32>
    %13 = arith.subf %11, %12 : vector<1x256xf32>
    %cst_7 = arith.constant 0.000000e+00 : f32
    %14 = vector.broadcast %cst_7 : f32 to vector<1x256xf32>
    %15 = arith.maximumf %13, %14 : vector<1x256xf32>
    %c0_8 = arith.constant 0 : index
    %c0_9 = arith.constant 0 : index
    %16 = vector.load %arg3[%c0_8, %c0_9] : memref<1x256xf32, #tpu.memory_space<vmem>>, vector<1x256xf32>
    %cst_10 = arith.constant 9.99999974E-6 : f32
    %17 = vector.broadcast %cst_10 : f32 to vector<1x256xf32>
    %18 = arith.addf %15, %17 : vector<1x256xf32>
    %19 = math.rsqrt %18 : vector<1x256xf32>
    %20 = arith.mulf %16, %19 : vector<1x256xf32>
    %c0_11 = arith.constant 0 : index
    %c0_12 = arith.constant 0 : index
    %21 = vector.load %arg4[%c0_11, %c0_12] : memref<1x256xf32, #tpu.memory_space<vmem>>, vector<1x256xf32>
    %22 = arith.mulf %6, %20 : vector<1x256xf32>
    %23 = arith.subf %21, %22 : vector<1x256xf32>
    %24 = vector.broadcast %20 : vector<1x256xf32> to vector<32x256xf32>
    %25 = arith.mulf %2, %24 : vector<32x256xf32>
    %26 = vector.broadcast %23 : vector<1x256xf32> to vector<32x256xf32>
    %27 = arith.addf %25, %26 : vector<32x256xf32>
    %cst_13 = arith.constant 0.000000e+00 : f32
    %28 = vector.broadcast %cst_13 : f32 to vector<32x256xf32>
    %29 = arith.cmpf oge, %27, %28 : vector<32x256xf32>
    %cst_14 = arith.constant 2.000000e-01 : f32
    %30 = vector.broadcast %cst_14 : f32 to vector<32x256xf32>
    %31 = arith.mulf %30, %27 : vector<32x256xf32>
    %32 = arith.select %29, %27, %31 : vector<32x256xi1>, vector<32x256xf32>
    %33 = arith.truncf %32 : vector<32x256xf32> to vector<32x256xbf16>
    %c0_15 = arith.constant 0 : index
    %c0_16 = arith.constant 0 : index
    %34 = vector.load %arg5[%c0_15, %c0_16] : memref<32x256xbf16, #tpu.memory_space<vmem>>, vector<32x256xbf16>
    tpu.vector_store %arg5[%c0_15, %c0_16], %33 {strides = array<i32>} : memref<32x256xbf16, #tpu.memory_space<vmem>>, vector<32x256xbf16>,
    return
  }
  func.func @transform_0(%arg0: i32) -> (i32, i32) {
    %c0_i32 = arith.constant 0 : i32
    %c0_i32_0 = arith.constant 0 : i32
    return %arg0, %c0_i32 : i32, i32
  }
  func.func @transform_1(%arg0: i32) -> (i32, i32) {
    %c0_i32 = arith.constant 0 : i32
    %c0_i32_0 = arith.constant 0 : i32
    %c0_i32_1 = arith.constant 0 : i32
    return %c0_i32, %c0_i32_0 : i32, i32
  }
  func.func @transform_2(%arg0: i32) -> (i32, i32) {
    %c0_i32 = arith.constant 0 : i32
    %c0_i32_0 = arith.constant 0 : i32
    %c0_i32_1 = arith.constant 0 : i32
    return %c0_i32, %c0_i32_0 : i32, i32
  }
  func.func @transform_3(%arg0: i32) -> (i32, i32) {
    %c0_i32 = arith.constant 0 : i32
    %c0_i32_0 = arith.constant 0 : i32
    %c0_i32_1 = arith.constant 0 : i32
    return %c0_i32, %c0_i32_0 : i32, i32
  }
  func.func @transform_4(%arg0: i32) -> (i32, i32) {
    %c0_i32 = arith.constant 0 : i32
    %c0_i32_0 = arith.constant 0 : i32
    return %arg0, %c0_i32 : i32, i32
  }
}

module attributes {stable_mosaic.version = 11 : i64} {
  func.func @_conv_bn_act_fused_kernel(%arg0: i32, %arg1: memref<24x4096xbf16, #tpu.memory_space<vmem>>, %arg2: memref<4096x512xbf16, #tpu.memory_space<vmem>>, %arg3: memref<1x512xf32, #tpu.memory_space<vmem>>, %arg4: memref<1x512xf32, #tpu.memory_space<vmem>>, %arg5: memref<24x512xbf16, #tpu.memory_space<vmem>>) attributes {dimension_semantics = [#tpu.dimension_semantics<parallel>], iteration_bounds = array<i64: 1>, scalar_prefetch = 0 : i64, scratch_operands = 0 : i64, tpu.core_type = #tpu.core_type<tc>, window_params = [{transform_indices = @transform_0, window_bounds = array<i64: 24, 4096>}, {pipeline_mode = #tpu.pipeline_mode<synchronous>, transform_indices = @transform_1, window_bounds = array<i64: 4096, 512>}, {pipeline_mode = #tpu.pipeline_mode<synchronous>, transform_indices = @transform_2, window_bounds = array<i64: 1, 512>}, {pipeline_mode = #tpu.pipeline_mode<synchronous>, transform_indices = @transform_3, window_bounds = array<i64: 1, 512>}, {transform_indices = @transform_4, window_bounds = array<i64: 24, 512>}]} {
    %c0 = arith.constant 0 : index
    %c0_0 = arith.constant 0 : index
    %0 = vector.load %arg1[%c0, %c0_0] : memref<24x4096xbf16, #tpu.memory_space<vmem>>, vector<24x4096xbf16>
    %c0_1 = arith.constant 0 : index
    %c0_2 = arith.constant 0 : index
    %1 = vector.load %arg2[%c0_1, %c0_2] : memref<4096x512xbf16, #tpu.memory_space<vmem>>, vector<4096x512xbf16>
    %cst = arith.constant dense<0.000000e+00> : vector<24x512xf32>
    %2 = tpu.matmul %0, %1, %cst {dimension_numbers = #tpu.dot_dimension_numbers<[1], [0], [0], [1], [0, 0, 1, 1], [], []>} : vector<24x4096xbf16>, vector<4096x512xbf16>, vector<24x512xf32> -> vector<24x512xf32>
    %cst_3 = arith.constant dense<0.000000e+00> : vector<512xf32>
    %3 = vector.multi_reduction <add>, %2, %cst_3 [0] : vector<24x512xf32> to vector<512xf32>
    %4 = vector.shape_cast %3 : vector<512xf32> to vector<1x512xf32>
    %cst_4 = arith.constant 0.055555556 : f32
    %5 = vector.broadcast %cst_4 : f32 to vector<1x512xf32>
    %6 = arith.mulf %4, %5 : vector<1x512xf32>
    %7 = arith.mulf %2, %2 : vector<24x512xf32>
    %cst_5 = arith.constant dense<0.000000e+00> : vector<512xf32>
    %8 = vector.multi_reduction <add>, %7, %cst_5 [0] : vector<24x512xf32> to vector<512xf32>
    %9 = vector.shape_cast %8 : vector<512xf32> to vector<1x512xf32>
    %cst_6 = arith.constant 0.055555556 : f32
    %10 = vector.broadcast %cst_6 : f32 to vector<1x512xf32>
    %11 = arith.mulf %9, %10 : vector<1x512xf32>
    %12 = arith.mulf %6, %6 : vector<1x512xf32>
    %13 = arith.subf %11, %12 : vector<1x512xf32>
    %cst_7 = arith.constant 0.000000e+00 : f32
    %14 = vector.broadcast %cst_7 : f32 to vector<1x512xf32>
    %15 = arith.maximumf %13, %14 : vector<1x512xf32>
    %c0_8 = arith.constant 0 : index
    %c0_9 = arith.constant 0 : index
    %16 = vector.load %arg3[%c0_8, %c0_9] : memref<1x512xf32, #tpu.memory_space<vmem>>, vector<1x512xf32>
    %cst_10 = arith.constant 9.99999974E-6 : f32
    %17 = vector.broadcast %cst_10 : f32 to vector<1x512xf32>
    %18 = arith.addf %15, %17 : vector<1x512xf32>
    %19 = math.rsqrt %18 : vector<1x512xf32>
    %20 = arith.mulf %16, %19 : vector<1x512xf32>
    %c0_11 = arith.constant 0 : index
    %c0_12 = arith.constant 0 : index
    %21 = vector.load %arg4[%c0_11, %c0_12] : memref<1x512xf32, #tpu.memory_space<vmem>>, vector<1x512xf32>
    %22 = arith.mulf %6, %20 : vector<1x512xf32>
    %23 = arith.subf %21, %22 : vector<1x512xf32>
    %24 = vector.broadcast %20 : vector<1x512xf32> to vector<24x512xf32>
    %25 = arith.mulf %2, %24 : vector<24x512xf32>
    %26 = vector.broadcast %23 : vector<1x512xf32> to vector<24x512xf32>
    %27 = arith.addf %25, %26 : vector<24x512xf32>
    %cst_13 = arith.constant 0.000000e+00 : f32
    %28 = vector.broadcast %cst_13 : f32 to vector<24x512xf32>
    %29 = arith.cmpf oge, %27, %28 : vector<24x512xf32>
    %cst_14 = arith.constant 2.000000e-01 : f32
    %30 = vector.broadcast %cst_14 : f32 to vector<24x512xf32>
    %31 = arith.mulf %30, %27 : vector<24x512xf32>
    %32 = arith.select %29, %27, %31 : vector<24x512xi1>, vector<24x512xf32>
    %33 = arith.truncf %32 : vector<24x512xf32> to vector<24x512xbf16>
    %c0_15 = arith.constant 0 : index
    %c0_16 = arith.constant 0 : index
    %34 = vector.load %arg5[%c0_15, %c0_16] : memref<24x512xbf16, #tpu.memory_space<vmem>>, vector<24x512xbf16>
    tpu.vector_store %arg5[%c0_15, %c0_16], %33 {strides = array<i32>} : memref<24x512xbf16, #tpu.memory_space<vmem>>, vector<24x512xbf16>,
    return
  }
  func.func @transform_0(%arg0: i32) -> (i32, i32) {
    %c0_i32 = arith.constant 0 : i32
    %c0_i32_0 = arith.constant 0 : i32
    return %arg0, %c0_i32 : i32, i32
  }
  func.func @transform_1(%arg0: i32) -> (i32, i32) {
    %c0_i32 = arith.constant 0 : i32
    %c0_i32_0 = arith.constant 0 : i32
    %c0_i32_1 = arith.constant 0 : i32
    return %c0_i32, %c0_i32_0 : i32, i32
  }
  func.func @transform_2(%arg0: i32) -> (i32, i32) {
    %c0_i32 = arith.constant 0 : i32
    %c0_i32_0 = arith.constant 0 : i32
    %c0_i32_1 = arith.constant 0 : i32
    return %c0_i32, %c0_i32_0 : i32, i32
  }
  func.func @transform_3(%arg0: i32) -> (i32, i32) {
    %c0_i32 = arith.constant 0 : i32
    %c0_i32_0 = arith.constant 0 : i32
    %c0_i32_1 = arith.constant 0 : i32
    return %c0_i32, %c0_i32_0 : i32, i32
  }
  func.func @transform_4(%arg0: i32) -> (i32, i32) {
    %c0_i32 = arith.constant 0 : i32
    %c0_i32_0 = arith.constant 0 : i32
    return %arg0, %c0_i32 : i32, i32
  }
}

module attributes {stable_mosaic.version = 11 : i64} {
  func.func @_conv_bias_act_kernel(%arg0: i32, %arg1: memref<8x8192xbf16, #tpu.memory_space<vmem>>, %arg2: memref<8192x128xbf16, #tpu.memory_space<vmem>>, %arg3: memref<1x128xf32, #tpu.memory_space<vmem>>, %arg4: memref<8x128xbf16, #tpu.memory_space<vmem>>) attributes {dimension_semantics = [#tpu.dimension_semantics<parallel>], iteration_bounds = array<i64: 1>, scalar_prefetch = 0 : i64, scratch_operands = 0 : i64, tpu.core_type = #tpu.core_type<tc>, window_params = [{transform_indices = @transform_0, window_bounds = array<i64: 8, 8192>}, {pipeline_mode = #tpu.pipeline_mode<synchronous>, transform_indices = @transform_1, window_bounds = array<i64: 8192, 128>}, {pipeline_mode = #tpu.pipeline_mode<synchronous>, transform_indices = @transform_2, window_bounds = array<i64: 1, 128>}, {transform_indices = @transform_3, window_bounds = array<i64: 8, 128>}]} {
    %c0 = arith.constant 0 : index
    %c0_0 = arith.constant 0 : index
    %0 = vector.load %arg1[%c0, %c0_0] : memref<8x8192xbf16, #tpu.memory_space<vmem>>, vector<8x8192xbf16>
    %c0_1 = arith.constant 0 : index
    %c0_2 = arith.constant 0 : index
    %1 = vector.load %arg2[%c0_1, %c0_2] : memref<8192x128xbf16, #tpu.memory_space<vmem>>, vector<8192x128xbf16>
    %cst = arith.constant dense<0.000000e+00> : vector<8x128xf32>
    %2 = tpu.matmul %0, %1, %cst {dimension_numbers = #tpu.dot_dimension_numbers<[1], [0], [0], [1], [0, 0, 1, 1], [], []>} : vector<8x8192xbf16>, vector<8192x128xbf16>, vector<8x128xf32> -> vector<8x128xf32>
    %c0_3 = arith.constant 0 : index
    %c0_4 = arith.constant 0 : index
    %3 = vector.load %arg3[%c0_3, %c0_4] : memref<1x128xf32, #tpu.memory_space<vmem>>, vector<1x128xf32>
    %4 = vector.broadcast %3 : vector<1x128xf32> to vector<8x128xf32>
    %5 = arith.addf %2, %4 : vector<8x128xf32>
    %6 = arith.truncf %5 : vector<8x128xf32> to vector<8x128xbf16>
    %c0_5 = arith.constant 0 : index
    %c0_6 = arith.constant 0 : index
    %7 = vector.load %arg4[%c0_5, %c0_6] : memref<8x128xbf16, #tpu.memory_space<vmem>>, vector<8x128xbf16>
    tpu.vector_store %arg4[%c0_5, %c0_6], %6 {strides = array<i32>} : memref<8x128xbf16, #tpu.memory_space<vmem>>, vector<8x128xbf16>,
    return
  }
  func.func @transform_0(%arg0: i32) -> (i32, i32) {
    %c0_i32 = arith.constant 0 : i32
    %c0_i32_0 = arith.constant 0 : i32
    return %arg0, %c0_i32 : i32, i32
  }
  func.func @transform_1(%arg0: i32) -> (i32, i32) {
    %c0_i32 = arith.constant 0 : i32
    %c0_i32_0 = arith.constant 0 : i32
    %c0_i32_1 = arith.constant 0 : i32
    return %c0_i32, %c0_i32_0 : i32, i32
  }
  func.func @transform_2(%arg0: i32) -> (i32, i32) {
    %c0_i32 = arith.constant 0 : i32
    %c0_i32_0 = arith.constant 0 : i32
    %c0_i32_1 = arith.constant 0 : i32
    return %c0_i32, %c0_i32_0 : i32, i32
  }
  func.func @transform_3(%arg0: i32) -> (i32, i32) {
    %c0_i32 = arith.constant 0 : i32
    %c0_i32_0 = arith.constant 0 : i32
    return %arg0, %c0_i32 : i32, i32
  }
}

</mosaic_0001>

<bundles_post_ra>
// kernel: _lambda_.5
= control target key start
LH: loop header
LB: loop body
LE: loop exit
PB: predicated region body
PF: predicated region fallthrough
CT: control target
= control target key end

     0   :  { %s1997_s1 = inlined_call_operand.vmem [shape: bf16[128,128], index: 1, kind: input, shape index: {}]   ;;  %s1998_s0 = inlined_call_operand.vmem [shape: bf16[512,128], index: 0, kind: input, shape index: {}]   ;;  %s1999_s2 = inlined_call_operand.vmem [shape: f32[1,128], index: 2, kind: input, shape index: {}]   ;;  %s2000_s3 = inlined_call_operand.vmem [shape: bf16[512,128], index: 3, kind: output, shape index: {}]  }
   0x1   :  { %v1643_v0 = vld [vmem:[%s1997_s1] sm:$0xff]   ;;  %v1644_v1 = vld [vmem:[%s1997_s1 + $0x8] sm:$0xff]   ;;  %v1645_v2 = vld [vmem:[%s1997_s1 + $0x10] sm:$0xff]  }
   0x2   :  { %1547 = vmatprep.subr.bf16.mxu0 %v1643_v0  ;;  %1627 = vmatprep.subr.bf16.mxu1 %v1643_v0  ;;  %v1646_v3 = vld [vmem:[%s1997_s1 + $0x18] sm:$0xff]   ;;  %v1651_v4 = vld [vmem:[%s1998_s0] sm:$0xff]   ;;  %v1648_v7 = vld [vmem:[%s1997_s1 + $0x28] sm:$0xff]  }
   0x3   :  { %1548 = vmatpush3.bf16.msra.mxu0 %v1643_v0  ;;  %1635 = vmatpush3.bf16.msra.mxu1 %v1643_v0  ;;  %v1652_v5 = vld [vmem:[%s1998_s0 + $0x80] sm:$0xff]   ;;  %v1649_v8 = vld [vmem:[%s1997_s1 + $0x30] sm:$0xff]   ;;  %v1650_v9 = vld [vmem:[%s1997_s1 + $0x38] sm:$0xff]  }
   0x4   :  { %1549 = vmatprep.subr.bf16.mxu0 %v1644_v1  ;;  %1628 = vmatprep.subr.bf16.mxu1 %v1644_v1  ;;  %v1647_v6 = vld [vmem:[%s1997_s1 + $0x20] sm:$0xff]   ;;  %v1653_v10 = vld [vmem:[%s1998_s0 + $0x8] sm:$0xff]   ;;  %v1655_v12 = vld [vmem:[%s1998_s0 + $0x10] sm:$0xff]  }
   0x5   :  { %1563 = vmatprep.mubr.bf16.mxu0 %v1651_v4  ;;  %1595 = vmatprep.mubr.bf16.mxu1 %v1652_v5  ;;  %v1654_v11 = vld [vmem:[%s1998_s0 + $0x88] sm:$0xff]   ;;  %v1656_v13 = vld [vmem:[%s1998_s0 + $0x90] sm:$0xff]   ;;  %v1657_v14 = vld [vmem:[%s1998_s0 + $0x18] sm:$0xff]  }
   0x6   :  { %v1658_v15 = vld [vmem:[%s1998_s0 + $0x98] sm:$0xff]   ;;  %v1659_v16 = vld [vmem:[%s1998_s0 + $0x20] sm:$0xff]   ;;  %v1661_v18 = vld [vmem:[%s1998_s0 + $0x28] sm:$0xff]  }
   0x7   :  { %1550 = vmatpush3.bf16.msra.mxu0 %v1644_v1  ;;  %1636 = vmatpush3.bf16.msra.mxu1 %v1644_v1  ;;  %v1660_v17 = vld [vmem:[%s1998_s0 + $0xa0] sm:$0xff]   ;;  %v1662_v19 = vld [vmem:[%s1998_s0 + $0xa8] sm:$0xff]   ;;  %v1663_v20 = vld [vmem:[%s1998_s0 + $0x30] sm:$0xff]  }
   0x8   :  { %1551 = vmatprep.subr.bf16.mxu0 %v1645_v2  ;;  %1629 = vmatprep.subr.bf16.mxu1 %v1645_v2  ;;  %v1664_v21 = vld [vmem:[%s1998_s0 + $0xb0] sm:$0xff]   ;;  %v1665_v22 = vld [vmem:[%s1998_s0 + $0x38] sm:$0xff]   ;;  %v1667_v24 = vld [vmem:[%s1998_s0 + $0x40] sm:$0xff]  }
   0x9   :  { %v1666_v23 = vld [vmem:[%s1998_s0 + $0xb8] sm:$0xff]   ;;  %v1668_v25 = vld [vmem:[%s1998_s0 + $0xc0] sm:$0xff]   ;;  %v1669_v26 = vld [vmem:[%s1998_s0 + $0x48] sm:$0xff]  }
   0xa   :  { %v1670_v27 = vld [vmem:[%s1998_s0 + $0xc8] sm:$0xff]   ;;  %v1671_v28 = vld [vmem:[%s1998_s0 + $0x50] sm:$0xff]   ;;  %v1673_v30 = vld [vmem:[%s1998_s0 + $0x58] sm:$0xff]  }
   0xb   :  { %1552 = vmatpush3.bf16.msra.mxu0 %v1645_v2  ;;  %1637 = vmatpush3.bf16.msra.mxu1 %v1645_v2  ;;  %v1672_v29 = vld [vmem:[%s1998_s0 + $0xd0] sm:$0xff]   ;;  %v1674_v31 = vld [vmem:[%s1998_s0 + $0xd8] sm:$0xff]   ;;  %v1675_v32 = vld [vmem:[%s1998_s0 + $0x60] sm:$0xff]  }
   0xc   :  { %1553 = vmatprep.subr.bf16.mxu0 %v1646_v3  ;;  %1630 = vmatprep.subr.bf16.mxu1 %v1646_v3  ;;  %v1676_v33 = vld [vmem:[%s1998_s0 + $0xe0] sm:$0xff]   ;;  %v1677_v34 = vld [vmem:[%s1998_s0 + $0x68] sm:$0xff]   ;;  %v1679_v36 = vld [vmem:[%s1998_s0 + $0x70] sm:$0xff]  }
   0xd   :  { %v1678_v35 = vld [vmem:[%s1998_s0 + $0xe8] sm:$0xff]   ;;  %v1680_v37 = vld [vmem:[%s1998_s0 + $0xf0] sm:$0xff]   ;;  %v1681_v38 = vld [vmem:[%s1998_s0 + $0x78] sm:$0xff]  }
   0xe   :  { %v1682_v39 = vld [vmem:[%s1998_s0 + $0xf8] sm:$0xff]   ;;  %v1826_v40 = vld [vmem:[%s1999_s2] ss:$0 sm:$0xff] }
   0xf   :  { %1554 = vmatpush3.bf16.msra.mxu0 %v1646_v3  ;;  %1638 = vmatpush3.bf16.msra.mxu1 %v1646_v3 }
  0x10   :  { %1555 = vmatprep.subr.bf16.mxu0 %v1647_v6  ;;  %1631 = vmatprep.subr.bf16.mxu1 %v1647_v6 }
  0x13   :  { %1556 = vmatpush3.bf16.msra.mxu0 %v1647_v6  ;;  %1639 = vmatpush3.bf16.msra.mxu1 %v1647_v6 }
  0x14   :  { %1557 = vmatprep.subr.bf16.mxu0 %v1648_v7  ;;  %1632 = vmatprep.subr.bf16.mxu1 %v1648_v7 }
  0x17   :  { %1558 = vmatpush3.bf16.msra.mxu0 %v1648_v7  ;;  %1640 = vmatpush3.bf16.msra.mxu1 %v1648_v7 }
  0x18   :  { %1559 = vmatprep.subr.bf16.mxu0 %v1649_v8  ;;  %1633 = vmatprep.subr.bf16.mxu1 %v1649_v8 }
  0x1b   :  { %1560 = vmatpush3.bf16.msra.mxu0 %v1649_v8  ;;  %1641 = vmatpush3.bf16.msra.mxu1 %v1649_v8 }
  0x1c   :  { %1561 = vmatprep.subr.bf16.mxu0 %v1650_v9  ;;  %1634 = vmatprep.subr.bf16.mxu1 %v1650_v9 }
  0x1f   :  { %1562 = vmatpush3.bf16.msra.mxu0 %v1650_v9  ;;  %1642 = vmatpush3.bf16.msra.mxu1 %v1650_v9 }
  0x22   :  { %1564 = vmatmul.mubr.bf16.vlgmr.msra.gmra.mrb[0].mxu0 %v1653_v10  ;;  %1596 = vmatmul.mubr.bf16.vlgmr.msra.gmra.mrb[0].mxu1 %v1654_v11 }
  0x23   :  { %1567 = vmatprep.mubr.bf16.mxu0 %v1655_v12  ;;  %1599 = vmatprep.mubr.bf16.mxu1 %v1656_v13 }
  0x2a   :  { %1568 = vmatmul.mubr.bf16.gmra.mrb[4].mxu0 %v1657_v14  ;;  %1600 = vmatmul.mubr.bf16.gmra.mrb[4].mxu1 %v1658_v15 }
  0x2b   :  { %1571 = vmatprep.mubr.bf16.mxu0 %v1659_v16  ;;  %1603 = vmatprep.mubr.bf16.mxu1 %v1660_v17 }
  0x32   :  { %1572 = vmatmul.mubr.bf16.gmra.mrb[8].mxu0 %v1661_v18  ;;  %1604 = vmatmul.mubr.bf16.gmra.mrb[8].mxu1 %v1662_v19 }
  0x33   :  { %1575 = vmatprep.mubr.bf16.mxu0 %v1663_v20  ;;  %1607 = vmatprep.mubr.bf16.mxu1 %v1664_v21 }
  0x3a   :  { %1576 = vmatmul.mubr.bf16.gmra.mrb[12].mxu0 %v1665_v22  ;;  %1608 = vmatmul.mubr.bf16.gmra.mrb[12].mxu1 %v1666_v23 }
  0x3b   :  { %1579 = vmatprep.mubr.bf16.mxu0 %v1667_v24  ;;  %1611 = vmatprep.mubr.bf16.mxu1 %v1668_v25 }
  0x42   :  { %1580 = vmatmul.mubr.bf16.gmra.mrb[16].mxu0 %v1669_v26  ;;  %1612 = vmatmul.mubr.bf16.gmra.mrb[16].mxu1 %v1670_v27 }
  0x43   :  { %1583 = vmatprep.mubr.bf16.mxu0 %v1671_v28  ;;  %1615 = vmatprep.mubr.bf16.mxu1 %v1672_v29 }
  0x4a   :  { %1584 = vmatmul.mubr.bf16.gmra.mrb[20].mxu0 %v1673_v30  ;;  %1616 = vmatmul.mubr.bf16.gmra.mrb[20].mxu1 %v1674_v31 }
  0x4b   :  { %1587 = vmatprep.mubr.bf16.mxu0 %v1675_v32  ;;  %1619 = vmatprep.mubr.bf16.mxu1 %v1676_v33 }
  0x52   :  { %1588 = vmatmul.mubr.bf16.gmra.mrb[24].mxu0 %v1677_v34  ;;  %1620 = vmatmul.mubr.bf16.gmra.mrb[24].mxu1 %v1678_v35 }
  0x53   :  { %1591 = vmatprep.mubr.bf16.mxu0 %v1679_v36  ;;  %1623 = vmatprep.mubr.bf16.mxu1 %v1680_v37 }
  0x5a   :  { %1592 = vmatmul.mubr.bf16.gmra.mrb[28].mxu0 %v1681_v38  ;;  %1624 = vmatmul.mubr.bf16.gmra.mrb[28].mxu1 %v1682_v39 }
  0xf5   :  { %v1565_v41 = vpop.f32.mrb[0].mxu0  ;;  %v1597_v42 = vpop.f32.mrb[0].mxu1 }
  0xf6   :  { %v385_v43 = vadd.f32 %v1565_v41, %v1826_v40  ;;  %v513_v44 = vadd.f32 %v1597_v42, %v1826_v40  ;;  %v376_v45 = vpop.f32.mrb[1].mxu0  ;;  %v504_v46 = vpop.f32.mrb[1].mxu1 }
  0xf7   :  { %v377_v47 = vadd.f32 %v1826_v40, %v376_v45  ;;  %v505_v48 = vadd.f32 %v1826_v40, %v504_v46  ;;  %v1566_v49 = vpop.f32.mrb[2].mxu0  ;;  %v1598_v50 = vpop.f32.mrb[2].mxu1 }
  0xf8   :  { %vm633_vm0 = vcmp.ge.f32.partialorder %v385_v43, 0.0  ;;  %v697_v51 = vmul.f32 0.2, %v385_v43  ;;  %vm665_vm1 = vcmp.ge.f32.partialorder %v513_v44, 0.0  ;;  %v729_v52 = vmul.f32 0.2, %v513_v44 }
  0xf9   :  { %vm631_vm2 = vcmp.ge.f32.partialorder %v377_v47, 0.0  ;;  %v695_v53 = vmul.f32 0.2, %v377_v47  ;;  %vm663_vm3 = vcmp.ge.f32.partialorder %v505_v48, 0.0  ;;  %v727_v54 = vmul.f32 0.2, %v505_v48 }
  0xfa   :  { %v388_v55 = vadd.f32 %v1566_v49, %v1826_v40  ;;  %v516_v56 = vadd.f32 %v1598_v50, %v1826_v40  ;;  %v379_v57 = vpop.f32.mrb[3].mxu0  ;;  %v507_v58 = vpop.f32.mrb[3].mxu1  ;;  %v761_v59 = vsel %vm633_vm0, %v385_v43, %v697_v51  ;;  %v793_v60 = vsel %vm665_vm1, %v513_v44, %v729_v52 }
  0xfb   :  { %v380_v61 = vadd.f32 %v1826_v40, %v379_v57  ;;  %v508_v62 = vadd.f32 %v1826_v40, %v507_v58  ;;  %v759_v3 = vsel %vm631_vm2, %v377_v47, %v695_v53  ;;  %v791_v4 = vsel %vm663_vm3, %v505_v48, %v727_v54 }
  0xfc   :  { %vm634_vm4 = vcmp.ge.f32.partialorder %v388_v55, 0.0  ;;  %v698_v63 = vmul.f32 0.2, %v388_v55  ;;  %vm666_vm5 = vcmp.ge.f32.partialorder %v516_v56, 0.0  ;;  %v730_v0 = vmul.f32 0.2, %v516_v56 }
  0xfd   :  { %vm632_vm6 = vcmp.ge.f32.partialorder %v380_v61, 0.0  ;;  %v696_v1 = vmul.f32 0.2, %v380_v61  ;;  %vm664_vm7 = vcmp.ge.f32.partialorder %v508_v62, 0.0  ;;  %v728_v2 = vmul.f32 0.2, %v508_v62 }
  0xfe   :  { %v762_v5 = vsel %vm634_vm4, %v388_v55, %v698_v63  ;;  %v794_v6 = vsel %vm666_vm5, %v516_v56, %v730_v0  ;;  %v1569_v7 = vpop.f32.mrb[4].mxu0  ;;  %v1601_v8 = vpop.f32.mrb[4].mxu1 }
  0xff   :  { %v1324_v9 = vpack.c.bf16 %v762_v5, %v761_v59  ;;  %v1404_v10 = vpack.c.bf16 %v794_v6, %v793_v60  ;;  %v760_v11 = vsel %vm632_vm6, %v380_v61, %v696_v1  ;;  %v792_v12 = vsel %vm664_vm7, %v508_v62, %v728_v2  ;;  %v392_v13 = vpop.f32.mrb[5].mxu0  ;;  %v520_v14 = vpop.f32.mrb[5].mxu1 }
 0x100   :  { %v1319_v15 = vpack.c.bf16 %v760_v11, %v759_v3  ;;  %v1399_v16 = vpack.c.bf16 %v792_v12, %v791_v4  ;;  %v401_v17 = vadd.f32 %v1569_v7, %v1826_v40  ;;  %v529_v18 = vadd.f32 %v1601_v8, %v1826_v40  ;;  %v1570_v19 = vpop.f32.mrb[6].mxu0  ;;  %v1602_v20 = vpop.f32.mrb[6].mxu1 }
 0x101   :  { %1476 = vst [vmem:[%s2000_s3 + $0x8] sm:$0xff] %v1324_v9   ;;  %1492 = vst [vmem:[%s2000_s3 + $0x88] sm:$0xff] %v1404_v10   ;;  %v393_v21 = vadd.f32 %v1826_v40, %v392_v13  ;;  %v521_v22 = vadd.f32 %v1826_v40, %v520_v14  ;;  %v404_v23 = vadd.f32 %v1570_v19, %v1826_v40  ;;  %v395_v25 = vpop.f32.mrb[7].mxu0  ;;  %v523_v26 = vpop.f32.mrb[7].mxu1 }
 0x102   :  { %v532_v24 = vadd.f32 %v1602_v20, %v1826_v40  ;;  %1320 = vst [vmem:[%s2000_s3] sm:$0xff] %v1319_v15   ;;  %1491 = vst [vmem:[%s2000_s3 + $0x80] sm:$0xff] %v1399_v16   ;;  %vm637_vm8 = vcmp.ge.f32.partialorder %v401_v17, 0.0  ;;  %v701_v27 = vmul.f32 0.2, %v401_v17  ;;  %vm669_vm9 = vcmp.ge.f32.partialorder %v529_v18, 0.0 }
 0x103   :  { %v733_v28 = vmul.f32 0.2, %v529_v18  ;;  %vm635_vm10 = vcmp.ge.f32.partialorder %v393_v21, 0.0  ;;  %v699_v29 = vmul.f32 0.2, %v393_v21  ;;  %vm667_vm11 = vcmp.ge.f32.partialorder %v521_v22, 0.0 }
 0x104   :  { %v731_v30 = vmul.f32 0.2, %v521_v22  ;;  %v765_v31 = vsel %vm637_vm8, %v401_v17, %v701_v27  ;;  %vm638_vm12 = vcmp.ge.f32.partialorder %v404_v23, 0.0  ;;  %v702_v33 = vmul.f32 0.2, %v404_v23 }
 0x105   :  { %v797_v32 = vsel %vm669_vm9, %v529_v18, %v733_v28  ;;  %v763_v34 = vsel %vm635_vm10, %v393_v21, %v699_v29  ;;  %vm670_vm13 = vcmp.ge.f32.partialorder %v532_v24, 0.0  ;;  %v734_v36 = vmul.f32 0.2, %v532_v24  ;;  %v1573_v37 = vpop.f32.mrb[8].mxu0  ;;  %v1605_v38 = vpop.f32.mrb[8].mxu1 }
 0x106   :  { %v795_v35 = vsel %vm667_vm11, %v521_v22, %v731_v30  ;;  %v766_v39 = vsel %vm638_vm12, %v404_v23, %v702_v33  ;;  %v396_v41 = vadd.f32 %v1826_v40, %v395_v25  ;;  %v524_v42 = vadd.f32 %v1826_v40, %v523_v26  ;;  %v408_v44 = vpop.f32.mrb[9].mxu0  ;;  %v536_v45 = vpop.f32.mrb[9].mxu1 }
 0x107   :  { %v417_v43 = vadd.f32 %v1573_v37, %v1826_v40  ;;  %v1334_v46 = vpack.c.bf16 %v766_v39, %v765_v31  ;;  %v798_v47 = vsel %vm670_vm13, %v532_v24, %v734_v36  ;;  %v545_v48 = vadd.f32 %v1605_v38, %v1826_v40  ;;  %v1574_v50 = vpop.f32.mrb[10].mxu0  ;;  %v1606_v51 = vpop.f32.mrb[10].mxu1 }
 0x108   :  { %v409_v49 = vadd.f32 %v1826_v40, %v408_v44  ;;  %v1414_v52 = vpack.c.bf16 %v798_v47, %v797_v32  ;;  %vm636_vm14 = vcmp.ge.f32.partialorder %v396_v41, 0.0  ;;  %v700_v53 = vmul.f32 0.2, %v396_v41  ;;  %v411_v54 = vpop.f32.mrb[11].mxu0  ;;  %v539_v55 = vpop.f32.mrb[11].mxu1 }
 0x109   :  { %vm668_vm15 = vcmp.ge.f32.partialorder %v524_v42, 0.0  ;;  %1478 = vst [vmem:[%s2000_s3 + $0x18] sm:$0xff] %v1334_v46   ;;  %v732_v56 = vmul.f32 0.2, %v524_v42  ;;  %vm641_vm0 = vcmp.ge.f32.partialorder %v417_v43, 0.0  ;;  %vm673_vm1 = vcmp.ge.f32.partialorder %v545_v48, 0.0 }
 0x10a   :  { %v705_v57 = vmul.f32 0.2, %v417_v43  ;;  %1494 = vst [vmem:[%s2000_s3 + $0x98] sm:$0xff] %v1414_v52   ;;  %v764_v58 = vsel %vm636_vm14, %v396_v41, %v700_v53  ;;  %v737_v59 = vmul.f32 0.2, %v545_v48  ;;  %vm639_vm2 = vcmp.ge.f32.partialorder %v409_v49, 0.0 }
 0x10b   :  { %v703_v60 = vmul.f32 0.2, %v409_v49  ;;  %v1329_v61 = vpack.c.bf16 %v764_v58, %v763_v34  ;;  %v796_v62 = vsel %vm668_vm15, %v524_v42, %v732_v56  ;;  %v537_v0 = vadd.f32 %v1826_v40, %v536_v45 }
 0x10c   :  { %v769_v63 = vsel %vm641_vm0, %v417_v43, %v705_v57  ;;  %v1409_v1 = vpack.c.bf16 %v796_v62, %v795_v35  ;;  %v801_v2 = vsel %vm673_vm1, %v545_v48, %v737_v59  ;;  %v420_v4 = vadd.f32 %v1574_v50, %v1826_v40 }
 0x10d   :  { %v767_v3 = vsel %vm639_vm2, %v409_v49, %v703_v60  ;;  %1477 = vst [vmem:[%s2000_s3 + $0x10] sm:$0xff] %v1329_v61   ;;  %vm671_vm3 = vcmp.ge.f32.partialorder %v537_v0, 0.0  ;;  %v735_v5 = vmul.f32 0.2, %v537_v0  ;;  %v548_v6 = vadd.f32 %v1606_v51, %v1826_v40  ;;  %v1577_v8 = vpop.f32.mrb[12].mxu0  ;;  %v1609_v9 = vpop.f32.mrb[12].mxu1 }
 0x10e   :  { %v412_v7 = vadd.f32 %v1826_v40, %v411_v54  ;;  %1493 = vst [vmem:[%s2000_s3 + $0x90] sm:$0xff] %v1409_v1   ;;  %vm642_vm4 = vcmp.ge.f32.partialorder %v420_v4, 0.0  ;;  %v706_v10 = vmul.f32 0.2, %v420_v4  ;;  %v540_v11 = vadd.f32 %v1826_v40, %v539_v55  ;;  %v424_v13 = vpop.f32.mrb[13].mxu0  ;;  %v552_v14 = vpop.f32.mrb[13].mxu1 }
 0x10f   :  { %v433_v12 = vadd.f32 %v1577_v8, %v1826_v40  ;;  %v799_v15 = vsel %vm671_vm3, %v537_v0, %v735_v5  ;;  %vm674_vm5 = vcmp.ge.f32.partialorder %v548_v6, 0.0  ;;  %v738_v16 = vmul.f32 0.2, %v548_v6  ;;  %v1578_v17 = vpop.f32.mrb[14].mxu0  ;;  %v1610_v18 = vpop.f32.mrb[14].mxu1 }
 0x110   :  { %vm640_vm6 = vcmp.ge.f32.partialorder %v412_v7, 0.0  ;;  %v770_v19 = vsel %vm642_vm4, %v420_v4, %v706_v10  ;;  %v704_v20 = vmul.f32 0.2, %v412_v7  ;;  %vm672_vm7 = vcmp.ge.f32.partialorder %v540_v11, 0.0  ;;  %v427_v22 = vpop.f32.mrb[15].mxu0  ;;  %v555_v26 = vpop.f32.mrb[15].mxu1 }
 0x111   :  { %v736_v21 = vmul.f32 0.2, %v540_v11  ;;  %v1344_v23 = vpack.c.bf16 %v770_v19, %v769_v63  ;;  %v802_v24 = vsel %vm674_vm5, %v548_v6, %v738_v16  ;;  %vm645_vm8 = vcmp.ge.f32.partialorder %v433_v12, 0.0 }
 0x112   :  { %v709_v25 = vmul.f32 0.2, %v433_v12  ;;  %v1424_v27 = vpack.c.bf16 %v802_v24, %v801_v2  ;;  %v768_v28 = vsel %vm640_vm6, %v412_v7, %v704_v20  ;;  %v561_v30 = vadd.f32 %v1609_v9, %v1826_v40 }
 0x113   :  { %v800_v29 = vsel %vm672_vm7, %v540_v11, %v736_v21  ;;  %1480 = vst [vmem:[%s2000_s3 + $0x28] sm:$0xff] %v1344_v23   ;;  %v1339_v31 = vpack.c.bf16 %v768_v28, %v767_v3  ;;  %v425_v34 = vadd.f32 %v1826_v40, %v424_v13  ;;  %v553_v36 = vadd.f32 %v1826_v40, %v552_v14 }
 0x114   :  { %v1419_v32 = vpack.c.bf16 %v800_v29, %v799_v15  ;;  %v773_v33 = vsel %vm645_vm8, %v433_v12, %v709_v25  ;;  %1496 = vst [vmem:[%s2000_s3 + $0xa8] sm:$0xff] %v1424_v27   ;;  %vm677_vm9 = vcmp.ge.f32.partialorder %v561_v30, 0.0  ;;  %v741_v35 = vmul.f32 0.2, %v561_v30 }
 0x115   :  { %v436_v37 = vadd.f32 %v1578_v17, %v1826_v40  ;;  %1479 = vst [vmem:[%s2000_s3 + $0x20] sm:$0xff] %v1339_v31   ;;  %vm643_vm10 = vcmp.ge.f32.partialorder %v425_v34, 0.0  ;;  %v707_v38 = vmul.f32 0.2, %v425_v34  ;;  %v564_v39 = vadd.f32 %v1610_v18, %v1826_v40  ;;  %v1581_v42 = vpop.f32.mrb[16].mxu0  ;;  %v1613_v43 = vpop.f32.mrb[16].mxu1 }
 0x116   :  { %1495 = vst [vmem:[%s2000_s3 + $0xa0] sm:$0xff] %v1419_v32   ;;  %v428_v41 = vadd.f32 %v1826_v40, %v427_v22  ;;  %v805_v44 = vsel %vm677_vm9, %v561_v30, %v741_v35  ;;  %vm675_vm11 = vcmp.ge.f32.partialorder %v553_v36, 0.0  ;;  %v739_v45 = vmul.f32 0.2, %v553_v36  ;;  %v440_v46 = vpop.f32.mrb[17].mxu0  ;;  %v568_v47 = vpop.f32.mrb[17].mxu1 }
 0x117   :  { %vm646_vm12 = vcmp.ge.f32.partialorder %v436_v37, 0.0  ;;  %v771_v48 = vsel %vm643_vm10, %v425_v34, %v707_v38  ;;  %v710_v49 = vmul.f32 0.2, %v436_v37  ;;  %vm678_vm13 = vcmp.ge.f32.partialorder %v564_v39, 0.0  ;;  %v1582_v51 = vpop.f32.mrb[18].mxu0  ;;  %v1614_v55 = vpop.f32.mrb[18].mxu1 }
 0x118   :  { %v742_v50 = vmul.f32 0.2, %v564_v39  ;;  %v803_v52 = vsel %vm675_vm11, %v553_v36, %v739_v45  ;;  %vm644_vm14 = vcmp.ge.f32.partialorder %v428_v41, 0.0  ;;  %v708_v53 = vmul.f32 0.2, %v428_v41  ;;  %v443_v56 = vpop.f32.mrb[19].mxu0 }
 0x119   :  { %v556_v54 = vadd.f32 %v1826_v40, %v555_v26  ;;  %v774_v57 = vsel %vm646_vm12, %v436_v37, %v710_v49  ;;  %v449_v59 = vadd.f32 %v1581_v42, %v1826_v40  ;;  %v577_v60 = vadd.f32 %v1613_v43, %v1826_v40  ;;  %v571_v61 = vpop.f32.mrb[19].mxu1 }
 0x11a   :  { %v806_v58 = vsel %vm678_vm13, %v564_v39, %v742_v50  ;;  %v1354_v62 = vpack.c.bf16 %v774_v57, %v773_v33  ;;  %v772_v0 = vsel %vm644_vm14, %v428_v41, %v708_v53  ;;  %v441_v5 = vadd.f32 %v1826_v40, %v440_v46 }
 0x11b   :  { %v1434_v63 = vpack.c.bf16 %v806_v58, %v805_v44  ;;  %vm676_vm15 = vcmp.ge.f32.partialorder %v556_v54, 0.0  ;;  %v1349_v1 = vpack.c.bf16 %v772_v0, %v771_v48  ;;  %v740_v2 = vmul.f32 0.2, %v556_v54 }
 0x11c   :  { %vm649_vm0 = vcmp.ge.f32.partialorder %v449_v59, 0.0  ;;  %v713_v3 = vmul.f32 0.2, %v449_v59  ;;  %1482 = vst [vmem:[%s2000_s3 + $0x38] sm:$0xff] %v1354_v62   ;;  %vm681_vm1 = vcmp.ge.f32.partialorder %v577_v60, 0.0  ;;  %v569_v6 = vadd.f32 %v1826_v40, %v568_v47 }
 0x11d   :  { %1498 = vst [vmem:[%s2000_s3 + $0xb8] sm:$0xff] %v1434_v63   ;;  %v745_v4 = vmul.f32 0.2, %v577_v60  ;;  %1481 = vst [vmem:[%s2000_s3 + $0x30] sm:$0xff] %v1349_v1   ;;  %v804_v7 = vsel %vm676_vm15, %v556_v54, %v740_v2  ;;  %v452_v9 = vadd.f32 %v1582_v51, %v1826_v40  ;;  %v580_v10 = vadd.f32 %v1614_v55, %v1826_v40  ;;  %v1585_v11 = vpop.f32.mrb[20].mxu0  ;;  %v1617_v12 = vpop.f32.mrb[20].mxu1 }
 0x11e   :  { %v777_v8 = vsel %vm649_vm0, %v449_v59, %v713_v3  ;;  %v1429_v13 = vpack.c.bf16 %v804_v7, %v803_v52  ;;  %vm647_vm2 = vcmp.ge.f32.partialorder %v441_v5, 0.0  ;;  %v711_v15 = vmul.f32 0.2, %v441_v5  ;;  %v456_v16 = vpop.f32.mrb[21].mxu0  ;;  %v584_v17 = vpop.f32.mrb[21].mxu1 }
 0x11f   :  { %v809_v14 = vsel %vm681_vm1, %v577_v60, %v745_v4  ;;  %vm679_vm3 = vcmp.ge.f32.partialorder %v569_v6, 0.0  ;;  %v743_v18 = vmul.f32 0.2, %v569_v6  ;;  %vm650_vm4 = vcmp.ge.f32.partialorder %v452_v9, 0.0  ;;  %v1586_v23 = vpop.f32.mrb[22].mxu0  ;;  %v1618_v24 = vpop.f32.mrb[22].mxu1 }
 0x120   :  { %v714_v19 = vmul.f32 0.2, %v452_v9  ;;  %1497 = vst [vmem:[%s2000_s3 + $0xb0] sm:$0xff] %v1429_v13   ;;  %v775_v20 = vsel %vm647_vm2, %v441_v5, %v711_v15  ;;  %vm682_vm5 = vcmp.ge.f32.partialorder %v580_v10, 0.0  ;;  %v746_v21 = vmul.f32 0.2, %v580_v10 }
 0x121   :  { %v444_v22 = vadd.f32 %v1826_v40, %v443_v56  ;;  %v807_v25 = vsel %vm679_vm3, %v569_v6, %v743_v18  ;;  %v572_v27 = vadd.f32 %v1826_v40, %v571_v61  ;;  %v465_v28 = vadd.f32 %v1585_v11, %v1826_v40  ;;  %v459_v29 = vpop.f32.mrb[23].mxu0  ;;  %v587_v30 = vpop.f32.mrb[23].mxu1 }
 0x122   :  { %v778_v26 = vsel %vm650_vm4, %v452_v9, %v714_v19  ;;  %v810_v32 = vsel %vm682_vm5, %v580_v10, %v746_v21  ;;  %v593_v38 = vadd.f32 %v1617_v12, %v1826_v40  ;;  %v457_v39 = vadd.f32 %v1826_v40, %v456_v16 }
 0x123   :  { %v1364_v31 = vpack.c.bf16 %v778_v26, %v777_v8  ;;  %vm648_vm6 = vcmp.ge.f32.partialorder %v444_v22, 0.0  ;;  %v712_v33 = vmul.f32 0.2, %v444_v22  ;;  %v1444_v34 = vpack.c.bf16 %v810_v32, %v809_v14 }
 0x124   :  { %vm680_vm7 = vcmp.ge.f32.partialorder %v572_v27, 0.0  ;;  %v744_v35 = vmul.f32 0.2, %v572_v27  ;;  %vm653_vm8 = vcmp.ge.f32.partialorder %v465_v28, 0.0  ;;  %v717_v37 = vmul.f32 0.2, %v465_v28 }
 0x125   :  { %1484 = vst [vmem:[%s2000_s3 + $0x48] sm:$0xff] %v1364_v31   ;;  %v776_v36 = vsel %vm648_vm6, %v444_v22, %v712_v33  ;;  %1500 = vst [vmem:[%s2000_s3 + $0xc8] sm:$0xff] %v1444_v34   ;;  %v585_v43 = vadd.f32 %v1826_v40, %v584_v17  ;;  %v468_v44 = vadd.f32 %v1586_v23, %v1826_v40  ;;  %v1589_v45 = vpop.f32.mrb[24].mxu0  ;;  %v1621_v46 = vpop.f32.mrb[24].mxu1  ;;  %vm685_vm9 = vcmp.ge.f32.partialorder %v593_v38, 0.0 }
 0x126   :  { %v1359_v41 = vpack.c.bf16 %v776_v36, %v775_v20  ;;  %v808_v42 = vsel %vm680_vm7, %v572_v27, %v744_v35  ;;  %v749_v48 = vmul.f32 0.2, %v593_v38  ;;  %v472_v49 = vpop.f32.mrb[25].mxu0  ;;  %v600_v50 = vpop.f32.mrb[25].mxu1  ;;  %v781_v51 = vsel %vm653_vm8, %v465_v28, %v717_v37 }
 0x127   :  { %v1439_v47 = vpack.c.bf16 %v808_v42, %v807_v25  ;;  %vm651_vm10 = vcmp.ge.f32.partialorder %v457_v39, 0.0  ;;  %v715_v52 = vmul.f32 0.2, %v457_v39  ;;  %v747_v53 = vmul.f32 0.2, %v585_v43  ;;  %v1590_v56 = vpop.f32.mrb[26].mxu0 }
 0x128   :  { %1483 = vst [vmem:[%s2000_s3 + $0x40] sm:$0xff] %v1359_v41   ;;  %vm683_vm11 = vcmp.ge.f32.partialorder %v585_v43, 0.0  ;;  %vm654_vm12 = vcmp.ge.f32.partialorder %v468_v44, 0.0  ;;  %v718_v54 = vmul.f32 0.2, %v468_v44  ;;  %v596_v55 = vadd.f32 %v1618_v24, %v1826_v40  ;;  %v1622_v57 = vpop.f32.mrb[26].mxu1 }
 0x129   :  { %1499 = vst [vmem:[%s2000_s3 + $0xc0] sm:$0xff] %v1439_v47   ;;  %v813_v58 = vsel %vm685_vm9, %v593_v38, %v749_v48  ;;  %v779_v59 = vsel %vm651_vm10, %v457_v39, %v715_v52  ;;  %v460_v60 = vadd.f32 %v1826_v40, %v459_v29  ;;  %v588_v61 = vadd.f32 %v1826_v40, %v587_v30  ;;  %v475_v62 = vpop.f32.mrb[27].mxu0  ;;  %v603_v63 = vpop.f32.mrb[27].mxu1 }
 0x12a   :  { %v782_v0 = vsel %vm654_vm12, %v468_v44, %v718_v54  ;;  %vm686_vm13 = vcmp.ge.f32.partialorder %v596_v55, 0.0  ;;  %v750_v1 = vmul.f32 0.2, %v596_v55  ;;  %v481_v2 = vadd.f32 %v1589_v45, %v1826_v40 }
 0x12b   :  { %v1374_v3 = vpack.c.bf16 %v782_v0, %v781_v51  ;;  %vm652_vm14 = vcmp.ge.f32.partialorder %v460_v60, 0.0  ;;  %v716_v4 = vmul.f32 0.2, %v460_v60  ;;  %vm684_vm15 = vcmp.ge.f32.partialorder %v588_v61, 0.0 }
 0x12c   :  { %v814_v5 = vsel %vm686_vm13, %v596_v55, %v750_v1  ;;  %v748_v6 = vmul.f32 0.2, %v588_v61  ;;  %vm657_vm0 = vcmp.ge.f32.partialorder %v481_v2, 0.0  ;;  %v721_v7 = vmul.f32 0.2, %v481_v2 }
 0x12d   :  { %1486 = vst [vmem:[%s2000_s3 + $0x58] sm:$0xff] %v1374_v3   ;;  %v1454_v8 = vpack.c.bf16 %v814_v5, %v813_v58  ;;  %v780_v9 = vsel %vm652_vm14, %v460_v60, %v716_v4  ;;  %v609_v10 = vadd.f32 %v1621_v46, %v1826_v40  ;;  %v473_v11 = vadd.f32 %v1826_v40, %v472_v49  ;;  %v1593_v12 = vpop.f32.mrb[28].mxu0  ;;  %v1625_v13 = vpop.f32.mrb[28].mxu1 }
 0x12e   :  { %v811_v14 = vsel %vm683_vm11, %v585_v43, %v747_v53  ;;  %v1369_v15 = vpack.c.bf16 %v780_v9, %v779_v59  ;;  %v812_v16 = vsel %vm684_vm15, %v588_v61, %v748_v6  ;;  %v601_v17 = vadd.f32 %v1826_v40, %v600_v50  ;;  %v488_v18 = vpop.f32.mrb[29].mxu0  ;;  %v616_v19 = vpop.f32.mrb[29].mxu1 }
 0x12f   :  { %1502 = vst [vmem:[%s2000_s3 + $0xd8] sm:$0xff] %v1454_v8   ;;  %v1449_v20 = vpack.c.bf16 %v812_v16, %v811_v14  ;;  %vm689_vm1 = vcmp.ge.f32.partialorder %v609_v10, 0.0  ;;  %v753_v21 = vmul.f32 0.2, %v609_v10  ;;  %vm655_vm2 = vcmp.ge.f32.partialorder %v473_v11, 0.0  ;;  %v1594_v22 = vpop.f32.mrb[30].mxu0 }
 0x130   :  { %v1626_v23 = vpop.f32.mrb[30].mxu1  ;;  %1485 = vst [vmem:[%s2000_s3 + $0x50] sm:$0xff] %v1369_v15   ;;  %v785_v24 = vsel %vm657_vm0, %v481_v2, %v721_v7  ;;  %v719_v25 = vmul.f32 0.2, %v473_v11  ;;  %vm687_vm3 = vcmp.ge.f32.partialorder %v601_v17, 0.0  ;;  %v484_v26 = vadd.f32 %v1590_v56, %v1826_v40  ;;  %v491_v27 = vpop.f32.mrb[31].mxu0 }
 0x131   :  { %1501 = vst [vmem:[%s2000_s3 + $0xd0] sm:$0xff] %v1449_v20   ;;  %v751_v28 = vmul.f32 0.2, %v601_v17  ;;  %v612_v29 = vadd.f32 %v1622_v57, %v1826_v40  ;;  %v476_v30 = vadd.f32 %v1826_v40, %v475_v62  ;;  %v604_v31 = vadd.f32 %v1826_v40, %v603_v63  ;;  %v619_v32 = vpop.f32.mrb[31].mxu1 }
 0x132   :  { %v817_v33 = vsel %vm689_vm1, %v609_v10, %v753_v21  ;;  %v783_v34 = vsel %vm655_vm2, %v473_v11, %v719_v25  ;;  %vm658_vm4 = vcmp.ge.f32.partialorder %v484_v26, 0.0  ;;  %v722_v35 = vmul.f32 0.2, %v484_v26 }
 0x133   :  { %vm690_vm5 = vcmp.ge.f32.partialorder %v612_v29, 0.0  ;;  %v754_v36 = vmul.f32 0.2, %v612_v29  ;;  %vm656_vm6 = vcmp.ge.f32.partialorder %v476_v30, 0.0  ;;  %v720_v37 = vmul.f32 0.2, %v476_v30 }
 0x134   :  { %v786_v38 = vsel %vm658_vm4, %v484_v26, %v722_v35  ;;  %vm688_vm7 = vcmp.ge.f32.partialorder %v604_v31, 0.0  ;;  %v752_v39 = vmul.f32 0.2, %v604_v31  ;;  %v497_v41 = vadd.f32 %v1593_v12, %v1826_v40 }
 0x135   :  { %v1384_v42 = vpack.c.bf16 %v786_v38, %v785_v24  ;;  %v818_v43 = vsel %vm690_vm5, %v612_v29, %v754_v36  ;;  %v784_v44 = vsel %vm656_vm6, %v476_v30, %v720_v37  ;;  %v625_v45 = vadd.f32 %v1625_v13, %v1826_v40 }
 0x136   :  { %v815_v46 = vsel %vm687_vm3, %v601_v17, %v751_v28  ;;  %v1464_v47 = vpack.c.bf16 %v818_v43, %v817_v33  ;;  %v1379_v48 = vpack.c.bf16 %v784_v44, %v783_v34  ;;  %v816_v49 = vsel %vm688_vm7, %v604_v31, %v752_v39 }
 0x137   :  { %1488 = vst [vmem:[%s2000_s3 + $0x68] sm:$0xff] %v1384_v42   ;;  %v1459_v50 = vpack.c.bf16 %v816_v49, %v815_v46  ;;  %vm661_vm8 = vcmp.ge.f32.partialorder %v497_v41, 0.0  ;;  %v725_v51 = vmul.f32 0.2, %v497_v41  ;;  %v757_v52 = vmul.f32 0.2, %v625_v45 }
 0x138   :  { %1504 = vst [vmem:[%s2000_s3 + $0xe8] sm:$0xff] %v1464_v47   ;;  %1487 = vst [vmem:[%s2000_s3 + $0x60] sm:$0xff] %v1379_v48   ;;  %v489_v53 = vadd.f32 %v1826_v40, %v488_v18  ;;  %v617_v54 = vadd.f32 %v1826_v40, %v616_v19  ;;  %v500_v55 = vadd.f32 %v1594_v22, %v1826_v40  ;;  %vm693_vm9 = vcmp.ge.f32.partialorder %v625_v45, 0.0 }
 0x139   :  { %v628_v56 = vadd.f32 %v1626_v23, %v1826_v40  ;;  %1503 = vst [vmem:[%s2000_s3 + $0xe0] sm:$0xff] %v1459_v50   ;;  %v492_v57 = vadd.f32 %v1826_v40, %v491_v27  ;;  %v620_v58 = vadd.f32 %v1826_v40, %v619_v32  ;;  %v789_v59 = vsel %vm661_vm8, %v497_v41, %v725_v51 }
 0x13a   :  { %vm659_vm10 = vcmp.ge.f32.partialorder %v489_v53, 0.0  ;;  %v723_v60 = vmul.f32 0.2, %v489_v53  ;;  %v755_v61 = vmul.f32 0.2, %v617_v54  ;;  %vm662_vm11 = vcmp.ge.f32.partialorder %v500_v55, 0.0 }
 0x13b   :  { %v726_v62 = vmul.f32 0.2, %v500_v55  ;;  %vm694_vm12 = vcmp.ge.f32.partialorder %v628_v56, 0.0  ;;  %v758_v63 = vmul.f32 0.2, %v628_v56  ;;  %v821_v0 = vsel %vm693_vm9, %v625_v45, %v757_v52 }
 0x13c   :  { %vm691_vm13 = vcmp.ge.f32.partialorder %v617_v54, 0.0  ;;  %vm660_vm14 = vcmp.ge.f32.partialorder %v492_v57, 0.0  ;;  %v724_v1 = vmul.f32 0.2, %v492_v57  ;;  %vm692_vm15 = vcmp.ge.f32.partialorder %v620_v58, 0.0 }
 0x13d   :  { %v790_v2 = vsel %vm662_vm11, %v500_v55, %v726_v62  ;;  %v822_v3 = vsel %vm694_vm12, %v628_v56, %v758_v63  ;;  %v756_v4 = vmul.f32 0.2, %v620_v58  ;;  %v787_v5 = vsel %vm659_vm10, %v489_v53, %v723_v60 }
 0x13e   :  { %v1394_v6 = vpack.c.bf16 %v790_v2, %v789_v59  ;;  %v1474_v7 = vpack.c.bf16 %v822_v3, %v821_v0  ;;  %v788_v40 = vsel %vm660_vm14, %v492_v57, %v724_v1  ;;  %v819_v8 = vsel %vm691_vm13, %v617_v54, %v755_v61 }
 0x13f   :  { %v1389_v9 = vpack.c.bf16 %v788_v40, %v787_v5  ;;  %v820_v10 = vsel %vm692_vm15, %v620_v58, %v756_v4 }
 0x140   :  { %1490 = vst [vmem:[%s2000_s3 + $0x78] sm:$0xff] %v1394_v6   ;;  %1506 = vst [vmem:[%s2000_s3 + $0xf8] sm:$0xff] %v1474_v7   ;;  %v1469_v11 = vpack.c.bf16 %v820_v10, %v819_v8 }
 0x141   :  { %1489 = vst [vmem:[%s2000_s3 + $0x70] sm:$0xff] %v1389_v9  }
 0x142   :  { %1505 = vst [vmem:[%s2000_s3 + $0xf0] sm:$0xff] %v1469_v11  }

// kernel: _lambda_.6
= control target key start
LH: loop header
LB: loop body
LE: loop exit
PB: predicated region body
PF: predicated region fallthrough
CT: control target
= control target key end

     0   :  { %s2664_s1 = inlined_call_operand.vmem [shape: bf16[1024,128], index: 1, kind: input, shape index: {}]   ;;  %s2665_s0 = inlined_call_operand.vmem [shape: bf16[128,1024], index: 0, kind: input, shape index: {}]   ;;  %s2666_s2 = inlined_call_operand.vmem [shape: f32[1,128], index: 2, kind: input, shape index: {}]   ;;  %s2667_s3 = inlined_call_operand.vmem [shape: f32[1,128], index: 3, kind: input, shape index: {}]   ;;  %s2668_s4 = inlined_call_operand.vmem [shape: bf16[128,128], index: 4, kind: output, shape index: {}]  }
   0x1   :  { %v2011_v0 = vld [vmem:[%s2664_s1 + $0x40] sm:$0xff]   ;;  %v2015_v4 = vld [vmem:[%s2664_s1 + $0x48] sm:$0xff]   ;;  %v2019_v8 = vld [vmem:[%s2664_s1 + $0x50] sm:$0xff]  }
   0x2   :  { %v2012_v1 = vld [vmem:[%s2664_s1 + $0xc0] sm:$0xff]   ;;  %1755 = vmatprep.subr.bf16.mxu0 %v2011_v0  ;;  %v2016_v5 = vld [vmem:[%s2664_s1 + $0xc8] sm:$0xff]   ;;  %v2020_v9 = vld [vmem:[%s2664_s1 + $0xd0] sm:$0xff]  }
   0x3   :  { %v2013_v2 = vld [vmem:[%s2664_s1] sm:$0xff]   ;;  %1819 = vmatprep.subr.bf16.mxu1 %v2012_v1  ;;  %v2017_v6 = vld [vmem:[%s2664_s1 + $0x8] sm:$0xff]   ;;  %v2021_v10 = vld [vmem:[%s2664_s1 + $0x10] sm:$0xff]  }
   0x4   :  { %v2014_v3 = vld [vmem:[%s2664_s1 + $0x80] sm:$0xff]   ;;  %1756 = vmatpush3.bf16.msra.mxu0 %v2013_v2  ;;  %v2018_v7 = vld [vmem:[%s2664_s1 + $0x88] sm:$0xff]   ;;  %v2022_v11 = vld [vmem:[%s2664_s1 + $0x90] sm:$0xff]  }
   0x5   :  { %1820 = vmatpush3.bf16.msra.mxu1 %v2014_v3  ;;  %1757 = vmatprep.subr.bf16.mxu0 %v2015_v4  ;;  %v2023_v12 = vld [vmem:[%s2664_s1 + $0x58] sm:$0xff]   ;;  %v2027_v16 = vld [vmem:[%s2664_s1 + $0x60] sm:$0xff]   ;;  %v2031_v20 = vld [vmem:[%s2664_s1 + $0x68] sm:$0xff]  }
   0x6   :  { %1821 = vmatprep.subr.bf16.mxu1 %v2016_v5  ;;  %v2024_v13 = vld [vmem:[%s2664_s1 + $0xd8] sm:$0xff]   ;;  %v2028_v17 = vld [vmem:[%s2664_s1 + $0xe0] sm:$0xff]   ;;  %v2032_v21 = vld [vmem:[%s2664_s1 + $0xe8] sm:$0xff]  }
   0x7   :  { %v2025_v14 = vld [vmem:[%s2664_s1 + $0x18] sm:$0xff]   ;;  %v2029_v18 = vld [vmem:[%s2664_s1 + $0x20] sm:$0xff]   ;;  %v2033_v22 = vld [vmem:[%s2664_s1 + $0x28] sm:$0xff]  }
   0x8   :  { %1758 = vmatpush3.bf16.msra.mxu0 %v2017_v6  ;;  %v2026_v15 = vld [vmem:[%s2664_s1 + $0x98] sm:$0xff]   ;;  %v2030_v19 = vld [vmem:[%s2664_s1 + $0xa0] sm:$0xff]   ;;  %v2034_v23 = vld [vmem:[%s2664_s1 + $0xa8] sm:$0xff]  }
   0x9   :  { %1822 = vmatpush3.bf16.msra.mxu1 %v2018_v7  ;;  %1759 = vmatprep.subr.bf16.mxu0 %v2019_v8  ;;  %v2035_v24 = vld [vmem:[%s2664_s1 + $0x70] sm:$0xff]   ;;  %v2039_v28 = vld [vmem:[%s2664_s1 + $0x78] sm:$0xff]   ;;  %v18_v32 = vld [vmem:[%s2665_s0] sm:$0xff] }
   0xa   :  { %1823 = vmatprep.subr.bf16.mxu1 %v2020_v9  ;;  %v2036_v25 = vld [vmem:[%s2664_s1 + $0xf0] sm:$0xff]   ;;  %v2040_v29 = vld [vmem:[%s2664_s1 + $0xf8] sm:$0xff]   ;;  %v22_v33 = vld [vmem:[%s2665_s0 + $0x20] sm:$0xff] }
   0xb   :  { %v2037_v26 = vld [vmem:[%s2664_s1 + $0x30] sm:$0xff]   ;;  %v2041_v30 = vld [vmem:[%s2664_s1 + $0x38] sm:$0xff]   ;;  %v19_v34 = vld [vmem:[%s2665_s0 + $0x8] sm:$0xff]  ;;  %v1548_v35 = vcombine.low %v18_v32, %v22_v33  ;;  %v1549_v36 = vcombine.high %v18_v32, %v22_v33 }
   0xc   :  { %1760 = vmatpush3.bf16.msra.mxu0 %v2021_v10  ;;  %v2038_v27 = vld [vmem:[%s2664_s1 + $0xb0] sm:$0xff]   ;;  %v2042_v31 = vld [vmem:[%s2664_s1 + $0xb8] sm:$0xff]   ;;  %v23_v37 = vld [vmem:[%s2665_s0 + $0x28] sm:$0xff] }
   0xd   :  { %1824 = vmatpush3.bf16.msra.mxu1 %v2022_v11  ;;  %1761 = vmatprep.subr.bf16.mxu0 %v2023_v12  ;;  %v1550_v38 = vcombine.low %v19_v34, %v23_v37  ;;  %v1551_v39 = vcombine.high %v19_v34, %v23_v37  ;;  %v2043_v40 = vld [vmem:[%s2664_s1 + $0x140] sm:$0xff]   ;;  %v27_v47 = vld [vmem:[%s2665_s0 + $0x48] sm:$0xff]  ;;  %v2051_v62 = vld [vmem:[%s2664_s1 + $0x150] sm:$0xff]  }
   0xe   :  { %1825 = vmatprep.subr.bf16.mxu1 %v2024_v13  ;;  %946 = vmatprep.mubr.bf16.mxu0 %v1549_v36  ;;  %v2044_v41 = vld [vmem:[%s2664_s1 + $0x100] sm:$0xff]   ;;  %v31_v48 = vld [vmem:[%s2665_s0 + $0x68] sm:$0xff]  ;;  %v2052_v63 = vld [vmem:[%s2664_s1 + $0x110] sm:$0xff]  }
   0xf   :  { %1043 = vmatprep.mubr.bf16.mxu1 %v1551_v39  ;;  %v2045_v42 = vld [vmem:[%s2664_s1 + $0x1c0] sm:$0xff]   ;;  %v1559_v49 = vcombine.high %v27_v47, %v31_v48  ;;  %v2047_v50 = vld [vmem:[%s2664_s1 + $0x148] sm:$0xff]   ;;  %v1558_v53 = vcombine.low %v27_v47, %v31_v48  ;;  %v2053_v0 = vld [vmem:[%s2664_s1 + $0x1d0] sm:$0xff]  }
  0x10   :  { %1762 = vmatpush3.bf16.msra.mxu0 %v2025_v14  ;;  %v2046_v43 = vld [vmem:[%s2664_s1 + $0x180] sm:$0xff]   ;;  %v2048_v52 = vld [vmem:[%s2664_s1 + $0x108] sm:$0xff]   ;;  %v2054_v1 = vld [vmem:[%s2664_s1 + $0x190] sm:$0xff]  }
  0x11   :  { %1826 = vmatpush3.bf16.msra.mxu1 %v2026_v15  ;;  %1763 = vmatprep.subr.bf16.mxu0 %v2027_v16  ;;  %v26_v44 = vld [vmem:[%s2665_s0 + $0x40] sm:$0xff]  ;;  %v2049_v54 = vld [vmem:[%s2664_s1 + $0x1c8] sm:$0xff]   ;;  %v2055_v10 = vld [vmem:[%s2664_s1 + $0x158] sm:$0xff]  }
  0x12   :  { %1827 = vmatprep.subr.bf16.mxu1 %v2028_v17  ;;  %v30_v45 = vld [vmem:[%s2665_s0 + $0x60] sm:$0xff]  ;;  %v2050_v55 = vld [vmem:[%s2664_s1 + $0x188] sm:$0xff]   ;;  %v2056_v11 = vld [vmem:[%s2664_s1 + $0x118] sm:$0xff]  }
  0x13   :  { %v1557_v46 = vcombine.high %v26_v44, %v30_v45  ;;  %v1556_v51 = vcombine.low %v26_v44, %v30_v45  ;;  %v34_v56 = vld [vmem:[%s2665_s0 + $0x80] sm:$0xff]  ;;  %v35_v58 = vld [vmem:[%s2665_s0 + $0x88] sm:$0xff]  ;;  %v2057_v12 = vld [vmem:[%s2664_s1 + $0x1d8] sm:$0xff]  }
  0x14   :  { %1764 = vmatpush3.bf16.msra.mxu0 %v2029_v18  ;;  %v38_v57 = vld [vmem:[%s2665_s0 + $0xa0] sm:$0xff]  ;;  %v39_v59 = vld [vmem:[%s2665_s0 + $0xa8] sm:$0xff]  ;;  %v2058_v13 = vld [vmem:[%s2664_s1 + $0x198] sm:$0xff]  }
  0x15   :  { %1828 = vmatpush3.bf16.msra.mxu1 %v2030_v19  ;;  %1765 = vmatprep.subr.bf16.mxu0 %v2031_v20  ;;  %v1565_v60 = vcombine.high %v34_v56, %v38_v57  ;;  %v1567_v61 = vcombine.high %v35_v58, %v39_v59  ;;  %v1564_v2 = vcombine.low %v34_v56, %v38_v57  ;;  %v42_v3 = vld [vmem:[%s2665_s0 + $0xc0] sm:$0xff]  ;;  %v43_v5 = vld [vmem:[%s2665_s0 + $0xc8] sm:$0xff]  ;;  %v2068_v39 = vld [vmem:[%s2664_s1 + $0x130] sm:$0xff]  }
  0x16   :  { %1829 = vmatprep.subr.bf16.mxu1 %v2032_v21  ;;  %v46_v4 = vld [vmem:[%s2665_s0 + $0xe0] sm:$0xff]  ;;  %v1566_v6 = vcombine.low %v35_v58, %v39_v59  ;;  %v47_v8 = vld [vmem:[%s2665_s0 + $0xe8] sm:$0xff]  ;;  %v2072_v48 = vld [vmem:[%s2664_s1 + $0x138] sm:$0xff]  }
  0x17   :  { %v1573_v7 = vcombine.high %v42_v3, %v46_v4  ;;  %v1575_v9 = vcombine.high %v43_v5, %v47_v8  ;;  %v50_v14 = vld [vmem:[%s2665_s0 + $0x100] sm:$0xff]  ;;  %v51_v16 = vld [vmem:[%s2665_s0 + $0x108] sm:$0xff]  ;;  %v1572_v19 = vcombine.low %v42_v3, %v46_v4  ;;  %v1574_v21 = vcombine.low %v43_v5, %v47_v8  ;;  %v29_v8 = vld [vmem:[%s2665_s0 + $0x58] sm:$0xff] }
  0x18   :  { %1766 = vmatpush3.bf16.msra.mxu0 %v2033_v22  ;;  %v54_v15 = vld [vmem:[%s2665_s0 + $0x120] sm:$0xff]  ;;  %v55_v17 = vld [vmem:[%s2665_s0 + $0x128] sm:$0xff] }
  0x19   :  { %1830 = vmatpush3.bf16.msra.mxu1 %v2034_v23  ;;  %1767 = vmatprep.subr.bf16.mxu0 %v2035_v24  ;;  %v2059_v18 = vld [vmem:[%s2664_s1 + $0x160] sm:$0xff]   ;;  %v1581_v22 = vcombine.high %v50_v14, %v54_v15  ;;  %v1583_v24 = vcombine.high %v51_v16, %v55_v17  ;;  %v2065_v32 = vld [vmem:[%s2664_s1 + $0x1e8] sm:$0xff]   ;;  %v1580_v34 = vcombine.low %v50_v14, %v54_v15  ;;  %v36_v14 = vld [vmem:[%s2665_s0 + $0x90] sm:$0xff] }
  0x1a   :  { %1831 = vmatprep.subr.bf16.mxu1 %v2036_v25  ;;  %v2060_v20 = vld [vmem:[%s2664_s1 + $0x120] sm:$0xff]   ;;  %v2066_v33 = vld [vmem:[%s2664_s1 + $0x1a8] sm:$0xff]   ;;  %v40_v15 = vld [vmem:[%s2665_s0 + $0xb0] sm:$0xff] }
  0x1b   :  { %v2061_v23 = vld [vmem:[%s2664_s1 + $0x1e0] sm:$0xff]   ;;  %v67_v44 = vld [vmem:[%s2665_s0 + $0x188] sm:$0xff] }
  0x1c   :  { %1768 = vmatpush3.bf16.msra.mxu0 %v2037_v26  ;;  %v2062_v25 = vld [vmem:[%s2664_s1 + $0x1a0] sm:$0xff]   ;;  %v71_v45 = vld [vmem:[%s2665_s0 + $0x1a8] sm:$0xff] }
  0x1d   :  { %1832 = vmatpush3.bf16.msra.mxu1 %v2038_v27  ;;  %1769 = vmatprep.subr.bf16.mxu0 %v2039_v28  ;;  %v58_v26 = vld [vmem:[%s2665_s0 + $0x140] sm:$0xff]  ;;  %v2063_v28 = vld [vmem:[%s2664_s1 + $0x168] sm:$0xff]   ;;  %v1598_v59 = vcombine.low %v67_v44, %v71_v45 }
  0x1e   :  { %1833 = vmatprep.subr.bf16.mxu1 %v2040_v29  ;;  %v62_v27 = vld [vmem:[%s2665_s0 + $0x160] sm:$0xff]  ;;  %v59_v29 = vld [vmem:[%s2665_s0 + $0x148] sm:$0xff] }
  0x1f   :  { %v1589_v36 = vcombine.high %v58_v26, %v62_v27  ;;  %v1588_v47 = vcombine.low %v58_v26, %v62_v27  ;;  %v75_v56 = vld [vmem:[%s2665_s0 + $0x1c8] sm:$0xff]  ;;  %v1568_v26 = vcombine.low %v36_v14, %v40_v15 }
  0x20   :  { %1770 = vmatpush3.bf16.msra.mxu0 %v2041_v30  ;;  %v63_v30 = vld [vmem:[%s2665_s0 + $0x168] sm:$0xff] }
  0x21   :  { %1834 = vmatpush3.bf16.msra.mxu1 %v2042_v31  ;;  %1883 = vmatprep.subr.bf16.mxu0 %v2043_v40  ;;  %v2064_v31 = vld [vmem:[%s2664_s1 + $0x128] sm:$0xff]   ;;  %v1591_v37 = vcombine.high %v59_v29, %v63_v30  ;;  %v2069_v40 = vld [vmem:[%s2664_s1 + $0x1f0] sm:$0xff]  }
  0x22   :  { %1947 = vmatprep.subr.bf16.mxu1 %v2045_v42  ;;  %v70_v42 = vld [vmem:[%s2665_s0 + $0x1a0] sm:$0xff]  ;;  %v79_v57 = vld [vmem:[%s2665_s0 + $0x1e8] sm:$0xff] }
  0x23   :  { %947 = vmatmul.mubr.bf16.vlgmr.msra.gmra.mrb[0].mxu0 %v1548_v35  ;;  %v1582_v35 = vcombine.low %v51_v16, %v55_v17  ;;  %v1606_v3 = vcombine.low %v75_v56, %v79_v57  ;;  %v37_v16 = vld [vmem:[%s2665_s0 + $0x98] sm:$0xff] }
  0x24   :  { %1044 = vmatmul.mubr.bf16.vlgmr.msra.gmra.mrb[0].mxu1 %v1550_v38  ;;  %1884 = vmatpush3.bf16.msra.mxu0 %v2044_v41  ;;  %v2067_v38 = vld [vmem:[%s2664_s1 + $0x170] sm:$0xff]   ;;  %v66_v41 = vld [vmem:[%s2665_s0 + $0x180] sm:$0xff]  ;;  %v41_v17 = vld [vmem:[%s2665_s0 + $0xb8] sm:$0xff] }
  0x25   :  { %1948 = vmatpush3.bf16.msra.mxu1 %v2046_v43  ;;  %954 = vmatprep.mubr.bf16.mxu0 %v1557_v46  ;;  %v2070_v43 = vld [vmem:[%s2664_s1 + $0x1b0] sm:$0xff]   ;;  %v2071_v46 = vld [vmem:[%s2664_s1 + $0x178] sm:$0xff]   ;;  %v1596_v58 = vcombine.low %v66_v41, %v70_v42  ;;  %v1570_v27 = vcombine.low %v37_v16, %v41_v17 }
  0x26   :  { %1051 = vmatprep.mubr.bf16.mxu1 %v1559_v49  ;;  %1885 = vmatprep.subr.bf16.mxu0 %v2047_v50  ;;  %v1590_v49 = vcombine.low %v59_v29, %v63_v30  ;;  %v1597_v50 = vcombine.high %v66_v41, %v70_v42  ;;  %v52_v30 = vld [vmem:[%s2665_s0 + $0x110] sm:$0xff]  ;;  %v65_v41 = vld [vmem:[%s2665_s0 + $0x178] sm:$0xff] }
  0x27   :  { %1949 = vmatprep.subr.bf16.mxu1 %v2049_v54  ;;  %v74_v54 = vld [vmem:[%s2665_s0 + $0x1c0] sm:$0xff] }
  0x28   :  { %1886 = vmatpush3.bf16.msra.mxu0 %v2048_v52  ;;  %v1599_v52 = vcombine.high %v67_v44, %v71_v45 }
  0x29   :  { %1950 = vmatpush3.bf16.msra.mxu1 %v2050_v55  ;;  %1887 = vmatprep.subr.bf16.mxu0 %v2051_v62  ;;  %v78_v55 = vld [vmem:[%s2665_s0 + $0x1e0] sm:$0xff]  ;;  %v20_v62 = vld [vmem:[%s2665_s0 + $0x10] sm:$0xff] }
  0x2a   :  { %1951 = vmatprep.subr.bf16.mxu1 %v2053_v0  ;;  %v21_v0 = vld [vmem:[%s2665_s0 + $0x18] sm:$0xff] }
  0x2b   :  { %955 = vmatmul.mubr.bf16.gmra.mrb[4].mxu0 %v1556_v51  ;;  %v2073_v51 = vld [vmem:[%s2664_s1 + $0x1f8] sm:$0xff]  }
  0x2c   :  { %1052 = vmatmul.mubr.bf16.gmra.mrb[4].mxu1 %v1558_v53  ;;  %962 = vmatprep.mubr.bf16.mxu0 %v1565_v60  ;;  %v2074_v53 = vld [vmem:[%s2664_s1 + $0x1b8] sm:$0xff]   ;;  %v1605_v60 = vcombine.high %v74_v54, %v78_v55 }
  0x2d   :  { %1059 = vmatprep.mubr.bf16.mxu1 %v1567_v61  ;;  %1888 = vmatpush3.bf16.msra.mxu0 %v2052_v63  ;;  %v1607_v61 = vcombine.high %v75_v56, %v79_v57  ;;  %v24_v63 = vld [vmem:[%s2665_s0 + $0x30] sm:$0xff]  ;;  %v77_v56 = vld [vmem:[%s2665_s0 + $0x1d8] sm:$0xff] }
  0x2e   :  { %1952 = vmatpush3.bf16.msra.mxu1 %v2054_v1  ;;  %1889 = vmatprep.subr.bf16.mxu0 %v2055_v10  ;;  %v25_v1 = vld [vmem:[%s2665_s0 + $0x38] sm:$0xff]  ;;  %v1553_v4 = vcombine.high %v20_v62, %v24_v63  ;;  %v1552_v10 = vcombine.low %v20_v62, %v24_v63 }
  0x2f   :  { %1953 = vmatprep.subr.bf16.mxu1 %v2057_v12  ;;  %v1555_v5 = vcombine.high %v21_v0, %v25_v1  ;;  %v81_v57 = vld [vmem:[%s2665_s0 + $0x1f8] sm:$0xff] }
  0x30   :  { %v1610_v63 = vcombine.low %v77_v56, %v81_v57 }
  0x31   :  { %1890 = vmatpush3.bf16.msra.mxu0 %v2056_v11  ;;  %v1554_v11 = vcombine.low %v21_v0, %v25_v1 }
  0x32   :  { %1954 = vmatpush3.bf16.msra.mxu1 %v2058_v13  ;;  %1891 = vmatprep.subr.bf16.mxu0 %v2059_v18 }
  0x33   :  { %963 = vmatmul.mubr.bf16.gmra.mrb[8].mxu0 %v1564_v2  ;;  %1955 = vmatprep.subr.bf16.mxu1 %v2061_v23  ;;  %v1604_v2 = vcombine.low %v74_v54, %v78_v55  ;;  %v48_v23 = vld [vmem:[%s2665_s0 + $0xf0] sm:$0xff] }
  0x34   :  { %1060 = vmatmul.mubr.bf16.gmra.mrb[8].mxu1 %v1566_v6  ;;  %970 = vmatprep.mubr.bf16.mxu0 %v1573_v7  ;;  %v28_v6 = vld [vmem:[%s2665_s0 + $0x50] sm:$0xff] }
  0x35   :  { %1067 = vmatprep.mubr.bf16.mxu1 %v1575_v9  ;;  %1892 = vmatpush3.bf16.msra.mxu0 %v2060_v20  ;;  %v32_v7 = vld [vmem:[%s2665_s0 + $0x70] sm:$0xff]  ;;  %v33_v9 = vld [vmem:[%s2665_s0 + $0x78] sm:$0xff]  ;;  %v1569_v20 = vcombine.high %v36_v14, %v40_v15 }
  0x36   :  { %1956 = vmatpush3.bf16.msra.mxu1 %v2062_v25  ;;  %1893 = vmatprep.subr.bf16.mxu0 %v2063_v28  ;;  %v1561_v12 = vcombine.high %v28_v6, %v32_v7  ;;  %v1563_v13 = vcombine.high %v29_v8, %v33_v9  ;;  %v1560_v18 = vcombine.low %v28_v6, %v32_v7  ;;  %v49_v25 = vld [vmem:[%s2665_s0 + $0xf8] sm:$0xff]  ;;  %v76_v54 = vld [vmem:[%s2665_s0 + $0x1d0] sm:$0xff] }
  0x37   :  { %1957 = vmatprep.subr.bf16.mxu1 %v2065_v32  ;;  %v53_v32 = vld [vmem:[%s2665_s0 + $0x118] sm:$0xff]  ;;  %v80_v55 = vld [vmem:[%s2665_s0 + $0x1f0] sm:$0xff] }
  0x38   :  { %v1608_v62 = vcombine.low %v76_v54, %v80_v55 }
  0x39   :  { %1894 = vmatpush3.bf16.msra.mxu0 %v2064_v31  ;;  %v56_v31 = vld [vmem:[%s2665_s0 + $0x130] sm:$0xff] }
  0x3a   :  { %1958 = vmatpush3.bf16.msra.mxu1 %v2066_v33  ;;  %1895 = vmatprep.subr.bf16.mxu0 %v2067_v38  ;;  %v57_v33 = vld [vmem:[%s2665_s0 + $0x138] sm:$0xff]  ;;  %v60_v38 = vld [vmem:[%s2665_s0 + $0x150] sm:$0xff]  ;;  %v1584_v42 = vcombine.low %v52_v30, %v56_v31 }
  0x3b   :  { %971 = vmatmul.mubr.bf16.gmra.mrb[12].mxu0 %v1572_v19  ;;  %1959 = vmatprep.subr.bf16.mxu1 %v2069_v40  ;;  %v1562_v19 = vcombine.low %v29_v8, %v33_v9  ;;  %v61_v40 = vld [vmem:[%s2665_s0 + $0x158] sm:$0xff] }
  0x3c   :  { %1068 = vmatmul.mubr.bf16.gmra.mrb[12].mxu1 %v1574_v21  ;;  %978 = vmatprep.mubr.bf16.mxu0 %v1581_v22  ;;  %v1571_v21 = vcombine.high %v37_v16, %v41_v17  ;;  %v44_v22 = vld [vmem:[%s2665_s0 + $0xd0] sm:$0xff]  ;;  %v1595_v45 = vcombine.high %v61_v40, %v65_v41 }
  0x3d   :  { %1075 = vmatprep.mubr.bf16.mxu1 %v1583_v24  ;;  %1896 = vmatpush3.bf16.msra.mxu0 %v2068_v39  ;;  %v45_v24 = vld [vmem:[%s2665_s0 + $0xd8] sm:$0xff]  ;;  %v1577_v28 = vcombine.high %v44_v22, %v48_v23  ;;  %v64_v39 = vld [vmem:[%s2665_s0 + $0x170] sm:$0xff] }
  0x3e   :  { %1960 = vmatpush3.bf16.msra.mxu1 %v2070_v43  ;;  %1897 = vmatprep.subr.bf16.mxu0 %v2071_v46  ;;  %v1579_v29 = vcombine.high %v45_v24, %v49_v25  ;;  %v1586_v43 = vcombine.low %v53_v32, %v57_v33  ;;  %v1593_v44 = vcombine.high %v60_v38, %v64_v39  ;;  %v68_v46 = vld [vmem:[%s2665_s0 + $0x190] sm:$0xff] }
  0x3f   :  { %1961 = vmatprep.subr.bf16.mxu1 %v2073_v51  ;;  %v1594_v51 = vcombine.low %v61_v40, %v65_v41 }
  0x41   :  { %1898 = vmatpush3.bf16.msra.mxu0 %v2072_v48  ;;  %v69_v48 = vld [vmem:[%s2665_s0 + $0x198] sm:$0xff] }
  0x42   :  { %1962 = vmatpush3.bf16.msra.mxu1 %v2074_v53 }
  0x43   :  { %979 = vmatmul.mubr.bf16.gmra.mrb[16].mxu0 %v1580_v34  ;;  %v1576_v34 = vcombine.low %v44_v22, %v48_v23 }
  0x44   :  { %1076 = vmatmul.mubr.bf16.gmra.mrb[16].mxu1 %v1582_v35  ;;  %986 = vmatprep.mubr.bf16.mxu0 %v1589_v36  ;;  %v1578_v35 = vcombine.low %v45_v24, %v49_v25  ;;  %v1585_v36 = vcombine.high %v52_v30, %v56_v31 }
  0x45   :  { %1083 = vmatprep.mubr.bf16.mxu1 %v1591_v37  ;;  %v1587_v37 = vcombine.high %v53_v32, %v57_v33 }
  0x4b   :  { %987 = vmatmul.mubr.bf16.gmra.mrb[20].mxu0 %v1588_v47  ;;  %v72_v47 = vld [vmem:[%s2665_s0 + $0x1b0] sm:$0xff] }
  0x4c   :  { %1084 = vmatmul.mubr.bf16.gmra.mrb[20].mxu1 %v1590_v49  ;;  %994 = vmatprep.mubr.bf16.mxu0 %v1597_v50  ;;  %v73_v49 = vld [vmem:[%s2665_s0 + $0x1b8] sm:$0xff]  ;;  %v1592_v50 = vcombine.low %v60_v38, %v64_v39 }
  0x4d   :  { %1091 = vmatprep.mubr.bf16.mxu1 %v1599_v52  ;;  %v1601_v52 = vcombine.high %v68_v46, %v72_v47  ;;  %v1603_v53 = vcombine.high %v69_v48, %v73_v49 }
  0x53   :  { %995 = vmatmul.mubr.bf16.gmra.mrb[24].mxu0 %v1596_v58  ;;  %v1600_v58 = vcombine.low %v68_v46, %v72_v47 }
  0x54   :  { %1092 = vmatmul.mubr.bf16.gmra.mrb[24].mxu1 %v1598_v59  ;;  %1002 = vmatprep.mubr.bf16.mxu0 %v1605_v60  ;;  %v1602_v59 = vcombine.low %v69_v48, %v73_v49  ;;  %v1609_v60 = vcombine.high %v76_v54, %v80_v55 }
  0x55   :  { %1099 = vmatprep.mubr.bf16.mxu1 %v1607_v61  ;;  %v1611_v61 = vcombine.high %v77_v56, %v81_v57 }
  0x5b   :  { %1003 = vmatmul.mubr.bf16.gmra.mrb[28].mxu0 %v1604_v2 }
  0x5c   :  { %1100 = vmatmul.mubr.bf16.gmra.mrb[28].mxu1 %v1606_v3  ;;  %1140 = vmatprep.mubr.bf16.mxu0 %v1553_v4 }
  0x5d   :  { %1237 = vmatprep.mubr.bf16.mxu1 %v1555_v5 }
  0x63   :  { %1141 = vmatmul.mubr.bf16.vlgmr.msra.gmra.mrb[32].mxu0 %v1552_v10 }
  0x64   :  { %1238 = vmatmul.mubr.bf16.vlgmr.msra.gmra.mrb[32].mxu1 %v1554_v11  ;;  %1148 = vmatprep.mubr.bf16.mxu0 %v1561_v12 }
  0x65   :  { %1245 = vmatprep.mubr.bf16.mxu1 %v1563_v13 }
  0x6b   :  { %1149 = vmatmul.mubr.bf16.gmra.mrb[36].mxu0 %v1560_v18 }
  0x6c   :  { %1246 = vmatmul.mubr.bf16.gmra.mrb[36].mxu1 %v1562_v19  ;;  %1156 = vmatprep.mubr.bf16.mxu0 %v1569_v20 }
  0x6d   :  { %1253 = vmatprep.mubr.bf16.mxu1 %v1571_v21 }
  0x73   :  { %1157 = vmatmul.mubr.bf16.gmra.mrb[40].mxu0 %v1568_v26 }
  0x74   :  { %1254 = vmatmul.mubr.bf16.gmra.mrb[40].mxu1 %v1570_v27  ;;  %1164 = vmatprep.mubr.bf16.mxu0 %v1577_v28 }
  0x75   :  { %1261 = vmatprep.mubr.bf16.mxu1 %v1579_v29 }
  0x7b   :  { %1165 = vmatmul.mubr.bf16.gmra.mrb[44].mxu0 %v1576_v34 }
  0x7c   :  { %1262 = vmatmul.mubr.bf16.gmra.mrb[44].mxu1 %v1578_v35  ;;  %1172 = vmatprep.mubr.bf16.mxu0 %v1585_v36 }
  0x7d   :  { %1269 = vmatprep.mubr.bf16.mxu1 %v1587_v37 }
  0x83   :  { %1173 = vmatmul.mubr.bf16.gmra.mrb[48].mxu0 %v1584_v42 }
  0x84   :  { %1270 = vmatmul.mubr.bf16.gmra.mrb[48].mxu1 %v1586_v43  ;;  %1180 = vmatprep.mubr.bf16.mxu0 %v1593_v44 }
  0x85   :  { %1277 = vmatprep.mubr.bf16.mxu1 %v1595_v45 }
  0x8b   :  { %1181 = vmatmul.mubr.bf16.gmra.mrb[52].mxu0 %v1592_v50 }
  0x8c   :  { %1278 = vmatmul.mubr.bf16.gmra.mrb[52].mxu1 %v1594_v51  ;;  %1188 = vmatprep.mubr.bf16.mxu0 %v1601_v52 }
  0x8d   :  { %1285 = vmatprep.mubr.bf16.mxu1 %v1603_v53 }
  0x93   :  { %1189 = vmatmul.mubr.bf16.gmra.mrb[56].mxu0 %v1600_v58 }
  0x94   :  { %1286 = vmatmul.mubr.bf16.gmra.mrb[56].mxu1 %v1602_v59  ;;  %1196 = vmatprep.mubr.bf16.mxu0 %v1609_v60 }
  0x95   :  { %1293 = vmatprep.mubr.bf16.mxu1 %v1611_v61 }
  0x9b   :  { %1197 = vmatmul.mubr.bf16.gmra.mrb[60].mxu0 %v1608_v62 }
  0x9c   :  { %1294 = vmatmul.mubr.bf16.gmra.mrb[60].mxu1 %v1610_v63 }
  0xf6   :  { %v1771_v0 = vpop.f32.mrb[0].mxu0 }
  0xf7   :  { %v1835_v1 = vpop.f32.mrb[0].mxu1  ;;  %v1772_v2 = vpop.f32.mrb[1].mxu0 }
  0xf8   :  { %v1773_v3 = vadd.f32 %v1772_v2, %v1771_v0  ;;  %v1836_v4 = vpop.f32.mrb[1].mxu1  ;;  %v1774_v5 = vpop.f32.mrb[2].mxu0 }
  0xf9   :  { %v1837_v6 = vadd.f32 %v1836_v4, %v1835_v1  ;;  %v1838_v7 = vpop.f32.mrb[2].mxu1  ;;  %v1775_v8 = vpop.f32.mrb[3].mxu0 }
  0xfa   :  { %v1776_v9 = vadd.f32 %v1775_v8, %v1774_v5  ;;  %v1839_v10 = vpop.f32.mrb[3].mxu1 }
  0xfb   :  { %v2486_v11 = vadd.f32 %v1837_v6, %v1773_v3  ;;  %v1840_v12 = vadd.f32 %v1839_v10, %v1838_v7 }
  0xfd   :  { %v2488_v13 = vadd.f32 %v1840_v12, %v1776_v9 }
  0xfe   :  { %v1777_v14 = vpop.f32.mrb[4].mxu0 }
  0xff   :  { %v1841_v15 = vpop.f32.mrb[4].mxu1  ;;  %v1778_v16 = vpop.f32.mrb[5].mxu0 }
 0x100   :  { %v1779_v17 = vadd.f32 %v1778_v16, %v1777_v14  ;;  %v1842_v18 = vpop.f32.mrb[5].mxu1  ;;  %v1780_v19 = vpop.f32.mrb[6].mxu0 }
 0x101   :  { %v1843_v20 = vadd.f32 %v1842_v18, %v1841_v15  ;;  %v1844_v21 = vpop.f32.mrb[6].mxu1  ;;  %v1781_v22 = vpop.f32.mrb[7].mxu0 }
 0x102   :  { %v1782_v23 = vadd.f32 %v1781_v22, %v1780_v19  ;;  %v1845_v24 = vpop.f32.mrb[7].mxu1 }
 0x103   :  { %v2490_v25 = vadd.f32 %v1843_v20, %v1779_v17  ;;  %v1846_v26 = vadd.f32 %v1845_v24, %v1844_v21 }
 0x105   :  { %v2492_v27 = vadd.f32 %v1846_v26, %v1782_v23 }
 0x106   :  { %v1783_v28 = vpop.f32.mrb[8].mxu0 }
 0x107   :  { %v1847_v29 = vpop.f32.mrb[8].mxu1  ;;  %v1784_v30 = vpop.f32.mrb[9].mxu0 }
 0x108   :  { %v1785_v31 = vadd.f32 %v1784_v30, %v1783_v28  ;;  %v1848_v32 = vpop.f32.mrb[9].mxu1  ;;  %v1786_v33 = vpop.f32.mrb[10].mxu0 }
 0x109   :  { %v1849_v34 = vadd.f32 %v1848_v32, %v1847_v29  ;;  %v1850_v35 = vpop.f32.mrb[10].mxu1  ;;  %v1787_v36 = vpop.f32.mrb[11].mxu0 }
 0x10a   :  { %v1788_v37 = vadd.f32 %v1787_v36, %v1786_v33  ;;  %v1851_v38 = vpop.f32.mrb[11].mxu1 }
 0x10b   :  { %v2494_v39 = vadd.f32 %v1849_v34, %v1785_v31  ;;  %v1852_v40 = vadd.f32 %v1851_v38, %v1850_v35 }
 0x10d   :  { %v2496_v41 = vadd.f32 %v1852_v40, %v1788_v37 }
 0x10e   :  { %v1789_v42 = vpop.f32.mrb[12].mxu0 }
 0x10f   :  { %v1853_v43 = vpop.f32.mrb[12].mxu1  ;;  %v1790_v44 = vpop.f32.mrb[13].mxu0 }
 0x110   :  { %v1791_v45 = vadd.f32 %v1790_v44, %v1789_v42  ;;  %v1854_v46 = vpop.f32.mrb[13].mxu1  ;;  %v1792_v47 = vpop.f32.mrb[14].mxu0 }
 0x111   :  { %v1855_v48 = vadd.f32 %v1854_v46, %v1853_v43  ;;  %v1856_v49 = vpop.f32.mrb[14].mxu1  ;;  %v1793_v50 = vpop.f32.mrb[15].mxu0 }
 0x112   :  { %v1794_v51 = vadd.f32 %v1793_v50, %v1792_v47  ;;  %v1857_v52 = vpop.f32.mrb[15].mxu1 }
 0x113   :  { %v2498_v53 = vadd.f32 %v1855_v48, %v1791_v45  ;;  %v1858_v54 = vadd.f32 %v1857_v52, %v1856_v49 }
 0x115   :  { %v2500_v55 = vadd.f32 %v1858_v54, %v1794_v51 }
 0x116   :  { %v1795_v56 = vpop.f32.mrb[16].mxu0 }
 0x117   :  { %v1859_v57 = vpop.f32.mrb[16].mxu1  ;;  %v1796_v58 = vpop.f32.mrb[17].mxu0 }
 0x118   :  { %v1797_v59 = vadd.f32 %v1796_v58, %v1795_v56  ;;  %v1860_v60 = vpop.f32.mrb[17].mxu1  ;;  %v1798_v61 = vpop.f32.mrb[18].mxu0 }
 0x119   :  { %v1861_v62 = vadd.f32 %v1860_v60, %v1859_v57  ;;  %v1862_v63 = vpop.f32.mrb[18].mxu1  ;;  %v1799_v0 = vpop.f32.mrb[19].mxu0 }
 0x11a   :  { %v1800_v1 = vadd.f32 %v1799_v0, %v1798_v61  ;;  %v1863_v2 = vpop.f32.mrb[19].mxu1 }
 0x11b   :  { %v2502_v3 = vadd.f32 %v1861_v62, %v1797_v59  ;;  %v1864_v4 = vadd.f32 %v1863_v2, %v1862_v63 }
 0x11d   :  { %v2504_v5 = vadd.f32 %v1864_v4, %v1800_v1 }
 0x11e   :  { %v1801_v6 = vpop.f32.mrb[20].mxu0 }
 0x11f   :  { %v1865_v7 = vpop.f32.mrb[20].mxu1  ;;  %v1802_v8 = vpop.f32.mrb[21].mxu0 }
 0x120   :  { %v1803_v9 = vadd.f32 %v1802_v8, %v1801_v6  ;;  %v1866_v10 = vpop.f32.mrb[21].mxu1  ;;  %v1804_v12 = vpop.f32.mrb[22].mxu0 }
 0x121   :  { %v1867_v14 = vadd.f32 %v1866_v10, %v1865_v7  ;;  %v1868_v15 = vpop.f32.mrb[22].mxu1  ;;  %v1805_v16 = vpop.f32.mrb[23].mxu0 }
 0x122   :  { %v1806_v17 = vadd.f32 %v1805_v16, %v1804_v12  ;;  %v1869_v18 = vpop.f32.mrb[23].mxu1 }
 0x123   :  { %v2506_v19 = vadd.f32 %v1867_v14, %v1803_v9  ;;  %v1870_v20 = vadd.f32 %v1869_v18, %v1868_v15 }
 0x125   :  { %v2508_v21 = vadd.f32 %v1870_v20, %v1806_v17 }
 0x126   :  { %v1807_v22 = vpop.f32.mrb[24].mxu0 }
 0x127   :  { %v1871_v23 = vpop.f32.mrb[24].mxu1  ;;  %v1808_v24 = vpop.f32.mrb[25].mxu0 }
 0x128   :  { %v1809_v26 = vadd.f32 %v1808_v24, %v1807_v22  ;;  %v1872_v28 = vpop.f32.mrb[25].mxu1  ;;  %v1810_v29 = vpop.f32.mrb[26].mxu0 }
 0x129   :  { %v1873_v30 = vadd.f32 %v1872_v28, %v1871_v23  ;;  %v1874_v31 = vpop.f32.mrb[26].mxu1  ;;  %v1811_v32 = vpop.f32.mrb[27].mxu0 }
 0x12a   :  { %v1812_v33 = vadd.f32 %v1811_v32, %v1810_v29  ;;  %v1875_v34 = vpop.f32.mrb[27].mxu1 }
 0x12b   :  { %v2510_v35 = vadd.f32 %v1873_v30, %v1809_v26  ;;  %v1876_v36 = vadd.f32 %v1875_v34, %v1874_v31 }
 0x12d   :  { %v2512_v37 = vadd.f32 %v1876_v36, %v1812_v33 }
 0x12e   :  { %v1813_v38 = vpop.f32.mrb[28].mxu0 }
 0x12f   :  { %v1877_v40 = vpop.f32.mrb[28].mxu1  ;;  %v1814_v42 = vpop.f32.mrb[29].mxu0 }
 0x130   :  { %v1815_v43 = vadd.f32 %v1814_v42, %v1813_v38  ;;  %v1878_v44 = vpop.f32.mrb[29].mxu1  ;;  %v1816_v45 = vpop.f32.mrb[30].mxu0 }
 0x131   :  { %v1879_v46 = vadd.f32 %v1878_v44, %v1877_v40  ;;  %v1880_v47 = vpop.f32.mrb[30].mxu1  ;;  %v1817_v48 = vpop.f32.mrb[31].mxu0 }
 0x132   :  { %v1818_v49 = vadd.f32 %v1817_v48, %v1816_v45  ;;  %v1881_v50 = vpop.f32.mrb[31].mxu1 }
 0x133   :  { %v2514_v51 = vadd.f32 %v1879_v46, %v1815_v43  ;;  %v1882_v52 = vadd.f32 %v1881_v50, %v1880_v47 }
 0x135   :  { %v2516_v54 = vadd.f32 %v1882_v52, %v1818_v49 }
 0x136   :  { %v1899_v56 = vpop.f32.mrb[32].mxu0 }
 0x137   :  { %v1963_v57 = vpop.f32.mrb[32].mxu1  ;;  %v1900_v58 = vpop.f32.mrb[33].mxu0 }
 0x138   :  { %v1901_v59 = vadd.f32 %v1900_v58, %v1899_v56  ;;  %v1964_v60 = vpop.f32.mrb[33].mxu1  ;;  %v1902_v61 = vpop.f32.mrb[34].mxu0 }
 0x139   :  { %v1965_v62 = vadd.f32 %v1964_v60, %v1963_v57  ;;  %v1966_v63 = vpop.f32.mrb[34].mxu1  ;;  %v1903_v0 = vpop.f32.mrb[35].mxu0 }
 0x13a   :  { %v1143_v1 = vadd.f32 %v1901_v59, %v2486_v11  ;;  %v1904_v2 = vadd.f32 %v1903_v0, %v1902_v61  ;;  %v1967_v4 = vpop.f32.mrb[35].mxu1 }
 0x13b   :  { %v1968_v6 = vadd.f32 %v1967_v4, %v1966_v63 }
 0x13c   :  { %v2519_v7 = vadd.f32 %v1965_v62, %v1143_v1  ;;  %v1146_v8 = vadd.f32 %v1904_v2, %v2488_v13 }
 0x13e   :  { %v2522_v9 = vadd.f32 %v1968_v6, %v1146_v8  ;;  %v1905_v10 = vpop.f32.mrb[36].mxu0  ;;  %v1324_v30 = vmul.f32 %v2519_v7, %v2519_v7 }
 0x13f   :  { %v1969_v12 = vpop.f32.mrb[36].mxu1  ;;  %v1906_v14 = vpop.f32.mrb[37].mxu0 }
 0x140   :  { %v1907_v15 = vadd.f32 %v1906_v14, %v1905_v10  ;;  %v1970_v16 = vpop.f32.mrb[37].mxu1  ;;  %v1908_v17 = vpop.f32.mrb[38].mxu0  ;;  %v1325_v28 = vmul.f32 %v2522_v9, %v2522_v9  ;;  %v1302_v31 = vadd.f32 %v2522_v9, %v2519_v7 }
 0x141   :  { %v1971_v18 = vadd.f32 %v1970_v16, %v1969_v12  ;;  %v1972_v20 = vpop.f32.mrb[38].mxu1  ;;  %v1909_v22 = vpop.f32.mrb[39].mxu0 }
 0x142   :  { %v1151_v11 = vadd.f32 %v1907_v15, %v2490_v25  ;;  %v1910_v23 = vadd.f32 %v1909_v22, %v1908_v17  ;;  %v1973_v24 = vpop.f32.mrb[39].mxu1  ;;  %v1340_v38 = vadd.f32 %v1325_v28, %v1324_v30 }
 0x143   :  { %v1974_v26 = vadd.f32 %v1973_v24, %v1972_v20 }
 0x144   :  { %v2527_v13 = vadd.f32 %v1971_v18, %v1151_v11  ;;  %v1154_v29 = vadd.f32 %v1910_v23, %v2492_v27 }
 0x146   :  { %v1326_v32 = vmul.f32 %v2527_v13, %v2527_v13  ;;  %v2536_v25 = vadd.f32 %v1974_v26, %v1154_v29  ;;  %v1911_v33 = vpop.f32.mrb[40].mxu0  ;;  %v1303_v40 = vadd.f32 %v1302_v31, %v2527_v13 }
 0x147   :  { %v1975_v34 = vpop.f32.mrb[40].mxu1  ;;  %v1912_v36 = vpop.f32.mrb[41].mxu0 }
 0x148   :  { %v1913_v42 = vadd.f32 %v1912_v36, %v1911_v33  ;;  %v1976_v43 = vpop.f32.mrb[41].mxu1  ;;  %v1914_v27 = vpop.f32.mrb[42].mxu0  ;;  %v1341_v47 = vadd.f32 %v1340_v38, %v1326_v32  ;;  %v1327_v48 = vmul.f32 %v2536_v25, %v2536_v25  ;;  %v1304_v57 = vadd.f32 %v1303_v40, %v2536_v25 }
 0x149   :  { %v1977_v44 = vadd.f32 %v1976_v43, %v1975_v34  ;;  %v1978_v45 = vpop.f32.mrb[42].mxu1  ;;  %v1915_v46 = vpop.f32.mrb[43].mxu0 }
 0x14a   :  { %v1159_v49 = vadd.f32 %v1913_v42, %v2494_v39  ;;  %v1916_v50 = vadd.f32 %v1915_v46, %v1914_v27  ;;  %v1979_v52 = vpop.f32.mrb[43].mxu1  ;;  %v1342_v60 = vadd.f32 %v1341_v47, %v1327_v48 }
 0x14b   :  { %v1980_v56 = vadd.f32 %v1979_v52, %v1978_v45 }
 0x14c   :  { %v2543_v58 = vadd.f32 %v1977_v44, %v1159_v49  ;;  %v1162_v59 = vadd.f32 %v1916_v50, %v2496_v41 }
 0x14e   :  { %v1305_v61 = vadd.f32 %v1304_v57, %v2543_v58  ;;  %v1328_v62 = vmul.f32 %v2543_v58, %v2543_v58  ;;  %v2549_v63 = vadd.f32 %v1980_v56, %v1162_v59  ;;  %v1917_v0 = vpop.f32.mrb[44].mxu0 }
 0x14f   :  { %v1981_v1 = vpop.f32.mrb[44].mxu1  ;;  %v1918_v39 = vpop.f32.mrb[45].mxu0 }
 0x150   :  { %v1343_v2 = vadd.f32 %v1342_v60, %v1328_v62  ;;  %v1306_v4 = vadd.f32 %v1305_v61, %v2549_v63  ;;  %v1329_v6 = vmul.f32 %v2549_v63, %v2549_v63  ;;  %v1919_v8 = vadd.f32 %v1918_v39, %v1917_v0  ;;  %v1982_v10 = vpop.f32.mrb[45].mxu1  ;;  %v1920_v41 = vpop.f32.mrb[46].mxu0 }
 0x151   :  { %v1983_v12 = vadd.f32 %v1982_v10, %v1981_v1  ;;  %v1984_v14 = vpop.f32.mrb[46].mxu1  ;;  %v1921_v15 = vpop.f32.mrb[47].mxu0 }
 0x152   :  { %v1344_v16 = vadd.f32 %v1343_v2, %v1329_v6  ;;  %v1167_v17 = vadd.f32 %v1919_v8, %v2498_v53  ;;  %v1922_v18 = vadd.f32 %v1921_v15, %v1920_v41  ;;  %v1985_v20 = vpop.f32.mrb[47].mxu1 }
 0x153   :  { %v1986_v22 = vadd.f32 %v1985_v20, %v1984_v14 }
 0x154   :  { %v2555_v11 = vadd.f32 %v1983_v12, %v1167_v17  ;;  %v1170_v23 = vadd.f32 %v1922_v18, %v2500_v55 }
 0x156   :  { %v1307_v24 = vadd.f32 %v1306_v4, %v2555_v11  ;;  %v1330_v26 = vmul.f32 %v2555_v11, %v2555_v11  ;;  %v2561_v28 = vadd.f32 %v1986_v22, %v1170_v23  ;;  %v1923_v29 = vpop.f32.mrb[48].mxu0 }
 0x157   :  { %v1987_v30 = vpop.f32.mrb[48].mxu1  ;;  %v1924_v31 = vpop.f32.mrb[49].mxu0 }
 0x158   :  { %v1345_v32 = vadd.f32 %v1344_v16, %v1330_v26  ;;  %v1308_v53 = vadd.f32 %v1307_v24, %v2561_v28  ;;  %v1331_v33 = vmul.f32 %v2561_v28, %v2561_v28  ;;  %v1925_v34 = vadd.f32 %v1924_v31, %v1923_v29  ;;  %v1988_v36 = vpop.f32.mrb[49].mxu1  ;;  %v1926_v38 = vpop.f32.mrb[50].mxu0 }
 0x159   :  { %v1989_v55 = vadd.f32 %v1988_v36, %v1987_v30  ;;  %v1990_v40 = vpop.f32.mrb[50].mxu1  ;;  %v1927_v42 = vpop.f32.mrb[51].mxu0 }
 0x15a   :  { %v1346_v43 = vadd.f32 %v1345_v32, %v1331_v33  ;;  %v1175_v27 = vadd.f32 %v1925_v34, %v2502_v3  ;;  %v1928_v44 = vadd.f32 %v1927_v42, %v1926_v38  ;;  %v1991_v45 = vpop.f32.mrb[51].mxu1 }
 0x15b   :  { %v1992_v46 = vadd.f32 %v1991_v45, %v1990_v40 }
 0x15c   :  { %v2567_v47 = vadd.f32 %v1989_v55, %v1175_v27  ;;  %v1178_v48 = vadd.f32 %v1928_v44, %v2504_v5 }
 0x15e   :  { %v1309_v49 = vadd.f32 %v1308_v53, %v2567_v47  ;;  %v1332_v50 = vmul.f32 %v2567_v47, %v2567_v47  ;;  %v2573_v52 = vadd.f32 %v1992_v46, %v1178_v48  ;;  %v1929_v56 = vpop.f32.mrb[52].mxu0 }
 0x15f   :  { %v1993_v57 = vpop.f32.mrb[52].mxu1  ;;  %v1930_v59 = vpop.f32.mrb[53].mxu0 }
 0x160   :  { %v1347_v60 = vadd.f32 %v1346_v43, %v1332_v50  ;;  %v1310_v3 = vadd.f32 %v1309_v49, %v2573_v52  ;;  %v1333_v61 = vmul.f32 %v2573_v52, %v2573_v52  ;;  %v1931_v62 = vadd.f32 %v1930_v59, %v1929_v56  ;;  %v1994_v0 = vpop.f32.mrb[53].mxu1  ;;  %v1932_v1 = vpop.f32.mrb[54].mxu0 }
 0x161   :  { %v1995_v5 = vadd.f32 %v1994_v0, %v1993_v57  ;;  %v1996_v39 = vpop.f32.mrb[54].mxu1  ;;  %v1933_v2 = vpop.f32.mrb[55].mxu0 }
 0x162   :  { %v1348_v4 = vadd.f32 %v1347_v60, %v1333_v61  ;;  %v1183_v6 = vadd.f32 %v1931_v62, %v2506_v19  ;;  %v1934_v8 = vadd.f32 %v1933_v2, %v1932_v1  ;;  %v1997_v10 = vpop.f32.mrb[55].mxu1 }
 0x163   :  { %v1998_v41 = vadd.f32 %v1997_v10, %v1996_v39 }
 0x164   :  { %v2579_v12 = vadd.f32 %v1995_v5, %v1183_v6  ;;  %v1186_v14 = vadd.f32 %v1934_v8, %v2508_v21 }
 0x166   :  { %v1311_v15 = vadd.f32 %v1310_v3, %v2579_v12  ;;  %v1334_v16 = vmul.f32 %v2579_v12, %v2579_v12  ;;  %v2585_v17 = vadd.f32 %v1998_v41, %v1186_v14  ;;  %v1935_v18 = vpop.f32.mrb[56].mxu0 }
 0x167   :  { %v1999_v20 = vpop.f32.mrb[56].mxu1  ;;  %v1936_v22 = vpop.f32.mrb[57].mxu0 }
 0x168   :  { %v1349_v23 = vadd.f32 %v1348_v4, %v1334_v16  ;;  %v1312_v19 = vadd.f32 %v1311_v15, %v2585_v17  ;;  %v1335_v24 = vmul.f32 %v2585_v17, %v2585_v17  ;;  %v1937_v26 = vadd.f32 %v1936_v22, %v1935_v18  ;;  %v2000_v29 = vpop.f32.mrb[57].mxu1  ;;  %v1938_v30 = vpop.f32.mrb[58].mxu0 }
 0x169   :  { %v2001_v21 = vadd.f32 %v2000_v29, %v1999_v20  ;;  %v2002_v31 = vpop.f32.mrb[58].mxu1  ;;  %v1939_v32 = vpop.f32.mrb[59].mxu0 }
 0x16a   :  { %v1350_v53 = vadd.f32 %v1349_v23, %v1335_v24  ;;  %v1191_v33 = vadd.f32 %v1937_v26, %v2510_v35  ;;  %v1940_v34 = vadd.f32 %v1939_v32, %v1938_v30  ;;  %v2003_v36 = vpop.f32.mrb[59].mxu1 }
 0x16b   :  { %v2004_v38 = vadd.f32 %v2003_v36, %v2002_v31 }
 0x16c   :  { %v2591_v55 = vadd.f32 %v2001_v21, %v1191_v33  ;;  %v1194_v40 = vadd.f32 %v1940_v34, %v2512_v37  ;;  %v1373_v34 = vlaneseq }
 0x16e   :  { %v1313_v42 = vadd.f32 %v1312_v19, %v2591_v55  ;;  %v1336_v43 = vmul.f32 %v2591_v55, %v2591_v55  ;;  %v2597_v27 = vadd.f32 %v2004_v38, %v1194_v40  ;;  %v1941_v44 = vpop.f32.mrb[60].mxu0  ;;  %v1374_v36 = vshrl.u32 %v1373_v34, 7  ;;  %v1365_v38 = vld [vmem:[%s2666_s2] sm:$0x1] }
 0x16f   :  { %v2005_v45 = vpop.f32.mrb[60].mxu1  ;;  %v1942_v46 = vpop.f32.mrb[61].mxu0 }
 0x170   :  { %v1351_v48 = vadd.f32 %v1350_v53, %v1336_v43  ;;  %v1314_v35 = vadd.f32 %v1313_v42, %v2597_v27  ;;  %v1337_v49 = vmul.f32 %v2597_v27, %v2597_v27  ;;  %v1943_v50 = vadd.f32 %v1942_v46, %v1941_v44  ;;  %v2006_v56 = vpop.f32.mrb[61].mxu1  ;;  %v1944_v57 = vpop.f32.mrb[62].mxu0  ;;  %v1369_v44 = vld [vmem:[%s2667_s3] sm:$0x1] }
 0x171   :  { %v2007_v37 = vadd.f32 %v2006_v56, %v2005_v45  ;;  %v2008_v59 = vpop.f32.mrb[62].mxu1  ;;  %v1945_v60 = vpop.f32.mrb[63].mxu0  ;;  %v1375_v40 = vsub.s32 0, %v1374_v36 }
 0x172   :  { %v1352_v3 = vadd.f32 %v1351_v48, %v1337_v49  ;;  %v1199_v61 = vadd.f32 %v1943_v50, %v2514_v51  ;;  %v1946_v62 = vadd.f32 %v1945_v60, %v1944_v57  ;;  %v2009_v0 = vpop.f32.mrb[63].mxu1 }
 0x173   :  { %v2010_v1 = vadd.f32 %v2009_v0, %v2008_v59 }
 0x174   :  { %v1296_v5 = vadd.f32 %v2007_v37, %v1199_v61  ;;  %v1202_v39 = vadd.f32 %v1946_v62, %v2516_v54 }
 0x176   :  { %v1315_v2 = vadd.f32 %v1314_v35, %v1296_v5  ;;  %v1338_v4 = vmul.f32 %v1296_v5, %v1296_v5  ;;  %v1299_v6 = vadd.f32 %v2010_v1, %v1202_v39 }
 0x178   :  { %v1353_v8 = vadd.f32 %v1352_v3, %v1338_v4  ;;  %v1316_v10 = vadd.f32 %v1315_v2, %v1299_v6  ;;  %v1339_v41 = vmul.f32 %v1299_v6, %v1299_v6 }
 0x17a   :  { %v1317_v14 = vrot.slane %v1316_v10, 4  ;;  %v1354_v15 = vadd.f32 %v1353_v8, %v1339_v41 }
 0x17c   :  { %v1318_v16 = vadd.f32 %v1317_v14, %v1316_v10  ;;  %v1355_v18 = vrot.slane %v1354_v15, 4 }
 0x17e   :  { %v1319_v20 = vrot.slane %v1318_v16, 2  ;;  %v1356_v22 = vadd.f32 %v1355_v18, %v1354_v15 }
 0x180   :  { %v1320_v23 = vadd.f32 %v1319_v20, %v1318_v16  ;;  %v1357_v51 = vrot.slane %v1356_v22, 2 }
 0x182   :  { %v1321_v19 = vrot.slane %v1320_v23, 1  ;;  %v1358_v24 = vadd.f32 %v1357_v51, %v1356_v22 }
 0x184   :  { %v1322_v26 = vadd.f32 %v1321_v19, %v1320_v23  ;;  %v1359_v29 = vrot.slane %v1358_v24, 1 }
 0x186   :  { %v1323_v30 = vmul.f32 0.0078125, %v1322_v26  ;;  %v1360_v54 = vadd.f32 %v1359_v29, %v1358_v24 }
 0x188   :  { %v1361_v21 = vmul.f32 0.0078125, %v1360_v54  ;;  %v1362_v31 = vmul.f32 %v1323_v30, %v1323_v30 }
 0x18a   :  { %v1363_v32 = vsub.f32 %v1361_v21, %v1362_v31 }
 0x18c   :  { %v1364_v53 = vmax.f32 %v1363_v32, 0.0 }
 0x18e   :  { %v1366_v33 = vadd.f32 1e-05, %v1364_v53 }
 0x190   :  { %2075 = vrsqrt.f32 %v1366_v33 }
 0x19a   :  { %v2076_v42 = vpop.eup %2075 }
 0x19b   :  { %v1368_v43 = vmul.f32 %v2076_v42, %v1365_v38 }
 0x19d   :  { %v1370_v45 = vmul.f32 %v1368_v43, %v1323_v30  ;;  %v1376_v46 = vrot.slane %v1368_v43, %v1375_v40 }
 0x19f   :  { %v1371_v48 = vsub.f32 %v1369_v44, %v1370_v45  ;;  %v1378_v35 = vmul.f32 %v1376_v46, %v2519_v7  ;;  %v1379_v49 = vmul.f32 %v1376_v46, %v2522_v9  ;;  %v1382_v50 = vmul.f32 %v1376_v46, %v2543_v58 }
 0x1a0   :  { %v1383_v56 = vmul.f32 %v1376_v46, %v2549_v63  ;;  %v1384_v57 = vmul.f32 %v1376_v46, %v2555_v11  ;;  %v1385_v37 = vmul.f32 %v1376_v46, %v2561_v28  ;;  %v1386_v59 = vmul.f32 %v1376_v46, %v2567_v47 }
 0x1a1   :  { %v1387_v60 = vmul.f32 %v1376_v46, %v2573_v52  ;;  %v1388_v3 = vmul.f32 %v1376_v46, %v2579_v12  ;;  %v1389_v61 = vmul.f32 %v1376_v46, %v2585_v17  ;;  %v1390_v7 = vmul.f32 %v1376_v46, %v2591_v55 }
 0x1a2   :  { %v1391_v9 = vmul.f32 %v1376_v46, %v2597_v27  ;;  %v1392_v62 = vmul.f32 %v1376_v46, %v1296_v5  ;;  %v1380_v58 = vmul.f32 %v1376_v46, %v2527_v13  ;;  %v1381_v63 = vmul.f32 %v1376_v46, %v2536_v25 }
 0x1a3   :  { %v1393_v11 = vmul.f32 %v1376_v46, %v1299_v6  ;;  %v1398_v0 = vrot.slane %v1371_v48, %v1375_v40 }
 0x1a5   :  { %v1400_v28 = vadd.f32 %v1398_v0, %v1378_v35  ;;  %v1401_v1 = vadd.f32 %v1398_v0, %v1379_v49  ;;  %v1402_v47 = vadd.f32 %v1398_v0, %v1380_v58  ;;  %v1403_v39 = vadd.f32 %v1398_v0, %v1381_v63 }
 0x1a6   :  { %v1404_v52 = vadd.f32 %v1398_v0, %v1382_v50  ;;  %v1405_v2 = vadd.f32 %v1398_v0, %v1383_v56  ;;  %v1406_v12 = vadd.f32 %v1398_v0, %v1384_v57  ;;  %v1407_v4 = vadd.f32 %v1398_v0, %v1385_v37 }
 0x1a7   :  { %v1408_v17 = vadd.f32 %v1398_v0, %v1386_v59  ;;  %v1409_v8 = vadd.f32 %v1398_v0, %v1387_v60  ;;  %v1410_v55 = vadd.f32 %v1398_v0, %v1388_v3  ;;  %v1411_v10 = vadd.f32 %v1398_v0, %v1389_v61 }
 0x1a8   :  { %v1412_v27 = vadd.f32 %v1398_v0, %v1390_v7  ;;  %v1413_v5 = vadd.f32 %v1398_v0, %v1391_v9  ;;  %v1414_v41 = vadd.f32 %v1398_v0, %v1392_v62  ;;  %v1415_v13 = vadd.f32 %v1398_v0, %v1393_v11 }
 0x1a9   :  { %vm1416_vm0 = vcmp.ge.f32.partialorder %v1400_v28, 0.0  ;;  %vm1417_vm1 = vcmp.ge.f32.partialorder %v1401_v1, 0.0  ;;  %vm1418_vm2 = vcmp.ge.f32.partialorder %v1402_v47, 0.0  ;;  %vm1419_vm3 = vcmp.ge.f32.partialorder %v1403_v39, 0.0 }
 0x1aa   :  { %vm1420_vm4 = vcmp.ge.f32.partialorder %v1404_v52, 0.0  ;;  %vm1421_vm5 = vcmp.ge.f32.partialorder %v1405_v2, 0.0  ;;  %vm1422_vm6 = vcmp.ge.f32.partialorder %v1406_v12, 0.0  ;;  %vm1423_vm7 = vcmp.ge.f32.partialorder %v1407_v4, 0.0 }
 0x1ab   :  { %vm1424_vm8 = vcmp.ge.f32.partialorder %v1408_v17, 0.0  ;;  %vm1425_vm9 = vcmp.ge.f32.partialorder %v1409_v8, 0.0  ;;  %vm1426_vm10 = vcmp.ge.f32.partialorder %v1410_v55, 0.0  ;;  %vm1427_vm11 = vcmp.ge.f32.partialorder %v1411_v10, 0.0 }
 0x1ac   :  { %vm1428_vm12 = vcmp.ge.f32.partialorder %v1412_v27, 0.0  ;;  %vm1429_vm13 = vcmp.ge.f32.partialorder %v1413_v5, 0.0  ;;  %vm1430_vm14 = vcmp.ge.f32.partialorder %v1414_v41, 0.0  ;;  %vm1431_vm15 = vcmp.ge.f32.partialorder %v1415_v13, 0.0 }
 0x1ad   :  { %v1432_v25 = vmul.f32 0.2, %v1400_v28  ;;  %v1433_v6 = vmul.f32 0.2, %v1401_v1  ;;  %v1434_v14 = vmul.f32 0.2, %v1402_v47 }
 0x1ae   :  { %v1435_v15 = vmul.f32 0.2, %v1403_v39  ;;  %v1436_v16 = vmul.f32 0.2, %v1404_v52  ;;  %v1437_v18 = vmul.f32 0.2, %v1405_v2 }
 0x1af   :  { %v1438_v20 = vmul.f32 0.2, %v1406_v12  ;;  %v1439_v22 = vmul.f32 0.2, %v1407_v4  ;;  %v1440_v23 = vmul.f32 0.2, %v1408_v17  ;;  %v1448_v51 = vsel %vm1416_vm0, %v1400_v28, %v1432_v25 }
 0x1b0   :  { %v1441_v19 = vmul.f32 0.2, %v1409_v8  ;;  %v1442_v24 = vmul.f32 0.2, %v1410_v55  ;;  %v1443_v26 = vmul.f32 0.2, %v1411_v10  ;;  %v1449_v29 = vsel %vm1417_vm1, %v1401_v1, %v1433_v6 }
 0x1b1   :  { %v1444_v30 = vmul.f32 0.2, %v1412_v27  ;;  %v1445_v54 = vmul.f32 0.2, %v1413_v5  ;;  %v1446_v21 = vmul.f32 0.2, %v1414_v41  ;;  %v1450_v31 = vsel %vm1418_vm2, %v1402_v47, %v1434_v14 }
 0x1b2   :  { %v1447_v32 = vmul.f32 0.2, %v1415_v13  ;;  %v1451_v53 = vsel %vm1419_vm3, %v1403_v39, %v1435_v15  ;;  %v1452_v33 = vsel %vm1420_vm4, %v1404_v52, %v1436_v16  ;;  %v1453_v34 = vsel %vm1421_vm5, %v1405_v2, %v1437_v18 }
 0x1b3   :  { %v1454_v36 = vsel %vm1422_vm6, %v1406_v12, %v1438_v20  ;;  %v1455_v38 = vsel %vm1423_vm7, %v1407_v4, %v1439_v22  ;;  %v1456_v40 = vsel %vm1424_vm8, %v1408_v17, %v1440_v23  ;;  %v1457_v42 = vsel %vm1425_vm9, %v1409_v8, %v1441_v19 }
 0x1b4   :  { %v1458_v43 = vsel %vm1426_vm10, %v1410_v55, %v1442_v24  ;;  %v1459_v44 = vsel %vm1427_vm11, %v1411_v10, %v1443_v26  ;;  %v1460_v45 = vsel %vm1428_vm12, %v1412_v27, %v1444_v30  ;;  %v1461_v46 = vsel %vm1429_vm13, %v1413_v5, %v1445_v54 }
 0x1b5   :  { %v1462_v48 = vsel %vm1430_vm14, %v1414_v41, %v1446_v21  ;;  %v1463_v35 = vsel %vm1431_vm15, %v1415_v13, %v1447_v32  ;;  %v1711_v49 = vpack.c.bf16 %v1449_v29, %v1448_v51  ;;  %v1716_v50 = vpack.c.bf16 %v1451_v53, %v1450_v31 }
 0x1b6   :  { %v1721_v56 = vpack.c.bf16 %v1453_v34, %v1452_v33  ;;  %v1726_v57 = vpack.c.bf16 %v1455_v38, %v1454_v36  ;;  %v1731_v37 = vpack.c.bf16 %v1457_v42, %v1456_v40  ;;  %v1736_v59 = vpack.c.bf16 %v1459_v44, %v1458_v43 }
 0x1b7   :  { %1712 = vst [vmem:[%s2668_s4] sm:$0xff] %v1711_v49   ;;  %1748 = vst [vmem:[%s2668_s4 + $0x8] sm:$0xff] %v1716_v50   ;;  %v1741_v60 = vpack.c.bf16 %v1461_v46, %v1460_v45  ;;  %v1746_v3 = vpack.c.bf16 %v1463_v35, %v1462_v48 }
 0x1b8   :  { %1749 = vst [vmem:[%s2668_s4 + $0x10] sm:$0xff] %v1721_v56   ;;  %1750 = vst [vmem:[%s2668_s4 + $0x18] sm:$0xff] %v1726_v57  }
 0x1b9   :  { %1751 = vst [vmem:[%s2668_s4 + $0x20] sm:$0xff] %v1731_v37   ;;  %1752 = vst [vmem:[%s2668_s4 + $0x28] sm:$0xff] %v1736_v59  }
 0x1ba   :  { %1753 = vst [vmem:[%s2668_s4 + $0x30] sm:$0xff] %v1741_v60   ;;  %1754 = vst [vmem:[%s2668_s4 + $0x38] sm:$0xff] %v1746_v3  }

// kernel: _lambda_.7
= control target key start
LH: loop header
LB: loop body
LE: loop exit
PB: predicated region body
PF: predicated region fallthrough
CT: control target
= control target key end

     0   :  { %s4116_s1 = inlined_call_operand.vmem [shape: bf16[2048,256], index: 1, kind: input, shape index: {}]   ;;  %s4117_s0 = inlined_call_operand.vmem [shape: bf16[32,2048], index: 0, kind: input, shape index: {}]   ;;  %s4118_s2 = inlined_call_operand.vmem [shape: f32[1,256], index: 2, kind: input, shape index: {}]   ;;  %s4119_s3 = inlined_call_operand.vmem [shape: f32[1,256], index: 3, kind: input, shape index: {}]   ;;  %s4120_s4 = inlined_call_operand.vmem [shape: bf16[32,256], index: 4, kind: output, shape index: {}]  }
   0x1   :  { %v2716_v0 = vld [vmem:[%s4116_s1 + $0x4] ss:$8 sps:$4 sm:$0xff]   ;;  %v2720_v2 = vld [vmem:[%s4116_s1] ss:$8 sps:$4 sm:$0xff]   ;;  %v2722_v4 = vld [vmem:[%s4116_s1 + $0x14] ss:$8 sps:$4 sm:$0xff]  }
   0x2   :  { %v2718_v1 = vld [vmem:[%s4116_s1 + $0x404] ss:$8 sps:$4 sm:$0xff]   ;;  %1745 = vmatprep.subr.bf16.mxu1 %v2716_v0  ;;  %v2721_v3 = vld [vmem:[%s4116_s1 + $0x400] ss:$8 sps:$4 sm:$0xff]   ;;  %v2724_v5 = vld [vmem:[%s4116_s1 + $0x414] ss:$8 sps:$4 sm:$0xff]  }
   0x3   :  { %1957 = vmatprep.subr.bf16.mxu0 %v2718_v1  ;;  %1746 = vmatpush1.bf16.msra.mxu1 %v2720_v2  ;;  %v2726_v6 = vld [vmem:[%s4116_s1 + $0x10] ss:$8 sps:$4 sm:$0xff]   ;;  %v2728_v8 = vld [vmem:[%s4116_s1 + $0x24] ss:$8 sps:$4 sm:$0xff]   ;;  %v2732_v10 = vld [vmem:[%s4116_s1 + $0x20] ss:$8 sps:$4 sm:$0xff]  }
   0x4   :  { %1958 = vmatpush1.bf16.msra.mxu0 %v2721_v3  ;;  %1747 = vmatprep.subr.bf16.mxu1 %v2722_v4  ;;  %v2727_v7 = vld [vmem:[%s4116_s1 + $0x410] ss:$8 sps:$4 sm:$0xff]   ;;  %v2730_v9 = vld [vmem:[%s4116_s1 + $0x424] ss:$8 sps:$4 sm:$0xff]   ;;  %v2733_v11 = vld [vmem:[%s4116_s1 + $0x420] ss:$8 sps:$4 sm:$0xff]  }
   0x5   :  { %1959 = vmatprep.subr.bf16.mxu0 %v2724_v5  ;;  %v2734_v12 = vld [vmem:[%s4116_s1 + $0x34] ss:$8 sps:$4 sm:$0xff]   ;;  %v2738_v14 = vld [vmem:[%s4116_s1 + $0x30] ss:$8 sps:$4 sm:$0xff]   ;;  %v2740_v16 = vld [vmem:[%s4116_s1 + $0x44] ss:$8 sps:$4 sm:$0xff]  }
   0x6   :  { %v2736_v13 = vld [vmem:[%s4116_s1 + $0x434] ss:$8 sps:$4 sm:$0xff]   ;;  %v2739_v15 = vld [vmem:[%s4116_s1 + $0x430] ss:$8 sps:$4 sm:$0xff]   ;;  %v2742_v17 = vld [vmem:[%s4116_s1 + $0x444] ss:$8 sps:$4 sm:$0xff]  }
   0x7   :  { %1748 = vmatpush1.bf16.msra.mxu1 %v2726_v6  ;;  %v2744_v18 = vld [vmem:[%s4116_s1 + $0x40] ss:$8 sps:$4 sm:$0xff]   ;;  %v2746_v20 = vld [vmem:[%s4116_s1 + $0x54] ss:$8 sps:$4 sm:$0xff]   ;;  %v2750_v22 = vld [vmem:[%s4116_s1 + $0x50] ss:$8 sps:$4 sm:$0xff]  }
   0x8   :  { %1960 = vmatpush1.bf16.msra.mxu0 %v2727_v7  ;;  %1749 = vmatprep.subr.bf16.mxu1 %v2728_v8  ;;  %v2745_v19 = vld [vmem:[%s4116_s1 + $0x440] ss:$8 sps:$4 sm:$0xff]   ;;  %v2748_v21 = vld [vmem:[%s4116_s1 + $0x454] ss:$8 sps:$4 sm:$0xff]   ;;  %v2751_v23 = vld [vmem:[%s4116_s1 + $0x450] ss:$8 sps:$4 sm:$0xff]  }
   0x9   :  { %1961 = vmatprep.subr.bf16.mxu0 %v2730_v9  ;;  %v2752_v24 = vld [vmem:[%s4116_s1 + $0x64] ss:$8 sps:$4 sm:$0xff]   ;;  %v2756_v26 = vld [vmem:[%s4116_s1 + $0x60] ss:$8 sps:$4 sm:$0xff]   ;;  %v2758_v28 = vld [vmem:[%s4116_s1 + $0x74] ss:$8 sps:$4 sm:$0xff]  }
   0xa   :  { %v2754_v25 = vld [vmem:[%s4116_s1 + $0x464] ss:$8 sps:$4 sm:$0xff]   ;;  %v2757_v27 = vld [vmem:[%s4116_s1 + $0x460] ss:$8 sps:$4 sm:$0xff]   ;;  %v2760_v29 = vld [vmem:[%s4116_s1 + $0x474] ss:$8 sps:$4 sm:$0xff]  }
   0xb   :  { %1750 = vmatpush1.bf16.msra.mxu1 %v2732_v10  ;;  %v2762_v30 = vld [vmem:[%s4116_s1 + $0x70] ss:$8 sps:$4 sm:$0xff]   ;;  %v2764_v32 = vld [vmem:[%s4116_s1 + $0x84] ss:$8 sps:$4 sm:$0xff]   ;;  %v2768_v34 = vld [vmem:[%s4116_s1 + $0x80] ss:$8 sps:$4 sm:$0xff]  }
   0xc   :  { %1962 = vmatpush1.bf16.msra.mxu0 %v2733_v11  ;;  %1751 = vmatprep.subr.bf16.mxu1 %v2734_v12  ;;  %v2763_v31 = vld [vmem:[%s4116_s1 + $0x470] ss:$8 sps:$4 sm:$0xff]   ;;  %v2766_v33 = vld [vmem:[%s4116_s1 + $0x484] ss:$8 sps:$4 sm:$0xff]   ;;  %v2769_v35 = vld [vmem:[%s4116_s1 + $0x480] ss:$8 sps:$4 sm:$0xff]  }
   0xd   :  { %1963 = vmatprep.subr.bf16.mxu0 %v2736_v13  ;;  %v2770_v36 = vld [vmem:[%s4116_s1 + $0x94] ss:$8 sps:$4 sm:$0xff]   ;;  %v2774_v38 = vld [vmem:[%s4116_s1 + $0x90] ss:$8 sps:$4 sm:$0xff]   ;;  %v2776_v40 = vld [vmem:[%s4116_s1 + $0xa4] ss:$8 sps:$4 sm:$0xff]  }
   0xe   :  { %v2772_v37 = vld [vmem:[%s4116_s1 + $0x494] ss:$8 sps:$4 sm:$0xff]   ;;  %v2775_v39 = vld [vmem:[%s4116_s1 + $0x490] ss:$8 sps:$4 sm:$0xff]   ;;  %v2778_v41 = vld [vmem:[%s4116_s1 + $0x4a4] ss:$8 sps:$4 sm:$0xff]  }
   0xf   :  { %1752 = vmatpush1.bf16.msra.mxu1 %v2738_v14  ;;  %v2780_v42 = vld [vmem:[%s4116_s1 + $0xa0] ss:$8 sps:$4 sm:$0xff]   ;;  %v2782_v44 = vld [vmem:[%s4116_s1 + $0xb4] ss:$8 sps:$4 sm:$0xff]   ;;  %v2786_v46 = vld [vmem:[%s4116_s1 + $0xb0] ss:$8 sps:$4 sm:$0xff]  }
  0x10   :  { %1964 = vmatpush1.bf16.msra.mxu0 %v2739_v15  ;;  %1753 = vmatprep.subr.bf16.mxu1 %v2740_v16  ;;  %v2781_v43 = vld [vmem:[%s4116_s1 + $0x4a0] ss:$8 sps:$4 sm:$0xff]   ;;  %v2784_v45 = vld [vmem:[%s4116_s1 + $0x4b4] ss:$8 sps:$4 sm:$0xff]   ;;  %v2787_v47 = vld [vmem:[%s4116_s1 + $0x4b0] ss:$8 sps:$4 sm:$0xff]  }
  0x11   :  { %1965 = vmatprep.subr.bf16.mxu0 %v2742_v17  ;;  %v17_v48 = vld [vmem:[%s4117_s0] sm:$0xff]  ;;  %v2794_v58 = vld [vmem:[%s4116_s1 + $0xd4] ss:$8 sps:$4 sm:$0xff]   ;;  %v2798_v60 = vld [vmem:[%s4116_s1 + $0xd0] ss:$8 sps:$4 sm:$0xff]  }
  0x12   :  { %v25_v49 = vld [vmem:[%s4117_s0 + $0x40] sm:$0xff]  ;;  %v2796_v59 = vld [vmem:[%s4116_s1 + $0x4d4] ss:$8 sps:$4 sm:$0xff]   ;;  %v2799_v61 = vld [vmem:[%s4116_s1 + $0x4d0] ss:$8 sps:$4 sm:$0xff]  }
  0x13   :  { %1754 = vmatpush1.bf16.msra.mxu1 %v2744_v18  ;;  %v2788_v50 = vld [vmem:[%s4116_s1 + $0xc4] ss:$8 sps:$4 sm:$0xff]   ;;  %v2364_v52 = vcombine.high %v17_v48, %v25_v49  ;;  %v2792_v56 = vld [vmem:[%s4116_s1 + $0xc0] ss:$8 sps:$4 sm:$0xff]   ;;  %v2806_v2 = vld [vmem:[%s4116_s1 + $0xf4] ss:$8 sps:$4 sm:$0xff]   ;;  %v2363_v8 = vcombine.low %v17_v48, %v25_v49 }
  0x14   :  { %1966 = vmatpush1.bf16.msra.mxu0 %v2745_v19  ;;  %1755 = vmatprep.subr.bf16.mxu1 %v2746_v20  ;;  %v2790_v51 = vld [vmem:[%s4116_s1 + $0x4c4] ss:$8 sps:$4 sm:$0xff]   ;;  %v2793_v57 = vld [vmem:[%s4116_s1 + $0x4c0] ss:$8 sps:$4 sm:$0xff]   ;;  %v2808_v3 = vld [vmem:[%s4116_s1 + $0x4f4] ss:$8 sps:$4 sm:$0xff]  }
  0x15   :  { %1967 = vmatprep.subr.bf16.mxu0 %v2748_v21  ;;  %v21_v53 = vld [vmem:[%s4117_s0 + $0x20] sm:$0xff]  ;;  %1777 = vmatprep.mubr.bf16.mxu1 %v2364_v52  ;;  %v2810_v4 = vld [vmem:[%s4116_s1 + $0xf0] ss:$8 sps:$4 sm:$0xff]   ;;  %v2820_v12 = vld [vmem:[%s4116_s1 + $0x114] ss:$8 sps:$4 sm:$0xff]  }
  0x16   :  { %v29_v54 = vld [vmem:[%s4117_s0 + $0x60] sm:$0xff]  ;;  %v2811_v5 = vld [vmem:[%s4116_s1 + $0x4f0] ss:$8 sps:$4 sm:$0xff]   ;;  %v2823_v13 = vld [vmem:[%s4116_s1 + $0x514] ss:$8 sps:$4 sm:$0xff]  }
  0x17   :  { %1756 = vmatpush1.bf16.msra.mxu1 %v2750_v22  ;;  %v2372_v55 = vcombine.high %v21_v53, %v29_v54  ;;  %v2800_v62 = vld [vmem:[%s4116_s1 + $0xe4] ss:$8 sps:$4 sm:$0xff]   ;;  %v2804_v0 = vld [vmem:[%s4116_s1 + $0xe0] ss:$8 sps:$4 sm:$0xff]   ;;  %v2371_v10 = vcombine.low %v21_v53, %v29_v54  ;;  %v2818_v14 = vld [vmem:[%s4116_s1 + $0x110] ss:$8 sps:$4 sm:$0xff]  }
  0x18   :  { %1968 = vmatpush1.bf16.msra.mxu0 %v2751_v23  ;;  %1757 = vmatprep.subr.bf16.mxu1 %v2752_v24  ;;  %v2802_v63 = vld [vmem:[%s4116_s1 + $0x4e4] ss:$8 sps:$4 sm:$0xff]   ;;  %v2805_v1 = vld [vmem:[%s4116_s1 + $0x4e0] ss:$8 sps:$4 sm:$0xff]   ;;  %v2821_v15 = vld [vmem:[%s4116_s1 + $0x510] ss:$8 sps:$4 sm:$0xff]  }
  0x19   :  { %1969 = vmatprep.subr.bf16.mxu0 %v2754_v25  ;;  %1989 = vmatprep.mubr.bf16.mxu0 %v2372_v55  ;;  %v2814_v6 = vld [vmem:[%s4116_s1 + $0x104] ss:$8 sps:$4 sm:$0xff]   ;;  %v2812_v9 = vld [vmem:[%s4116_s1 + $0x100] ss:$8 sps:$4 sm:$0xff]   ;;  %v2832_v20 = vld [vmem:[%s4116_s1 + $0x134] ss:$8 sps:$4 sm:$0xff]  }
  0x1a   :  { %v2817_v7 = vld [vmem:[%s4116_s1 + $0x504] ss:$8 sps:$4 sm:$0xff]   ;;  %v2815_v11 = vld [vmem:[%s4116_s1 + $0x500] ss:$8 sps:$4 sm:$0xff]   ;;  %v2835_v21 = vld [vmem:[%s4116_s1 + $0x534] ss:$8 sps:$4 sm:$0xff]  }
  0x1b   :  { %1758 = vmatpush1.bf16.msra.mxu1 %v2756_v26  ;;  %v2826_v16 = vld [vmem:[%s4116_s1 + $0x124] ss:$8 sps:$4 sm:$0xff]   ;;  %v2824_v18 = vld [vmem:[%s4116_s1 + $0x120] ss:$8 sps:$4 sm:$0xff]   ;;  %v2830_v22 = vld [vmem:[%s4116_s1 + $0x130] ss:$8 sps:$4 sm:$0xff]  }
  0x1c   :  { %1970 = vmatpush1.bf16.msra.mxu0 %v2757_v27  ;;  %1759 = vmatprep.subr.bf16.mxu1 %v2758_v28  ;;  %v2829_v17 = vld [vmem:[%s4116_s1 + $0x524] ss:$8 sps:$4 sm:$0xff]   ;;  %v2827_v19 = vld [vmem:[%s4116_s1 + $0x520] ss:$8 sps:$4 sm:$0xff]   ;;  %v2833_v23 = vld [vmem:[%s4116_s1 + $0x530] ss:$8 sps:$4 sm:$0xff]  }
  0x1d   :  { %1971 = vmatprep.subr.bf16.mxu0 %v2760_v29  ;;  %v2838_v24 = vld [vmem:[%s4116_s1 + $0x144] ss:$8 sps:$4 sm:$0xff]   ;;  %v2836_v26 = vld [vmem:[%s4116_s1 + $0x140] ss:$8 sps:$4 sm:$0xff]   ;;  %v2844_v28 = vld [vmem:[%s4116_s1 + $0x154] ss:$8 sps:$4 sm:$0xff]  }
  0x1e   :  { %v2841_v25 = vld [vmem:[%s4116_s1 + $0x544] ss:$8 sps:$4 sm:$0xff]   ;;  %v2839_v27 = vld [vmem:[%s4116_s1 + $0x540] ss:$8 sps:$4 sm:$0xff]   ;;  %v2847_v29 = vld [vmem:[%s4116_s1 + $0x554] ss:$8 sps:$4 sm:$0xff]  }
  0x1f   :  { %1760 = vmatpush1.bf16.msra.mxu1 %v2762_v30  ;;  %v33_v30 = vld [vmem:[%s4117_s0 + $0x80] sm:$0xff]  ;;  %v3451_v49 = vld [vmem:[%s4117_s0 + $0x28] sm:$0xff]  ;;  %v2857_v52 = vld [vmem:[%s4116_s1 + $0x570] ss:$8 sps:$4 sm:$0xff]  }
  0x20   :  { %1972 = vmatpush1.bf16.msra.mxu0 %v2763_v31  ;;  %1761 = vmatprep.subr.bf16.mxu1 %v2764_v32  ;;  %v41_v31 = vld [vmem:[%s4117_s0 + $0xc0] sm:$0xff]  ;;  %v2842_v32 = vld [vmem:[%s4116_s1 + $0x150] ss:$8 sps:$4 sm:$0xff]  }
  0x21   :  { %1973 = vmatprep.subr.bf16.mxu0 %v2766_v33  ;;  %v2380_v33 = vcombine.high %v33_v30, %v41_v31  ;;  %v2862_v54 = vld [vmem:[%s4116_s1 + $0x184] ss:$8 sps:$4 sm:$0xff]  }
  0x22   :  { %v2865_v55 = vld [vmem:[%s4116_s1 + $0x584] ss:$8 sps:$4 sm:$0xff]  }
  0x23   :  { %1762 = vmatpush1.bf16.msra.mxu1 %v2768_v34  ;;  %v2845_v34 = vld [vmem:[%s4116_s1 + $0x550] ss:$8 sps:$4 sm:$0xff]  }
  0x24   :  { %1974 = vmatpush1.bf16.msra.mxu0 %v2769_v35  ;;  %1763 = vmatprep.subr.bf16.mxu1 %v2770_v36  ;;  %v37_v35 = vld [vmem:[%s4117_s0 + $0xa0] sm:$0xff] }
  0x25   :  { %1975 = vmatprep.subr.bf16.mxu0 %v2772_v37  ;;  %v45_v36 = vld [vmem:[%s4117_s0 + $0xe0] sm:$0xff]  ;;  %v2379_v37 = vcombine.low %v33_v30, %v41_v31  ;;  %v2916_v30 = vld [vmem:[%s4116_s1 + $0x214] ss:$8 sps:$4 sm:$0xff]  }
  0x26   :  { %v2919_v31 = vld [vmem:[%s4116_s1 + $0x614] ss:$8 sps:$4 sm:$0xff]  }
  0x27   :  { %1764 = vmatpush1.bf16.msra.mxu1 %v2774_v38  ;;  %v2850_v38 = vld [vmem:[%s4116_s1 + $0x164] ss:$8 sps:$4 sm:$0xff]  }
  0x28   :  { %1976 = vmatpush1.bf16.msra.mxu0 %v2775_v39  ;;  %1765 = vmatprep.subr.bf16.mxu1 %v2776_v40  ;;  %v2388_v39 = vcombine.high %v37_v35, %v45_v36  ;;  %v2387_v40 = vcombine.low %v37_v35, %v45_v36  ;;  %v2914_v36 = vld [vmem:[%s4116_s1 + $0x210] ss:$8 sps:$4 sm:$0xff]  }
  0x29   :  { %1977 = vmatprep.subr.bf16.mxu0 %v2778_v41  ;;  %v2853_v41 = vld [vmem:[%s4116_s1 + $0x564] ss:$8 sps:$4 sm:$0xff]  }
  0x2b   :  { %1766 = vmatpush1.bf16.msra.mxu1 %v2780_v42  ;;  %v2848_v42 = vld [vmem:[%s4116_s1 + $0x160] ss:$8 sps:$4 sm:$0xff]  }
  0x2c   :  { %1978 = vmatpush1.bf16.msra.mxu0 %v2781_v43  ;;  %1767 = vmatprep.subr.bf16.mxu1 %v2782_v44  ;;  %v2851_v43 = vld [vmem:[%s4116_s1 + $0x560] ss:$8 sps:$4 sm:$0xff]  }
  0x2d   :  { %1979 = vmatprep.subr.bf16.mxu0 %v2784_v45  ;;  %v3433_v44 = vld [vmem:[%s4117_s0 + $0x8] sm:$0xff] }
  0x2e   :  { %v3438_v45 = vld [vmem:[%s4117_s0 + $0x48] sm:$0xff] }
  0x2f   :  { %1768 = vmatpush1.bf16.msra.mxu1 %v2786_v46  ;;  %v2856_v46 = vld [vmem:[%s4116_s1 + $0x174] ss:$8 sps:$4 sm:$0xff]   ;;  %v2366_v48 = vcombine.high %v3433_v44, %v3438_v45 }
  0x30   :  { %1980 = vmatpush1.bf16.msra.mxu0 %v2787_v47  ;;  %1769 = vmatprep.subr.bf16.mxu1 %v2788_v50  ;;  %v2859_v47 = vld [vmem:[%s4116_s1 + $0x574] ss:$8 sps:$4 sm:$0xff]   ;;  %v3456_v50 = vld [vmem:[%s4117_s0 + $0x68] sm:$0xff] }
  0x31   :  { %1981 = vmatprep.subr.bf16.mxu0 %v2790_v51  ;;  %v2854_v51 = vld [vmem:[%s4116_s1 + $0x170] ss:$8 sps:$4 sm:$0xff]   ;;  %v2374_v53 = vcombine.high %v3451_v49, %v3456_v50 }
  0x33   :  { %1770 = vmatpush1.bf16.msra.mxu1 %v2792_v56  ;;  %v2860_v56 = vld [vmem:[%s4116_s1 + $0x180] ss:$8 sps:$4 sm:$0xff]  }
  0x34   :  { %1982 = vmatpush1.bf16.msra.mxu0 %v2793_v57  ;;  %1771 = vmatprep.subr.bf16.mxu1 %v2794_v58  ;;  %v2863_v57 = vld [vmem:[%s4116_s1 + $0x580] ss:$8 sps:$4 sm:$0xff]   ;;  %v2868_v58 = vld [vmem:[%s4116_s1 + $0x194] ss:$8 sps:$4 sm:$0xff]  }
  0x35   :  { %1983 = vmatprep.subr.bf16.mxu0 %v2796_v59  ;;  %v2871_v59 = vld [vmem:[%s4116_s1 + $0x594] ss:$8 sps:$4 sm:$0xff]  }
  0x37   :  { %1772 = vmatpush1.bf16.msra.mxu1 %v2798_v60  ;;  %v2866_v60 = vld [vmem:[%s4116_s1 + $0x190] ss:$8 sps:$4 sm:$0xff]  }
  0x38   :  { %1984 = vmatpush1.bf16.msra.mxu0 %v2799_v61  ;;  %1773 = vmatprep.subr.bf16.mxu1 %v2800_v62  ;;  %v2869_v61 = vld [vmem:[%s4116_s1 + $0x590] ss:$8 sps:$4 sm:$0xff]   ;;  %v2874_v62 = vld [vmem:[%s4116_s1 + $0x1a4] ss:$8 sps:$4 sm:$0xff]  }
  0x39   :  { %1985 = vmatprep.subr.bf16.mxu0 %v2802_v63  ;;  %v2877_v63 = vld [vmem:[%s4116_s1 + $0x5a4] ss:$8 sps:$4 sm:$0xff]  }
  0x3b   :  { %1774 = vmatpush1.bf16.msra.mxu1 %v2804_v0  ;;  %v2872_v0 = vld [vmem:[%s4116_s1 + $0x1a0] ss:$8 sps:$4 sm:$0xff]  }
  0x3c   :  { %1986 = vmatpush1.bf16.msra.mxu0 %v2805_v1  ;;  %1775 = vmatprep.subr.bf16.mxu1 %v2806_v2  ;;  %v2875_v1 = vld [vmem:[%s4116_s1 + $0x5a0] ss:$8 sps:$4 sm:$0xff]   ;;  %v2880_v2 = vld [vmem:[%s4116_s1 + $0x1b4] ss:$8 sps:$4 sm:$0xff]  }
  0x3d   :  { %1987 = vmatprep.subr.bf16.mxu0 %v2808_v3  ;;  %v2883_v3 = vld [vmem:[%s4116_s1 + $0x5b4] ss:$8 sps:$4 sm:$0xff]  }
  0x3f   :  { %1776 = vmatpush1.bf16.msra.mxu1 %v2810_v4  ;;  %v2878_v4 = vld [vmem:[%s4116_s1 + $0x1b0] ss:$8 sps:$4 sm:$0xff]  }
  0x40   :  { %1988 = vmatpush1.bf16.msra.mxu0 %v2811_v5  ;;  %1798 = vmatprep.subr.bf16.mxu1 %v2814_v6  ;;  %v2881_v5 = vld [vmem:[%s4116_s1 + $0x5b0] ss:$8 sps:$4 sm:$0xff]   ;;  %v2886_v6 = vld [vmem:[%s4116_s1 + $0x1c4] ss:$8 sps:$4 sm:$0xff]  }
  0x41   :  { %2010 = vmatprep.subr.bf16.mxu0 %v2817_v7  ;;  %v2889_v7 = vld [vmem:[%s4116_s1 + $0x5c4] ss:$8 sps:$4 sm:$0xff]  }
  0x42   :  { %1778 = vmatmul.mubr.bf16.vlgmr.msra.gmra.mrb[0].mxu1 %v2363_v8  ;;  %v2884_v8 = vld [vmem:[%s4116_s1 + $0x1c0] ss:$8 sps:$4 sm:$0xff]  }
  0x43   :  { %1990 = vmatmul.mubr.bf16.vlgmr.msra.gmra.mrb[0].mxu0 %v2371_v10  ;;  %1799 = vmatpush1.bf16.msra.mxu1 %v2812_v9  ;;  %v2887_v9 = vld [vmem:[%s4116_s1 + $0x5c0] ss:$8 sps:$4 sm:$0xff]   ;;  %v2892_v10 = vld [vmem:[%s4116_s1 + $0x1d4] ss:$8 sps:$4 sm:$0xff]  }
  0x44   :  { %2011 = vmatpush1.bf16.msra.mxu0 %v2815_v11  ;;  %1800 = vmatprep.subr.bf16.mxu1 %v2820_v12  ;;  %v2895_v11 = vld [vmem:[%s4116_s1 + $0x5d4] ss:$8 sps:$4 sm:$0xff]   ;;  %v2890_v12 = vld [vmem:[%s4116_s1 + $0x1d0] ss:$8 sps:$4 sm:$0xff]  }
  0x45   :  { %2012 = vmatprep.subr.bf16.mxu0 %v2823_v13  ;;  %1787 = vmatprep.mubr.bf16.mxu1 %v2380_v33  ;;  %v2893_v13 = vld [vmem:[%s4116_s1 + $0x5d0] ss:$8 sps:$4 sm:$0xff]   ;;  %v46_v33 = vld [vmem:[%s4117_s0 + $0xe8] sm:$0xff] }
  0x46   :  { %1999 = vmatprep.mubr.bf16.mxu0 %v2388_v39  ;;  %v2925_v39 = vld [vmem:[%s4116_s1 + $0x624] ss:$8 sps:$4 sm:$0xff]  }
  0x47   :  { %1801 = vmatpush1.bf16.msra.mxu1 %v2818_v14  ;;  %v2898_v14 = vld [vmem:[%s4116_s1 + $0x1e4] ss:$8 sps:$4 sm:$0xff]  }
  0x48   :  { %2013 = vmatpush1.bf16.msra.mxu0 %v2821_v15  ;;  %1802 = vmatprep.subr.bf16.mxu1 %v2826_v16  ;;  %v2901_v15 = vld [vmem:[%s4116_s1 + $0x5e4] ss:$8 sps:$4 sm:$0xff]   ;;  %v2896_v16 = vld [vmem:[%s4116_s1 + $0x1e0] ss:$8 sps:$4 sm:$0xff]  }
  0x49   :  { %2014 = vmatprep.subr.bf16.mxu0 %v2829_v17  ;;  %v2899_v17 = vld [vmem:[%s4116_s1 + $0x5e0] ss:$8 sps:$4 sm:$0xff]  }
  0x4a   :  { %1788 = vmatmul.mubr.bf16.gmra.mrb[4].mxu1 %v2379_v37  ;;  %v2917_v37 = vld [vmem:[%s4116_s1 + $0x610] ss:$8 sps:$4 sm:$0xff]  }
  0x4b   :  { %1803 = vmatpush1.bf16.msra.mxu1 %v2824_v18  ;;  %2000 = vmatmul.mubr.bf16.gmra.mrb[4].mxu0 %v2387_v40  ;;  %v2904_v18 = vld [vmem:[%s4116_s1 + $0x1f4] ss:$8 sps:$4 sm:$0xff]   ;;  %v2920_v40 = vld [vmem:[%s4116_s1 + $0x220] ss:$8 sps:$4 sm:$0xff]  }
  0x4c   :  { %2015 = vmatpush1.bf16.msra.mxu0 %v2827_v19  ;;  %1804 = vmatprep.subr.bf16.mxu1 %v2832_v20  ;;  %v2907_v19 = vld [vmem:[%s4116_s1 + $0x5f4] ss:$8 sps:$4 sm:$0xff]   ;;  %v2902_v20 = vld [vmem:[%s4116_s1 + $0x1f0] ss:$8 sps:$4 sm:$0xff]  }
  0x4d   :  { %2016 = vmatprep.subr.bf16.mxu0 %v2835_v21  ;;  %1830 = vmatprep.mubr.bf16.mxu1 %v2366_v48  ;;  %v2905_v21 = vld [vmem:[%s4116_s1 + $0x5f0] ss:$8 sps:$4 sm:$0xff]   ;;  %v2928_v48 = vld [vmem:[%s4116_s1 + $0x234] ss:$8 sps:$4 sm:$0xff]  }
  0x4e   :  { %2042 = vmatprep.mubr.bf16.mxu0 %v2374_v53  ;;  %v2929_v53 = vld [vmem:[%s4116_s1 + $0x630] ss:$8 sps:$4 sm:$0xff]  }
  0x4f   :  { %1805 = vmatpush1.bf16.msra.mxu1 %v2830_v22  ;;  %v2910_v22 = vld [vmem:[%s4116_s1 + $0x204] ss:$8 sps:$4 sm:$0xff]  }
  0x50   :  { %2017 = vmatpush1.bf16.msra.mxu0 %v2833_v23  ;;  %1806 = vmatprep.subr.bf16.mxu1 %v2838_v24  ;;  %v2913_v23 = vld [vmem:[%s4116_s1 + $0x604] ss:$8 sps:$4 sm:$0xff]   ;;  %v2908_v24 = vld [vmem:[%s4116_s1 + $0x200] ss:$8 sps:$4 sm:$0xff]  }
  0x51   :  { %2018 = vmatprep.subr.bf16.mxu0 %v2841_v25  ;;  %v2911_v25 = vld [vmem:[%s4116_s1 + $0x600] ss:$8 sps:$4 sm:$0xff]  }
  0x53   :  { %1807 = vmatpush1.bf16.msra.mxu1 %v2836_v26  ;;  %v34_v26 = vld [vmem:[%s4117_s0 + $0x88] sm:$0xff] }
  0x54   :  { %2019 = vmatpush1.bf16.msra.mxu0 %v2839_v27  ;;  %1808 = vmatprep.subr.bf16.mxu1 %v2844_v28  ;;  %v2365_v27 = vcombine.low %v3433_v44, %v3438_v45  ;;  %v2373_v28 = vcombine.low %v3451_v49, %v3456_v50  ;;  %v3622_v45 = vld [vmem:[%s4117_s0 + $0x50] sm:$0xff] }
  0x55   :  { %2020 = vmatprep.subr.bf16.mxu0 %v2847_v29  ;;  %v42_v29 = vld [vmem:[%s4117_s0 + $0xc8] sm:$0xff]  ;;  %v2931_v49 = vld [vmem:[%s4116_s1 + $0x634] ss:$8 sps:$4 sm:$0xff]  }
  0x57   :  { %1809 = vmatpush1.bf16.msra.mxu1 %v2842_v32  ;;  %v38_v32 = vld [vmem:[%s4117_s0 + $0xa8] sm:$0xff] }
  0x58   :  { %2021 = vmatpush1.bf16.msra.mxu0 %v2845_v34  ;;  %1810 = vmatprep.subr.bf16.mxu1 %v2850_v38  ;;  %v2382_v34 = vcombine.high %v34_v26, %v42_v29  ;;  %v2390_v35 = vcombine.high %v38_v32, %v46_v33  ;;  %v2922_v38 = vld [vmem:[%s4116_s1 + $0x224] ss:$8 sps:$4 sm:$0xff]   ;;  %v2389_v44 = vcombine.low %v38_v32, %v46_v33  ;;  %v2992_v32 = vld [vmem:[%s4116_s1 + $0x2e0] ss:$8 sps:$4 sm:$0xff]  }
  0x59   :  { %2022 = vmatprep.subr.bf16.mxu0 %v2853_v41  ;;  %v2923_v41 = vld [vmem:[%s4116_s1 + $0x620] ss:$8 sps:$4 sm:$0xff]  }
  0x5a   :  { %v2995_v33 = vld [vmem:[%s4116_s1 + $0x6e0] ss:$8 sps:$4 sm:$0xff]  }
  0x5b   :  { %1811 = vmatpush1.bf16.msra.mxu1 %v2848_v42  ;;  %v3617_v42 = vld [vmem:[%s4117_s0 + $0x10] sm:$0xff] }
  0x5c   :  { %2023 = vmatpush1.bf16.msra.mxu0 %v2851_v43  ;;  %1812 = vmatprep.subr.bf16.mxu1 %v2856_v46  ;;  %v2381_v43 = vcombine.low %v34_v26, %v42_v29  ;;  %v3627_v46 = vld [vmem:[%s4117_s0 + $0x30] sm:$0xff]  ;;  %v2368_v50 = vcombine.high %v3617_v42, %v3622_v45 }
  0x5d   :  { %2024 = vmatprep.subr.bf16.mxu0 %v2859_v47  ;;  %v3632_v47 = vld [vmem:[%s4117_s0 + $0x70] sm:$0xff] }
  0x5e   :  { %v2988_v26 = vld [vmem:[%s4116_s1 + $0x2d4] ss:$8 sps:$4 sm:$0xff]   ;;  %v2989_v29 = vld [vmem:[%s4116_s1 + $0x6d0] ss:$8 sps:$4 sm:$0xff]  }
  0x5f   :  { %1813 = vmatpush1.bf16.msra.mxu1 %v2854_v51  ;;  %v2376_v51 = vcombine.high %v3627_v46, %v3632_v47 }
  0x60   :  { %2025 = vmatpush1.bf16.msra.mxu0 %v2857_v52  ;;  %1814 = vmatprep.subr.bf16.mxu1 %v2862_v54  ;;  %v2926_v52 = vld [vmem:[%s4116_s1 + $0x230] ss:$8 sps:$4 sm:$0xff]   ;;  %v2934_v54 = vld [vmem:[%s4116_s1 + $0x244] ss:$8 sps:$4 sm:$0xff]  }
  0x61   :  { %2026 = vmatprep.subr.bf16.mxu0 %v2865_v55  ;;  %v2937_v55 = vld [vmem:[%s4116_s1 + $0x644] ss:$8 sps:$4 sm:$0xff]  }
  0x63   :  { %1815 = vmatpush1.bf16.msra.mxu1 %v2860_v56  ;;  %v2932_v56 = vld [vmem:[%s4116_s1 + $0x240] ss:$8 sps:$4 sm:$0xff]  }
  0x64   :  { %2027 = vmatpush1.bf16.msra.mxu0 %v2863_v57  ;;  %1816 = vmatprep.subr.bf16.mxu1 %v2868_v58  ;;  %v2935_v57 = vld [vmem:[%s4116_s1 + $0x640] ss:$8 sps:$4 sm:$0xff]   ;;  %v2940_v58 = vld [vmem:[%s4116_s1 + $0x254] ss:$8 sps:$4 sm:$0xff]  }
  0x65   :  { %2028 = vmatprep.subr.bf16.mxu0 %v2871_v59  ;;  %v2943_v59 = vld [vmem:[%s4116_s1 + $0x654] ss:$8 sps:$4 sm:$0xff]  }
  0x67   :  { %1817 = vmatpush1.bf16.msra.mxu1 %v2866_v60  ;;  %v2938_v60 = vld [vmem:[%s4116_s1 + $0x250] ss:$8 sps:$4 sm:$0xff]  }
  0x68   :  { %2029 = vmatpush1.bf16.msra.mxu0 %v2869_v61  ;;  %1818 = vmatprep.subr.bf16.mxu1 %v2874_v62  ;;  %v2941_v61 = vld [vmem:[%s4116_s1 + $0x650] ss:$8 sps:$4 sm:$0xff]   ;;  %v2946_v62 = vld [vmem:[%s4116_s1 + $0x264] ss:$8 sps:$4 sm:$0xff]  }
  0x69   :  { %2030 = vmatprep.subr.bf16.mxu0 %v2877_v63  ;;  %v2949_v63 = vld [vmem:[%s4116_s1 + $0x664] ss:$8 sps:$4 sm:$0xff]  }
  0x6b   :  { %1819 = vmatpush1.bf16.msra.mxu1 %v2872_v0  ;;  %v2944_v0 = vld [vmem:[%s4116_s1 + $0x260] ss:$8 sps:$4 sm:$0xff]  }
  0x6c   :  { %2031 = vmatpush1.bf16.msra.mxu0 %v2875_v1  ;;  %1820 = vmatprep.subr.bf16.mxu1 %v2880_v2  ;;  %v2947_v1 = vld [vmem:[%s4116_s1 + $0x660] ss:$8 sps:$4 sm:$0xff]   ;;  %v2952_v2 = vld [vmem:[%s4116_s1 + $0x274] ss:$8 sps:$4 sm:$0xff]  }
  0x6d   :  { %2032 = vmatprep.subr.bf16.mxu0 %v2883_v3  ;;  %v2955_v3 = vld [vmem:[%s4116_s1 + $0x674] ss:$8 sps:$4 sm:$0xff]  }
  0x6f   :  { %1821 = vmatpush1.bf16.msra.mxu1 %v2878_v4  ;;  %v2950_v4 = vld [vmem:[%s4116_s1 + $0x270] ss:$8 sps:$4 sm:$0xff]  }
  0x70   :  { %2033 = vmatpush1.bf16.msra.mxu0 %v2881_v5  ;;  %1822 = vmatprep.subr.bf16.mxu1 %v2886_v6  ;;  %v2953_v5 = vld [vmem:[%s4116_s1 + $0x670] ss:$8 sps:$4 sm:$0xff]   ;;  %v2958_v6 = vld [vmem:[%s4116_s1 + $0x284] ss:$8 sps:$4 sm:$0xff]  }
  0x71   :  { %2034 = vmatprep.subr.bf16.mxu0 %v2889_v7  ;;  %v2961_v7 = vld [vmem:[%s4116_s1 + $0x684] ss:$8 sps:$4 sm:$0xff]  }
  0x73   :  { %1823 = vmatpush1.bf16.msra.mxu1 %v2884_v8  ;;  %v2956_v8 = vld [vmem:[%s4116_s1 + $0x280] ss:$8 sps:$4 sm:$0xff]  }
  0x74   :  { %2035 = vmatpush1.bf16.msra.mxu0 %v2887_v9  ;;  %1824 = vmatprep.subr.bf16.mxu1 %v2892_v10  ;;  %v2959_v9 = vld [vmem:[%s4116_s1 + $0x680] ss:$8 sps:$4 sm:$0xff]   ;;  %v2964_v10 = vld [vmem:[%s4116_s1 + $0x294] ss:$8 sps:$4 sm:$0xff]  }
  0x75   :  { %2036 = vmatprep.subr.bf16.mxu0 %v2895_v11  ;;  %v2967_v11 = vld [vmem:[%s4116_s1 + $0x694] ss:$8 sps:$4 sm:$0xff]  }
  0x77   :  { %1825 = vmatpush1.bf16.msra.mxu1 %v2890_v12  ;;  %v2962_v12 = vld [vmem:[%s4116_s1 + $0x290] ss:$8 sps:$4 sm:$0xff]  }
  0x78   :  { %2037 = vmatpush1.bf16.msra.mxu0 %v2893_v13  ;;  %1826 = vmatprep.subr.bf16.mxu1 %v2898_v14  ;;  %v2965_v13 = vld [vmem:[%s4116_s1 + $0x690] ss:$8 sps:$4 sm:$0xff]   ;;  %v2970_v14 = vld [vmem:[%s4116_s1 + $0x2a4] ss:$8 sps:$4 sm:$0xff]  }
  0x79   :  { %2038 = vmatprep.subr.bf16.mxu0 %v2901_v15  ;;  %v2973_v15 = vld [vmem:[%s4116_s1 + $0x6a4] ss:$8 sps:$4 sm:$0xff]  }
  0x7b   :  { %1827 = vmatpush1.bf16.msra.mxu1 %v2896_v16  ;;  %v2968_v16 = vld [vmem:[%s4116_s1 + $0x2a0] ss:$8 sps:$4 sm:$0xff]  }
  0x7c   :  { %2039 = vmatpush1.bf16.msra.mxu0 %v2899_v17  ;;  %1828 = vmatprep.subr.bf16.mxu1 %v2904_v18  ;;  %v2971_v17 = vld [vmem:[%s4116_s1 + $0x6a0] ss:$8 sps:$4 sm:$0xff]   ;;  %v2976_v18 = vld [vmem:[%s4116_s1 + $0x2b4] ss:$8 sps:$4 sm:$0xff]  }
  0x7d   :  { %2040 = vmatprep.subr.bf16.mxu0 %v2907_v19  ;;  %v2979_v19 = vld [vmem:[%s4116_s1 + $0x6b4] ss:$8 sps:$4 sm:$0xff]  }
  0x7f   :  { %1829 = vmatpush1.bf16.msra.mxu1 %v2902_v20  ;;  %v2974_v20 = vld [vmem:[%s4116_s1 + $0x2b0] ss:$8 sps:$4 sm:$0xff]  }
  0x80   :  { %2041 = vmatpush1.bf16.msra.mxu0 %v2905_v21  ;;  %1851 = vmatprep.subr.bf16.mxu1 %v2910_v22  ;;  %v2977_v21 = vld [vmem:[%s4116_s1 + $0x6b0] ss:$8 sps:$4 sm:$0xff]   ;;  %v2982_v22 = vld [vmem:[%s4116_s1 + $0x2c4] ss:$8 sps:$4 sm:$0xff]  }
  0x81   :  { %2063 = vmatprep.subr.bf16.mxu0 %v2913_v23  ;;  %v2985_v23 = vld [vmem:[%s4116_s1 + $0x6c4] ss:$8 sps:$4 sm:$0xff]  }
  0x82   :  { %1831 = vmatmul.mubr.bf16.vlgmr.msra.gmra.mrb[0].mxu1 %v2365_v27  ;;  %v2991_v27 = vld [vmem:[%s4116_s1 + $0x6d4] ss:$8 sps:$4 sm:$0xff]  }
  0x83   :  { %2043 = vmatmul.mubr.bf16.vlgmr.msra.gmra.mrb[0].mxu0 %v2373_v28  ;;  %1852 = vmatpush1.bf16.msra.mxu1 %v2908_v24  ;;  %v2980_v24 = vld [vmem:[%s4116_s1 + $0x2c0] ss:$8 sps:$4 sm:$0xff]   ;;  %v2986_v28 = vld [vmem:[%s4116_s1 + $0x2d0] ss:$8 sps:$4 sm:$0xff]  }
  0x84   :  { %2064 = vmatpush1.bf16.msra.mxu0 %v2911_v25  ;;  %1853 = vmatprep.subr.bf16.mxu1 %v2916_v30  ;;  %v2983_v25 = vld [vmem:[%s4116_s1 + $0x6c0] ss:$8 sps:$4 sm:$0xff]   ;;  %v2994_v30 = vld [vmem:[%s4116_s1 + $0x2e4] ss:$8 sps:$4 sm:$0xff]  }
  0x85   :  { %2065 = vmatprep.subr.bf16.mxu0 %v2919_v31  ;;  %1840 = vmatprep.mubr.bf16.mxu1 %v2382_v34  ;;  %v2997_v31 = vld [vmem:[%s4116_s1 + $0x6e4] ss:$8 sps:$4 sm:$0xff]   ;;  %v3000_v34 = vld [vmem:[%s4116_s1 + $0x2f4] ss:$8 sps:$4 sm:$0xff]  }
  0x86   :  { %2052 = vmatprep.mubr.bf16.mxu0 %v2390_v35  ;;  %v3003_v35 = vld [vmem:[%s4116_s1 + $0x6f4] ss:$8 sps:$4 sm:$0xff]  }
  0x87   :  { %1854 = vmatpush1.bf16.msra.mxu1 %v2914_v36  ;;  %v2998_v36 = vld [vmem:[%s4116_s1 + $0x2f0] ss:$8 sps:$4 sm:$0xff]  }
  0x88   :  { %2066 = vmatpush1.bf16.msra.mxu0 %v2917_v37  ;;  %1855 = vmatprep.subr.bf16.mxu1 %v2922_v38  ;;  %v3001_v37 = vld [vmem:[%s4116_s1 + $0x6f0] ss:$8 sps:$4 sm:$0xff]   ;;  %v3006_v38 = vld [vmem:[%s4116_s1 + $0x304] ss:$8 sps:$4 sm:$0xff]  }
  0x89   :  { %2067 = vmatprep.subr.bf16.mxu0 %v2925_v39  ;;  %v3009_v39 = vld [vmem:[%s4116_s1 + $0x704] ss:$8 sps:$4 sm:$0xff]  }
  0x8a   :  { %1841 = vmatmul.mubr.bf16.gmra.mrb[4].mxu1 %v2381_v43  ;;  %v2375_v43 = vcombine.low %v3627_v46, %v3632_v47  ;;  %v3012_v46 = vld [vmem:[%s4116_s1 + $0x314] ss:$8 sps:$4 sm:$0xff]  }
  0x8b   :  { %2053 = vmatmul.mubr.bf16.gmra.mrb[4].mxu0 %v2389_v44  ;;  %1856 = vmatpush1.bf16.msra.mxu1 %v2920_v40  ;;  %v35_v40 = vld [vmem:[%s4117_s0 + $0x90] sm:$0xff] }
  0x8c   :  { %2068 = vmatpush1.bf16.msra.mxu0 %v2923_v41  ;;  %1857 = vmatprep.subr.bf16.mxu1 %v2928_v48  ;;  %v2367_v41 = vcombine.low %v3617_v42, %v3622_v45  ;;  %v43_v44 = vld [vmem:[%s4117_s0 + $0xd0] sm:$0xff]  ;;  %v3004_v42 = vld [vmem:[%s4116_s1 + $0x300] ss:$8 sps:$4 sm:$0xff]  }
  0x8d   :  { %2069 = vmatprep.subr.bf16.mxu0 %v2931_v49  ;;  %1883 = vmatprep.mubr.bf16.mxu1 %v2368_v50  ;;  %v39_v48 = vld [vmem:[%s4117_s0 + $0xb0] sm:$0xff]  ;;  %v3007_v45 = vld [vmem:[%s4116_s1 + $0x700] ss:$8 sps:$4 sm:$0xff]   ;;  %v2384_v50 = vcombine.high %v35_v40, %v43_v44 }
  0x8e   :  { %2095 = vmatprep.mubr.bf16.mxu0 %v2376_v51  ;;  %v47_v49 = vld [vmem:[%s4117_s0 + $0xf0] sm:$0xff] }
  0x8f   :  { %1858 = vmatpush1.bf16.msra.mxu1 %v2926_v52  ;;  %v3015_v47 = vld [vmem:[%s4116_s1 + $0x714] ss:$8 sps:$4 sm:$0xff]   ;;  %v2392_v51 = vcombine.high %v39_v48, %v47_v49  ;;  %v3010_v52 = vld [vmem:[%s4116_s1 + $0x310] ss:$8 sps:$4 sm:$0xff]  }
  0x90   :  { %2070 = vmatpush1.bf16.msra.mxu0 %v2929_v53  ;;  %1859 = vmatprep.subr.bf16.mxu1 %v2934_v54  ;;  %v3013_v53 = vld [vmem:[%s4116_s1 + $0x710] ss:$8 sps:$4 sm:$0xff]   ;;  %v3018_v54 = vld [vmem:[%s4116_s1 + $0x324] ss:$8 sps:$4 sm:$0xff]  }
  0x91   :  { %2071 = vmatprep.subr.bf16.mxu0 %v2937_v55  ;;  %v3021_v55 = vld [vmem:[%s4116_s1 + $0x724] ss:$8 sps:$4 sm:$0xff]  }
  0x93   :  { %1860 = vmatpush1.bf16.msra.mxu1 %v2932_v56  ;;  %v3843_v56 = vld [vmem:[%s4117_s0 + $0x18] sm:$0xff] }
  0x94   :  { %2072 = vmatpush1.bf16.msra.mxu0 %v2935_v57  ;;  %1861 = vmatprep.subr.bf16.mxu1 %v2940_v58  ;;  %v2383_v57 = vcombine.low %v35_v40, %v43_v44  ;;  %v2391_v58 = vcombine.low %v39_v48, %v47_v49  ;;  %v3076_v40 = vld [vmem:[%s4116_s1 + $0x3c0] ss:$8 sps:$4 sm:$0xff]   ;;  %v3087_v44 = vld [vmem:[%s4116_s1 + $0x7d4] ss:$8 sps:$4 sm:$0xff]   ;;  %v3082_v48 = vld [vmem:[%s4116_s1 + $0x3d0] ss:$8 sps:$4 sm:$0xff]  }
  0x95   :  { %2073 = vmatprep.subr.bf16.mxu0 %v2943_v59  ;;  %v3848_v59 = vld [vmem:[%s4117_s0 + $0x58] sm:$0xff] }
  0x96   :  { %v3085_v49 = vld [vmem:[%s4116_s1 + $0x7d0] ss:$8 sps:$4 sm:$0xff]  }
  0x97   :  { %1862 = vmatpush1.bf16.msra.mxu1 %v2938_v60  ;;  %v3853_v60 = vld [vmem:[%s4117_s0 + $0x38] sm:$0xff] }
  0x98   :  { %2074 = vmatpush1.bf16.msra.mxu0 %v2941_v61  ;;  %1863 = vmatprep.subr.bf16.mxu1 %v2946_v62  ;;  %v3858_v61 = vld [vmem:[%s4117_s0 + $0x78] sm:$0xff]  ;;  %v3016_v62 = vld [vmem:[%s4116_s1 + $0x320] ss:$8 sps:$4 sm:$0xff]  }
  0x99   :  { %2075 = vmatprep.subr.bf16.mxu0 %v2949_v63  ;;  %v3019_v63 = vld [vmem:[%s4116_s1 + $0x720] ss:$8 sps:$4 sm:$0xff]  }
  0x9b   :  { %1864 = vmatpush1.bf16.msra.mxu1 %v2944_v0  ;;  %v3024_v0 = vld [vmem:[%s4116_s1 + $0x334] ss:$8 sps:$4 sm:$0xff]  }
  0x9c   :  { %2076 = vmatpush1.bf16.msra.mxu0 %v2947_v1  ;;  %1865 = vmatprep.subr.bf16.mxu1 %v2952_v2  ;;  %v3027_v1 = vld [vmem:[%s4116_s1 + $0x734] ss:$8 sps:$4 sm:$0xff]   ;;  %v2370_v2 = vcombine.high %v3843_v56, %v3848_v59 }
  0x9d   :  { %2077 = vmatprep.subr.bf16.mxu0 %v2955_v3  ;;  %v2378_v3 = vcombine.high %v3853_v60, %v3858_v61 }
  0x9f   :  { %1866 = vmatpush1.bf16.msra.mxu1 %v2950_v4  ;;  %v3022_v4 = vld [vmem:[%s4116_s1 + $0x330] ss:$8 sps:$4 sm:$0xff]  }
  0xa0   :  { %2078 = vmatpush1.bf16.msra.mxu0 %v2953_v5  ;;  %1867 = vmatprep.subr.bf16.mxu1 %v2958_v6  ;;  %v3025_v5 = vld [vmem:[%s4116_s1 + $0x730] ss:$8 sps:$4 sm:$0xff]   ;;  %v3030_v6 = vld [vmem:[%s4116_s1 + $0x344] ss:$8 sps:$4 sm:$0xff]  }
  0xa1   :  { %2079 = vmatprep.subr.bf16.mxu0 %v2961_v7  ;;  %v3033_v7 = vld [vmem:[%s4116_s1 + $0x744] ss:$8 sps:$4 sm:$0xff]  }
  0xa3   :  { %1868 = vmatpush1.bf16.msra.mxu1 %v2956_v8  ;;  %v3028_v8 = vld [vmem:[%s4116_s1 + $0x340] ss:$8 sps:$4 sm:$0xff]  }
  0xa4   :  { %2080 = vmatpush1.bf16.msra.mxu0 %v2959_v9  ;;  %1869 = vmatprep.subr.bf16.mxu1 %v2964_v10  ;;  %v3031_v9 = vld [vmem:[%s4116_s1 + $0x740] ss:$8 sps:$4 sm:$0xff]   ;;  %v3036_v10 = vld [vmem:[%s4116_s1 + $0x354] ss:$8 sps:$4 sm:$0xff]  }
  0xa5   :  { %2081 = vmatprep.subr.bf16.mxu0 %v2967_v11  ;;  %v3039_v11 = vld [vmem:[%s4116_s1 + $0x754] ss:$8 sps:$4 sm:$0xff]  }
  0xa7   :  { %1870 = vmatpush1.bf16.msra.mxu1 %v2962_v12  ;;  %v3034_v12 = vld [vmem:[%s4116_s1 + $0x350] ss:$8 sps:$4 sm:$0xff]  }
  0xa8   :  { %2082 = vmatpush1.bf16.msra.mxu0 %v2965_v13  ;;  %1871 = vmatprep.subr.bf16.mxu1 %v2970_v14  ;;  %v3037_v13 = vld [vmem:[%s4116_s1 + $0x750] ss:$8 sps:$4 sm:$0xff]   ;;  %v3042_v14 = vld [vmem:[%s4116_s1 + $0x364] ss:$8 sps:$4 sm:$0xff]  }
  0xa9   :  { %2083 = vmatprep.subr.bf16.mxu0 %v2973_v15  ;;  %v3045_v15 = vld [vmem:[%s4116_s1 + $0x764] ss:$8 sps:$4 sm:$0xff]  }
  0xab   :  { %1872 = vmatpush1.bf16.msra.mxu1 %v2968_v16  ;;  %v3040_v16 = vld [vmem:[%s4116_s1 + $0x360] ss:$8 sps:$4 sm:$0xff]  }
  0xac   :  { %2084 = vmatpush1.bf16.msra.mxu0 %v2971_v17  ;;  %1873 = vmatprep.subr.bf16.mxu1 %v2976_v18  ;;  %v3043_v17 = vld [vmem:[%s4116_s1 + $0x760] ss:$8 sps:$4 sm:$0xff]   ;;  %v3048_v18 = vld [vmem:[%s4116_s1 + $0x374] ss:$8 sps:$4 sm:$0xff]  }
  0xad   :  { %2085 = vmatprep.subr.bf16.mxu0 %v2979_v19  ;;  %v3051_v19 = vld [vmem:[%s4116_s1 + $0x774] ss:$8 sps:$4 sm:$0xff]  }
  0xaf   :  { %1874 = vmatpush1.bf16.msra.mxu1 %v2974_v20  ;;  %v3046_v20 = vld [vmem:[%s4116_s1 + $0x370] ss:$8 sps:$4 sm:$0xff]  }
  0xb0   :  { %2086 = vmatpush1.bf16.msra.mxu0 %v2977_v21  ;;  %1875 = vmatprep.subr.bf16.mxu1 %v2982_v22  ;;  %v3049_v21 = vld [vmem:[%s4116_s1 + $0x770] ss:$8 sps:$4 sm:$0xff]   ;;  %v3054_v22 = vld [vmem:[%s4116_s1 + $0x384] ss:$8 sps:$4 sm:$0xff]  }
  0xb1   :  { %2087 = vmatprep.subr.bf16.mxu0 %v2985_v23  ;;  %v3057_v23 = vld [vmem:[%s4116_s1 + $0x784] ss:$8 sps:$4 sm:$0xff]  }
  0xb3   :  { %1876 = vmatpush1.bf16.msra.mxu1 %v2980_v24  ;;  %v3052_v24 = vld [vmem:[%s4116_s1 + $0x380] ss:$8 sps:$4 sm:$0xff]  }
  0xb4   :  { %2088 = vmatpush1.bf16.msra.mxu0 %v2983_v25  ;;  %1877 = vmatprep.subr.bf16.mxu1 %v2988_v26  ;;  %v3055_v25 = vld [vmem:[%s4116_s1 + $0x780] ss:$8 sps:$4 sm:$0xff]   ;;  %v3060_v26 = vld [vmem:[%s4116_s1 + $0x394] ss:$8 sps:$4 sm:$0xff]  }
  0xb5   :  { %2089 = vmatprep.subr.bf16.mxu0 %v2991_v27  ;;  %v3063_v27 = vld [vmem:[%s4116_s1 + $0x794] ss:$8 sps:$4 sm:$0xff]  }
  0xb7   :  { %1878 = vmatpush1.bf16.msra.mxu1 %v2986_v28  ;;  %v3058_v28 = vld [vmem:[%s4116_s1 + $0x390] ss:$8 sps:$4 sm:$0xff]  }
  0xb8   :  { %2090 = vmatpush1.bf16.msra.mxu0 %v2989_v29  ;;  %1879 = vmatprep.subr.bf16.mxu1 %v2994_v30  ;;  %v3061_v29 = vld [vmem:[%s4116_s1 + $0x790] ss:$8 sps:$4 sm:$0xff]   ;;  %v3066_v30 = vld [vmem:[%s4116_s1 + $0x3a4] ss:$8 sps:$4 sm:$0xff]  }
  0xb9   :  { %2091 = vmatprep.subr.bf16.mxu0 %v2997_v31  ;;  %v3069_v31 = vld [vmem:[%s4116_s1 + $0x7a4] ss:$8 sps:$4 sm:$0xff]  }
  0xbb   :  { %1880 = vmatpush1.bf16.msra.mxu1 %v2992_v32  ;;  %v3064_v32 = vld [vmem:[%s4116_s1 + $0x3a0] ss:$8 sps:$4 sm:$0xff]  }
  0xbc   :  { %2092 = vmatpush1.bf16.msra.mxu0 %v2995_v33  ;;  %1881 = vmatprep.subr.bf16.mxu1 %v3000_v34  ;;  %v3067_v33 = vld [vmem:[%s4116_s1 + $0x7a0] ss:$8 sps:$4 sm:$0xff]   ;;  %v3072_v34 = vld [vmem:[%s4116_s1 + $0x3b4] ss:$8 sps:$4 sm:$0xff]  }
  0xbd   :  { %2093 = vmatprep.subr.bf16.mxu0 %v3003_v35  ;;  %v3075_v35 = vld [vmem:[%s4116_s1 + $0x7b4] ss:$8 sps:$4 sm:$0xff]  }
  0xbf   :  { %1882 = vmatpush1.bf16.msra.mxu1 %v2998_v36  ;;  %v3070_v36 = vld [vmem:[%s4116_s1 + $0x3b0] ss:$8 sps:$4 sm:$0xff]  }
  0xc0   :  { %2094 = vmatpush1.bf16.msra.mxu0 %v3001_v37  ;;  %1904 = vmatprep.subr.bf16.mxu1 %v3006_v38  ;;  %v3073_v37 = vld [vmem:[%s4116_s1 + $0x7b0] ss:$8 sps:$4 sm:$0xff]   ;;  %v3078_v38 = vld [vmem:[%s4116_s1 + $0x3c4] ss:$8 sps:$4 sm:$0xff]  }
  0xc1   :  { %2116 = vmatprep.subr.bf16.mxu0 %v3009_v39  ;;  %v3081_v39 = vld [vmem:[%s4116_s1 + $0x7c4] ss:$8 sps:$4 sm:$0xff]  }
  0xc2   :  { %1884 = vmatmul.mubr.bf16.vlgmr.msra.gmra.mrb[0].mxu1 %v2367_v41  ;;  %v3079_v41 = vld [vmem:[%s4116_s1 + $0x7c0] ss:$8 sps:$4 sm:$0xff]  }
  0xc3   :  { %2096 = vmatmul.mubr.bf16.vlgmr.msra.gmra.mrb[0].mxu0 %v2375_v43  ;;  %1905 = vmatpush1.bf16.msra.mxu1 %v3004_v42  ;;  %v3084_v43 = vld [vmem:[%s4116_s1 + $0x3d4] ss:$8 sps:$4 sm:$0xff]   ;;  %v3090_v42 = vld [vmem:[%s4116_s1 + $0x3e4] ss:$8 sps:$4 sm:$0xff]  }
  0xc4   :  { %2117 = vmatpush1.bf16.msra.mxu0 %v3007_v45  ;;  %1906 = vmatprep.subr.bf16.mxu1 %v3012_v46  ;;  %v3093_v45 = vld [vmem:[%s4116_s1 + $0x7e4] ss:$8 sps:$4 sm:$0xff]   ;;  %v3088_v46 = vld [vmem:[%s4116_s1 + $0x3e0] ss:$8 sps:$4 sm:$0xff]  }
  0xc5   :  { %2118 = vmatprep.subr.bf16.mxu0 %v3015_v47  ;;  %1893 = vmatprep.mubr.bf16.mxu1 %v2384_v50  ;;  %v3091_v47 = vld [vmem:[%s4116_s1 + $0x7e0] ss:$8 sps:$4 sm:$0xff]   ;;  %v3096_v50 = vld [vmem:[%s4116_s1 + $0x3f4] ss:$8 sps:$4 sm:$0xff]  }
  0xc6   :  { %2105 = vmatprep.mubr.bf16.mxu0 %v2392_v51  ;;  %v3099_v51 = vld [vmem:[%s4116_s1 + $0x7f4] ss:$8 sps:$4 sm:$0xff]  }
  0xc7   :  { %1907 = vmatpush1.bf16.msra.mxu1 %v3010_v52  ;;  %v3094_v52 = vld [vmem:[%s4116_s1 + $0x3f0] ss:$8 sps:$4 sm:$0xff]  }
  0xc8   :  { %2119 = vmatpush1.bf16.msra.mxu0 %v3013_v53  ;;  %1908 = vmatprep.subr.bf16.mxu1 %v3018_v54  ;;  %v3097_v53 = vld [vmem:[%s4116_s1 + $0x7f0] ss:$8 sps:$4 sm:$0xff]  }
  0xc9   :  { %2120 = vmatprep.subr.bf16.mxu0 %v3021_v55  ;;  %v36_v54 = vld [vmem:[%s4117_s0 + $0x98] sm:$0xff] }
  0xca   :  { %1894 = vmatmul.mubr.bf16.gmra.mrb[4].mxu1 %v2383_v57  ;;  %v44_v55 = vld [vmem:[%s4117_s0 + $0xd8] sm:$0xff] }
  0xcb   :  { %2106 = vmatmul.mubr.bf16.gmra.mrb[4].mxu0 %v2391_v58  ;;  %1909 = vmatpush1.bf16.msra.mxu1 %v3016_v62  ;;  %v40_v57 = vld [vmem:[%s4117_s0 + $0xb8] sm:$0xff]  ;;  %v2369_v62 = vcombine.low %v3843_v56, %v3848_v59 }
  0xcc   :  { %2121 = vmatpush1.bf16.msra.mxu0 %v3019_v63  ;;  %1910 = vmatprep.subr.bf16.mxu1 %v3024_v0  ;;  %v48_v58 = vld [vmem:[%s4117_s0 + $0xf8] sm:$0xff]  ;;  %v2377_v63 = vcombine.low %v3853_v60, %v3858_v61  ;;  %v2386_v0 = vcombine.high %v36_v54, %v44_v55 }
  0xcd   :  { %2122 = vmatprep.subr.bf16.mxu0 %v3027_v1  ;;  %1936 = vmatprep.mubr.bf16.mxu1 %v2370_v2  ;;  %v2394_v1 = vcombine.high %v40_v57, %v48_v58  ;;  %v2385_v2 = vcombine.low %v36_v54, %v44_v55 }
  0xce   :  { %2148 = vmatprep.mubr.bf16.mxu0 %v2378_v3  ;;  %v2393_v3 = vcombine.low %v40_v57, %v48_v58 }
  0xcf   :  { %1911 = vmatpush1.bf16.msra.mxu1 %v3022_v4 }
  0xd0   :  { %2123 = vmatpush1.bf16.msra.mxu0 %v3025_v5  ;;  %1912 = vmatprep.subr.bf16.mxu1 %v3030_v6 }
  0xd1   :  { %2124 = vmatprep.subr.bf16.mxu0 %v3033_v7 }
  0xd3   :  { %1913 = vmatpush1.bf16.msra.mxu1 %v3028_v8 }
  0xd4   :  { %2125 = vmatpush1.bf16.msra.mxu0 %v3031_v9  ;;  %1914 = vmatprep.subr.bf16.mxu1 %v3036_v10 }
  0xd5   :  { %2126 = vmatprep.subr.bf16.mxu0 %v3039_v11 }
  0xd7   :  { %1915 = vmatpush1.bf16.msra.mxu1 %v3034_v12 }
  0xd8   :  { %2127 = vmatpush1.bf16.msra.mxu0 %v3037_v13  ;;  %1916 = vmatprep.subr.bf16.mxu1 %v3042_v14 }
  0xd9   :  { %2128 = vmatprep.subr.bf16.mxu0 %v3045_v15 }
  0xdb   :  { %1917 = vmatpush1.bf16.msra.mxu1 %v3040_v16 }
  0xdc   :  { %2129 = vmatpush1.bf16.msra.mxu0 %v3043_v17  ;;  %1918 = vmatprep.subr.bf16.mxu1 %v3048_v18 }
  0xdd   :  { %2130 = vmatprep.subr.bf16.mxu0 %v3051_v19 }
  0xdf   :  { %1919 = vmatpush1.bf16.msra.mxu1 %v3046_v20 }
  0xe0   :  { %2131 = vmatpush1.bf16.msra.mxu0 %v3049_v21  ;;  %1920 = vmatprep.subr.bf16.mxu1 %v3054_v22 }
  0xe1   :  { %2132 = vmatprep.subr.bf16.mxu0 %v3057_v23 }
  0xe3   :  { %1921 = vmatpush1.bf16.msra.mxu1 %v3052_v24 }
  0xe4   :  { %2133 = vmatpush1.bf16.msra.mxu0 %v3055_v25  ;;  %1922 = vmatprep.subr.bf16.mxu1 %v3060_v26 }
  0xe5   :  { %2134 = vmatprep.subr.bf16.mxu0 %v3063_v27 }
  0xe7   :  { %1923 = vmatpush1.bf16.msra.mxu1 %v3058_v28 }
  0xe8   :  { %2135 = vmatpush1.bf16.msra.mxu0 %v3061_v29  ;;  %1924 = vmatprep.subr.bf16.mxu1 %v3066_v30 }
  0xe9   :  { %2136 = vmatprep.subr.bf16.mxu0 %v3069_v31 }
  0xeb   :  { %1925 = vmatpush1.bf16.msra.mxu1 %v3064_v32 }
  0xec   :  { %2137 = vmatpush1.bf16.msra.mxu0 %v3067_v33  ;;  %1926 = vmatprep.subr.bf16.mxu1 %v3072_v34 }
  0xed   :  { %2138 = vmatprep.subr.bf16.mxu0 %v3075_v35 }
  0xef   :  { %1927 = vmatpush1.bf16.msra.mxu1 %v3070_v36 }
  0xf0   :  { %2139 = vmatpush1.bf16.msra.mxu0 %v3073_v37  ;;  %1928 = vmatprep.subr.bf16.mxu1 %v3078_v38 }
  0xf1   :  { %2140 = vmatprep.subr.bf16.mxu0 %v3081_v39 }
  0xf3   :  { %1929 = vmatpush1.bf16.msra.mxu1 %v3076_v40 }
  0xf4   :  { %2141 = vmatpush1.bf16.msra.mxu0 %v3079_v41  ;;  %1930 = vmatprep.subr.bf16.mxu1 %v3084_v43 }
  0xf5   :  { %2142 = vmatprep.subr.bf16.mxu0 %v3087_v44 }
  0xf7   :  { %1931 = vmatpush1.bf16.msra.mxu1 %v3082_v48 }
  0xf8   :  { %2143 = vmatpush1.bf16.msra.mxu0 %v3085_v49  ;;  %1932 = vmatprep.subr.bf16.mxu1 %v3090_v42 }
  0xf9   :  { %2144 = vmatprep.subr.bf16.mxu0 %v3093_v45 }
  0xfb   :  { %1933 = vmatpush1.bf16.msra.mxu1 %v3088_v46 }
  0xfc   :  { %2145 = vmatpush1.bf16.msra.mxu0 %v3091_v47  ;;  %1934 = vmatprep.subr.bf16.mxu1 %v3096_v50 }
  0xfd   :  { %2146 = vmatprep.subr.bf16.mxu0 %v3099_v51 }
  0xff   :  { %1935 = vmatpush1.bf16.msra.mxu1 %v3094_v52 }
 0x100   :  { %2147 = vmatpush1.bf16.msra.mxu0 %v3097_v53 }
 0x102   :  { %1937 = vmatmul.mubr.bf16.vlgmr.msra.gmra.mrb[0].mxu1 %v2369_v62 }
 0x103   :  { %2149 = vmatmul.mubr.bf16.vlgmr.msra.gmra.mrb[0].mxu0 %v2377_v63  ;;  %1946 = vmatprep.mubr.bf16.mxu1 %v2386_v0 }
 0x104   :  { %2158 = vmatprep.mubr.bf16.mxu0 %v2394_v1 }
 0x10a   :  { %1947 = vmatmul.mubr.bf16.gmra.mrb[4].mxu1 %v2385_v2 }
 0x10b   :  { %2159 = vmatmul.mubr.bf16.gmra.mrb[4].mxu0 %v2393_v3 }
 0x1d5   :  { %v1938_v4 = vpop.f32.mrb[0].mxu1 }
 0x1d6   :  { %v2150_v5 = vpop.f32.mrb[0].mxu0  ;;  %v1940_v56 = vpop.f32.mrb[1].mxu1 }
 0x1d7   :  { %v4042_v6 = vadd.f32 %v2150_v5, %v1938_v4  ;;  %v2152_v59 = vpop.f32.mrb[1].mxu0  ;;  %v1942_v60 = vpop.f32.mrb[2].mxu1 }
 0x1d8   :  { %v4044_v7 = vadd.f32 %v2152_v59, %v1940_v56  ;;  %v2154_v61 = vpop.f32.mrb[2].mxu0  ;;  %v1944_v9 = vpop.f32.mrb[3].mxu1 }
 0x1d9   :  { %v4046_v8 = vadd.f32 %v2154_v61, %v1942_v60  ;;  %v2156_v10 = vpop.f32.mrb[3].mxu0  ;;  %v2189_v12 = vmul.f32 %v4042_v6, %v4042_v6 }
 0x1da   :  { %v4048_v11 = vadd.f32 %v2156_v10, %v1944_v9  ;;  %v2190_v15 = vmul.f32 %v4044_v7, %v4044_v7 }
 0x1db   :  { %v2169_v13 = vadd.f32 %v4046_v8, %v4042_v6  ;;  %v2191_v14 = vmul.f32 %v4046_v8, %v4046_v8 }
 0x1dc   :  { %v2178_v16 = vadd.f32 %v4048_v11, %v4044_v7  ;;  %v2192_v17 = vmul.f32 %v4048_v11, %v4048_v11 }
 0x1dd   :  { %v2197_v18 = vadd.f32 %v2191_v14, %v2189_v12  ;;  %v1948_v20 = vpop.f32.mrb[4].mxu1 }
 0x1de   :  { %v2206_v19 = vadd.f32 %v2192_v17, %v2190_v15  ;;  %v2160_v21 = vpop.f32.mrb[4].mxu0  ;;  %v1950_v23 = vpop.f32.mrb[5].mxu1 }
 0x1df   :  { %v4062_v22 = vadd.f32 %v2160_v21, %v1948_v20  ;;  %v2162_v24 = vpop.f32.mrb[5].mxu0  ;;  %v1952_v26 = vpop.f32.mrb[6].mxu1  ;;  %v3104_v20 = vmov 1966171168  }
 0x1e0   :  { %v4064_v25 = vadd.f32 %v2162_v24, %v1950_v23  ;;  %v2164_v27 = vpop.f32.mrb[6].mxu0  ;;  %v1954_v31 = vpop.f32.mrb[7].mxu1  ;;  %v2232_v21 = vunpack.c.l.s4 %v3104_v20  ;;  %v2234_v23 = vlaneseq }
 0x1e1   :  { %v2170_v28 = vadd.f32 %v4062_v22, %v2169_v13  ;;  %v2193_v29 = vmul.f32 %v4062_v22, %v4062_v22  ;;  %v4069_v30 = vadd.f32 %v2164_v27, %v1952_v26  ;;  %v2166_v32 = vpop.f32.mrb[7].mxu0 }
 0x1e2   :  { %v2179_v33 = vadd.f32 %v4064_v25, %v2178_v16  ;;  %v2194_v34 = vmul.f32 %v4064_v25, %v4064_v25  ;;  %v4074_v35 = vadd.f32 %v2166_v32, %v1954_v31  ;;  %v2233_v24 = vunpack.c.0.s8 %v2232_v21 }
 0x1e3   :  { %v2198_v36 = vadd.f32 %v2197_v18, %v2193_v29  ;;  %v2171_v37 = vadd.f32 %v4069_v30, %v2170_v28  ;;  %v2195_v38 = vmul.f32 %v4069_v30, %v4069_v30  ;;  %v2235_v26 = vshrl.u32 %v2234_v23, 7 }
 0x1e4   :  { %v2207_v39 = vadd.f32 %v2206_v19, %v2194_v34  ;;  %v2180_v40 = vadd.f32 %v4074_v35, %v2179_v33  ;;  %v2196_v41 = vmul.f32 %v4074_v35, %v4074_v35  ;;  %v2223_v33 = vld [vmem:[%s4118_s2] sm:$0x3] }
 0x1e5   :  { %v2172_v43 = vrot.slane %v2171_v37, 4  ;;  %v2199_v44 = vadd.f32 %v2198_v36, %v2195_v38  ;;  %v2236_v28 = vsub.s32 %v2233_v24, %v2235_v26  ;;  %v2251_v36 = vsub.s32 0, %v2235_v26 }
 0x1e6   :  { %v2181_v48 = vrot.slane %v2180_v40, 4  ;;  %v2208_v49 = vadd.f32 %v2207_v39, %v2196_v41 }
 0x1e7   :  { %v2173_v42 = vadd.f32 %v2172_v43, %v2171_v37  ;;  %v2200_v45 = vrot.slane %v2199_v44, 4  ;;  %v2255_v37 = vsub.s32 1, %v2235_v26 }
 0x1e8   :  { %v2182_v46 = vadd.f32 %v2181_v48, %v2180_v40  ;;  %v2209_v47 = vrot.slane %v2208_v49, 4 }
 0x1e9   :  { %v2174_v50 = vrot.slane %v2173_v42, 2  ;;  %v2201_v51 = vadd.f32 %v2200_v45, %v2199_v44 }
 0x1ea   :  { %v2183_v52 = vrot.slane %v2182_v46, 2  ;;  %v2210_v53 = vadd.f32 %v2209_v47, %v2208_v49 }
 0x1eb   :  { %v2175_v54 = vadd.f32 %v2174_v50, %v2173_v42  ;;  %v2202_v55 = vrot.slane %v2201_v51, 2 }
 0x1ec   :  { %v2184_v57 = vadd.f32 %v2183_v52, %v2182_v46  ;;  %v2211_v58 = vrot.slane %v2210_v53, 2 }
 0x1ed   :  { %v2176_v62 = vrot.slane %v2175_v54, 1  ;;  %v2203_v63 = vadd.f32 %v2202_v55, %v2201_v51 }
 0x1ee   :  { %v2185_v0 = vrot.slane %v2184_v57, 1  ;;  %v2212_v1 = vadd.f32 %v2211_v58, %v2210_v53 }
 0x1ef   :  { %v2177_v2 = vadd.f32 %v2176_v62, %v2175_v54  ;;  %v2204_v3 = vrot.slane %v2203_v63, 1 }
 0x1f0   :  { %v2186_v4 = vadd.f32 %v2185_v0, %v2184_v57  ;;  %v2213_v5 = vrot.slane %v2212_v1, 1 }
 0x1f1   :  { %v2187_v56 = vmul.f32 0.03125, %v2177_v2  ;;  %v2205_v59 = vadd.f32 %v2204_v3, %v2203_v63 }
 0x1f2   :  { %v2188_v60 = vmul.f32 0.03125, %v2186_v4  ;;  %v2214_v61 = vadd.f32 %v2213_v5, %v2212_v1 }
 0x1f3   :  { %v2215_v9 = vmul.f32 0.03125, %v2205_v59  ;;  %v2217_v10 = vmul.f32 %v2187_v56, %v2187_v56 }
 0x1f4   :  { %v2216_v12 = vmul.f32 0.03125, %v2214_v61  ;;  %v2218_v13 = vmul.f32 %v2188_v60, %v2188_v60 }
 0x1f5   :  { %v2219_v14 = vsub.f32 %v2215_v9, %v2217_v10 }
 0x1f6   :  { %v2220_v15 = vsub.f32 %v2216_v12, %v2218_v13 }
 0x1f7   :  { %v2221_v16 = vmax.f32 %v2219_v14, 0.0 }
 0x1f8   :  { %v2222_v17 = vmax.f32 %v2220_v15, 0.0 }
 0x1f9   :  { %v2224_v18 = vadd.f32 1e-05, %v2221_v16 }
 0x1fa   :  { %v2225_v19 = vadd.f32 1e-05, %v2222_v17 }
 0x1fb   :  { %3100 = vrsqrt.f32 %v2224_v18 }
 0x1fc   :  { %3102 = vrsqrt.f32 %v2225_v19 }
 0x205   :  { %v3101_v27 = vpop.eup %3100 }
 0x206   :  { %v3103_v29 = vpop.eup %3102 }
 0x207   :  { %v2230_v31 = vcombine.low %v3101_v27, %v3103_v29 }
 0x209   :  { %v2237_v32 = vrot.slane %v2230_v31, %v2236_v28 }
 0x20b   :  { %v2244_v34 = vrot.slane %v2237_v32, %v2236_v28 }
 0x20d   :  { %v2246_v38 = vmul.f32 %v2244_v34, %v2223_v33 }
 0x20f   :  { %v2252_v39 = vrot.slane %v2246_v38, %v2251_v36  ;;  %v2256_v40 = vrot.slane %v2246_v38, %v2255_v37 }
 0x211   :  { %v2259_v41 = vmul.f32 %v2252_v39, %v2187_v56  ;;  %v2260_v43 = vmul.f32 %v2256_v40, %v2188_v60  ;;  %v2280_v44 = vmul.f32 %v4042_v6, %v2252_v39  ;;  %v2281_v48 = vmul.f32 %v4044_v7, %v2256_v40  ;;  %v2247_v6 = vld [vmem:[%s4119_s3] sm:$0x3] }
 0x212   :  { %v2282_v49 = vmul.f32 %v4046_v8, %v2252_v39  ;;  %v2283_v42 = vmul.f32 %v4048_v11, %v2256_v40  ;;  %v2284_v45 = vmul.f32 %v4062_v22, %v2252_v39  ;;  %v2285_v46 = vmul.f32 %v4064_v25, %v2256_v40 }
 0x213   :  { %v2263_v47 = vcombine.low %v2259_v41, %v2260_v43  ;;  %v2286_v50 = vmul.f32 %v4069_v30, %v2252_v39  ;;  %v2287_v51 = vmul.f32 %v4074_v35, %v2256_v40 }
 0x215   :  { %v2270_v52 = vrot.slane %v2263_v47, %v2236_v28 }
 0x217   :  { %v2277_v53 = vrot.slane %v2270_v52, %v2236_v28 }
 0x219   :  { %v2279_v7 = vsub.f32 %v2247_v6, %v2277_v53 }
 0x21b   :  { %v2292_v54 = vrot.slane %v2279_v7, %v2251_v36  ;;  %v2296_v8 = vrot.slane %v2279_v7, %v2255_v37 }
 0x21d   :  { %v2299_v55 = vadd.f32 %v2292_v54, %v2280_v44  ;;  %v2300_v11 = vadd.f32 %v2296_v8, %v2281_v48  ;;  %v2301_v57 = vadd.f32 %v2292_v54, %v2282_v49  ;;  %v2302_v22 = vadd.f32 %v2296_v8, %v2283_v42 }
 0x21e   :  { %v2303_v58 = vadd.f32 %v2292_v54, %v2284_v45  ;;  %v2304_v25 = vadd.f32 %v2296_v8, %v2285_v46  ;;  %v2305_v62 = vadd.f32 %v2292_v54, %v2286_v50  ;;  %v2306_v63 = vadd.f32 %v2296_v8, %v2287_v51 }
 0x21f   :  { %vm2307_vm0 = vcmp.ge.f32.partialorder %v2299_v55, 0.0  ;;  %vm2308_vm1 = vcmp.ge.f32.partialorder %v2300_v11, 0.0  ;;  %vm2309_vm2 = vcmp.ge.f32.partialorder %v2301_v57, 0.0  ;;  %vm2310_vm3 = vcmp.ge.f32.partialorder %v2302_v22, 0.0 }
 0x220   :  { %vm2311_vm4 = vcmp.ge.f32.partialorder %v2303_v58, 0.0  ;;  %vm2312_vm5 = vcmp.ge.f32.partialorder %v2304_v25, 0.0  ;;  %vm2313_vm6 = vcmp.ge.f32.partialorder %v2305_v62, 0.0  ;;  %vm2314_vm7 = vcmp.ge.f32.partialorder %v2306_v63, 0.0 }
 0x221   :  { %v2315_v30 = vmul.f32 0.2, %v2299_v55  ;;  %v2316_v35 = vmul.f32 0.2, %v2300_v11  ;;  %v2317_v0 = vmul.f32 0.2, %v2301_v57 }
 0x222   :  { %v2318_v1 = vmul.f32 0.2, %v2302_v22  ;;  %v2319_v2 = vmul.f32 0.2, %v2303_v58  ;;  %v2320_v3 = vmul.f32 0.2, %v2304_v25 }
 0x223   :  { %v2321_v4 = vmul.f32 0.2, %v2305_v62  ;;  %v2322_v5 = vmul.f32 0.2, %v2306_v63  ;;  %v2323_v56 = vsel %vm2307_vm0, %v2299_v55, %v2315_v30  ;;  %v2324_v59 = vsel %vm2308_vm1, %v2300_v11, %v2316_v35 }
 0x224   :  { %v2325_v60 = vsel %vm2309_vm2, %v2301_v57, %v2317_v0  ;;  %v2326_v61 = vsel %vm2310_vm3, %v2302_v22, %v2318_v1  ;;  %v2327_v9 = vsel %vm2311_vm4, %v2303_v58, %v2319_v2  ;;  %v2328_v10 = vsel %vm2312_vm5, %v2304_v25, %v2320_v3 }
 0x225   :  { %v2329_v12 = vsel %vm2313_vm6, %v2305_v62, %v2321_v4  ;;  %v2330_v13 = vsel %vm2314_vm7, %v2306_v63, %v2322_v5  ;;  %v2655_v14 = vpack.c.bf16 %v2324_v59, %v2323_v56  ;;  %v2656_v15 = vpack.c.bf16 %v2326_v61, %v2325_v60 }
 0x226   :  { %v2657_v16 = vpack.c.bf16 %v2328_v10, %v2327_v9  ;;  %v2658_v17 = vpack.c.bf16 %v2330_v13, %v2329_v12 }
 0x227   :  { %2355 = vst [vmem:[%s4120_s4] sm:$0xff] %v2655_v14  ;;  %2356 = vst [vmem:[%s4120_s4 + $0x8] sm:$0xff] %v2656_v15 }
 0x228   :  { %2357 = vst [vmem:[%s4120_s4 + $0x10] sm:$0xff] %v2657_v16  ;;  %2358 = vst [vmem:[%s4120_s4 + $0x18] sm:$0xff] %v2658_v17 }

// kernel: _lambda_.8
= control target key start
LH: loop header
LB: loop body
LE: loop exit
PB: predicated region body
PF: predicated region fallthrough
CT: control target
= control target key end

     0   :  { %s14822_s1 = inlined_call_operand.vmem [shape: bf16[4096,512], index: 1, kind: input, shape index: {}]   ;;  %s14823_s0 = inlined_call_operand.vmem [shape: bf16[24,4096], index: 0, kind: input, shape index: {}]   ;;  %s14824_s2 = inlined_call_operand.vmem [shape: f32[1,512], index: 2, kind: input, shape index: {}]   ;;  %s14825_s3 = inlined_call_operand.vmem [shape: f32[1,512], index: 3, kind: input, shape index: {}]   ;;  %s14826_s4 = inlined_call_operand.vmem [shape: bf16[24,512], index: 4, kind: output, shape index: {}]  }
   0x1   :  { %v9776_v0 = vld [vmem:[%s14822_s1 + $0x4] ss:$16 sps:$4 sm:$0xff]   ;;  %v9778_v1 = vld [vmem:[%s14822_s1 + $0xc] ss:$16 sps:$4 sm:$0xff]   ;;  %v9780_v2 = vld [vmem:[%s14822_s1] ss:$16 sps:$4 sm:$0xff]  }
   0x2   :  { %6481 = vmatprep.subr.bf16.mxu0 %v9776_v0  ;;  %v9781_v3 = vld [vmem:[%s14822_s1 + $0x8] ss:$16 sps:$4 sm:$0xff]   ;;  %7297 = vmatprep.subr.bf16.mxu1 %v9778_v1  ;;  %v9782_v4 = vld [vmem:[%s14822_s1 + $0x24] ss:$16 sps:$4 sm:$0xff]   ;;  %v9784_v5 = vld [vmem:[%s14822_s1 + $0x2c] ss:$16 sps:$4 sm:$0xff]  }
   0x3   :  { %6482 = vmatpush1.bf16.msra.mxu0 %v9780_v2  ;;  %7298 = vmatpush1.bf16.msra.mxu1 %v9781_v3  ;;  %v9786_v6 = vld [vmem:[%s14822_s1 + $0x20] ss:$16 sps:$4 sm:$0xff]   ;;  %v9787_v7 = vld [vmem:[%s14822_s1 + $0x28] ss:$16 sps:$4 sm:$0xff]   ;;  %v9788_v8 = vld [vmem:[%s14822_s1 + $0x44] ss:$16 sps:$4 sm:$0xff]  }
   0x4   :  { %6483 = vmatprep.subr.bf16.mxu0 %v9782_v4  ;;  %7299 = vmatprep.subr.bf16.mxu1 %v9784_v5  ;;  %v9790_v9 = vld [vmem:[%s14822_s1 + $0x4c] ss:$16 sps:$4 sm:$0xff]   ;;  %v9792_v10 = vld [vmem:[%s14822_s1 + $0x40] ss:$16 sps:$4 sm:$0xff]   ;;  %v9793_v11 = vld [vmem:[%s14822_s1 + $0x48] ss:$16 sps:$4 sm:$0xff]  }
   0x5   :  { %v9794_v12 = vld [vmem:[%s14822_s1 + $0x64] ss:$16 sps:$4 sm:$0xff]   ;;  %v9796_v13 = vld [vmem:[%s14822_s1 + $0x6c] ss:$16 sps:$4 sm:$0xff]   ;;  %v9798_v14 = vld [vmem:[%s14822_s1 + $0x60] ss:$16 sps:$4 sm:$0xff]  }
   0x6   :  { %v9799_v15 = vld [vmem:[%s14822_s1 + $0x68] ss:$16 sps:$4 sm:$0xff]   ;;  %v9800_v16 = vld [vmem:[%s14822_s1 + $0x84] ss:$16 sps:$4 sm:$0xff]   ;;  %v9802_v17 = vld [vmem:[%s14822_s1 + $0x8c] ss:$16 sps:$4 sm:$0xff]  }
   0x7   :  { %6484 = vmatpush1.bf16.msra.mxu0 %v9786_v6  ;;  %7300 = vmatpush1.bf16.msra.mxu1 %v9787_v7  ;;  %v9804_v18 = vld [vmem:[%s14822_s1 + $0x80] ss:$16 sps:$4 sm:$0xff]   ;;  %v9805_v19 = vld [vmem:[%s14822_s1 + $0x88] ss:$16 sps:$4 sm:$0xff]   ;;  %v9806_v20 = vld [vmem:[%s14822_s1 + $0xa4] ss:$16 sps:$4 sm:$0xff]  }
   0x8   :  { %6485 = vmatprep.subr.bf16.mxu0 %v9788_v8  ;;  %7301 = vmatprep.subr.bf16.mxu1 %v9790_v9  ;;  %v9808_v21 = vld [vmem:[%s14822_s1 + $0xac] ss:$16 sps:$4 sm:$0xff]   ;;  %v9810_v22 = vld [vmem:[%s14822_s1 + $0xa0] ss:$16 sps:$4 sm:$0xff]   ;;  %v9811_v23 = vld [vmem:[%s14822_s1 + $0xa8] ss:$16 sps:$4 sm:$0xff]  }
   0x9   :  { %v9812_v24 = vld [vmem:[%s14822_s1 + $0xc4] ss:$16 sps:$4 sm:$0xff]   ;;  %v9814_v25 = vld [vmem:[%s14822_s1 + $0xcc] ss:$16 sps:$4 sm:$0xff]   ;;  %v9816_v26 = vld [vmem:[%s14822_s1 + $0xc0] ss:$16 sps:$4 sm:$0xff]  }
   0xa   :  { %v9817_v27 = vld [vmem:[%s14822_s1 + $0xc8] ss:$16 sps:$4 sm:$0xff]   ;;  %v9818_v28 = vld [vmem:[%s14822_s1 + $0xe4] ss:$16 sps:$4 sm:$0xff]   ;;  %v9820_v29 = vld [vmem:[%s14822_s1 + $0xec] ss:$16 sps:$4 sm:$0xff]  }
   0xb   :  { %6486 = vmatpush1.bf16.msra.mxu0 %v9792_v10  ;;  %7302 = vmatpush1.bf16.msra.mxu1 %v9793_v11  ;;  %v9822_v30 = vld [vmem:[%s14822_s1 + $0xe0] ss:$16 sps:$4 sm:$0xff]   ;;  %v9823_v31 = vld [vmem:[%s14822_s1 + $0xe8] ss:$16 sps:$4 sm:$0xff]   ;;  %v9824_v32 = vld [vmem:[%s14822_s1 + $0x104] ss:$16 sps:$4 sm:$0xff]  }
   0xc   :  { %6487 = vmatprep.subr.bf16.mxu0 %v9794_v12  ;;  %7303 = vmatprep.subr.bf16.mxu1 %v9796_v13  ;;  %v9826_v33 = vld [vmem:[%s14822_s1 + $0x10c] ss:$16 sps:$4 sm:$0xff]   ;;  %v9828_v34 = vld [vmem:[%s14822_s1 + $0x100] ss:$16 sps:$4 sm:$0xff]   ;;  %v9829_v35 = vld [vmem:[%s14822_s1 + $0x108] ss:$16 sps:$4 sm:$0xff]  }
   0xd   :  { %v9830_v36 = vld [vmem:[%s14822_s1 + $0x124] ss:$16 sps:$4 sm:$0xff]   ;;  %v9832_v37 = vld [vmem:[%s14822_s1 + $0x12c] ss:$16 sps:$4 sm:$0xff]   ;;  %v9834_v38 = vld [vmem:[%s14822_s1 + $0x120] ss:$16 sps:$4 sm:$0xff]  }
   0xe   :  { %v9835_v39 = vld [vmem:[%s14822_s1 + $0x128] ss:$16 sps:$4 sm:$0xff]   ;;  %v9836_v40 = vld [vmem:[%s14822_s1 + $0x144] ss:$16 sps:$4 sm:$0xff]   ;;  %v9838_v41 = vld [vmem:[%s14822_s1 + $0x14c] ss:$16 sps:$4 sm:$0xff]  }
   0xf   :  { %6488 = vmatpush1.bf16.msra.mxu0 %v9798_v14  ;;  %7304 = vmatpush1.bf16.msra.mxu1 %v9799_v15  ;;  %v9840_v42 = vld [vmem:[%s14822_s1 + $0x140] ss:$16 sps:$4 sm:$0xff]   ;;  %v9841_v43 = vld [vmem:[%s14822_s1 + $0x148] ss:$16 sps:$4 sm:$0xff]   ;;  %v9842_v44 = vld [vmem:[%s14822_s1 + $0x164] ss:$16 sps:$4 sm:$0xff]  }
  0x10   :  { %6489 = vmatprep.subr.bf16.mxu0 %v9800_v16  ;;  %7305 = vmatprep.subr.bf16.mxu1 %v9802_v17  ;;  %v9844_v45 = vld [vmem:[%s14822_s1 + $0x16c] ss:$16 sps:$4 sm:$0xff]   ;;  %v17_v46 = vld [vmem:[%s14823_s0] sm:$0xff]  ;;  %v9847_v49 = vld [vmem:[%s14822_s1 + $0x168] ss:$16 sps:$4 sm:$0xff]  }
  0x11   :  { %v33_v47 = vld [vmem:[%s14823_s0 + $0x80] sm:$0xff]  ;;  %v9850_v52 = vld [vmem:[%s14822_s1 + $0x18c] ss:$16 sps:$4 sm:$0xff]   ;;  %v9853_v54 = vld [vmem:[%s14822_s1 + $0x188] ss:$16 sps:$4 sm:$0xff]  }
  0x12   :  { %v9846_v48 = vld [vmem:[%s14822_s1 + $0x160] ss:$16 sps:$4 sm:$0xff]   ;;  %v8436_v50 = vcombine.high %v17_v46, %v33_v47  ;;  %v9848_v51 = vld [vmem:[%s14822_s1 + $0x184] ss:$16 sps:$4 sm:$0xff]   ;;  %v9856_v56 = vld [vmem:[%s14822_s1 + $0x1ac] ss:$16 sps:$4 sm:$0xff]   ;;  %v8435_v5 = vcombine.low %v17_v46, %v33_v47 }
  0x13   :  { %6490 = vmatpush1.bf16.msra.mxu0 %v9804_v18  ;;  %7306 = vmatpush1.bf16.msra.mxu1 %v9805_v19  ;;  %v9852_v53 = vld [vmem:[%s14822_s1 + $0x180] ss:$16 sps:$4 sm:$0xff]   ;;  %v9854_v55 = vld [vmem:[%s14822_s1 + $0x1a4] ss:$16 sps:$4 sm:$0xff]   ;;  %v9859_v58 = vld [vmem:[%s14822_s1 + $0x1a8] ss:$16 sps:$4 sm:$0xff]  }
  0x14   :  { %6491 = vmatprep.subr.bf16.mxu0 %v9806_v20  ;;  %7307 = vmatprep.subr.bf16.mxu1 %v9808_v21  ;;  %v9858_v57 = vld [vmem:[%s14822_s1 + $0x1a0] ss:$16 sps:$4 sm:$0xff]   ;;  %v9860_v59 = vld [vmem:[%s14822_s1 + $0x1c4] ss:$16 sps:$4 sm:$0xff]   ;;  %v9862_v60 = vld [vmem:[%s14822_s1 + $0x1cc] ss:$16 sps:$4 sm:$0xff]  }
  0x15   :  { %6513 = vmatprep.mubr.bf16.mxu0 %v8436_v50  ;;  %7329 = vmatprep.mubr.bf16.mxu1 %v8436_v50  ;;  %v9864_v61 = vld [vmem:[%s14822_s1 + $0x1c0] ss:$16 sps:$4 sm:$0xff]   ;;  %v9865_v62 = vld [vmem:[%s14822_s1 + $0x1c8] ss:$16 sps:$4 sm:$0xff]   ;;  %v9866_v63 = vld [vmem:[%s14822_s1 + $0x1e4] ss:$16 sps:$4 sm:$0xff]  }
  0x16   :  { %v9868_v0 = vld [vmem:[%s14822_s1 + $0x1ec] ss:$16 sps:$4 sm:$0xff]   ;;  %v9870_v1 = vld [vmem:[%s14822_s1 + $0x1e0] ss:$16 sps:$4 sm:$0xff]   ;;  %v9871_v2 = vld [vmem:[%s14822_s1 + $0x1e8] ss:$16 sps:$4 sm:$0xff]  }
  0x17   :  { %6492 = vmatpush1.bf16.msra.mxu0 %v9810_v22  ;;  %7308 = vmatpush1.bf16.msra.mxu1 %v9811_v23  ;;  %v9874_v3 = vld [vmem:[%s14822_s1 + $0x204] ss:$16 sps:$4 sm:$0xff]   ;;  %v9877_v4 = vld [vmem:[%s14822_s1 + $0x20c] ss:$16 sps:$4 sm:$0xff]   ;;  %v9872_v6 = vld [vmem:[%s14822_s1 + $0x200] ss:$16 sps:$4 sm:$0xff]  }
  0x18   :  { %6493 = vmatprep.subr.bf16.mxu0 %v9812_v24  ;;  %7309 = vmatprep.subr.bf16.mxu1 %v9814_v25  ;;  %v9875_v7 = vld [vmem:[%s14822_s1 + $0x208] ss:$16 sps:$4 sm:$0xff]   ;;  %v9880_v8 = vld [vmem:[%s14822_s1 + $0x224] ss:$16 sps:$4 sm:$0xff]   ;;  %v9883_v9 = vld [vmem:[%s14822_s1 + $0x22c] ss:$16 sps:$4 sm:$0xff]  }
  0x19   :  { %v9878_v10 = vld [vmem:[%s14822_s1 + $0x220] ss:$16 sps:$4 sm:$0xff]   ;;  %v9881_v11 = vld [vmem:[%s14822_s1 + $0x228] ss:$16 sps:$4 sm:$0xff]   ;;  %v9886_v12 = vld [vmem:[%s14822_s1 + $0x244] ss:$16 sps:$4 sm:$0xff]  }
  0x1a   :  { %v9889_v13 = vld [vmem:[%s14822_s1 + $0x24c] ss:$16 sps:$4 sm:$0xff]   ;;  %v9884_v14 = vld [vmem:[%s14822_s1 + $0x240] ss:$16 sps:$4 sm:$0xff]   ;;  %v9887_v15 = vld [vmem:[%s14822_s1 + $0x248] ss:$16 sps:$4 sm:$0xff]  }
  0x1b   :  { %6494 = vmatpush1.bf16.msra.mxu0 %v9816_v26  ;;  %7310 = vmatpush1.bf16.msra.mxu1 %v9817_v27  ;;  %v9892_v16 = vld [vmem:[%s14822_s1 + $0x264] ss:$16 sps:$4 sm:$0xff]   ;;  %v9895_v17 = vld [vmem:[%s14822_s1 + $0x26c] ss:$16 sps:$4 sm:$0xff]   ;;  %v9890_v18 = vld [vmem:[%s14822_s1 + $0x260] ss:$16 sps:$4 sm:$0xff]  }
  0x1c   :  { %6495 = vmatprep.subr.bf16.mxu0 %v9818_v28  ;;  %7311 = vmatprep.subr.bf16.mxu1 %v9820_v29  ;;  %v9893_v19 = vld [vmem:[%s14822_s1 + $0x268] ss:$16 sps:$4 sm:$0xff]   ;;  %v9898_v20 = vld [vmem:[%s14822_s1 + $0x284] ss:$16 sps:$4 sm:$0xff]   ;;  %v9901_v21 = vld [vmem:[%s14822_s1 + $0x28c] ss:$16 sps:$4 sm:$0xff]  }
  0x1d   :  { %v9896_v22 = vld [vmem:[%s14822_s1 + $0x280] ss:$16 sps:$4 sm:$0xff]   ;;  %v9899_v23 = vld [vmem:[%s14822_s1 + $0x288] ss:$16 sps:$4 sm:$0xff]   ;;  %v9904_v24 = vld [vmem:[%s14822_s1 + $0x2a4] ss:$16 sps:$4 sm:$0xff]  }
  0x1e   :  { %v49_v25 = vld [vmem:[%s14823_s0 + $0x100] sm:$0xff]  ;;  %v9907_v26 = vld [vmem:[%s14822_s1 + $0x2ac] ss:$16 sps:$4 sm:$0xff]  }
  0x1f   :  { %6496 = vmatpush1.bf16.msra.mxu0 %v9822_v30  ;;  %7312 = vmatpush1.bf16.msra.mxu1 %v9823_v31  ;;  %v8468_v27 = vcombine.high %v49_v25, %v49_v25  ;;  %v8467_v28 = vcombine.low %v49_v25, %v49_v25  ;;  %v9902_v29 = vld [vmem:[%s14822_s1 + $0x2a0] ss:$16 sps:$4 sm:$0xff]   ;;  %v9905_v30 = vld [vmem:[%s14822_s1 + $0x2a8] ss:$16 sps:$4 sm:$0xff]   ;;  %v9910_v31 = vld [vmem:[%s14822_s1 + $0x2c4] ss:$16 sps:$4 sm:$0xff]  }
  0x20   :  { %6497 = vmatprep.subr.bf16.mxu0 %v9824_v32  ;;  %7313 = vmatprep.subr.bf16.mxu1 %v9826_v33  ;;  %v9913_v32 = vld [vmem:[%s14822_s1 + $0x2cc] ss:$16 sps:$4 sm:$0xff]   ;;  %v9928_v46 = vld [vmem:[%s14822_s1 + $0x324] ss:$16 sps:$4 sm:$0xff]  }
  0x21   :  { %v11660_v33 = vld [vmem:[%s14823_s0 + $0x8] sm:$0xff]  ;;  %v9934_v50 = vld [vmem:[%s14822_s1 + $0x344] ss:$16 sps:$4 sm:$0xff]  }
  0x22   :  { %v9931_v47 = vld [vmem:[%s14822_s1 + $0x32c] ss:$16 sps:$4 sm:$0xff]  }
  0x23   :  { %6498 = vmatpush1.bf16.msra.mxu0 %v9828_v34  ;;  %7314 = vmatpush1.bf16.msra.mxu1 %v9829_v35  ;;  %v11665_v34 = vld [vmem:[%s14823_s0 + $0x88] sm:$0xff]  ;;  %v9908_v35 = vld [vmem:[%s14822_s1 + $0x2c0] ss:$16 sps:$4 sm:$0xff]  }
  0x24   :  { %6499 = vmatprep.subr.bf16.mxu0 %v9830_v36  ;;  %7315 = vmatprep.subr.bf16.mxu1 %v9832_v37  ;;  %v8438_v36 = vcombine.high %v11660_v33, %v11665_v34  ;;  %v9911_v37 = vld [vmem:[%s14822_s1 + $0x2c8] ss:$16 sps:$4 sm:$0xff]  }
  0x27   :  { %6500 = vmatpush1.bf16.msra.mxu0 %v9834_v38  ;;  %7316 = vmatpush1.bf16.msra.mxu1 %v9835_v39  ;;  %v9916_v38 = vld [vmem:[%s14822_s1 + $0x2e4] ss:$16 sps:$4 sm:$0xff]   ;;  %v9919_v39 = vld [vmem:[%s14822_s1 + $0x2ec] ss:$16 sps:$4 sm:$0xff]  }
  0x28   :  { %6501 = vmatprep.subr.bf16.mxu0 %v9836_v40  ;;  %7317 = vmatprep.subr.bf16.mxu1 %v9838_v41  ;;  %v9914_v40 = vld [vmem:[%s14822_s1 + $0x2e0] ss:$16 sps:$4 sm:$0xff]   ;;  %v9917_v41 = vld [vmem:[%s14822_s1 + $0x2e8] ss:$16 sps:$4 sm:$0xff]  }
  0x2b   :  { %6502 = vmatpush1.bf16.msra.mxu0 %v9840_v42  ;;  %7318 = vmatpush1.bf16.msra.mxu1 %v9841_v43  ;;  %v9922_v42 = vld [vmem:[%s14822_s1 + $0x304] ss:$16 sps:$4 sm:$0xff]   ;;  %v9925_v43 = vld [vmem:[%s14822_s1 + $0x30c] ss:$16 sps:$4 sm:$0xff]  }
  0x2c   :  { %6503 = vmatprep.subr.bf16.mxu0 %v9842_v44  ;;  %7319 = vmatprep.subr.bf16.mxu1 %v9844_v45  ;;  %v9920_v44 = vld [vmem:[%s14822_s1 + $0x300] ss:$16 sps:$4 sm:$0xff]   ;;  %v9923_v45 = vld [vmem:[%s14822_s1 + $0x308] ss:$16 sps:$4 sm:$0xff]  }
  0x2f   :  { %6504 = vmatpush1.bf16.msra.mxu0 %v9846_v48  ;;  %7320 = vmatpush1.bf16.msra.mxu1 %v9847_v49  ;;  %v9926_v48 = vld [vmem:[%s14822_s1 + $0x320] ss:$16 sps:$4 sm:$0xff]   ;;  %v9929_v49 = vld [vmem:[%s14822_s1 + $0x328] ss:$16 sps:$4 sm:$0xff]  }
  0x30   :  { %6505 = vmatprep.subr.bf16.mxu0 %v9848_v51  ;;  %7321 = vmatprep.subr.bf16.mxu1 %v9850_v52  ;;  %v9937_v51 = vld [vmem:[%s14822_s1 + $0x34c] ss:$16 sps:$4 sm:$0xff]   ;;  %v9932_v52 = vld [vmem:[%s14822_s1 + $0x340] ss:$16 sps:$4 sm:$0xff]  }
  0x33   :  { %6506 = vmatpush1.bf16.msra.mxu0 %v9852_v53  ;;  %7322 = vmatpush1.bf16.msra.mxu1 %v9853_v54  ;;  %v9935_v53 = vld [vmem:[%s14822_s1 + $0x348] ss:$16 sps:$4 sm:$0xff]   ;;  %v9940_v54 = vld [vmem:[%s14822_s1 + $0x364] ss:$16 sps:$4 sm:$0xff]  }
  0x34   :  { %6507 = vmatprep.subr.bf16.mxu0 %v9854_v55  ;;  %7323 = vmatprep.subr.bf16.mxu1 %v9856_v56  ;;  %v9943_v55 = vld [vmem:[%s14822_s1 + $0x36c] ss:$16 sps:$4 sm:$0xff]   ;;  %v9938_v56 = vld [vmem:[%s14822_s1 + $0x360] ss:$16 sps:$4 sm:$0xff]  }
  0x37   :  { %6508 = vmatpush1.bf16.msra.mxu0 %v9858_v57  ;;  %7324 = vmatpush1.bf16.msra.mxu1 %v9859_v58  ;;  %v9941_v57 = vld [vmem:[%s14822_s1 + $0x368] ss:$16 sps:$4 sm:$0xff]   ;;  %v9946_v58 = vld [vmem:[%s14822_s1 + $0x384] ss:$16 sps:$4 sm:$0xff]  }
  0x38   :  { %6509 = vmatprep.subr.bf16.mxu0 %v9860_v59  ;;  %7325 = vmatprep.subr.bf16.mxu1 %v9862_v60  ;;  %v9949_v59 = vld [vmem:[%s14822_s1 + $0x38c] ss:$16 sps:$4 sm:$0xff]   ;;  %v9944_v60 = vld [vmem:[%s14822_s1 + $0x380] ss:$16 sps:$4 sm:$0xff]  }
  0x3b   :  { %6510 = vmatpush1.bf16.msra.mxu0 %v9864_v61  ;;  %7326 = vmatpush1.bf16.msra.mxu1 %v9865_v62  ;;  %v9947_v61 = vld [vmem:[%s14822_s1 + $0x388] ss:$16 sps:$4 sm:$0xff]   ;;  %v9952_v62 = vld [vmem:[%s14822_s1 + $0x3a4] ss:$16 sps:$4 sm:$0xff]  }
  0x3c   :  { %6511 = vmatprep.subr.bf16.mxu0 %v9866_v63  ;;  %7327 = vmatprep.subr.bf16.mxu1 %v9868_v0  ;;  %v9955_v63 = vld [vmem:[%s14822_s1 + $0x3ac] ss:$16 sps:$4 sm:$0xff]   ;;  %v9950_v0 = vld [vmem:[%s14822_s1 + $0x3a0] ss:$16 sps:$4 sm:$0xff]  }
  0x3f   :  { %6512 = vmatpush1.bf16.msra.mxu0 %v9870_v1  ;;  %7328 = vmatpush1.bf16.msra.mxu1 %v9871_v2  ;;  %v9953_v1 = vld [vmem:[%s14822_s1 + $0x3a8] ss:$16 sps:$4 sm:$0xff]   ;;  %v9959_v2 = vld [vmem:[%s14822_s1 + $0x3c4] ss:$16 sps:$4 sm:$0xff]  }
  0x40   :  { %6532 = vmatprep.subr.bf16.mxu0 %v9874_v3  ;;  %7348 = vmatprep.subr.bf16.mxu1 %v9877_v4  ;;  %v9962_v3 = vld [vmem:[%s14822_s1 + $0x3cc] ss:$16 sps:$4 sm:$0xff]   ;;  %v9957_v4 = vld [vmem:[%s14822_s1 + $0x3c0] ss:$16 sps:$4 sm:$0xff]  }
  0x42   :  { %6514 = vmatmul.mubr.bf16.vlgmr.msra.gmra.mrb[0].mxu0 %v8435_v5  ;;  %7330 = vmatmul.mubr.bf16.vlgmr.msra.gmra.mrb[0].mxu1 %v8435_v5  ;;  %v9960_v5 = vld [vmem:[%s14822_s1 + $0x3c8] ss:$16 sps:$4 sm:$0xff]  }
  0x43   :  { %6533 = vmatpush1.bf16.msra.mxu0 %v9872_v6  ;;  %7349 = vmatpush1.bf16.msra.mxu1 %v9875_v7  ;;  %v9966_v6 = vld [vmem:[%s14822_s1 + $0x3e4] ss:$16 sps:$4 sm:$0xff]   ;;  %v9969_v7 = vld [vmem:[%s14822_s1 + $0x3ec] ss:$16 sps:$4 sm:$0xff]  }
  0x44   :  { %6534 = vmatprep.subr.bf16.mxu0 %v9880_v8  ;;  %7350 = vmatprep.subr.bf16.mxu1 %v9883_v9  ;;  %v9964_v8 = vld [vmem:[%s14822_s1 + $0x3e0] ss:$16 sps:$4 sm:$0xff]   ;;  %v9967_v9 = vld [vmem:[%s14822_s1 + $0x3e8] ss:$16 sps:$4 sm:$0xff]  }
  0x45   :  { %6523 = vmatprep.mubr.bf16.mxu0 %v8468_v27  ;;  %7339 = vmatprep.mubr.bf16.mxu1 %v8468_v27  ;;  %v11832_v27 = vld [vmem:[%s14823_s0 + $0x90] sm:$0xff] }
  0x47   :  { %6535 = vmatpush1.bf16.msra.mxu0 %v9878_v10  ;;  %7351 = vmatpush1.bf16.msra.mxu1 %v9881_v11  ;;  %v9972_v10 = vld [vmem:[%s14822_s1 + $0x404] ss:$16 sps:$4 sm:$0xff]   ;;  %v9975_v11 = vld [vmem:[%s14822_s1 + $0x40c] ss:$16 sps:$4 sm:$0xff]  }
  0x48   :  { %6536 = vmatprep.subr.bf16.mxu0 %v9886_v12  ;;  %7352 = vmatprep.subr.bf16.mxu1 %v9889_v13  ;;  %v8437_v12 = vcombine.low %v11660_v33, %v11665_v34  ;;  %v50_v13 = vld [vmem:[%s14823_s0 + $0x108] sm:$0xff]  ;;  %v9996_v33 = vld [vmem:[%s14822_s1 + $0x484] ss:$16 sps:$4 sm:$0xff]  }
  0x49   :  { %v8469_v25 = vcombine.low %v50_v13, %v50_v13  ;;  %v9999_v34 = vld [vmem:[%s14822_s1 + $0x48c] ss:$16 sps:$4 sm:$0xff]  }
  0x4a   :  { %6524 = vmatmul.mubr.bf16.gmra.mrb[4].mxu0 %v8467_v28  ;;  %7340 = vmatmul.mubr.bf16.gmra.mrb[4].mxu1 %v8467_v28  ;;  %v9990_v28 = vld [vmem:[%s14822_s1 + $0x464] ss:$16 sps:$4 sm:$0xff]  }
  0x4b   :  { %6537 = vmatpush1.bf16.msra.mxu0 %v9884_v14  ;;  %7353 = vmatpush1.bf16.msra.mxu1 %v9887_v15  ;;  %v9970_v14 = vld [vmem:[%s14822_s1 + $0x400] ss:$16 sps:$4 sm:$0xff]   ;;  %v9973_v15 = vld [vmem:[%s14822_s1 + $0x408] ss:$16 sps:$4 sm:$0xff]  }
  0x4c   :  { %6538 = vmatprep.subr.bf16.mxu0 %v9892_v16  ;;  %7354 = vmatprep.subr.bf16.mxu1 %v9895_v17  ;;  %v9978_v16 = vld [vmem:[%s14822_s1 + $0x424] ss:$16 sps:$4 sm:$0xff]   ;;  %v9981_v17 = vld [vmem:[%s14822_s1 + $0x42c] ss:$16 sps:$4 sm:$0xff]  }
  0x4d   :  { %6564 = vmatprep.mubr.bf16.mxu0 %v8438_v36  ;;  %7380 = vmatprep.mubr.bf16.mxu1 %v8438_v36  ;;  %v9997_v36 = vld [vmem:[%s14822_s1 + $0x488] ss:$16 sps:$4 sm:$0xff]  }
  0x4f   :  { %6539 = vmatpush1.bf16.msra.mxu0 %v9890_v18  ;;  %7355 = vmatpush1.bf16.msra.mxu1 %v9893_v19  ;;  %v8470_v18 = vcombine.high %v50_v13, %v50_v13  ;;  %v9976_v19 = vld [vmem:[%s14822_s1 + $0x420] ss:$16 sps:$4 sm:$0xff]   ;;  %v10064_v13 = vld [vmem:[%s14822_s1 + $0x5e4] ss:$16 sps:$4 sm:$0xff]  }
  0x50   :  { %6540 = vmatprep.subr.bf16.mxu0 %v9898_v20  ;;  %7356 = vmatprep.subr.bf16.mxu1 %v9901_v21  ;;  %v9979_v20 = vld [vmem:[%s14822_s1 + $0x428] ss:$16 sps:$4 sm:$0xff]   ;;  %v9984_v21 = vld [vmem:[%s14822_s1 + $0x444] ss:$16 sps:$4 sm:$0xff]  }
  0x53   :  { %6541 = vmatpush1.bf16.msra.mxu0 %v9896_v22  ;;  %7357 = vmatpush1.bf16.msra.mxu1 %v9899_v23  ;;  %v9987_v22 = vld [vmem:[%s14822_s1 + $0x44c] ss:$16 sps:$4 sm:$0xff]   ;;  %v9982_v23 = vld [vmem:[%s14822_s1 + $0x440] ss:$16 sps:$4 sm:$0xff]  }
  0x54   :  { %6542 = vmatprep.subr.bf16.mxu0 %v9904_v24  ;;  %7358 = vmatprep.subr.bf16.mxu1 %v9907_v26  ;;  %v9985_v24 = vld [vmem:[%s14822_s1 + $0x448] ss:$16 sps:$4 sm:$0xff]   ;;  %v11827_v26 = vld [vmem:[%s14823_s0 + $0x10] sm:$0xff] }
  0x57   :  { %6543 = vmatpush1.bf16.msra.mxu0 %v9902_v29  ;;  %7359 = vmatpush1.bf16.msra.mxu1 %v9905_v30  ;;  %v9993_v29 = vld [vmem:[%s14822_s1 + $0x46c] ss:$16 sps:$4 sm:$0xff]   ;;  %v8440_v30 = vcombine.high %v11827_v26, %v11832_v27 }
  0x58   :  { %6544 = vmatprep.subr.bf16.mxu0 %v9910_v31  ;;  %7360 = vmatprep.subr.bf16.mxu1 %v9913_v32  ;;  %v9988_v31 = vld [vmem:[%s14822_s1 + $0x460] ss:$16 sps:$4 sm:$0xff]   ;;  %v9991_v32 = vld [vmem:[%s14822_s1 + $0x468] ss:$16 sps:$4 sm:$0xff]  }
  0x5b   :  { %6545 = vmatpush1.bf16.msra.mxu0 %v9908_v35  ;;  %7361 = vmatpush1.bf16.msra.mxu1 %v9911_v37  ;;  %v9994_v35 = vld [vmem:[%s14822_s1 + $0x480] ss:$16 sps:$4 sm:$0xff]   ;;  %v10002_v37 = vld [vmem:[%s14822_s1 + $0x4a4] ss:$16 sps:$4 sm:$0xff]  }
  0x5c   :  { %6546 = vmatprep.subr.bf16.mxu0 %v9916_v38  ;;  %7362 = vmatprep.subr.bf16.mxu1 %v9919_v39  ;;  %v10005_v38 = vld [vmem:[%s14822_s1 + $0x4ac] ss:$16 sps:$4 sm:$0xff]   ;;  %v10000_v39 = vld [vmem:[%s14822_s1 + $0x4a0] ss:$16 sps:$4 sm:$0xff]  }
  0x5f   :  { %6547 = vmatpush1.bf16.msra.mxu0 %v9914_v40  ;;  %7363 = vmatpush1.bf16.msra.mxu1 %v9917_v41  ;;  %v10003_v40 = vld [vmem:[%s14822_s1 + $0x4a8] ss:$16 sps:$4 sm:$0xff]   ;;  %v10008_v41 = vld [vmem:[%s14822_s1 + $0x4c4] ss:$16 sps:$4 sm:$0xff]  }
  0x60   :  { %6548 = vmatprep.subr.bf16.mxu0 %v9922_v42  ;;  %7364 = vmatprep.subr.bf16.mxu1 %v9925_v43  ;;  %v10011_v42 = vld [vmem:[%s14822_s1 + $0x4cc] ss:$16 sps:$4 sm:$0xff]   ;;  %v10006_v43 = vld [vmem:[%s14822_s1 + $0x4c0] ss:$16 sps:$4 sm:$0xff]  }
  0x63   :  { %6549 = vmatpush1.bf16.msra.mxu0 %v9920_v44  ;;  %7365 = vmatpush1.bf16.msra.mxu1 %v9923_v45  ;;  %v10009_v44 = vld [vmem:[%s14822_s1 + $0x4c8] ss:$16 sps:$4 sm:$0xff]   ;;  %v10014_v45 = vld [vmem:[%s14822_s1 + $0x4e4] ss:$16 sps:$4 sm:$0xff]  }
  0x64   :  { %6550 = vmatprep.subr.bf16.mxu0 %v9928_v46  ;;  %7366 = vmatprep.subr.bf16.mxu1 %v9931_v47  ;;  %v10017_v46 = vld [vmem:[%s14822_s1 + $0x4ec] ss:$16 sps:$4 sm:$0xff]   ;;  %v10012_v47 = vld [vmem:[%s14822_s1 + $0x4e0] ss:$16 sps:$4 sm:$0xff]  }
  0x67   :  { %6551 = vmatpush1.bf16.msra.mxu0 %v9926_v48  ;;  %7367 = vmatpush1.bf16.msra.mxu1 %v9929_v49  ;;  %v10015_v48 = vld [vmem:[%s14822_s1 + $0x4e8] ss:$16 sps:$4 sm:$0xff]   ;;  %v10020_v49 = vld [vmem:[%s14822_s1 + $0x504] ss:$16 sps:$4 sm:$0xff]  }
  0x68   :  { %6552 = vmatprep.subr.bf16.mxu0 %v9934_v50  ;;  %7368 = vmatprep.subr.bf16.mxu1 %v9937_v51  ;;  %v10023_v50 = vld [vmem:[%s14822_s1 + $0x50c] ss:$16 sps:$4 sm:$0xff]   ;;  %v10018_v51 = vld [vmem:[%s14822_s1 + $0x500] ss:$16 sps:$4 sm:$0xff]  }
  0x6b   :  { %6553 = vmatpush1.bf16.msra.mxu0 %v9932_v52  ;;  %7369 = vmatpush1.bf16.msra.mxu1 %v9935_v53  ;;  %v10021_v52 = vld [vmem:[%s14822_s1 + $0x508] ss:$16 sps:$4 sm:$0xff]   ;;  %v10026_v53 = vld [vmem:[%s14822_s1 + $0x524] ss:$16 sps:$4 sm:$0xff]  }
  0x6c   :  { %6554 = vmatprep.subr.bf16.mxu0 %v9940_v54  ;;  %7370 = vmatprep.subr.bf16.mxu1 %v9943_v55  ;;  %v10029_v54 = vld [vmem:[%s14822_s1 + $0x52c] ss:$16 sps:$4 sm:$0xff]   ;;  %v10024_v55 = vld [vmem:[%s14822_s1 + $0x520] ss:$16 sps:$4 sm:$0xff]  }
  0x6f   :  { %6555 = vmatpush1.bf16.msra.mxu0 %v9938_v56  ;;  %7371 = vmatpush1.bf16.msra.mxu1 %v9941_v57  ;;  %v10027_v56 = vld [vmem:[%s14822_s1 + $0x528] ss:$16 sps:$4 sm:$0xff]   ;;  %v10032_v57 = vld [vmem:[%s14822_s1 + $0x544] ss:$16 sps:$4 sm:$0xff]  }
  0x70   :  { %6556 = vmatprep.subr.bf16.mxu0 %v9946_v58  ;;  %7372 = vmatprep.subr.bf16.mxu1 %v9949_v59  ;;  %v10035_v58 = vld [vmem:[%s14822_s1 + $0x54c] ss:$16 sps:$4 sm:$0xff]   ;;  %v10030_v59 = vld [vmem:[%s14822_s1 + $0x540] ss:$16 sps:$4 sm:$0xff]  }
  0x73   :  { %6557 = vmatpush1.bf16.msra.mxu0 %v9944_v60  ;;  %7373 = vmatpush1.bf16.msra.mxu1 %v9947_v61  ;;  %v10033_v60 = vld [vmem:[%s14822_s1 + $0x548] ss:$16 sps:$4 sm:$0xff]   ;;  %v10038_v61 = vld [vmem:[%s14822_s1 + $0x564] ss:$16 sps:$4 sm:$0xff]  }
  0x74   :  { %6558 = vmatprep.subr.bf16.mxu0 %v9952_v62  ;;  %7374 = vmatprep.subr.bf16.mxu1 %v9955_v63  ;;  %v10041_v62 = vld [vmem:[%s14822_s1 + $0x56c] ss:$16 sps:$4 sm:$0xff]   ;;  %v10036_v63 = vld [vmem:[%s14822_s1 + $0x560] ss:$16 sps:$4 sm:$0xff]  }
  0x77   :  { %6559 = vmatpush1.bf16.msra.mxu0 %v9950_v0  ;;  %7375 = vmatpush1.bf16.msra.mxu1 %v9953_v1  ;;  %v10039_v0 = vld [vmem:[%s14822_s1 + $0x568] ss:$16 sps:$4 sm:$0xff]   ;;  %v10044_v1 = vld [vmem:[%s14822_s1 + $0x584] ss:$16 sps:$4 sm:$0xff]  }
  0x78   :  { %6560 = vmatprep.subr.bf16.mxu0 %v9959_v2  ;;  %7376 = vmatprep.subr.bf16.mxu1 %v9962_v3  ;;  %v10047_v2 = vld [vmem:[%s14822_s1 + $0x58c] ss:$16 sps:$4 sm:$0xff]   ;;  %v10042_v3 = vld [vmem:[%s14822_s1 + $0x580] ss:$16 sps:$4 sm:$0xff]  }
  0x7b   :  { %6561 = vmatpush1.bf16.msra.mxu0 %v9957_v4  ;;  %7377 = vmatpush1.bf16.msra.mxu1 %v9960_v5  ;;  %v10045_v4 = vld [vmem:[%s14822_s1 + $0x588] ss:$16 sps:$4 sm:$0xff]   ;;  %v10050_v5 = vld [vmem:[%s14822_s1 + $0x5a4] ss:$16 sps:$4 sm:$0xff]  }
  0x7c   :  { %6562 = vmatprep.subr.bf16.mxu0 %v9966_v6  ;;  %7378 = vmatprep.subr.bf16.mxu1 %v9969_v7  ;;  %v10053_v6 = vld [vmem:[%s14822_s1 + $0x5ac] ss:$16 sps:$4 sm:$0xff]   ;;  %v10048_v7 = vld [vmem:[%s14822_s1 + $0x5a0] ss:$16 sps:$4 sm:$0xff]  }
  0x7f   :  { %6563 = vmatpush1.bf16.msra.mxu0 %v9964_v8  ;;  %7379 = vmatpush1.bf16.msra.mxu1 %v9967_v9  ;;  %v10051_v8 = vld [vmem:[%s14822_s1 + $0x5a8] ss:$16 sps:$4 sm:$0xff]   ;;  %v10057_v9 = vld [vmem:[%s14822_s1 + $0x5c4] ss:$16 sps:$4 sm:$0xff]  }
  0x80   :  { %6583 = vmatprep.subr.bf16.mxu0 %v9972_v10  ;;  %7399 = vmatprep.subr.bf16.mxu1 %v9975_v11  ;;  %v10060_v10 = vld [vmem:[%s14822_s1 + $0x5cc] ss:$16 sps:$4 sm:$0xff]   ;;  %v10055_v11 = vld [vmem:[%s14822_s1 + $0x5c0] ss:$16 sps:$4 sm:$0xff]  }
  0x82   :  { %6565 = vmatmul.mubr.bf16.vlgmr.msra.gmra.mrb[0].mxu0 %v8437_v12  ;;  %7381 = vmatmul.mubr.bf16.vlgmr.msra.gmra.mrb[0].mxu1 %v8437_v12  ;;  %v10058_v12 = vld [vmem:[%s14822_s1 + $0x5c8] ss:$16 sps:$4 sm:$0xff]  }
  0x83   :  { %6584 = vmatpush1.bf16.msra.mxu0 %v9970_v14  ;;  %7400 = vmatpush1.bf16.msra.mxu1 %v9973_v15  ;;  %v10067_v14 = vld [vmem:[%s14822_s1 + $0x5ec] ss:$16 sps:$4 sm:$0xff]   ;;  %v10062_v15 = vld [vmem:[%s14822_s1 + $0x5e0] ss:$16 sps:$4 sm:$0xff]  }
  0x84   :  { %6585 = vmatprep.subr.bf16.mxu0 %v9978_v16  ;;  %7401 = vmatprep.subr.bf16.mxu1 %v9981_v17  ;;  %v10065_v16 = vld [vmem:[%s14822_s1 + $0x5e8] ss:$16 sps:$4 sm:$0xff]   ;;  %v10070_v17 = vld [vmem:[%s14822_s1 + $0x604] ss:$16 sps:$4 sm:$0xff]  }
  0x85   :  { %6574 = vmatprep.mubr.bf16.mxu0 %v8470_v18  ;;  %7390 = vmatprep.mubr.bf16.mxu1 %v8470_v18  ;;  %v10073_v18 = vld [vmem:[%s14822_s1 + $0x60c] ss:$16 sps:$4 sm:$0xff]  }
  0x87   :  { %6586 = vmatpush1.bf16.msra.mxu0 %v9976_v19  ;;  %7402 = vmatpush1.bf16.msra.mxu1 %v9979_v20  ;;  %v8439_v19 = vcombine.low %v11827_v26, %v11832_v27  ;;  %v10068_v20 = vld [vmem:[%s14822_s1 + $0x600] ss:$16 sps:$4 sm:$0xff]   ;;  %v10077_v27 = vld [vmem:[%s14822_s1 + $0x628] ss:$16 sps:$4 sm:$0xff]  }
  0x88   :  { %6587 = vmatprep.subr.bf16.mxu0 %v9984_v21  ;;  %7403 = vmatprep.subr.bf16.mxu1 %v9987_v22  ;;  %v51_v21 = vld [vmem:[%s14823_s0 + $0x110] sm:$0xff]  ;;  %v10071_v22 = vld [vmem:[%s14822_s1 + $0x608] ss:$16 sps:$4 sm:$0xff]  }
  0x89   :  { %v10074_v26 = vld [vmem:[%s14822_s1 + $0x620] ss:$16 sps:$4 sm:$0xff]  }
  0x8a   :  { %6575 = vmatmul.mubr.bf16.gmra.mrb[4].mxu0 %v8469_v25  ;;  %7391 = vmatmul.mubr.bf16.gmra.mrb[4].mxu1 %v8469_v25  ;;  %v8472_v25 = vcombine.high %v51_v21, %v51_v21 }
  0x8b   :  { %6588 = vmatpush1.bf16.msra.mxu0 %v9982_v23  ;;  %7404 = vmatpush1.bf16.msra.mxu1 %v9985_v24  ;;  %v10076_v23 = vld [vmem:[%s14822_s1 + $0x624] ss:$16 sps:$4 sm:$0xff]   ;;  %v10079_v24 = vld [vmem:[%s14822_s1 + $0x62c] ss:$16 sps:$4 sm:$0xff]  }
  0x8c   :  { %6589 = vmatprep.subr.bf16.mxu0 %v9990_v28  ;;  %7405 = vmatprep.subr.bf16.mxu1 %v9993_v29  ;;  %v10082_v28 = vld [vmem:[%s14822_s1 + $0x644] ss:$16 sps:$4 sm:$0xff]   ;;  %v10085_v29 = vld [vmem:[%s14822_s1 + $0x64c] ss:$16 sps:$4 sm:$0xff]  }
  0x8d   :  { %6615 = vmatprep.mubr.bf16.mxu0 %v8440_v30  ;;  %7431 = vmatprep.mubr.bf16.mxu1 %v8440_v30  ;;  %v10080_v30 = vld [vmem:[%s14822_s1 + $0x640] ss:$16 sps:$4 sm:$0xff]  }
  0x8f   :  { %6590 = vmatpush1.bf16.msra.mxu0 %v9988_v31  ;;  %7406 = vmatpush1.bf16.msra.mxu1 %v9991_v32  ;;  %v8471_v31 = vcombine.low %v51_v21, %v51_v21  ;;  %v12033_v32 = vld [vmem:[%s14823_s0 + $0x18] sm:$0xff] }
  0x90   :  { %6591 = vmatprep.subr.bf16.mxu0 %v9996_v33  ;;  %7407 = vmatprep.subr.bf16.mxu1 %v9999_v34  ;;  %v12038_v33 = vld [vmem:[%s14823_s0 + $0x98] sm:$0xff] }
  0x91   :  { %v10083_v34 = vld [vmem:[%s14822_s1 + $0x648] ss:$16 sps:$4 sm:$0xff]   ;;  %v10165_v21 = vld [vmem:[%s14822_s1 + $0x7ec] ss:$16 sps:$4 sm:$0xff]  }
  0x93   :  { %6592 = vmatpush1.bf16.msra.mxu0 %v9994_v35  ;;  %7408 = vmatpush1.bf16.msra.mxu1 %v9997_v36  ;;  %v10088_v35 = vld [vmem:[%s14822_s1 + $0x664] ss:$16 sps:$4 sm:$0xff]   ;;  %v10091_v36 = vld [vmem:[%s14822_s1 + $0x66c] ss:$16 sps:$4 sm:$0xff]  }
  0x94   :  { %6593 = vmatprep.subr.bf16.mxu0 %v10002_v37  ;;  %7409 = vmatprep.subr.bf16.mxu1 %v10005_v38  ;;  %v8442_v37 = vcombine.high %v12033_v32, %v12038_v33  ;;  %v10086_v38 = vld [vmem:[%s14822_s1 + $0x660] ss:$16 sps:$4 sm:$0xff]  }
  0x97   :  { %6594 = vmatpush1.bf16.msra.mxu0 %v10000_v39  ;;  %7410 = vmatpush1.bf16.msra.mxu1 %v10003_v40  ;;  %v10089_v39 = vld [vmem:[%s14822_s1 + $0x668] ss:$16 sps:$4 sm:$0xff]   ;;  %v10094_v40 = vld [vmem:[%s14822_s1 + $0x684] ss:$16 sps:$4 sm:$0xff]  }
  0x98   :  { %6595 = vmatprep.subr.bf16.mxu0 %v10008_v41  ;;  %7411 = vmatprep.subr.bf16.mxu1 %v10011_v42  ;;  %v10097_v41 = vld [vmem:[%s14822_s1 + $0x68c] ss:$16 sps:$4 sm:$0xff]   ;;  %v10092_v42 = vld [vmem:[%s14822_s1 + $0x680] ss:$16 sps:$4 sm:$0xff]  }
  0x9b   :  { %6596 = vmatpush1.bf16.msra.mxu0 %v10006_v43  ;;  %7412 = vmatpush1.bf16.msra.mxu1 %v10009_v44  ;;  %v10095_v43 = vld [vmem:[%s14822_s1 + $0x688] ss:$16 sps:$4 sm:$0xff]   ;;  %v10100_v44 = vld [vmem:[%s14822_s1 + $0x6a4] ss:$16 sps:$4 sm:$0xff]  }
  0x9c   :  { %6597 = vmatprep.subr.bf16.mxu0 %v10014_v45  ;;  %7413 = vmatprep.subr.bf16.mxu1 %v10017_v46  ;;  %v10103_v45 = vld [vmem:[%s14822_s1 + $0x6ac] ss:$16 sps:$4 sm:$0xff]   ;;  %v10098_v46 = vld [vmem:[%s14822_s1 + $0x6a0] ss:$16 sps:$4 sm:$0xff]  }
  0x9f   :  { %6598 = vmatpush1.bf16.msra.mxu0 %v10012_v47  ;;  %7414 = vmatpush1.bf16.msra.mxu1 %v10015_v48  ;;  %v10101_v47 = vld [vmem:[%s14822_s1 + $0x6a8] ss:$16 sps:$4 sm:$0xff]   ;;  %v10106_v48 = vld [vmem:[%s14822_s1 + $0x6c4] ss:$16 sps:$4 sm:$0xff]  }
  0xa0   :  { %6599 = vmatprep.subr.bf16.mxu0 %v10020_v49  ;;  %7415 = vmatprep.subr.bf16.mxu1 %v10023_v50  ;;  %v10109_v49 = vld [vmem:[%s14822_s1 + $0x6cc] ss:$16 sps:$4 sm:$0xff]   ;;  %v10104_v50 = vld [vmem:[%s14822_s1 + $0x6c0] ss:$16 sps:$4 sm:$0xff]  }
  0xa3   :  { %6600 = vmatpush1.bf16.msra.mxu0 %v10018_v51  ;;  %7416 = vmatpush1.bf16.msra.mxu1 %v10021_v52  ;;  %v10107_v51 = vld [vmem:[%s14822_s1 + $0x6c8] ss:$16 sps:$4 sm:$0xff]   ;;  %v10112_v52 = vld [vmem:[%s14822_s1 + $0x6e4] ss:$16 sps:$4 sm:$0xff]  }
  0xa4   :  { %6601 = vmatprep.subr.bf16.mxu0 %v10026_v53  ;;  %7417 = vmatprep.subr.bf16.mxu1 %v10029_v54  ;;  %v10115_v53 = vld [vmem:[%s14822_s1 + $0x6ec] ss:$16 sps:$4 sm:$0xff]   ;;  %v10110_v54 = vld [vmem:[%s14822_s1 + $0x6e0] ss:$16 sps:$4 sm:$0xff]  }
  0xa7   :  { %6602 = vmatpush1.bf16.msra.mxu0 %v10024_v55  ;;  %7418 = vmatpush1.bf16.msra.mxu1 %v10027_v56  ;;  %v10113_v55 = vld [vmem:[%s14822_s1 + $0x6e8] ss:$16 sps:$4 sm:$0xff]   ;;  %v10118_v56 = vld [vmem:[%s14822_s1 + $0x704] ss:$16 sps:$4 sm:$0xff]  }
  0xa8   :  { %6603 = vmatprep.subr.bf16.mxu0 %v10032_v57  ;;  %7419 = vmatprep.subr.bf16.mxu1 %v10035_v58  ;;  %v10121_v57 = vld [vmem:[%s14822_s1 + $0x70c] ss:$16 sps:$4 sm:$0xff]   ;;  %v10116_v58 = vld [vmem:[%s14822_s1 + $0x700] ss:$16 sps:$4 sm:$0xff]  }
  0xab   :  { %6604 = vmatpush1.bf16.msra.mxu0 %v10030_v59  ;;  %7420 = vmatpush1.bf16.msra.mxu1 %v10033_v60  ;;  %v10119_v59 = vld [vmem:[%s14822_s1 + $0x708] ss:$16 sps:$4 sm:$0xff]   ;;  %v10124_v60 = vld [vmem:[%s14822_s1 + $0x724] ss:$16 sps:$4 sm:$0xff]  }
  0xac   :  { %6605 = vmatprep.subr.bf16.mxu0 %v10038_v61  ;;  %7421 = vmatprep.subr.bf16.mxu1 %v10041_v62  ;;  %v10127_v61 = vld [vmem:[%s14822_s1 + $0x72c] ss:$16 sps:$4 sm:$0xff]   ;;  %v10122_v62 = vld [vmem:[%s14822_s1 + $0x720] ss:$16 sps:$4 sm:$0xff]  }
  0xaf   :  { %6606 = vmatpush1.bf16.msra.mxu0 %v10036_v63  ;;  %7422 = vmatpush1.bf16.msra.mxu1 %v10039_v0  ;;  %v10125_v63 = vld [vmem:[%s14822_s1 + $0x728] ss:$16 sps:$4 sm:$0xff]   ;;  %v10130_v0 = vld [vmem:[%s14822_s1 + $0x744] ss:$16 sps:$4 sm:$0xff]  }
  0xb0   :  { %6607 = vmatprep.subr.bf16.mxu0 %v10044_v1  ;;  %7423 = vmatprep.subr.bf16.mxu1 %v10047_v2  ;;  %v10133_v1 = vld [vmem:[%s14822_s1 + $0x74c] ss:$16 sps:$4 sm:$0xff]   ;;  %v10128_v2 = vld [vmem:[%s14822_s1 + $0x740] ss:$16 sps:$4 sm:$0xff]  }
  0xb3   :  { %6608 = vmatpush1.bf16.msra.mxu0 %v10042_v3  ;;  %7424 = vmatpush1.bf16.msra.mxu1 %v10045_v4  ;;  %v10131_v3 = vld [vmem:[%s14822_s1 + $0x748] ss:$16 sps:$4 sm:$0xff]   ;;  %v10136_v4 = vld [vmem:[%s14822_s1 + $0x764] ss:$16 sps:$4 sm:$0xff]  }
  0xb4   :  { %6609 = vmatprep.subr.bf16.mxu0 %v10050_v5  ;;  %7425 = vmatprep.subr.bf16.mxu1 %v10053_v6  ;;  %v10139_v5 = vld [vmem:[%s14822_s1 + $0x76c] ss:$16 sps:$4 sm:$0xff]   ;;  %v10134_v6 = vld [vmem:[%s14822_s1 + $0x760] ss:$16 sps:$4 sm:$0xff]  }
  0xb7   :  { %6610 = vmatpush1.bf16.msra.mxu0 %v10048_v7  ;;  %7426 = vmatpush1.bf16.msra.mxu1 %v10051_v8  ;;  %v10137_v7 = vld [vmem:[%s14822_s1 + $0x768] ss:$16 sps:$4 sm:$0xff]   ;;  %v10142_v8 = vld [vmem:[%s14822_s1 + $0x784] ss:$16 sps:$4 sm:$0xff]  }
  0xb8   :  { %6611 = vmatprep.subr.bf16.mxu0 %v10057_v9  ;;  %7427 = vmatprep.subr.bf16.mxu1 %v10060_v10  ;;  %v10145_v9 = vld [vmem:[%s14822_s1 + $0x78c] ss:$16 sps:$4 sm:$0xff]   ;;  %v10140_v10 = vld [vmem:[%s14822_s1 + $0x780] ss:$16 sps:$4 sm:$0xff]  }
  0xbb   :  { %6612 = vmatpush1.bf16.msra.mxu0 %v10055_v11  ;;  %7428 = vmatpush1.bf16.msra.mxu1 %v10058_v12  ;;  %v10143_v11 = vld [vmem:[%s14822_s1 + $0x788] ss:$16 sps:$4 sm:$0xff]   ;;  %v10148_v12 = vld [vmem:[%s14822_s1 + $0x7a4] ss:$16 sps:$4 sm:$0xff]  }
  0xbc   :  { %6613 = vmatprep.subr.bf16.mxu0 %v10064_v13  ;;  %7429 = vmatprep.subr.bf16.mxu1 %v10067_v14  ;;  %v10151_v13 = vld [vmem:[%s14822_s1 + $0x7ac] ss:$16 sps:$4 sm:$0xff]   ;;  %v10146_v14 = vld [vmem:[%s14822_s1 + $0x7a0] ss:$16 sps:$4 sm:$0xff]  }
  0xbf   :  { %6614 = vmatpush1.bf16.msra.mxu0 %v10062_v15  ;;  %7430 = vmatpush1.bf16.msra.mxu1 %v10065_v16  ;;  %v10149_v15 = vld [vmem:[%s14822_s1 + $0x7a8] ss:$16 sps:$4 sm:$0xff]   ;;  %v10155_v16 = vld [vmem:[%s14822_s1 + $0x7c4] ss:$16 sps:$4 sm:$0xff]  }
  0xc0   :  { %6634 = vmatprep.subr.bf16.mxu0 %v10070_v17  ;;  %7450 = vmatprep.subr.bf16.mxu1 %v10073_v18  ;;  %v10158_v17 = vld [vmem:[%s14822_s1 + $0x7cc] ss:$16 sps:$4 sm:$0xff]   ;;  %v10153_v18 = vld [vmem:[%s14822_s1 + $0x7c0] ss:$16 sps:$4 sm:$0xff]  }
  0xc2   :  { %6616 = vmatmul.mubr.bf16.vlgmr.msra.gmra.mrb[0].mxu0 %v8439_v19  ;;  %7432 = vmatmul.mubr.bf16.vlgmr.msra.gmra.mrb[0].mxu1 %v8439_v19  ;;  %v10156_v19 = vld [vmem:[%s14822_s1 + $0x7c8] ss:$16 sps:$4 sm:$0xff]  }
  0xc3   :  { %6635 = vmatpush1.bf16.msra.mxu0 %v10068_v20  ;;  %7451 = vmatpush1.bf16.msra.mxu1 %v10071_v22  ;;  %v10162_v20 = vld [vmem:[%s14822_s1 + $0x7e4] ss:$16 sps:$4 sm:$0xff]   ;;  %v10160_v22 = vld [vmem:[%s14822_s1 + $0x7e0] ss:$16 sps:$4 sm:$0xff]  }
  0xc4   :  { %6636 = vmatprep.subr.bf16.mxu0 %v10076_v23  ;;  %7452 = vmatprep.subr.bf16.mxu1 %v10079_v24  ;;  %v10163_v23 = vld [vmem:[%s14822_s1 + $0x7e8] ss:$16 sps:$4 sm:$0xff]   ;;  %v10168_v24 = vld [vmem:[%s14822_s1 + $0x804] ss:$16 sps:$4 sm:$0xff]  }
  0xc5   :  { %6625 = vmatprep.mubr.bf16.mxu0 %v8472_v25  ;;  %7441 = vmatprep.mubr.bf16.mxu1 %v8472_v25  ;;  %v10171_v25 = vld [vmem:[%s14822_s1 + $0x80c] ss:$16 sps:$4 sm:$0xff]  }
  0xc7   :  { %6637 = vmatpush1.bf16.msra.mxu0 %v10074_v26  ;;  %7453 = vmatpush1.bf16.msra.mxu1 %v10077_v27  ;;  %v8441_v26 = vcombine.low %v12033_v32, %v12038_v33  ;;  %v10166_v27 = vld [vmem:[%s14822_s1 + $0x800] ss:$16 sps:$4 sm:$0xff]  }
  0xc8   :  { %6638 = vmatprep.subr.bf16.mxu0 %v10082_v28  ;;  %7454 = vmatprep.subr.bf16.mxu1 %v10085_v29  ;;  %v52_v28 = vld [vmem:[%s14823_s0 + $0x118] sm:$0xff]  ;;  %v10172_v33 = vld [vmem:[%s14822_s1 + $0x820] ss:$16 sps:$4 sm:$0xff]  }
  0xc9   :  { %v10169_v29 = vld [vmem:[%s14822_s1 + $0x808] ss:$16 sps:$4 sm:$0xff]   ;;  %v8474_v32 = vcombine.high %v52_v28, %v52_v28 }
  0xca   :  { %6626 = vmatmul.mubr.bf16.gmra.mrb[4].mxu0 %v8471_v31  ;;  %7442 = vmatmul.mubr.bf16.gmra.mrb[4].mxu1 %v8471_v31  ;;  %v10177_v31 = vld [vmem:[%s14822_s1 + $0x82c] ss:$16 sps:$4 sm:$0xff]  }
  0xcb   :  { %6639 = vmatpush1.bf16.msra.mxu0 %v10080_v30  ;;  %7455 = vmatpush1.bf16.msra.mxu1 %v10083_v34  ;;  %v10174_v30 = vld [vmem:[%s14822_s1 + $0x824] ss:$16 sps:$4 sm:$0xff]   ;;  %v10175_v34 = vld [vmem:[%s14822_s1 + $0x828] ss:$16 sps:$4 sm:$0xff]  }
  0xcc   :  { %6640 = vmatprep.subr.bf16.mxu0 %v10088_v35  ;;  %7456 = vmatprep.subr.bf16.mxu1 %v10091_v36  ;;  %v10180_v35 = vld [vmem:[%s14822_s1 + $0x844] ss:$16 sps:$4 sm:$0xff]   ;;  %v10183_v36 = vld [vmem:[%s14822_s1 + $0x84c] ss:$16 sps:$4 sm:$0xff]  }
  0xcd   :  { %6666 = vmatprep.mubr.bf16.mxu0 %v8442_v37  ;;  %7482 = vmatprep.mubr.bf16.mxu1 %v8442_v37  ;;  %v10178_v37 = vld [vmem:[%s14822_s1 + $0x840] ss:$16 sps:$4 sm:$0xff]  }
  0xcf   :  { %6641 = vmatpush1.bf16.msra.mxu0 %v10086_v38  ;;  %7457 = vmatpush1.bf16.msra.mxu1 %v10089_v39  ;;  %v12242_v38 = vld [vmem:[%s14823_s0 + $0x20] sm:$0xff]  ;;  %v8473_v39 = vcombine.low %v52_v28, %v52_v28  ;;  %v10263_v28 = vld [vmem:[%s14822_s1 + $0x9ec] ss:$16 sps:$4 sm:$0xff]  }
  0xd0   :  { %6642 = vmatprep.subr.bf16.mxu0 %v10094_v40  ;;  %7458 = vmatprep.subr.bf16.mxu1 %v10097_v41  ;;  %v12247_v40 = vld [vmem:[%s14823_s0 + $0xa0] sm:$0xff]  ;;  %v10181_v41 = vld [vmem:[%s14822_s1 + $0x848] ss:$16 sps:$4 sm:$0xff]  }
  0xd3   :  { %6643 = vmatpush1.bf16.msra.mxu0 %v10092_v42  ;;  %7459 = vmatpush1.bf16.msra.mxu1 %v10095_v43  ;;  %v10186_v42 = vld [vmem:[%s14822_s1 + $0x864] ss:$16 sps:$4 sm:$0xff]   ;;  %v10189_v43 = vld [vmem:[%s14822_s1 + $0x86c] ss:$16 sps:$4 sm:$0xff]  }
  0xd4   :  { %6644 = vmatprep.subr.bf16.mxu0 %v10100_v44  ;;  %7460 = vmatprep.subr.bf16.mxu1 %v10103_v45  ;;  %v8444_v44 = vcombine.high %v12242_v38, %v12247_v40  ;;  %v10184_v45 = vld [vmem:[%s14822_s1 + $0x860] ss:$16 sps:$4 sm:$0xff]  }
  0xd7   :  { %6645 = vmatpush1.bf16.msra.mxu0 %v10098_v46  ;;  %7461 = vmatpush1.bf16.msra.mxu1 %v10101_v47  ;;  %v10187_v46 = vld [vmem:[%s14822_s1 + $0x868] ss:$16 sps:$4 sm:$0xff]   ;;  %v10192_v47 = vld [vmem:[%s14822_s1 + $0x884] ss:$16 sps:$4 sm:$0xff]  }
  0xd8   :  { %6646 = vmatprep.subr.bf16.mxu0 %v10106_v48  ;;  %7462 = vmatprep.subr.bf16.mxu1 %v10109_v49  ;;  %v10195_v48 = vld [vmem:[%s14822_s1 + $0x88c] ss:$16 sps:$4 sm:$0xff]   ;;  %v10190_v49 = vld [vmem:[%s14822_s1 + $0x880] ss:$16 sps:$4 sm:$0xff]  }
  0xdb   :  { %6647 = vmatpush1.bf16.msra.mxu0 %v10104_v50  ;;  %7463 = vmatpush1.bf16.msra.mxu1 %v10107_v51  ;;  %v10193_v50 = vld [vmem:[%s14822_s1 + $0x888] ss:$16 sps:$4 sm:$0xff]   ;;  %v10198_v51 = vld [vmem:[%s14822_s1 + $0x8a4] ss:$16 sps:$4 sm:$0xff]  }
  0xdc   :  { %6648 = vmatprep.subr.bf16.mxu0 %v10112_v52  ;;  %7464 = vmatprep.subr.bf16.mxu1 %v10115_v53  ;;  %v10201_v52 = vld [vmem:[%s14822_s1 + $0x8ac] ss:$16 sps:$4 sm:$0xff]   ;;  %v10196_v53 = vld [vmem:[%s14822_s1 + $0x8a0] ss:$16 sps:$4 sm:$0xff]  }
  0xdf   :  { %6649 = vmatpush1.bf16.msra.mxu0 %v10110_v54  ;;  %7465 = vmatpush1.bf16.msra.mxu1 %v10113_v55  ;;  %v10199_v54 = vld [vmem:[%s14822_s1 + $0x8a8] ss:$16 sps:$4 sm:$0xff]   ;;  %v10204_v55 = vld [vmem:[%s14822_s1 + $0x8c4] ss:$16 sps:$4 sm:$0xff]  }
  0xe0   :  { %6650 = vmatprep.subr.bf16.mxu0 %v10118_v56  ;;  %7466 = vmatprep.subr.bf16.mxu1 %v10121_v57  ;;  %v10207_v56 = vld [vmem:[%s14822_s1 + $0x8cc] ss:$16 sps:$4 sm:$0xff]   ;;  %v10202_v57 = vld [vmem:[%s14822_s1 + $0x8c0] ss:$16 sps:$4 sm:$0xff]  }
  0xe3   :  { %6651 = vmatpush1.bf16.msra.mxu0 %v10116_v58  ;;  %7467 = vmatpush1.bf16.msra.mxu1 %v10119_v59  ;;  %v10205_v58 = vld [vmem:[%s14822_s1 + $0x8c8] ss:$16 sps:$4 sm:$0xff]   ;;  %v10210_v59 = vld [vmem:[%s14822_s1 + $0x8e4] ss:$16 sps:$4 sm:$0xff]  }
  0xe4   :  { %6652 = vmatprep.subr.bf16.mxu0 %v10124_v60  ;;  %7468 = vmatprep.subr.bf16.mxu1 %v10127_v61  ;;  %v10213_v60 = vld [vmem:[%s14822_s1 + $0x8ec] ss:$16 sps:$4 sm:$0xff]   ;;  %v10208_v61 = vld [vmem:[%s14822_s1 + $0x8e0] ss:$16 sps:$4 sm:$0xff]  }
  0xe7   :  { %6653 = vmatpush1.bf16.msra.mxu0 %v10122_v62  ;;  %7469 = vmatpush1.bf16.msra.mxu1 %v10125_v63  ;;  %v10211_v62 = vld [vmem:[%s14822_s1 + $0x8e8] ss:$16 sps:$4 sm:$0xff]   ;;  %v10216_v63 = vld [vmem:[%s14822_s1 + $0x904] ss:$16 sps:$4 sm:$0xff]  }
  0xe8   :  { %6654 = vmatprep.subr.bf16.mxu0 %v10130_v0  ;;  %7470 = vmatprep.subr.bf16.mxu1 %v10133_v1  ;;  %v10219_v0 = vld [vmem:[%s14822_s1 + $0x90c] ss:$16 sps:$4 sm:$0xff]   ;;  %v10214_v1 = vld [vmem:[%s14822_s1 + $0x900] ss:$16 sps:$4 sm:$0xff]  }
  0xeb   :  { %6655 = vmatpush1.bf16.msra.mxu0 %v10128_v2  ;;  %7471 = vmatpush1.bf16.msra.mxu1 %v10131_v3  ;;  %v10217_v2 = vld [vmem:[%s14822_s1 + $0x908] ss:$16 sps:$4 sm:$0xff]   ;;  %v10222_v3 = vld [vmem:[%s14822_s1 + $0x924] ss:$16 sps:$4 sm:$0xff]  }
  0xec   :  { %6656 = vmatprep.subr.bf16.mxu0 %v10136_v4  ;;  %7472 = vmatprep.subr.bf16.mxu1 %v10139_v5  ;;  %v10225_v4 = vld [vmem:[%s14822_s1 + $0x92c] ss:$16 sps:$4 sm:$0xff]   ;;  %v10220_v5 = vld [vmem:[%s14822_s1 + $0x920] ss:$16 sps:$4 sm:$0xff]  }
  0xef   :  { %6657 = vmatpush1.bf16.msra.mxu0 %v10134_v6  ;;  %7473 = vmatpush1.bf16.msra.mxu1 %v10137_v7  ;;  %v10223_v6 = vld [vmem:[%s14822_s1 + $0x928] ss:$16 sps:$4 sm:$0xff]   ;;  %v10228_v7 = vld [vmem:[%s14822_s1 + $0x944] ss:$16 sps:$4 sm:$0xff]  }
  0xf0   :  { %6658 = vmatprep.subr.bf16.mxu0 %v10142_v8  ;;  %7474 = vmatprep.subr.bf16.mxu1 %v10145_v9  ;;  %v10231_v8 = vld [vmem:[%s14822_s1 + $0x94c] ss:$16 sps:$4 sm:$0xff]   ;;  %v10226_v9 = vld [vmem:[%s14822_s1 + $0x940] ss:$16 sps:$4 sm:$0xff]  }
  0xf3   :  { %6659 = vmatpush1.bf16.msra.mxu0 %v10140_v10  ;;  %7475 = vmatpush1.bf16.msra.mxu1 %v10143_v11  ;;  %v10229_v10 = vld [vmem:[%s14822_s1 + $0x948] ss:$16 sps:$4 sm:$0xff]   ;;  %v10234_v11 = vld [vmem:[%s14822_s1 + $0x964] ss:$16 sps:$4 sm:$0xff]  }
  0xf4   :  { %6660 = vmatprep.subr.bf16.mxu0 %v10148_v12  ;;  %7476 = vmatprep.subr.bf16.mxu1 %v10151_v13  ;;  %v10237_v12 = vld [vmem:[%s14822_s1 + $0x96c] ss:$16 sps:$4 sm:$0xff]   ;;  %v10232_v13 = vld [vmem:[%s14822_s1 + $0x960] ss:$16 sps:$4 sm:$0xff]  }
  0xf7   :  { %6661 = vmatpush1.bf16.msra.mxu0 %v10146_v14  ;;  %7477 = vmatpush1.bf16.msra.mxu1 %v10149_v15  ;;  %v10235_v14 = vld [vmem:[%s14822_s1 + $0x968] ss:$16 sps:$4 sm:$0xff]   ;;  %v10240_v15 = vld [vmem:[%s14822_s1 + $0x984] ss:$16 sps:$4 sm:$0xff]  }
  0xf8   :  { %6662 = vmatprep.subr.bf16.mxu0 %v10155_v16  ;;  %7478 = vmatprep.subr.bf16.mxu1 %v10158_v17  ;;  %v10243_v16 = vld [vmem:[%s14822_s1 + $0x98c] ss:$16 sps:$4 sm:$0xff]   ;;  %v10238_v17 = vld [vmem:[%s14822_s1 + $0x980] ss:$16 sps:$4 sm:$0xff]  }
  0xfb   :  { %6663 = vmatpush1.bf16.msra.mxu0 %v10153_v18  ;;  %7479 = vmatpush1.bf16.msra.mxu1 %v10156_v19  ;;  %v10241_v18 = vld [vmem:[%s14822_s1 + $0x988] ss:$16 sps:$4 sm:$0xff]   ;;  %v10246_v19 = vld [vmem:[%s14822_s1 + $0x9a4] ss:$16 sps:$4 sm:$0xff]  }
  0xfc   :  { %6664 = vmatprep.subr.bf16.mxu0 %v10162_v20  ;;  %7480 = vmatprep.subr.bf16.mxu1 %v10165_v21  ;;  %v10249_v20 = vld [vmem:[%s14822_s1 + $0x9ac] ss:$16 sps:$4 sm:$0xff]   ;;  %v10244_v21 = vld [vmem:[%s14822_s1 + $0x9a0] ss:$16 sps:$4 sm:$0xff]  }
  0xff   :  { %6665 = vmatpush1.bf16.msra.mxu0 %v10160_v22  ;;  %7481 = vmatpush1.bf16.msra.mxu1 %v10163_v23  ;;  %v10247_v22 = vld [vmem:[%s14822_s1 + $0x9a8] ss:$16 sps:$4 sm:$0xff]   ;;  %v10253_v23 = vld [vmem:[%s14822_s1 + $0x9c4] ss:$16 sps:$4 sm:$0xff]  }
 0x100   :  { %6685 = vmatprep.subr.bf16.mxu0 %v10168_v24  ;;  %7501 = vmatprep.subr.bf16.mxu1 %v10171_v25  ;;  %v10256_v24 = vld [vmem:[%s14822_s1 + $0x9cc] ss:$16 sps:$4 sm:$0xff]   ;;  %v10251_v25 = vld [vmem:[%s14822_s1 + $0x9c0] ss:$16 sps:$4 sm:$0xff]  }
 0x102   :  { %6667 = vmatmul.mubr.bf16.vlgmr.msra.gmra.mrb[0].mxu0 %v8441_v26  ;;  %7483 = vmatmul.mubr.bf16.vlgmr.msra.gmra.mrb[0].mxu1 %v8441_v26  ;;  %v10254_v26 = vld [vmem:[%s14822_s1 + $0x9c8] ss:$16 sps:$4 sm:$0xff]  }
 0x103   :  { %6686 = vmatpush1.bf16.msra.mxu0 %v10166_v27  ;;  %7502 = vmatpush1.bf16.msra.mxu1 %v10169_v29  ;;  %v10260_v27 = vld [vmem:[%s14822_s1 + $0x9e4] ss:$16 sps:$4 sm:$0xff]   ;;  %v10258_v29 = vld [vmem:[%s14822_s1 + $0x9e0] ss:$16 sps:$4 sm:$0xff]  }
 0x104   :  { %6687 = vmatprep.subr.bf16.mxu0 %v10174_v30  ;;  %7503 = vmatprep.subr.bf16.mxu1 %v10177_v31  ;;  %v10261_v30 = vld [vmem:[%s14822_s1 + $0x9e8] ss:$16 sps:$4 sm:$0xff]   ;;  %v10266_v31 = vld [vmem:[%s14822_s1 + $0xa04] ss:$16 sps:$4 sm:$0xff]  }
 0x105   :  { %6676 = vmatprep.mubr.bf16.mxu0 %v8474_v32  ;;  %7492 = vmatprep.mubr.bf16.mxu1 %v8474_v32  ;;  %v10269_v32 = vld [vmem:[%s14822_s1 + $0xa0c] ss:$16 sps:$4 sm:$0xff]  }
 0x107   :  { %6688 = vmatpush1.bf16.msra.mxu0 %v10172_v33  ;;  %7504 = vmatpush1.bf16.msra.mxu1 %v10175_v34  ;;  %v53_v33 = vld [vmem:[%s14823_s0 + $0x120] sm:$0xff]  ;;  %v8443_v34 = vcombine.low %v12242_v38, %v12247_v40  ;;  %v10275_v38 = vld [vmem:[%s14822_s1 + $0xa2c] ss:$16 sps:$4 sm:$0xff]   ;;  %v10273_v40 = vld [vmem:[%s14822_s1 + $0xa28] ss:$16 sps:$4 sm:$0xff]  }
 0x108   :  { %6689 = vmatprep.subr.bf16.mxu0 %v10180_v35  ;;  %7505 = vmatprep.subr.bf16.mxu1 %v10183_v36  ;;  %v10264_v35 = vld [vmem:[%s14822_s1 + $0xa00] ss:$16 sps:$4 sm:$0xff]   ;;  %v10267_v36 = vld [vmem:[%s14822_s1 + $0xa08] ss:$16 sps:$4 sm:$0xff]  }
 0x10a   :  { %6677 = vmatmul.mubr.bf16.gmra.mrb[4].mxu0 %v8473_v39  ;;  %7493 = vmatmul.mubr.bf16.gmra.mrb[4].mxu1 %v8473_v39  ;;  %v10270_v39 = vld [vmem:[%s14822_s1 + $0xa20] ss:$16 sps:$4 sm:$0xff]  }
 0x10b   :  { %6690 = vmatpush1.bf16.msra.mxu0 %v10178_v37  ;;  %7506 = vmatpush1.bf16.msra.mxu1 %v10181_v41  ;;  %v10272_v37 = vld [vmem:[%s14822_s1 + $0xa24] ss:$16 sps:$4 sm:$0xff]   ;;  %v8476_v41 = vcombine.high %v53_v33, %v53_v33 }
 0x10c   :  { %6691 = vmatprep.subr.bf16.mxu0 %v10186_v42  ;;  %7507 = vmatprep.subr.bf16.mxu1 %v10189_v43  ;;  %v10278_v42 = vld [vmem:[%s14822_s1 + $0xa44] ss:$16 sps:$4 sm:$0xff]   ;;  %v10281_v43 = vld [vmem:[%s14822_s1 + $0xa4c] ss:$16 sps:$4 sm:$0xff]  }
 0x10d   :  { %6717 = vmatprep.mubr.bf16.mxu0 %v8444_v44  ;;  %7533 = vmatprep.mubr.bf16.mxu1 %v8444_v44  ;;  %v12448_v44 = vld [vmem:[%s14823_s0 + $0x28] sm:$0xff] }
 0x10f   :  { %6692 = vmatpush1.bf16.msra.mxu0 %v10184_v45  ;;  %7508 = vmatpush1.bf16.msra.mxu1 %v10187_v46  ;;  %v12453_v45 = vld [vmem:[%s14823_s0 + $0xa8] sm:$0xff]  ;;  %v8475_v46 = vcombine.low %v53_v33, %v53_v33 }
 0x110   :  { %6693 = vmatprep.subr.bf16.mxu0 %v10192_v47  ;;  %7509 = vmatprep.subr.bf16.mxu1 %v10195_v48  ;;  %v10276_v47 = vld [vmem:[%s14822_s1 + $0xa40] ss:$16 sps:$4 sm:$0xff]   ;;  %v10279_v48 = vld [vmem:[%s14822_s1 + $0xa48] ss:$16 sps:$4 sm:$0xff]  }
 0x111   :  { %v10352_v33 = vld [vmem:[%s14822_s1 + $0xbc8] ss:$16 sps:$4 sm:$0xff]  }
 0x113   :  { %6694 = vmatpush1.bf16.msra.mxu0 %v10190_v49  ;;  %7510 = vmatpush1.bf16.msra.mxu1 %v10193_v50  ;;  %v10284_v49 = vld [vmem:[%s14822_s1 + $0xa64] ss:$16 sps:$4 sm:$0xff]   ;;  %v10287_v50 = vld [vmem:[%s14822_s1 + $0xa6c] ss:$16 sps:$4 sm:$0xff]  }
 0x114   :  { %6695 = vmatprep.subr.bf16.mxu0 %v10198_v51  ;;  %7511 = vmatprep.subr.bf16.mxu1 %v10201_v52  ;;  %v8446_v51 = vcombine.high %v12448_v44, %v12453_v45  ;;  %v10282_v52 = vld [vmem:[%s14822_s1 + $0xa60] ss:$16 sps:$4 sm:$0xff]  }
 0x117   :  { %6696 = vmatpush1.bf16.msra.mxu0 %v10196_v53  ;;  %7512 = vmatpush1.bf16.msra.mxu1 %v10199_v54  ;;  %v10285_v53 = vld [vmem:[%s14822_s1 + $0xa68] ss:$16 sps:$4 sm:$0xff]   ;;  %v10290_v54 = vld [vmem:[%s14822_s1 + $0xa84] ss:$16 sps:$4 sm:$0xff]  }
 0x118   :  { %6697 = vmatprep.subr.bf16.mxu0 %v10204_v55  ;;  %7513 = vmatprep.subr.bf16.mxu1 %v10207_v56  ;;  %v10293_v55 = vld [vmem:[%s14822_s1 + $0xa8c] ss:$16 sps:$4 sm:$0xff]   ;;  %v10288_v56 = vld [vmem:[%s14822_s1 + $0xa80] ss:$16 sps:$4 sm:$0xff]  }
 0x11b   :  { %6698 = vmatpush1.bf16.msra.mxu0 %v10202_v57  ;;  %7514 = vmatpush1.bf16.msra.mxu1 %v10205_v58  ;;  %v10291_v57 = vld [vmem:[%s14822_s1 + $0xa88] ss:$16 sps:$4 sm:$0xff]   ;;  %v10296_v58 = vld [vmem:[%s14822_s1 + $0xaa4] ss:$16 sps:$4 sm:$0xff]  }
 0x11c   :  { %6699 = vmatprep.subr.bf16.mxu0 %v10210_v59  ;;  %7515 = vmatprep.subr.bf16.mxu1 %v10213_v60  ;;  %v10299_v59 = vld [vmem:[%s14822_s1 + $0xaac] ss:$16 sps:$4 sm:$0xff]   ;;  %v10294_v60 = vld [vmem:[%s14822_s1 + $0xaa0] ss:$16 sps:$4 sm:$0xff]  }
 0x11f   :  { %6700 = vmatpush1.bf16.msra.mxu0 %v10208_v61  ;;  %7516 = vmatpush1.bf16.msra.mxu1 %v10211_v62  ;;  %v10297_v61 = vld [vmem:[%s14822_s1 + $0xaa8] ss:$16 sps:$4 sm:$0xff]   ;;  %v10302_v62 = vld [vmem:[%s14822_s1 + $0xac4] ss:$16 sps:$4 sm:$0xff]  }
 0x120   :  { %6701 = vmatprep.subr.bf16.mxu0 %v10216_v63  ;;  %7517 = vmatprep.subr.bf16.mxu1 %v10219_v0  ;;  %v10305_v63 = vld [vmem:[%s14822_s1 + $0xacc] ss:$16 sps:$4 sm:$0xff]   ;;  %v10300_v0 = vld [vmem:[%s14822_s1 + $0xac0] ss:$16 sps:$4 sm:$0xff]  }
 0x123   :  { %6702 = vmatpush1.bf16.msra.mxu0 %v10214_v1  ;;  %7518 = vmatpush1.bf16.msra.mxu1 %v10217_v2  ;;  %v10303_v1 = vld [vmem:[%s14822_s1 + $0xac8] ss:$16 sps:$4 sm:$0xff]   ;;  %v10308_v2 = vld [vmem:[%s14822_s1 + $0xae4] ss:$16 sps:$4 sm:$0xff]  }
 0x124   :  { %6703 = vmatprep.subr.bf16.mxu0 %v10222_v3  ;;  %7519 = vmatprep.subr.bf16.mxu1 %v10225_v4  ;;  %v10311_v3 = vld [vmem:[%s14822_s1 + $0xaec] ss:$16 sps:$4 sm:$0xff]   ;;  %v10306_v4 = vld [vmem:[%s14822_s1 + $0xae0] ss:$16 sps:$4 sm:$0xff]  }
 0x127   :  { %6704 = vmatpush1.bf16.msra.mxu0 %v10220_v5  ;;  %7520 = vmatpush1.bf16.msra.mxu1 %v10223_v6  ;;  %v10309_v5 = vld [vmem:[%s14822_s1 + $0xae8] ss:$16 sps:$4 sm:$0xff]   ;;  %v10314_v6 = vld [vmem:[%s14822_s1 + $0xb04] ss:$16 sps:$4 sm:$0xff]  }
 0x128   :  { %6705 = vmatprep.subr.bf16.mxu0 %v10228_v7  ;;  %7521 = vmatprep.subr.bf16.mxu1 %v10231_v8  ;;  %v10317_v7 = vld [vmem:[%s14822_s1 + $0xb0c] ss:$16 sps:$4 sm:$0xff]   ;;  %v10312_v8 = vld [vmem:[%s14822_s1 + $0xb00] ss:$16 sps:$4 sm:$0xff]  }
 0x12b   :  { %6706 = vmatpush1.bf16.msra.mxu0 %v10226_v9  ;;  %7522 = vmatpush1.bf16.msra.mxu1 %v10229_v10  ;;  %v10315_v9 = vld [vmem:[%s14822_s1 + $0xb08] ss:$16 sps:$4 sm:$0xff]   ;;  %v10320_v10 = vld [vmem:[%s14822_s1 + $0xb24] ss:$16 sps:$4 sm:$0xff]  }
 0x12c   :  { %6707 = vmatprep.subr.bf16.mxu0 %v10234_v11  ;;  %7523 = vmatprep.subr.bf16.mxu1 %v10237_v12  ;;  %v10323_v11 = vld [vmem:[%s14822_s1 + $0xb2c] ss:$16 sps:$4 sm:$0xff]   ;;  %v10318_v12 = vld [vmem:[%s14822_s1 + $0xb20] ss:$16 sps:$4 sm:$0xff]  }
 0x12f   :  { %6708 = vmatpush1.bf16.msra.mxu0 %v10232_v13  ;;  %7524 = vmatpush1.bf16.msra.mxu1 %v10235_v14  ;;  %v10321_v13 = vld [vmem:[%s14822_s1 + $0xb28] ss:$16 sps:$4 sm:$0xff]   ;;  %v10326_v14 = vld [vmem:[%s14822_s1 + $0xb44] ss:$16 sps:$4 sm:$0xff]  }
 0x130   :  { %6709 = vmatprep.subr.bf16.mxu0 %v10240_v15  ;;  %7525 = vmatprep.subr.bf16.mxu1 %v10243_v16  ;;  %v10329_v15 = vld [vmem:[%s14822_s1 + $0xb4c] ss:$16 sps:$4 sm:$0xff]   ;;  %v10324_v16 = vld [vmem:[%s14822_s1 + $0xb40] ss:$16 sps:$4 sm:$0xff]  }
 0x133   :  { %6710 = vmatpush1.bf16.msra.mxu0 %v10238_v17  ;;  %7526 = vmatpush1.bf16.msra.mxu1 %v10241_v18  ;;  %v10327_v17 = vld [vmem:[%s14822_s1 + $0xb48] ss:$16 sps:$4 sm:$0xff]   ;;  %v10332_v18 = vld [vmem:[%s14822_s1 + $0xb64] ss:$16 sps:$4 sm:$0xff]  }
 0x134   :  { %6711 = vmatprep.subr.bf16.mxu0 %v10246_v19  ;;  %7527 = vmatprep.subr.bf16.mxu1 %v10249_v20  ;;  %v10335_v19 = vld [vmem:[%s14822_s1 + $0xb6c] ss:$16 sps:$4 sm:$0xff]   ;;  %v10330_v20 = vld [vmem:[%s14822_s1 + $0xb60] ss:$16 sps:$4 sm:$0xff]  }
 0x137   :  { %6712 = vmatpush1.bf16.msra.mxu0 %v10244_v21  ;;  %7528 = vmatpush1.bf16.msra.mxu1 %v10247_v22  ;;  %v10333_v21 = vld [vmem:[%s14822_s1 + $0xb68] ss:$16 sps:$4 sm:$0xff]   ;;  %v10338_v22 = vld [vmem:[%s14822_s1 + $0xb84] ss:$16 sps:$4 sm:$0xff]  }
 0x138   :  { %6713 = vmatprep.subr.bf16.mxu0 %v10253_v23  ;;  %7529 = vmatprep.subr.bf16.mxu1 %v10256_v24  ;;  %v10341_v23 = vld [vmem:[%s14822_s1 + $0xb8c] ss:$16 sps:$4 sm:$0xff]   ;;  %v10336_v24 = vld [vmem:[%s14822_s1 + $0xb80] ss:$16 sps:$4 sm:$0xff]  }
 0x13b   :  { %6714 = vmatpush1.bf16.msra.mxu0 %v10251_v25  ;;  %7530 = vmatpush1.bf16.msra.mxu1 %v10254_v26  ;;  %v10339_v25 = vld [vmem:[%s14822_s1 + $0xb88] ss:$16 sps:$4 sm:$0xff]   ;;  %v10344_v26 = vld [vmem:[%s14822_s1 + $0xba4] ss:$16 sps:$4 sm:$0xff]  }
 0x13c   :  { %6715 = vmatprep.subr.bf16.mxu0 %v10260_v27  ;;  %7531 = vmatprep.subr.bf16.mxu1 %v10263_v28  ;;  %v10347_v27 = vld [vmem:[%s14822_s1 + $0xbac] ss:$16 sps:$4 sm:$0xff]   ;;  %v10342_v28 = vld [vmem:[%s14822_s1 + $0xba0] ss:$16 sps:$4 sm:$0xff]  }
 0x13f   :  { %6716 = vmatpush1.bf16.msra.mxu0 %v10258_v29  ;;  %7532 = vmatpush1.bf16.msra.mxu1 %v10261_v30  ;;  %v10345_v29 = vld [vmem:[%s14822_s1 + $0xba8] ss:$16 sps:$4 sm:$0xff]   ;;  %v10351_v30 = vld [vmem:[%s14822_s1 + $0xbc4] ss:$16 sps:$4 sm:$0xff]  }
 0x140   :  { %6736 = vmatprep.subr.bf16.mxu0 %v10266_v31  ;;  %7552 = vmatprep.subr.bf16.mxu1 %v10269_v32  ;;  %v10354_v31 = vld [vmem:[%s14822_s1 + $0xbcc] ss:$16 sps:$4 sm:$0xff]   ;;  %v10349_v32 = vld [vmem:[%s14822_s1 + $0xbc0] ss:$16 sps:$4 sm:$0xff]  }
 0x142   :  { %6718 = vmatmul.mubr.bf16.vlgmr.msra.gmra.mrb[0].mxu0 %v8443_v34  ;;  %7534 = vmatmul.mubr.bf16.vlgmr.msra.gmra.mrb[0].mxu1 %v8443_v34  ;;  %v10358_v34 = vld [vmem:[%s14822_s1 + $0xbe4] ss:$16 sps:$4 sm:$0xff]  }
 0x143   :  { %6737 = vmatpush1.bf16.msra.mxu0 %v10264_v35  ;;  %7553 = vmatpush1.bf16.msra.mxu1 %v10267_v36  ;;  %v10361_v35 = vld [vmem:[%s14822_s1 + $0xbec] ss:$16 sps:$4 sm:$0xff]   ;;  %v10356_v36 = vld [vmem:[%s14822_s1 + $0xbe0] ss:$16 sps:$4 sm:$0xff]  }
 0x144   :  { %6738 = vmatprep.subr.bf16.mxu0 %v10272_v37  ;;  %7554 = vmatprep.subr.bf16.mxu1 %v10275_v38  ;;  %v10359_v37 = vld [vmem:[%s14822_s1 + $0xbe8] ss:$16 sps:$4 sm:$0xff]   ;;  %v10364_v38 = vld [vmem:[%s14822_s1 + $0xc04] ss:$16 sps:$4 sm:$0xff]  }
 0x145   :  { %6727 = vmatprep.mubr.bf16.mxu0 %v8476_v41  ;;  %7543 = vmatprep.mubr.bf16.mxu1 %v8476_v41  ;;  %v8445_v41 = vcombine.low %v12448_v44, %v12453_v45  ;;  %v10373_v44 = vld [vmem:[%s14822_s1 + $0xc2c] ss:$16 sps:$4 sm:$0xff]   ;;  %v10368_v45 = vld [vmem:[%s14822_s1 + $0xc20] ss:$16 sps:$4 sm:$0xff]  }
 0x147   :  { %6739 = vmatpush1.bf16.msra.mxu0 %v10270_v39  ;;  %7555 = vmatpush1.bf16.msra.mxu1 %v10273_v40  ;;  %v10367_v39 = vld [vmem:[%s14822_s1 + $0xc0c] ss:$16 sps:$4 sm:$0xff]  }
 0x148   :  { %6740 = vmatprep.subr.bf16.mxu0 %v10278_v42  ;;  %7556 = vmatprep.subr.bf16.mxu1 %v10281_v43  ;;  %v54_v40 = vld [vmem:[%s14823_s0 + $0x128] sm:$0xff]  ;;  %v10362_v42 = vld [vmem:[%s14822_s1 + $0xc00] ss:$16 sps:$4 sm:$0xff]  }
 0x149   :  { %v10365_v43 = vld [vmem:[%s14822_s1 + $0xc08] ss:$16 sps:$4 sm:$0xff]  }
 0x14a   :  { %6728 = vmatmul.mubr.bf16.gmra.mrb[4].mxu0 %v8475_v46  ;;  %7544 = vmatmul.mubr.bf16.gmra.mrb[4].mxu1 %v8475_v46  ;;  %v10370_v46 = vld [vmem:[%s14822_s1 + $0xc24] ss:$16 sps:$4 sm:$0xff]  }
 0x14b   :  { %6741 = vmatpush1.bf16.msra.mxu0 %v10276_v47  ;;  %7557 = vmatpush1.bf16.msra.mxu1 %v10279_v48  ;;  %v10371_v47 = vld [vmem:[%s14822_s1 + $0xc28] ss:$16 sps:$4 sm:$0xff]   ;;  %v8478_v48 = vcombine.high %v54_v40, %v54_v40 }
 0x14c   :  { %6742 = vmatprep.subr.bf16.mxu0 %v10284_v49  ;;  %7558 = vmatprep.subr.bf16.mxu1 %v10287_v50  ;;  %v10376_v49 = vld [vmem:[%s14822_s1 + $0xc44] ss:$16 sps:$4 sm:$0xff]   ;;  %v10379_v50 = vld [vmem:[%s14822_s1 + $0xc4c] ss:$16 sps:$4 sm:$0xff]  }
 0x14d   :  { %6768 = vmatprep.mubr.bf16.mxu0 %v8446_v51  ;;  %7584 = vmatprep.mubr.bf16.mxu1 %v8446_v51  ;;  %v12657_v51 = vld [vmem:[%s14823_s0 + $0x30] sm:$0xff] }
 0x14f   :  { %6743 = vmatpush1.bf16.msra.mxu0 %v10282_v52  ;;  %7559 = vmatpush1.bf16.msra.mxu1 %v10285_v53  ;;  %v12662_v52 = vld [vmem:[%s14823_s0 + $0xb0] sm:$0xff]  ;;  %v8477_v53 = vcombine.low %v54_v40, %v54_v40  ;;  %v10450_v40 = vld [vmem:[%s14822_s1 + $0xdc8] ss:$16 sps:$4 sm:$0xff]  }
 0x150   :  { %6744 = vmatprep.subr.bf16.mxu0 %v10290_v54  ;;  %7560 = vmatprep.subr.bf16.mxu1 %v10293_v55  ;;  %v10374_v54 = vld [vmem:[%s14822_s1 + $0xc40] ss:$16 sps:$4 sm:$0xff]   ;;  %v10377_v55 = vld [vmem:[%s14822_s1 + $0xc48] ss:$16 sps:$4 sm:$0xff]  }
 0x153   :  { %6745 = vmatpush1.bf16.msra.mxu0 %v10288_v56  ;;  %7561 = vmatpush1.bf16.msra.mxu1 %v10291_v57  ;;  %v10382_v56 = vld [vmem:[%s14822_s1 + $0xc64] ss:$16 sps:$4 sm:$0xff]   ;;  %v10385_v57 = vld [vmem:[%s14822_s1 + $0xc6c] ss:$16 sps:$4 sm:$0xff]  }
 0x154   :  { %6746 = vmatprep.subr.bf16.mxu0 %v10296_v58  ;;  %7562 = vmatprep.subr.bf16.mxu1 %v10299_v59  ;;  %v8448_v58 = vcombine.high %v12657_v51, %v12662_v52  ;;  %v10380_v59 = vld [vmem:[%s14822_s1 + $0xc60] ss:$16 sps:$4 sm:$0xff]  }
 0x157   :  { %6747 = vmatpush1.bf16.msra.mxu0 %v10294_v60  ;;  %7563 = vmatpush1.bf16.msra.mxu1 %v10297_v61  ;;  %v10383_v60 = vld [vmem:[%s14822_s1 + $0xc68] ss:$16 sps:$4 sm:$0xff]   ;;  %v10388_v61 = vld [vmem:[%s14822_s1 + $0xc84] ss:$16 sps:$4 sm:$0xff]  }
 0x158   :  { %6748 = vmatprep.subr.bf16.mxu0 %v10302_v62  ;;  %7564 = vmatprep.subr.bf16.mxu1 %v10305_v63  ;;  %v10391_v62 = vld [vmem:[%s14822_s1 + $0xc8c] ss:$16 sps:$4 sm:$0xff]   ;;  %v10386_v63 = vld [vmem:[%s14822_s1 + $0xc80] ss:$16 sps:$4 sm:$0xff]  }
 0x15b   :  { %6749 = vmatpush1.bf16.msra.mxu0 %v10300_v0  ;;  %7565 = vmatpush1.bf16.msra.mxu1 %v10303_v1  ;;  %v10389_v0 = vld [vmem:[%s14822_s1 + $0xc88] ss:$16 sps:$4 sm:$0xff]   ;;  %v10394_v1 = vld [vmem:[%s14822_s1 + $0xca4] ss:$16 sps:$4 sm:$0xff]  }
 0x15c   :  { %6750 = vmatprep.subr.bf16.mxu0 %v10308_v2  ;;  %7566 = vmatprep.subr.bf16.mxu1 %v10311_v3  ;;  %v10397_v2 = vld [vmem:[%s14822_s1 + $0xcac] ss:$16 sps:$4 sm:$0xff]   ;;  %v10392_v3 = vld [vmem:[%s14822_s1 + $0xca0] ss:$16 sps:$4 sm:$0xff]  }
 0x15f   :  { %6751 = vmatpush1.bf16.msra.mxu0 %v10306_v4  ;;  %7567 = vmatpush1.bf16.msra.mxu1 %v10309_v5  ;;  %v10395_v4 = vld [vmem:[%s14822_s1 + $0xca8] ss:$16 sps:$4 sm:$0xff]   ;;  %v10400_v5 = vld [vmem:[%s14822_s1 + $0xcc4] ss:$16 sps:$4 sm:$0xff]  }
 0x160   :  { %6752 = vmatprep.subr.bf16.mxu0 %v10314_v6  ;;  %7568 = vmatprep.subr.bf16.mxu1 %v10317_v7  ;;  %v10403_v6 = vld [vmem:[%s14822_s1 + $0xccc] ss:$16 sps:$4 sm:$0xff]   ;;  %v10398_v7 = vld [vmem:[%s14822_s1 + $0xcc0] ss:$16 sps:$4 sm:$0xff]  }
 0x163   :  { %6753 = vmatpush1.bf16.msra.mxu0 %v10312_v8  ;;  %7569 = vmatpush1.bf16.msra.mxu1 %v10315_v9  ;;  %v10401_v8 = vld [vmem:[%s14822_s1 + $0xcc8] ss:$16 sps:$4 sm:$0xff]   ;;  %v10406_v9 = vld [vmem:[%s14822_s1 + $0xce4] ss:$16 sps:$4 sm:$0xff]  }
 0x164   :  { %6754 = vmatprep.subr.bf16.mxu0 %v10320_v10  ;;  %7570 = vmatprep.subr.bf16.mxu1 %v10323_v11  ;;  %v10409_v10 = vld [vmem:[%s14822_s1 + $0xcec] ss:$16 sps:$4 sm:$0xff]   ;;  %v10404_v11 = vld [vmem:[%s14822_s1 + $0xce0] ss:$16 sps:$4 sm:$0xff]  }
 0x167   :  { %6755 = vmatpush1.bf16.msra.mxu0 %v10318_v12  ;;  %7571 = vmatpush1.bf16.msra.mxu1 %v10321_v13  ;;  %v10407_v12 = vld [vmem:[%s14822_s1 + $0xce8] ss:$16 sps:$4 sm:$0xff]   ;;  %v10412_v13 = vld [vmem:[%s14822_s1 + $0xd04] ss:$16 sps:$4 sm:$0xff]  }
 0x168   :  { %6756 = vmatprep.subr.bf16.mxu0 %v10326_v14  ;;  %7572 = vmatprep.subr.bf16.mxu1 %v10329_v15  ;;  %v10415_v14 = vld [vmem:[%s14822_s1 + $0xd0c] ss:$16 sps:$4 sm:$0xff]   ;;  %v10410_v15 = vld [vmem:[%s14822_s1 + $0xd00] ss:$16 sps:$4 sm:$0xff]  }
 0x16b   :  { %6757 = vmatpush1.bf16.msra.mxu0 %v10324_v16  ;;  %7573 = vmatpush1.bf16.msra.mxu1 %v10327_v17  ;;  %v10413_v16 = vld [vmem:[%s14822_s1 + $0xd08] ss:$16 sps:$4 sm:$0xff]   ;;  %v10418_v17 = vld [vmem:[%s14822_s1 + $0xd24] ss:$16 sps:$4 sm:$0xff]  }
 0x16c   :  { %6758 = vmatprep.subr.bf16.mxu0 %v10332_v18  ;;  %7574 = vmatprep.subr.bf16.mxu1 %v10335_v19  ;;  %v10421_v18 = vld [vmem:[%s14822_s1 + $0xd2c] ss:$16 sps:$4 sm:$0xff]   ;;  %v10416_v19 = vld [vmem:[%s14822_s1 + $0xd20] ss:$16 sps:$4 sm:$0xff]  }
 0x16f   :  { %6759 = vmatpush1.bf16.msra.mxu0 %v10330_v20  ;;  %7575 = vmatpush1.bf16.msra.mxu1 %v10333_v21  ;;  %v10419_v20 = vld [vmem:[%s14822_s1 + $0xd28] ss:$16 sps:$4 sm:$0xff]   ;;  %v10424_v21 = vld [vmem:[%s14822_s1 + $0xd44] ss:$16 sps:$4 sm:$0xff]  }
 0x170   :  { %6760 = vmatprep.subr.bf16.mxu0 %v10338_v22  ;;  %7576 = vmatprep.subr.bf16.mxu1 %v10341_v23  ;;  %v10427_v22 = vld [vmem:[%s14822_s1 + $0xd4c] ss:$16 sps:$4 sm:$0xff]   ;;  %v10422_v23 = vld [vmem:[%s14822_s1 + $0xd40] ss:$16 sps:$4 sm:$0xff]  }
 0x173   :  { %6761 = vmatpush1.bf16.msra.mxu0 %v10336_v24  ;;  %7577 = vmatpush1.bf16.msra.mxu1 %v10339_v25  ;;  %v10425_v24 = vld [vmem:[%s14822_s1 + $0xd48] ss:$16 sps:$4 sm:$0xff]   ;;  %v10430_v25 = vld [vmem:[%s14822_s1 + $0xd64] ss:$16 sps:$4 sm:$0xff]  }
 0x174   :  { %6762 = vmatprep.subr.bf16.mxu0 %v10344_v26  ;;  %7578 = vmatprep.subr.bf16.mxu1 %v10347_v27  ;;  %v10433_v26 = vld [vmem:[%s14822_s1 + $0xd6c] ss:$16 sps:$4 sm:$0xff]   ;;  %v10428_v27 = vld [vmem:[%s14822_s1 + $0xd60] ss:$16 sps:$4 sm:$0xff]  }
 0x177   :  { %6763 = vmatpush1.bf16.msra.mxu0 %v10342_v28  ;;  %7579 = vmatpush1.bf16.msra.mxu1 %v10345_v29  ;;  %v10431_v28 = vld [vmem:[%s14822_s1 + $0xd68] ss:$16 sps:$4 sm:$0xff]   ;;  %v10436_v29 = vld [vmem:[%s14822_s1 + $0xd84] ss:$16 sps:$4 sm:$0xff]  }
 0x178   :  { %6764 = vmatprep.subr.bf16.mxu0 %v10351_v30  ;;  %7580 = vmatprep.subr.bf16.mxu1 %v10354_v31  ;;  %v10439_v30 = vld [vmem:[%s14822_s1 + $0xd8c] ss:$16 sps:$4 sm:$0xff]   ;;  %v10434_v31 = vld [vmem:[%s14822_s1 + $0xd80] ss:$16 sps:$4 sm:$0xff]  }
 0x17b   :  { %6765 = vmatpush1.bf16.msra.mxu0 %v10349_v32  ;;  %7581 = vmatpush1.bf16.msra.mxu1 %v10352_v33  ;;  %v10437_v32 = vld [vmem:[%s14822_s1 + $0xd88] ss:$16 sps:$4 sm:$0xff]   ;;  %v10442_v33 = vld [vmem:[%s14822_s1 + $0xda4] ss:$16 sps:$4 sm:$0xff]  }
 0x17c   :  { %6766 = vmatprep.subr.bf16.mxu0 %v10358_v34  ;;  %7582 = vmatprep.subr.bf16.mxu1 %v10361_v35  ;;  %v10445_v34 = vld [vmem:[%s14822_s1 + $0xdac] ss:$16 sps:$4 sm:$0xff]   ;;  %v10440_v35 = vld [vmem:[%s14822_s1 + $0xda0] ss:$16 sps:$4 sm:$0xff]  }
 0x17f   :  { %6767 = vmatpush1.bf16.msra.mxu0 %v10356_v36  ;;  %7583 = vmatpush1.bf16.msra.mxu1 %v10359_v37  ;;  %v10443_v36 = vld [vmem:[%s14822_s1 + $0xda8] ss:$16 sps:$4 sm:$0xff]   ;;  %v10449_v37 = vld [vmem:[%s14822_s1 + $0xdc4] ss:$16 sps:$4 sm:$0xff]  }
 0x180   :  { %6787 = vmatprep.subr.bf16.mxu0 %v10364_v38  ;;  %7603 = vmatprep.subr.bf16.mxu1 %v10367_v39  ;;  %v10452_v38 = vld [vmem:[%s14822_s1 + $0xdcc] ss:$16 sps:$4 sm:$0xff]   ;;  %v10447_v39 = vld [vmem:[%s14822_s1 + $0xdc0] ss:$16 sps:$4 sm:$0xff]  }
 0x182   :  { %6769 = vmatmul.mubr.bf16.vlgmr.msra.gmra.mrb[0].mxu0 %v8445_v41  ;;  %7585 = vmatmul.mubr.bf16.vlgmr.msra.gmra.mrb[0].mxu1 %v8445_v41  ;;  %v10456_v41 = vld [vmem:[%s14822_s1 + $0xde4] ss:$16 sps:$4 sm:$0xff]  }
 0x183   :  { %6788 = vmatpush1.bf16.msra.mxu0 %v10362_v42  ;;  %7604 = vmatpush1.bf16.msra.mxu1 %v10365_v43  ;;  %v10459_v42 = vld [vmem:[%s14822_s1 + $0xdec] ss:$16 sps:$4 sm:$0xff]   ;;  %v10454_v43 = vld [vmem:[%s14822_s1 + $0xde0] ss:$16 sps:$4 sm:$0xff]  }
 0x184   :  { %6789 = vmatprep.subr.bf16.mxu0 %v10370_v46  ;;  %7605 = vmatprep.subr.bf16.mxu1 %v10373_v44  ;;  %v10457_v46 = vld [vmem:[%s14822_s1 + $0xde8] ss:$16 sps:$4 sm:$0xff]   ;;  %v10462_v44 = vld [vmem:[%s14822_s1 + $0xe04] ss:$16 sps:$4 sm:$0xff]  }
 0x185   :  { %6778 = vmatprep.mubr.bf16.mxu0 %v8478_v48  ;;  %7594 = vmatprep.mubr.bf16.mxu1 %v8478_v48  ;;  %v8447_v48 = vcombine.low %v12657_v51, %v12662_v52  ;;  %v10471_v51 = vld [vmem:[%s14822_s1 + $0xe2c] ss:$16 sps:$4 sm:$0xff]   ;;  %v10466_v52 = vld [vmem:[%s14822_s1 + $0xe20] ss:$16 sps:$4 sm:$0xff]  }
 0x187   :  { %6790 = vmatpush1.bf16.msra.mxu0 %v10368_v45  ;;  %7606 = vmatpush1.bf16.msra.mxu1 %v10371_v47  ;;  %v10465_v45 = vld [vmem:[%s14822_s1 + $0xe0c] ss:$16 sps:$4 sm:$0xff]   ;;  %v55_v47 = vld [vmem:[%s14823_s0 + $0x130] sm:$0xff] }
 0x188   :  { %6791 = vmatprep.subr.bf16.mxu0 %v10376_v49  ;;  %7607 = vmatprep.subr.bf16.mxu1 %v10379_v50  ;;  %v10460_v49 = vld [vmem:[%s14822_s1 + $0xe00] ss:$16 sps:$4 sm:$0xff]   ;;  %v10463_v50 = vld [vmem:[%s14822_s1 + $0xe08] ss:$16 sps:$4 sm:$0xff]  }
 0x18a   :  { %6779 = vmatmul.mubr.bf16.gmra.mrb[4].mxu0 %v8477_v53  ;;  %7595 = vmatmul.mubr.bf16.gmra.mrb[4].mxu1 %v8477_v53  ;;  %v10468_v53 = vld [vmem:[%s14822_s1 + $0xe24] ss:$16 sps:$4 sm:$0xff]  }
 0x18b   :  { %6792 = vmatpush1.bf16.msra.mxu0 %v10374_v54  ;;  %7608 = vmatpush1.bf16.msra.mxu1 %v10377_v55  ;;  %v10469_v54 = vld [vmem:[%s14822_s1 + $0xe28] ss:$16 sps:$4 sm:$0xff]   ;;  %v8480_v55 = vcombine.high %v55_v47, %v55_v47 }
 0x18c   :  { %6793 = vmatprep.subr.bf16.mxu0 %v10382_v56  ;;  %7609 = vmatprep.subr.bf16.mxu1 %v10385_v57  ;;  %v10474_v56 = vld [vmem:[%s14822_s1 + $0xe44] ss:$16 sps:$4 sm:$0xff]   ;;  %v10477_v57 = vld [vmem:[%s14822_s1 + $0xe4c] ss:$16 sps:$4 sm:$0xff]  }
 0x18d   :  { %6819 = vmatprep.mubr.bf16.mxu0 %v8448_v58  ;;  %7635 = vmatprep.mubr.bf16.mxu1 %v8448_v58  ;;  %v12866_v58 = vld [vmem:[%s14823_s0 + $0x38] sm:$0xff] }
 0x18f   :  { %6794 = vmatpush1.bf16.msra.mxu0 %v10380_v59  ;;  %7610 = vmatpush1.bf16.msra.mxu1 %v10383_v60  ;;  %v12871_v59 = vld [vmem:[%s14823_s0 + $0xb8] sm:$0xff]  ;;  %v8479_v60 = vcombine.low %v55_v47, %v55_v47 }
 0x190   :  { %6795 = vmatprep.subr.bf16.mxu0 %v10388_v61  ;;  %7611 = vmatprep.subr.bf16.mxu1 %v10391_v62  ;;  %v10472_v61 = vld [vmem:[%s14822_s1 + $0xe40] ss:$16 sps:$4 sm:$0xff]   ;;  %v10475_v62 = vld [vmem:[%s14822_s1 + $0xe48] ss:$16 sps:$4 sm:$0xff]  }
 0x191   :  { %v10548_v47 = vld [vmem:[%s14822_s1 + $0xfc8] ss:$16 sps:$4 sm:$0xff]  }
 0x193   :  { %6796 = vmatpush1.bf16.msra.mxu0 %v10386_v63  ;;  %7612 = vmatpush1.bf16.msra.mxu1 %v10389_v0  ;;  %v10480_v63 = vld [vmem:[%s14822_s1 + $0xe64] ss:$16 sps:$4 sm:$0xff]   ;;  %v10483_v0 = vld [vmem:[%s14822_s1 + $0xe6c] ss:$16 sps:$4 sm:$0xff]  }
 0x194   :  { %6797 = vmatprep.subr.bf16.mxu0 %v10394_v1  ;;  %7613 = vmatprep.subr.bf16.mxu1 %v10397_v2  ;;  %v8450_v1 = vcombine.high %v12866_v58, %v12871_v59  ;;  %v10478_v2 = vld [vmem:[%s14822_s1 + $0xe60] ss:$16 sps:$4 sm:$0xff]  }
 0x197   :  { %6798 = vmatpush1.bf16.msra.mxu0 %v10392_v3  ;;  %7614 = vmatpush1.bf16.msra.mxu1 %v10395_v4  ;;  %v10481_v3 = vld [vmem:[%s14822_s1 + $0xe68] ss:$16 sps:$4 sm:$0xff]   ;;  %v10486_v4 = vld [vmem:[%s14822_s1 + $0xe84] ss:$16 sps:$4 sm:$0xff]  }
 0x198   :  { %6799 = vmatprep.subr.bf16.mxu0 %v10400_v5  ;;  %7615 = vmatprep.subr.bf16.mxu1 %v10403_v6  ;;  %v10489_v5 = vld [vmem:[%s14822_s1 + $0xe8c] ss:$16 sps:$4 sm:$0xff]   ;;  %v10484_v6 = vld [vmem:[%s14822_s1 + $0xe80] ss:$16 sps:$4 sm:$0xff]  }
 0x19b   :  { %6800 = vmatpush1.bf16.msra.mxu0 %v10398_v7  ;;  %7616 = vmatpush1.bf16.msra.mxu1 %v10401_v8  ;;  %v10487_v7 = vld [vmem:[%s14822_s1 + $0xe88] ss:$16 sps:$4 sm:$0xff]   ;;  %v10492_v8 = vld [vmem:[%s14822_s1 + $0xea4] ss:$16 sps:$4 sm:$0xff]  }
 0x19c   :  { %6801 = vmatprep.subr.bf16.mxu0 %v10406_v9  ;;  %7617 = vmatprep.subr.bf16.mxu1 %v10409_v10  ;;  %v10495_v9 = vld [vmem:[%s14822_s1 + $0xeac] ss:$16 sps:$4 sm:$0xff]   ;;  %v10490_v10 = vld [vmem:[%s14822_s1 + $0xea0] ss:$16 sps:$4 sm:$0xff]  }
 0x19f   :  { %6802 = vmatpush1.bf16.msra.mxu0 %v10404_v11  ;;  %7618 = vmatpush1.bf16.msra.mxu1 %v10407_v12  ;;  %v10493_v11 = vld [vmem:[%s14822_s1 + $0xea8] ss:$16 sps:$4 sm:$0xff]   ;;  %v10498_v12 = vld [vmem:[%s14822_s1 + $0xec4] ss:$16 sps:$4 sm:$0xff]  }
 0x1a0   :  { %6803 = vmatprep.subr.bf16.mxu0 %v10412_v13  ;;  %7619 = vmatprep.subr.bf16.mxu1 %v10415_v14  ;;  %v10501_v13 = vld [vmem:[%s14822_s1 + $0xecc] ss:$16 sps:$4 sm:$0xff]   ;;  %v10496_v14 = vld [vmem:[%s14822_s1 + $0xec0] ss:$16 sps:$4 sm:$0xff]  }
 0x1a3   :  { %6804 = vmatpush1.bf16.msra.mxu0 %v10410_v15  ;;  %7620 = vmatpush1.bf16.msra.mxu1 %v10413_v16  ;;  %v10499_v15 = vld [vmem:[%s14822_s1 + $0xec8] ss:$16 sps:$4 sm:$0xff]   ;;  %v10504_v16 = vld [vmem:[%s14822_s1 + $0xee4] ss:$16 sps:$4 sm:$0xff]  }
 0x1a4   :  { %6805 = vmatprep.subr.bf16.mxu0 %v10418_v17  ;;  %7621 = vmatprep.subr.bf16.mxu1 %v10421_v18  ;;  %v10507_v17 = vld [vmem:[%s14822_s1 + $0xeec] ss:$16 sps:$4 sm:$0xff]   ;;  %v10502_v18 = vld [vmem:[%s14822_s1 + $0xee0] ss:$16 sps:$4 sm:$0xff]  }
 0x1a7   :  { %6806 = vmatpush1.bf16.msra.mxu0 %v10416_v19  ;;  %7622 = vmatpush1.bf16.msra.mxu1 %v10419_v20  ;;  %v10505_v19 = vld [vmem:[%s14822_s1 + $0xee8] ss:$16 sps:$4 sm:$0xff]   ;;  %v10510_v20 = vld [vmem:[%s14822_s1 + $0xf04] ss:$16 sps:$4 sm:$0xff]  }
 0x1a8   :  { %6807 = vmatprep.subr.bf16.mxu0 %v10424_v21  ;;  %7623 = vmatprep.subr.bf16.mxu1 %v10427_v22  ;;  %v10513_v21 = vld [vmem:[%s14822_s1 + $0xf0c] ss:$16 sps:$4 sm:$0xff]   ;;  %v10508_v22 = vld [vmem:[%s14822_s1 + $0xf00] ss:$16 sps:$4 sm:$0xff]  }
 0x1ab   :  { %6808 = vmatpush1.bf16.msra.mxu0 %v10422_v23  ;;  %7624 = vmatpush1.bf16.msra.mxu1 %v10425_v24  ;;  %v10511_v23 = vld [vmem:[%s14822_s1 + $0xf08] ss:$16 sps:$4 sm:$0xff]   ;;  %v10516_v24 = vld [vmem:[%s14822_s1 + $0xf24] ss:$16 sps:$4 sm:$0xff]  }
 0x1ac   :  { %6809 = vmatprep.subr.bf16.mxu0 %v10430_v25  ;;  %7625 = vmatprep.subr.bf16.mxu1 %v10433_v26  ;;  %v10519_v25 = vld [vmem:[%s14822_s1 + $0xf2c] ss:$16 sps:$4 sm:$0xff]   ;;  %v10514_v26 = vld [vmem:[%s14822_s1 + $0xf20] ss:$16 sps:$4 sm:$0xff]  }
 0x1af   :  { %6810 = vmatpush1.bf16.msra.mxu0 %v10428_v27  ;;  %7626 = vmatpush1.bf16.msra.mxu1 %v10431_v28  ;;  %v10517_v27 = vld [vmem:[%s14822_s1 + $0xf28] ss:$16 sps:$4 sm:$0xff]   ;;  %v10522_v28 = vld [vmem:[%s14822_s1 + $0xf44] ss:$16 sps:$4 sm:$0xff]  }
 0x1b0   :  { %6811 = vmatprep.subr.bf16.mxu0 %v10436_v29  ;;  %7627 = vmatprep.subr.bf16.mxu1 %v10439_v30  ;;  %v10525_v29 = vld [vmem:[%s14822_s1 + $0xf4c] ss:$16 sps:$4 sm:$0xff]   ;;  %v10520_v30 = vld [vmem:[%s14822_s1 + $0xf40] ss:$16 sps:$4 sm:$0xff]  }
 0x1b3   :  { %6812 = vmatpush1.bf16.msra.mxu0 %v10434_v31  ;;  %7628 = vmatpush1.bf16.msra.mxu1 %v10437_v32  ;;  %v10523_v31 = vld [vmem:[%s14822_s1 + $0xf48] ss:$16 sps:$4 sm:$0xff]   ;;  %v10528_v32 = vld [vmem:[%s14822_s1 + $0xf64] ss:$16 sps:$4 sm:$0xff]  }
 0x1b4   :  { %6813 = vmatprep.subr.bf16.mxu0 %v10442_v33  ;;  %7629 = vmatprep.subr.bf16.mxu1 %v10445_v34  ;;  %v10531_v33 = vld [vmem:[%s14822_s1 + $0xf6c] ss:$16 sps:$4 sm:$0xff]   ;;  %v10526_v34 = vld [vmem:[%s14822_s1 + $0xf60] ss:$16 sps:$4 sm:$0xff]  }
 0x1b7   :  { %6814 = vmatpush1.bf16.msra.mxu0 %v10440_v35  ;;  %7630 = vmatpush1.bf16.msra.mxu1 %v10443_v36  ;;  %v10529_v35 = vld [vmem:[%s14822_s1 + $0xf68] ss:$16 sps:$4 sm:$0xff]   ;;  %v10534_v36 = vld [vmem:[%s14822_s1 + $0xf84] ss:$16 sps:$4 sm:$0xff]  }
 0x1b8   :  { %6815 = vmatprep.subr.bf16.mxu0 %v10449_v37  ;;  %7631 = vmatprep.subr.bf16.mxu1 %v10452_v38  ;;  %v10537_v37 = vld [vmem:[%s14822_s1 + $0xf8c] ss:$16 sps:$4 sm:$0xff]   ;;  %v10532_v38 = vld [vmem:[%s14822_s1 + $0xf80] ss:$16 sps:$4 sm:$0xff]  }
 0x1bb   :  { %6816 = vmatpush1.bf16.msra.mxu0 %v10447_v39  ;;  %7632 = vmatpush1.bf16.msra.mxu1 %v10450_v40  ;;  %v10535_v39 = vld [vmem:[%s14822_s1 + $0xf88] ss:$16 sps:$4 sm:$0xff]   ;;  %v10540_v40 = vld [vmem:[%s14822_s1 + $0xfa4] ss:$16 sps:$4 sm:$0xff]  }
 0x1bc   :  { %6817 = vmatprep.subr.bf16.mxu0 %v10456_v41  ;;  %7633 = vmatprep.subr.bf16.mxu1 %v10459_v42  ;;  %v10543_v41 = vld [vmem:[%s14822_s1 + $0xfac] ss:$16 sps:$4 sm:$0xff]   ;;  %v10538_v42 = vld [vmem:[%s14822_s1 + $0xfa0] ss:$16 sps:$4 sm:$0xff]  }
 0x1bf   :  { %6818 = vmatpush1.bf16.msra.mxu0 %v10454_v43  ;;  %7634 = vmatpush1.bf16.msra.mxu1 %v10457_v46  ;;  %v10541_v43 = vld [vmem:[%s14822_s1 + $0xfa8] ss:$16 sps:$4 sm:$0xff]   ;;  %v10547_v46 = vld [vmem:[%s14822_s1 + $0xfc4] ss:$16 sps:$4 sm:$0xff]  }
 0x1c0   :  { %6838 = vmatprep.subr.bf16.mxu0 %v10462_v44  ;;  %7654 = vmatprep.subr.bf16.mxu1 %v10465_v45  ;;  %v10550_v44 = vld [vmem:[%s14822_s1 + $0xfcc] ss:$16 sps:$4 sm:$0xff]   ;;  %v10545_v45 = vld [vmem:[%s14822_s1 + $0xfc0] ss:$16 sps:$4 sm:$0xff]  }
 0x1c2   :  { %6820 = vmatmul.mubr.bf16.vlgmr.msra.gmra.mrb[0].mxu0 %v8447_v48  ;;  %7636 = vmatmul.mubr.bf16.vlgmr.msra.gmra.mrb[0].mxu1 %v8447_v48  ;;  %v10554_v48 = vld [vmem:[%s14822_s1 + $0xfe4] ss:$16 sps:$4 sm:$0xff]  }
 0x1c3   :  { %6839 = vmatpush1.bf16.msra.mxu0 %v10460_v49  ;;  %7655 = vmatpush1.bf16.msra.mxu1 %v10463_v50  ;;  %v10557_v49 = vld [vmem:[%s14822_s1 + $0xfec] ss:$16 sps:$4 sm:$0xff]   ;;  %v10552_v50 = vld [vmem:[%s14822_s1 + $0xfe0] ss:$16 sps:$4 sm:$0xff]  }
 0x1c4   :  { %6840 = vmatprep.subr.bf16.mxu0 %v10468_v53  ;;  %7656 = vmatprep.subr.bf16.mxu1 %v10471_v51  ;;  %v10555_v53 = vld [vmem:[%s14822_s1 + $0xfe8] ss:$16 sps:$4 sm:$0xff]   ;;  %v10560_v51 = vld [vmem:[%s14822_s1 + $0x1004] ss:$16 sps:$4 sm:$0xff]  }
 0x1c5   :  { %6829 = vmatprep.mubr.bf16.mxu0 %v8480_v55  ;;  %7645 = vmatprep.mubr.bf16.mxu1 %v8480_v55  ;;  %v8449_v55 = vcombine.low %v12866_v58, %v12871_v59  ;;  %v10569_v58 = vld [vmem:[%s14822_s1 + $0x102c] ss:$16 sps:$4 sm:$0xff]   ;;  %v10564_v59 = vld [vmem:[%s14822_s1 + $0x1020] ss:$16 sps:$4 sm:$0xff]  }
 0x1c7   :  { %6841 = vmatpush1.bf16.msra.mxu0 %v10466_v52  ;;  %7657 = vmatpush1.bf16.msra.mxu1 %v10469_v54  ;;  %v10563_v52 = vld [vmem:[%s14822_s1 + $0x100c] ss:$16 sps:$4 sm:$0xff]  }
 0x1c8   :  { %6842 = vmatprep.subr.bf16.mxu0 %v10474_v56  ;;  %7658 = vmatprep.subr.bf16.mxu1 %v10477_v57  ;;  %v56_v54 = vld [vmem:[%s14823_s0 + $0x138] sm:$0xff]  ;;  %v10558_v56 = vld [vmem:[%s14822_s1 + $0x1000] ss:$16 sps:$4 sm:$0xff]  }
 0x1c9   :  { %v10561_v57 = vld [vmem:[%s14822_s1 + $0x1008] ss:$16 sps:$4 sm:$0xff]  }
 0x1ca   :  { %6830 = vmatmul.mubr.bf16.gmra.mrb[4].mxu0 %v8479_v60  ;;  %7646 = vmatmul.mubr.bf16.gmra.mrb[4].mxu1 %v8479_v60  ;;  %v10566_v60 = vld [vmem:[%s14822_s1 + $0x1024] ss:$16 sps:$4 sm:$0xff]  }
 0x1cb   :  { %6843 = vmatpush1.bf16.msra.mxu0 %v10472_v61  ;;  %7659 = vmatpush1.bf16.msra.mxu1 %v10475_v62  ;;  %v10567_v61 = vld [vmem:[%s14822_s1 + $0x1028] ss:$16 sps:$4 sm:$0xff]   ;;  %v8482_v62 = vcombine.high %v56_v54, %v56_v54 }
 0x1cc   :  { %6844 = vmatprep.subr.bf16.mxu0 %v10480_v63  ;;  %7660 = vmatprep.subr.bf16.mxu1 %v10483_v0  ;;  %v10572_v63 = vld [vmem:[%s14822_s1 + $0x1044] ss:$16 sps:$4 sm:$0xff]   ;;  %v10575_v0 = vld [vmem:[%s14822_s1 + $0x104c] ss:$16 sps:$4 sm:$0xff]  }
 0x1cd   :  { %6870 = vmatprep.mubr.bf16.mxu0 %v8450_v1  ;;  %7686 = vmatprep.mubr.bf16.mxu1 %v8450_v1  ;;  %v13075_v1 = vld [vmem:[%s14823_s0 + $0x40] sm:$0xff] }
 0x1cf   :  { %6845 = vmatpush1.bf16.msra.mxu0 %v10478_v2  ;;  %7661 = vmatpush1.bf16.msra.mxu1 %v10481_v3  ;;  %v13080_v2 = vld [vmem:[%s14823_s0 + $0xc0] sm:$0xff]  ;;  %v8481_v3 = vcombine.low %v56_v54, %v56_v54  ;;  %v10646_v54 = vld [vmem:[%s14822_s1 + $0x11c8] ss:$16 sps:$4 sm:$0xff]  }
 0x1d0   :  { %6846 = vmatprep.subr.bf16.mxu0 %v10486_v4  ;;  %7662 = vmatprep.subr.bf16.mxu1 %v10489_v5  ;;  %v10570_v4 = vld [vmem:[%s14822_s1 + $0x1040] ss:$16 sps:$4 sm:$0xff]   ;;  %v10573_v5 = vld [vmem:[%s14822_s1 + $0x1048] ss:$16 sps:$4 sm:$0xff]  }
 0x1d3   :  { %6847 = vmatpush1.bf16.msra.mxu0 %v10484_v6  ;;  %7663 = vmatpush1.bf16.msra.mxu1 %v10487_v7  ;;  %v10578_v6 = vld [vmem:[%s14822_s1 + $0x1064] ss:$16 sps:$4 sm:$0xff]   ;;  %v10581_v7 = vld [vmem:[%s14822_s1 + $0x106c] ss:$16 sps:$4 sm:$0xff]  }
 0x1d4   :  { %6848 = vmatprep.subr.bf16.mxu0 %v10492_v8  ;;  %7664 = vmatprep.subr.bf16.mxu1 %v10495_v9  ;;  %v8452_v8 = vcombine.high %v13075_v1, %v13080_v2  ;;  %v10576_v9 = vld [vmem:[%s14822_s1 + $0x1060] ss:$16 sps:$4 sm:$0xff]  }
 0x1d7   :  { %6849 = vmatpush1.bf16.msra.mxu0 %v10490_v10  ;;  %7665 = vmatpush1.bf16.msra.mxu1 %v10493_v11  ;;  %v10579_v10 = vld [vmem:[%s14822_s1 + $0x1068] ss:$16 sps:$4 sm:$0xff]   ;;  %v10584_v11 = vld [vmem:[%s14822_s1 + $0x1084] ss:$16 sps:$4 sm:$0xff]  }
 0x1d8   :  { %6850 = vmatprep.subr.bf16.mxu0 %v10498_v12  ;;  %7666 = vmatprep.subr.bf16.mxu1 %v10501_v13  ;;  %v10587_v12 = vld [vmem:[%s14822_s1 + $0x108c] ss:$16 sps:$4 sm:$0xff]   ;;  %v10582_v13 = vld [vmem:[%s14822_s1 + $0x1080] ss:$16 sps:$4 sm:$0xff]  }
 0x1db   :  { %6851 = vmatpush1.bf16.msra.mxu0 %v10496_v14  ;;  %7667 = vmatpush1.bf16.msra.mxu1 %v10499_v15  ;;  %v10585_v14 = vld [vmem:[%s14822_s1 + $0x1088] ss:$16 sps:$4 sm:$0xff]   ;;  %v10590_v15 = vld [vmem:[%s14822_s1 + $0x10a4] ss:$16 sps:$4 sm:$0xff]  }
 0x1dc   :  { %6852 = vmatprep.subr.bf16.mxu0 %v10504_v16  ;;  %7668 = vmatprep.subr.bf16.mxu1 %v10507_v17  ;;  %v10593_v16 = vld [vmem:[%s14822_s1 + $0x10ac] ss:$16 sps:$4 sm:$0xff]   ;;  %v10588_v17 = vld [vmem:[%s14822_s1 + $0x10a0] ss:$16 sps:$4 sm:$0xff]  }
 0x1df   :  { %6853 = vmatpush1.bf16.msra.mxu0 %v10502_v18  ;;  %7669 = vmatpush1.bf16.msra.mxu1 %v10505_v19  ;;  %v10591_v18 = vld [vmem:[%s14822_s1 + $0x10a8] ss:$16 sps:$4 sm:$0xff]   ;;  %v10596_v19 = vld [vmem:[%s14822_s1 + $0x10c4] ss:$16 sps:$4 sm:$0xff]  }
 0x1e0   :  { %6854 = vmatprep.subr.bf16.mxu0 %v10510_v20  ;;  %7670 = vmatprep.subr.bf16.mxu1 %v10513_v21  ;;  %v10599_v20 = vld [vmem:[%s14822_s1 + $0x10cc] ss:$16 sps:$4 sm:$0xff]   ;;  %v10594_v21 = vld [vmem:[%s14822_s1 + $0x10c0] ss:$16 sps:$4 sm:$0xff]  }
 0x1e3   :  { %6855 = vmatpush1.bf16.msra.mxu0 %v10508_v22  ;;  %7671 = vmatpush1.bf16.msra.mxu1 %v10511_v23  ;;  %v10597_v22 = vld [vmem:[%s14822_s1 + $0x10c8] ss:$16 sps:$4 sm:$0xff]   ;;  %v10602_v23 = vld [vmem:[%s14822_s1 + $0x10e4] ss:$16 sps:$4 sm:$0xff]  }
 0x1e4   :  { %6856 = vmatprep.subr.bf16.mxu0 %v10516_v24  ;;  %7672 = vmatprep.subr.bf16.mxu1 %v10519_v25  ;;  %v10605_v24 = vld [vmem:[%s14822_s1 + $0x10ec] ss:$16 sps:$4 sm:$0xff]   ;;  %v10600_v25 = vld [vmem:[%s14822_s1 + $0x10e0] ss:$16 sps:$4 sm:$0xff]  }
 0x1e7   :  { %6857 = vmatpush1.bf16.msra.mxu0 %v10514_v26  ;;  %7673 = vmatpush1.bf16.msra.mxu1 %v10517_v27  ;;  %v10603_v26 = vld [vmem:[%s14822_s1 + $0x10e8] ss:$16 sps:$4 sm:$0xff]   ;;  %v10608_v27 = vld [vmem:[%s14822_s1 + $0x1104] ss:$16 sps:$4 sm:$0xff]  }
 0x1e8   :  { %6858 = vmatprep.subr.bf16.mxu0 %v10522_v28  ;;  %7674 = vmatprep.subr.bf16.mxu1 %v10525_v29  ;;  %v10611_v28 = vld [vmem:[%s14822_s1 + $0x110c] ss:$16 sps:$4 sm:$0xff]   ;;  %v10606_v29 = vld [vmem:[%s14822_s1 + $0x1100] ss:$16 sps:$4 sm:$0xff]  }
 0x1eb   :  { %6859 = vmatpush1.bf16.msra.mxu0 %v10520_v30  ;;  %7675 = vmatpush1.bf16.msra.mxu1 %v10523_v31  ;;  %v10609_v30 = vld [vmem:[%s14822_s1 + $0x1108] ss:$16 sps:$4 sm:$0xff]   ;;  %v10614_v31 = vld [vmem:[%s14822_s1 + $0x1124] ss:$16 sps:$4 sm:$0xff]  }
 0x1ec   :  { %6860 = vmatprep.subr.bf16.mxu0 %v10528_v32  ;;  %7676 = vmatprep.subr.bf16.mxu1 %v10531_v33  ;;  %v10617_v32 = vld [vmem:[%s14822_s1 + $0x112c] ss:$16 sps:$4 sm:$0xff]   ;;  %v10612_v33 = vld [vmem:[%s14822_s1 + $0x1120] ss:$16 sps:$4 sm:$0xff]  }
 0x1ef   :  { %6861 = vmatpush1.bf16.msra.mxu0 %v10526_v34  ;;  %7677 = vmatpush1.bf16.msra.mxu1 %v10529_v35  ;;  %v10615_v34 = vld [vmem:[%s14822_s1 + $0x1128] ss:$16 sps:$4 sm:$0xff]   ;;  %v10620_v35 = vld [vmem:[%s14822_s1 + $0x1144] ss:$16 sps:$4 sm:$0xff]  }
 0x1f0   :  { %6862 = vmatprep.subr.bf16.mxu0 %v10534_v36  ;;  %7678 = vmatprep.subr.bf16.mxu1 %v10537_v37  ;;  %v10623_v36 = vld [vmem:[%s14822_s1 + $0x114c] ss:$16 sps:$4 sm:$0xff]   ;;  %v10618_v37 = vld [vmem:[%s14822_s1 + $0x1140] ss:$16 sps:$4 sm:$0xff]  }
 0x1f3   :  { %6863 = vmatpush1.bf16.msra.mxu0 %v10532_v38  ;;  %7679 = vmatpush1.bf16.msra.mxu1 %v10535_v39  ;;  %v10621_v38 = vld [vmem:[%s14822_s1 + $0x1148] ss:$16 sps:$4 sm:$0xff]   ;;  %v10626_v39 = vld [vmem:[%s14822_s1 + $0x1164] ss:$16 sps:$4 sm:$0xff]  }
 0x1f4   :  { %6864 = vmatprep.subr.bf16.mxu0 %v10540_v40  ;;  %7680 = vmatprep.subr.bf16.mxu1 %v10543_v41  ;;  %v10629_v40 = vld [vmem:[%s14822_s1 + $0x116c] ss:$16 sps:$4 sm:$0xff]   ;;  %v10624_v41 = vld [vmem:[%s14822_s1 + $0x1160] ss:$16 sps:$4 sm:$0xff]  }
 0x1f7   :  { %6865 = vmatpush1.bf16.msra.mxu0 %v10538_v42  ;;  %7681 = vmatpush1.bf16.msra.mxu1 %v10541_v43  ;;  %v10627_v42 = vld [vmem:[%s14822_s1 + $0x1168] ss:$16 sps:$4 sm:$0xff]   ;;  %v10632_v43 = vld [vmem:[%s14822_s1 + $0x1184] ss:$16 sps:$4 sm:$0xff]  }
 0x1f8   :  { %6866 = vmatprep.subr.bf16.mxu0 %v10547_v46  ;;  %7682 = vmatprep.subr.bf16.mxu1 %v10550_v44  ;;  %v10635_v46 = vld [vmem:[%s14822_s1 + $0x118c] ss:$16 sps:$4 sm:$0xff]   ;;  %v10630_v44 = vld [vmem:[%s14822_s1 + $0x1180] ss:$16 sps:$4 sm:$0xff]  }
 0x1fb   :  { %6867 = vmatpush1.bf16.msra.mxu0 %v10545_v45  ;;  %7683 = vmatpush1.bf16.msra.mxu1 %v10548_v47  ;;  %v10633_v45 = vld [vmem:[%s14822_s1 + $0x1188] ss:$16 sps:$4 sm:$0xff]   ;;  %v10638_v47 = vld [vmem:[%s14822_s1 + $0x11a4] ss:$16 sps:$4 sm:$0xff]  }
 0x1fc   :  { %6868 = vmatprep.subr.bf16.mxu0 %v10554_v48  ;;  %7684 = vmatprep.subr.bf16.mxu1 %v10557_v49  ;;  %v10641_v48 = vld [vmem:[%s14822_s1 + $0x11ac] ss:$16 sps:$4 sm:$0xff]   ;;  %v10636_v49 = vld [vmem:[%s14822_s1 + $0x11a0] ss:$16 sps:$4 sm:$0xff]  }
 0x1ff   :  { %6869 = vmatpush1.bf16.msra.mxu0 %v10552_v50  ;;  %7685 = vmatpush1.bf16.msra.mxu1 %v10555_v53  ;;  %v10639_v50 = vld [vmem:[%s14822_s1 + $0x11a8] ss:$16 sps:$4 sm:$0xff]   ;;  %v10645_v53 = vld [vmem:[%s14822_s1 + $0x11c4] ss:$16 sps:$4 sm:$0xff]  }
 0x200   :  { %6889 = vmatprep.subr.bf16.mxu0 %v10560_v51  ;;  %7705 = vmatprep.subr.bf16.mxu1 %v10563_v52  ;;  %v10648_v51 = vld [vmem:[%s14822_s1 + $0x11cc] ss:$16 sps:$4 sm:$0xff]   ;;  %v10643_v52 = vld [vmem:[%s14822_s1 + $0x11c0] ss:$16 sps:$4 sm:$0xff]  }
 0x202   :  { %6871 = vmatmul.mubr.bf16.vlgmr.msra.gmra.mrb[0].mxu0 %v8449_v55  ;;  %7687 = vmatmul.mubr.bf16.vlgmr.msra.gmra.mrb[0].mxu1 %v8449_v55  ;;  %v10652_v55 = vld [vmem:[%s14822_s1 + $0x11e4] ss:$16 sps:$4 sm:$0xff]  }
 0x203   :  { %6890 = vmatpush1.bf16.msra.mxu0 %v10558_v56  ;;  %7706 = vmatpush1.bf16.msra.mxu1 %v10561_v57  ;;  %v10655_v56 = vld [vmem:[%s14822_s1 + $0x11ec] ss:$16 sps:$4 sm:$0xff]   ;;  %v10650_v57 = vld [vmem:[%s14822_s1 + $0x11e0] ss:$16 sps:$4 sm:$0xff]  }
 0x204   :  { %6891 = vmatprep.subr.bf16.mxu0 %v10566_v60  ;;  %7707 = vmatprep.subr.bf16.mxu1 %v10569_v58  ;;  %v10653_v60 = vld [vmem:[%s14822_s1 + $0x11e8] ss:$16 sps:$4 sm:$0xff]   ;;  %v10658_v58 = vld [vmem:[%s14822_s1 + $0x1204] ss:$16 sps:$4 sm:$0xff]  }
 0x205   :  { %6880 = vmatprep.mubr.bf16.mxu0 %v8482_v62  ;;  %7696 = vmatprep.mubr.bf16.mxu1 %v8482_v62  ;;  %v8451_v62 = vcombine.low %v13075_v1, %v13080_v2  ;;  %v10667_v1 = vld [vmem:[%s14822_s1 + $0x122c] ss:$16 sps:$4 sm:$0xff]   ;;  %v10662_v2 = vld [vmem:[%s14822_s1 + $0x1220] ss:$16 sps:$4 sm:$0xff]  }
 0x207   :  { %6892 = vmatpush1.bf16.msra.mxu0 %v10564_v59  ;;  %7708 = vmatpush1.bf16.msra.mxu1 %v10567_v61  ;;  %v10661_v59 = vld [vmem:[%s14822_s1 + $0x120c] ss:$16 sps:$4 sm:$0xff]   ;;  %v57_v61 = vld [vmem:[%s14823_s0 + $0x140] sm:$0xff] }
 0x208   :  { %6893 = vmatprep.subr.bf16.mxu0 %v10572_v63  ;;  %7709 = vmatprep.subr.bf16.mxu1 %v10575_v0  ;;  %v10656_v63 = vld [vmem:[%s14822_s1 + $0x1200] ss:$16 sps:$4 sm:$0xff]   ;;  %v10659_v0 = vld [vmem:[%s14822_s1 + $0x1208] ss:$16 sps:$4 sm:$0xff]  }
 0x20a   :  { %6881 = vmatmul.mubr.bf16.gmra.mrb[4].mxu0 %v8481_v3  ;;  %7697 = vmatmul.mubr.bf16.gmra.mrb[4].mxu1 %v8481_v3  ;;  %v10664_v3 = vld [vmem:[%s14822_s1 + $0x1224] ss:$16 sps:$4 sm:$0xff]  }
 0x20b   :  { %6894 = vmatpush1.bf16.msra.mxu0 %v10570_v4  ;;  %7710 = vmatpush1.bf16.msra.mxu1 %v10573_v5  ;;  %v10665_v4 = vld [vmem:[%s14822_s1 + $0x1228] ss:$16 sps:$4 sm:$0xff]   ;;  %v8484_v5 = vcombine.high %v57_v61, %v57_v61 }
 0x20c   :  { %6895 = vmatprep.subr.bf16.mxu0 %v10578_v6  ;;  %7711 = vmatprep.subr.bf16.mxu1 %v10581_v7  ;;  %v10670_v6 = vld [vmem:[%s14822_s1 + $0x1244] ss:$16 sps:$4 sm:$0xff]   ;;  %v10673_v7 = vld [vmem:[%s14822_s1 + $0x124c] ss:$16 sps:$4 sm:$0xff]  }
 0x20d   :  { %6921 = vmatprep.mubr.bf16.mxu0 %v8452_v8  ;;  %7737 = vmatprep.mubr.bf16.mxu1 %v8452_v8  ;;  %v13284_v8 = vld [vmem:[%s14823_s0 + $0x48] sm:$0xff] }
 0x20f   :  { %6896 = vmatpush1.bf16.msra.mxu0 %v10576_v9  ;;  %7712 = vmatpush1.bf16.msra.mxu1 %v10579_v10  ;;  %v13289_v9 = vld [vmem:[%s14823_s0 + $0xc8] sm:$0xff]  ;;  %v8483_v10 = vcombine.low %v57_v61, %v57_v61 }
 0x210   :  { %6897 = vmatprep.subr.bf16.mxu0 %v10584_v11  ;;  %7713 = vmatprep.subr.bf16.mxu1 %v10587_v12  ;;  %v10668_v11 = vld [vmem:[%s14822_s1 + $0x1240] ss:$16 sps:$4 sm:$0xff]   ;;  %v10671_v12 = vld [vmem:[%s14822_s1 + $0x1248] ss:$16 sps:$4 sm:$0xff]  }
 0x211   :  { %v10744_v61 = vld [vmem:[%s14822_s1 + $0x13c8] ss:$16 sps:$4 sm:$0xff]  }
 0x213   :  { %6898 = vmatpush1.bf16.msra.mxu0 %v10582_v13  ;;  %7714 = vmatpush1.bf16.msra.mxu1 %v10585_v14  ;;  %v10676_v13 = vld [vmem:[%s14822_s1 + $0x1264] ss:$16 sps:$4 sm:$0xff]   ;;  %v10679_v14 = vld [vmem:[%s14822_s1 + $0x126c] ss:$16 sps:$4 sm:$0xff]  }
 0x214   :  { %6899 = vmatprep.subr.bf16.mxu0 %v10590_v15  ;;  %7715 = vmatprep.subr.bf16.mxu1 %v10593_v16  ;;  %v8454_v15 = vcombine.high %v13284_v8, %v13289_v9  ;;  %v10674_v16 = vld [vmem:[%s14822_s1 + $0x1260] ss:$16 sps:$4 sm:$0xff]  }
 0x217   :  { %6900 = vmatpush1.bf16.msra.mxu0 %v10588_v17  ;;  %7716 = vmatpush1.bf16.msra.mxu1 %v10591_v18  ;;  %v10677_v17 = vld [vmem:[%s14822_s1 + $0x1268] ss:$16 sps:$4 sm:$0xff]   ;;  %v10682_v18 = vld [vmem:[%s14822_s1 + $0x1284] ss:$16 sps:$4 sm:$0xff]  }
 0x218   :  { %6901 = vmatprep.subr.bf16.mxu0 %v10596_v19  ;;  %7717 = vmatprep.subr.bf16.mxu1 %v10599_v20  ;;  %v10685_v19 = vld [vmem:[%s14822_s1 + $0x128c] ss:$16 sps:$4 sm:$0xff]   ;;  %v10680_v20 = vld [vmem:[%s14822_s1 + $0x1280] ss:$16 sps:$4 sm:$0xff]  }
 0x21b   :  { %6902 = vmatpush1.bf16.msra.mxu0 %v10594_v21  ;;  %7718 = vmatpush1.bf16.msra.mxu1 %v10597_v22  ;;  %v10683_v21 = vld [vmem:[%s14822_s1 + $0x1288] ss:$16 sps:$4 sm:$0xff]   ;;  %v10688_v22 = vld [vmem:[%s14822_s1 + $0x12a4] ss:$16 sps:$4 sm:$0xff]  }
 0x21c   :  { %6903 = vmatprep.subr.bf16.mxu0 %v10602_v23  ;;  %7719 = vmatprep.subr.bf16.mxu1 %v10605_v24  ;;  %v10691_v23 = vld [vmem:[%s14822_s1 + $0x12ac] ss:$16 sps:$4 sm:$0xff]   ;;  %v10686_v24 = vld [vmem:[%s14822_s1 + $0x12a0] ss:$16 sps:$4 sm:$0xff]  }
 0x21f   :  { %6904 = vmatpush1.bf16.msra.mxu0 %v10600_v25  ;;  %7720 = vmatpush1.bf16.msra.mxu1 %v10603_v26  ;;  %v10689_v25 = vld [vmem:[%s14822_s1 + $0x12a8] ss:$16 sps:$4 sm:$0xff]   ;;  %v10694_v26 = vld [vmem:[%s14822_s1 + $0x12c4] ss:$16 sps:$4 sm:$0xff]  }
 0x220   :  { %6905 = vmatprep.subr.bf16.mxu0 %v10608_v27  ;;  %7721 = vmatprep.subr.bf16.mxu1 %v10611_v28  ;;  %v10697_v27 = vld [vmem:[%s14822_s1 + $0x12cc] ss:$16 sps:$4 sm:$0xff]   ;;  %v10692_v28 = vld [vmem:[%s14822_s1 + $0x12c0] ss:$16 sps:$4 sm:$0xff]  }
 0x223   :  { %6906 = vmatpush1.bf16.msra.mxu0 %v10606_v29  ;;  %7722 = vmatpush1.bf16.msra.mxu1 %v10609_v30  ;;  %v10695_v29 = vld [vmem:[%s14822_s1 + $0x12c8] ss:$16 sps:$4 sm:$0xff]   ;;  %v10700_v30 = vld [vmem:[%s14822_s1 + $0x12e4] ss:$16 sps:$4 sm:$0xff]  }
 0x224   :  { %6907 = vmatprep.subr.bf16.mxu0 %v10614_v31  ;;  %7723 = vmatprep.subr.bf16.mxu1 %v10617_v32  ;;  %v10703_v31 = vld [vmem:[%s14822_s1 + $0x12ec] ss:$16 sps:$4 sm:$0xff]   ;;  %v10698_v32 = vld [vmem:[%s14822_s1 + $0x12e0] ss:$16 sps:$4 sm:$0xff]  }
 0x227   :  { %6908 = vmatpush1.bf16.msra.mxu0 %v10612_v33  ;;  %7724 = vmatpush1.bf16.msra.mxu1 %v10615_v34  ;;  %v10701_v33 = vld [vmem:[%s14822_s1 + $0x12e8] ss:$16 sps:$4 sm:$0xff]   ;;  %v10706_v34 = vld [vmem:[%s14822_s1 + $0x1304] ss:$16 sps:$4 sm:$0xff]  }
 0x228   :  { %6909 = vmatprep.subr.bf16.mxu0 %v10620_v35  ;;  %7725 = vmatprep.subr.bf16.mxu1 %v10623_v36  ;;  %v10709_v35 = vld [vmem:[%s14822_s1 + $0x130c] ss:$16 sps:$4 sm:$0xff]   ;;  %v10704_v36 = vld [vmem:[%s14822_s1 + $0x1300] ss:$16 sps:$4 sm:$0xff]  }
 0x22b   :  { %6910 = vmatpush1.bf16.msra.mxu0 %v10618_v37  ;;  %7726 = vmatpush1.bf16.msra.mxu1 %v10621_v38  ;;  %v10707_v37 = vld [vmem:[%s14822_s1 + $0x1308] ss:$16 sps:$4 sm:$0xff]   ;;  %v10712_v38 = vld [vmem:[%s14822_s1 + $0x1324] ss:$16 sps:$4 sm:$0xff]  }
 0x22c   :  { %6911 = vmatprep.subr.bf16.mxu0 %v10626_v39  ;;  %7727 = vmatprep.subr.bf16.mxu1 %v10629_v40  ;;  %v10715_v39 = vld [vmem:[%s14822_s1 + $0x132c] ss:$16 sps:$4 sm:$0xff]   ;;  %v10710_v40 = vld [vmem:[%s14822_s1 + $0x1320] ss:$16 sps:$4 sm:$0xff]  }
 0x22f   :  { %6912 = vmatpush1.bf16.msra.mxu0 %v10624_v41  ;;  %7728 = vmatpush1.bf16.msra.mxu1 %v10627_v42  ;;  %v10713_v41 = vld [vmem:[%s14822_s1 + $0x1328] ss:$16 sps:$4 sm:$0xff]   ;;  %v10718_v42 = vld [vmem:[%s14822_s1 + $0x1344] ss:$16 sps:$4 sm:$0xff]  }
 0x230   :  { %6913 = vmatprep.subr.bf16.mxu0 %v10632_v43  ;;  %7729 = vmatprep.subr.bf16.mxu1 %v10635_v46  ;;  %v10721_v43 = vld [vmem:[%s14822_s1 + $0x134c] ss:$16 sps:$4 sm:$0xff]   ;;  %v10716_v46 = vld [vmem:[%s14822_s1 + $0x1340] ss:$16 sps:$4 sm:$0xff]  }
 0x233   :  { %6914 = vmatpush1.bf16.msra.mxu0 %v10630_v44  ;;  %7730 = vmatpush1.bf16.msra.mxu1 %v10633_v45  ;;  %v10719_v44 = vld [vmem:[%s14822_s1 + $0x1348] ss:$16 sps:$4 sm:$0xff]   ;;  %v10724_v45 = vld [vmem:[%s14822_s1 + $0x1364] ss:$16 sps:$4 sm:$0xff]  }
 0x234   :  { %6915 = vmatprep.subr.bf16.mxu0 %v10638_v47  ;;  %7731 = vmatprep.subr.bf16.mxu1 %v10641_v48  ;;  %v10727_v47 = vld [vmem:[%s14822_s1 + $0x136c] ss:$16 sps:$4 sm:$0xff]   ;;  %v10722_v48 = vld [vmem:[%s14822_s1 + $0x1360] ss:$16 sps:$4 sm:$0xff]  }
 0x237   :  { %6916 = vmatpush1.bf16.msra.mxu0 %v10636_v49  ;;  %7732 = vmatpush1.bf16.msra.mxu1 %v10639_v50  ;;  %v10725_v49 = vld [vmem:[%s14822_s1 + $0x1368] ss:$16 sps:$4 sm:$0xff]   ;;  %v10730_v50 = vld [vmem:[%s14822_s1 + $0x1384] ss:$16 sps:$4 sm:$0xff]  }
 0x238   :  { %6917 = vmatprep.subr.bf16.mxu0 %v10645_v53  ;;  %7733 = vmatprep.subr.bf16.mxu1 %v10648_v51  ;;  %v10733_v53 = vld [vmem:[%s14822_s1 + $0x138c] ss:$16 sps:$4 sm:$0xff]   ;;  %v10728_v51 = vld [vmem:[%s14822_s1 + $0x1380] ss:$16 sps:$4 sm:$0xff]  }
 0x23b   :  { %6918 = vmatpush1.bf16.msra.mxu0 %v10643_v52  ;;  %7734 = vmatpush1.bf16.msra.mxu1 %v10646_v54  ;;  %v10731_v52 = vld [vmem:[%s14822_s1 + $0x1388] ss:$16 sps:$4 sm:$0xff]   ;;  %v10736_v54 = vld [vmem:[%s14822_s1 + $0x13a4] ss:$16 sps:$4 sm:$0xff]  }
 0x23c   :  { %6919 = vmatprep.subr.bf16.mxu0 %v10652_v55  ;;  %7735 = vmatprep.subr.bf16.mxu1 %v10655_v56  ;;  %v10739_v55 = vld [vmem:[%s14822_s1 + $0x13ac] ss:$16 sps:$4 sm:$0xff]   ;;  %v10734_v56 = vld [vmem:[%s14822_s1 + $0x13a0] ss:$16 sps:$4 sm:$0xff]  }
 0x23f   :  { %6920 = vmatpush1.bf16.msra.mxu0 %v10650_v57  ;;  %7736 = vmatpush1.bf16.msra.mxu1 %v10653_v60  ;;  %v10737_v57 = vld [vmem:[%s14822_s1 + $0x13a8] ss:$16 sps:$4 sm:$0xff]   ;;  %v10743_v60 = vld [vmem:[%s14822_s1 + $0x13c4] ss:$16 sps:$4 sm:$0xff]  }
 0x240   :  { %6940 = vmatprep.subr.bf16.mxu0 %v10658_v58  ;;  %7756 = vmatprep.subr.bf16.mxu1 %v10661_v59  ;;  %v10746_v58 = vld [vmem:[%s14822_s1 + $0x13cc] ss:$16 sps:$4 sm:$0xff]   ;;  %v10741_v59 = vld [vmem:[%s14822_s1 + $0x13c0] ss:$16 sps:$4 sm:$0xff]  }
 0x242   :  { %6922 = vmatmul.mubr.bf16.vlgmr.msra.gmra.mrb[0].mxu0 %v8451_v62  ;;  %7738 = vmatmul.mubr.bf16.vlgmr.msra.gmra.mrb[0].mxu1 %v8451_v62  ;;  %v10750_v62 = vld [vmem:[%s14822_s1 + $0x13e4] ss:$16 sps:$4 sm:$0xff]  }
 0x243   :  { %6941 = vmatpush1.bf16.msra.mxu0 %v10656_v63  ;;  %7757 = vmatpush1.bf16.msra.mxu1 %v10659_v0  ;;  %v10753_v63 = vld [vmem:[%s14822_s1 + $0x13ec] ss:$16 sps:$4 sm:$0xff]   ;;  %v10748_v0 = vld [vmem:[%s14822_s1 + $0x13e0] ss:$16 sps:$4 sm:$0xff]  }
 0x244   :  { %6942 = vmatprep.subr.bf16.mxu0 %v10664_v3  ;;  %7758 = vmatprep.subr.bf16.mxu1 %v10667_v1  ;;  %v10751_v3 = vld [vmem:[%s14822_s1 + $0x13e8] ss:$16 sps:$4 sm:$0xff]   ;;  %v10756_v1 = vld [vmem:[%s14822_s1 + $0x1404] ss:$16 sps:$4 sm:$0xff]  }
 0x245   :  { %6931 = vmatprep.mubr.bf16.mxu0 %v8484_v5  ;;  %7747 = vmatprep.mubr.bf16.mxu1 %v8484_v5  ;;  %v58_v5 = vld [vmem:[%s14823_s0 + $0x148] sm:$0xff] }
 0x247   :  { %6943 = vmatpush1.bf16.msra.mxu0 %v10662_v2  ;;  %7759 = vmatpush1.bf16.msra.mxu1 %v10665_v4  ;;  %v10759_v2 = vld [vmem:[%s14822_s1 + $0x140c] ss:$16 sps:$4 sm:$0xff]   ;;  %v8453_v4 = vcombine.low %v13284_v8, %v13289_v9  ;;  %v10762_v8 = vld [vmem:[%s14822_s1 + $0x1424] ss:$16 sps:$4 sm:$0xff]  }
 0x248   :  { %6944 = vmatprep.subr.bf16.mxu0 %v10670_v6  ;;  %7760 = vmatprep.subr.bf16.mxu1 %v10673_v7  ;;  %v10754_v6 = vld [vmem:[%s14822_s1 + $0x1400] ss:$16 sps:$4 sm:$0xff]   ;;  %v10757_v7 = vld [vmem:[%s14822_s1 + $0x1408] ss:$16 sps:$4 sm:$0xff]   ;;  %v10765_v9 = vld [vmem:[%s14822_s1 + $0x142c] ss:$16 sps:$4 sm:$0xff]  }
 0x24a   :  { %6932 = vmatmul.mubr.bf16.gmra.mrb[4].mxu0 %v8483_v10  ;;  %7748 = vmatmul.mubr.bf16.gmra.mrb[4].mxu1 %v8483_v10  ;;  %v8486_v10 = vcombine.high %v58_v5, %v58_v5 }
 0x24b   :  { %6945 = vmatpush1.bf16.msra.mxu0 %v10668_v11  ;;  %7761 = vmatpush1.bf16.msra.mxu1 %v10671_v12  ;;  %v10760_v11 = vld [vmem:[%s14822_s1 + $0x1420] ss:$16 sps:$4 sm:$0xff]   ;;  %v10763_v12 = vld [vmem:[%s14822_s1 + $0x1428] ss:$16 sps:$4 sm:$0xff]  }
 0x24c   :  { %6946 = vmatprep.subr.bf16.mxu0 %v10676_v13  ;;  %7762 = vmatprep.subr.bf16.mxu1 %v10679_v14  ;;  %v10768_v13 = vld [vmem:[%s14822_s1 + $0x1444] ss:$16 sps:$4 sm:$0xff]   ;;  %v10771_v14 = vld [vmem:[%s14822_s1 + $0x144c] ss:$16 sps:$4 sm:$0xff]  }
 0x24d   :  { %6972 = vmatprep.mubr.bf16.mxu0 %v8454_v15  ;;  %7788 = vmatprep.mubr.bf16.mxu1 %v8454_v15  ;;  %v8485_v15 = vcombine.low %v58_v5, %v58_v5  ;;  %v10848_v5 = vld [vmem:[%s14822_s1 + $0x15e4] ss:$16 sps:$4 sm:$0xff]  }
 0x24f   :  { %6947 = vmatpush1.bf16.msra.mxu0 %v10674_v16  ;;  %7763 = vmatpush1.bf16.msra.mxu1 %v10677_v17  ;;  %v13493_v16 = vld [vmem:[%s14823_s0 + $0x50] sm:$0xff] }
 0x250   :  { %6948 = vmatprep.subr.bf16.mxu0 %v10682_v18  ;;  %7764 = vmatprep.subr.bf16.mxu1 %v10685_v19  ;;  %v13498_v17 = vld [vmem:[%s14823_s0 + $0xd0] sm:$0xff]  ;;  %v10769_v19 = vld [vmem:[%s14822_s1 + $0x1448] ss:$16 sps:$4 sm:$0xff]  }
 0x251   :  { %v10766_v18 = vld [vmem:[%s14822_s1 + $0x1440] ss:$16 sps:$4 sm:$0xff]  }
 0x253   :  { %6949 = vmatpush1.bf16.msra.mxu0 %v10680_v20  ;;  %7765 = vmatpush1.bf16.msra.mxu1 %v10683_v21  ;;  %v10774_v20 = vld [vmem:[%s14822_s1 + $0x1464] ss:$16 sps:$4 sm:$0xff]   ;;  %v10777_v21 = vld [vmem:[%s14822_s1 + $0x146c] ss:$16 sps:$4 sm:$0xff]  }
 0x254   :  { %6950 = vmatprep.subr.bf16.mxu0 %v10688_v22  ;;  %7766 = vmatprep.subr.bf16.mxu1 %v10691_v23  ;;  %v8456_v22 = vcombine.high %v13493_v16, %v13498_v17  ;;  %v10772_v23 = vld [vmem:[%s14822_s1 + $0x1460] ss:$16 sps:$4 sm:$0xff]  }
 0x257   :  { %6951 = vmatpush1.bf16.msra.mxu0 %v10686_v24  ;;  %7767 = vmatpush1.bf16.msra.mxu1 %v10689_v25  ;;  %v10775_v24 = vld [vmem:[%s14822_s1 + $0x1468] ss:$16 sps:$4 sm:$0xff]   ;;  %v10780_v25 = vld [vmem:[%s14822_s1 + $0x1484] ss:$16 sps:$4 sm:$0xff]  }
 0x258   :  { %6952 = vmatprep.subr.bf16.mxu0 %v10694_v26  ;;  %7768 = vmatprep.subr.bf16.mxu1 %v10697_v27  ;;  %v10783_v26 = vld [vmem:[%s14822_s1 + $0x148c] ss:$16 sps:$4 sm:$0xff]   ;;  %v10778_v27 = vld [vmem:[%s14822_s1 + $0x1480] ss:$16 sps:$4 sm:$0xff]  }
 0x25b   :  { %6953 = vmatpush1.bf16.msra.mxu0 %v10692_v28  ;;  %7769 = vmatpush1.bf16.msra.mxu1 %v10695_v29  ;;  %v10781_v28 = vld [vmem:[%s14822_s1 + $0x1488] ss:$16 sps:$4 sm:$0xff]   ;;  %v10786_v29 = vld [vmem:[%s14822_s1 + $0x14a4] ss:$16 sps:$4 sm:$0xff]  }
 0x25c   :  { %6954 = vmatprep.subr.bf16.mxu0 %v10700_v30  ;;  %7770 = vmatprep.subr.bf16.mxu1 %v10703_v31  ;;  %v10789_v30 = vld [vmem:[%s14822_s1 + $0x14ac] ss:$16 sps:$4 sm:$0xff]   ;;  %v10784_v31 = vld [vmem:[%s14822_s1 + $0x14a0] ss:$16 sps:$4 sm:$0xff]  }
 0x25f   :  { %6955 = vmatpush1.bf16.msra.mxu0 %v10698_v32  ;;  %7771 = vmatpush1.bf16.msra.mxu1 %v10701_v33  ;;  %v10787_v32 = vld [vmem:[%s14822_s1 + $0x14a8] ss:$16 sps:$4 sm:$0xff]   ;;  %v10792_v33 = vld [vmem:[%s14822_s1 + $0x14c4] ss:$16 sps:$4 sm:$0xff]  }
 0x260   :  { %6956 = vmatprep.subr.bf16.mxu0 %v10706_v34  ;;  %7772 = vmatprep.subr.bf16.mxu1 %v10709_v35  ;;  %v10795_v34 = vld [vmem:[%s14822_s1 + $0x14cc] ss:$16 sps:$4 sm:$0xff]   ;;  %v10790_v35 = vld [vmem:[%s14822_s1 + $0x14c0] ss:$16 sps:$4 sm:$0xff]  }
 0x263   :  { %6957 = vmatpush1.bf16.msra.mxu0 %v10704_v36  ;;  %7773 = vmatpush1.bf16.msra.mxu1 %v10707_v37  ;;  %v10793_v36 = vld [vmem:[%s14822_s1 + $0x14c8] ss:$16 sps:$4 sm:$0xff]   ;;  %v10798_v37 = vld [vmem:[%s14822_s1 + $0x14e4] ss:$16 sps:$4 sm:$0xff]  }
 0x264   :  { %6958 = vmatprep.subr.bf16.mxu0 %v10712_v38  ;;  %7774 = vmatprep.subr.bf16.mxu1 %v10715_v39  ;;  %v10801_v38 = vld [vmem:[%s14822_s1 + $0x14ec] ss:$16 sps:$4 sm:$0xff]   ;;  %v10796_v39 = vld [vmem:[%s14822_s1 + $0x14e0] ss:$16 sps:$4 sm:$0xff]  }
 0x267   :  { %6959 = vmatpush1.bf16.msra.mxu0 %v10710_v40  ;;  %7775 = vmatpush1.bf16.msra.mxu1 %v10713_v41  ;;  %v10799_v40 = vld [vmem:[%s14822_s1 + $0x14e8] ss:$16 sps:$4 sm:$0xff]   ;;  %v10804_v41 = vld [vmem:[%s14822_s1 + $0x1504] ss:$16 sps:$4 sm:$0xff]  }
 0x268   :  { %6960 = vmatprep.subr.bf16.mxu0 %v10718_v42  ;;  %7776 = vmatprep.subr.bf16.mxu1 %v10721_v43  ;;  %v10807_v42 = vld [vmem:[%s14822_s1 + $0x150c] ss:$16 sps:$4 sm:$0xff]   ;;  %v10802_v43 = vld [vmem:[%s14822_s1 + $0x1500] ss:$16 sps:$4 sm:$0xff]  }
 0x26b   :  { %6961 = vmatpush1.bf16.msra.mxu0 %v10716_v46  ;;  %7777 = vmatpush1.bf16.msra.mxu1 %v10719_v44  ;;  %v10805_v46 = vld [vmem:[%s14822_s1 + $0x1508] ss:$16 sps:$4 sm:$0xff]   ;;  %v10810_v44 = vld [vmem:[%s14822_s1 + $0x1524] ss:$16 sps:$4 sm:$0xff]  }
 0x26c   :  { %6962 = vmatprep.subr.bf16.mxu0 %v10724_v45  ;;  %7778 = vmatprep.subr.bf16.mxu1 %v10727_v47  ;;  %v10813_v45 = vld [vmem:[%s14822_s1 + $0x152c] ss:$16 sps:$4 sm:$0xff]   ;;  %v10808_v47 = vld [vmem:[%s14822_s1 + $0x1520] ss:$16 sps:$4 sm:$0xff]  }
 0x26f   :  { %6963 = vmatpush1.bf16.msra.mxu0 %v10722_v48  ;;  %7779 = vmatpush1.bf16.msra.mxu1 %v10725_v49  ;;  %v10811_v48 = vld [vmem:[%s14822_s1 + $0x1528] ss:$16 sps:$4 sm:$0xff]   ;;  %v10816_v49 = vld [vmem:[%s14822_s1 + $0x1544] ss:$16 sps:$4 sm:$0xff]  }
 0x270   :  { %6964 = vmatprep.subr.bf16.mxu0 %v10730_v50  ;;  %7780 = vmatprep.subr.bf16.mxu1 %v10733_v53  ;;  %v10819_v50 = vld [vmem:[%s14822_s1 + $0x154c] ss:$16 sps:$4 sm:$0xff]   ;;  %v10814_v53 = vld [vmem:[%s14822_s1 + $0x1540] ss:$16 sps:$4 sm:$0xff]  }
 0x273   :  { %6965 = vmatpush1.bf16.msra.mxu0 %v10728_v51  ;;  %7781 = vmatpush1.bf16.msra.mxu1 %v10731_v52  ;;  %v10817_v51 = vld [vmem:[%s14822_s1 + $0x1548] ss:$16 sps:$4 sm:$0xff]   ;;  %v10822_v52 = vld [vmem:[%s14822_s1 + $0x1564] ss:$16 sps:$4 sm:$0xff]  }
 0x274   :  { %6966 = vmatprep.subr.bf16.mxu0 %v10736_v54  ;;  %7782 = vmatprep.subr.bf16.mxu1 %v10739_v55  ;;  %v10825_v54 = vld [vmem:[%s14822_s1 + $0x156c] ss:$16 sps:$4 sm:$0xff]   ;;  %v10820_v55 = vld [vmem:[%s14822_s1 + $0x1560] ss:$16 sps:$4 sm:$0xff]  }
 0x277   :  { %6967 = vmatpush1.bf16.msra.mxu0 %v10734_v56  ;;  %7783 = vmatpush1.bf16.msra.mxu1 %v10737_v57  ;;  %v10823_v56 = vld [vmem:[%s14822_s1 + $0x1568] ss:$16 sps:$4 sm:$0xff]   ;;  %v10828_v57 = vld [vmem:[%s14822_s1 + $0x1584] ss:$16 sps:$4 sm:$0xff]  }
 0x278   :  { %6968 = vmatprep.subr.bf16.mxu0 %v10743_v60  ;;  %7784 = vmatprep.subr.bf16.mxu1 %v10746_v58  ;;  %v10831_v60 = vld [vmem:[%s14822_s1 + $0x158c] ss:$16 sps:$4 sm:$0xff]   ;;  %v10826_v58 = vld [vmem:[%s14822_s1 + $0x1580] ss:$16 sps:$4 sm:$0xff]  }
 0x27b   :  { %6969 = vmatpush1.bf16.msra.mxu0 %v10741_v59  ;;  %7785 = vmatpush1.bf16.msra.mxu1 %v10744_v61  ;;  %v10829_v59 = vld [vmem:[%s14822_s1 + $0x1588] ss:$16 sps:$4 sm:$0xff]   ;;  %v10834_v61 = vld [vmem:[%s14822_s1 + $0x15a4] ss:$16 sps:$4 sm:$0xff]  }
 0x27c   :  { %6970 = vmatprep.subr.bf16.mxu0 %v10750_v62  ;;  %7786 = vmatprep.subr.bf16.mxu1 %v10753_v63  ;;  %v10837_v62 = vld [vmem:[%s14822_s1 + $0x15ac] ss:$16 sps:$4 sm:$0xff]   ;;  %v10832_v63 = vld [vmem:[%s14822_s1 + $0x15a0] ss:$16 sps:$4 sm:$0xff]  }
 0x27f   :  { %6971 = vmatpush1.bf16.msra.mxu0 %v10748_v0  ;;  %7787 = vmatpush1.bf16.msra.mxu1 %v10751_v3  ;;  %v10835_v0 = vld [vmem:[%s14822_s1 + $0x15a8] ss:$16 sps:$4 sm:$0xff]   ;;  %v10841_v3 = vld [vmem:[%s14822_s1 + $0x15c4] ss:$16 sps:$4 sm:$0xff]  }
 0x280   :  { %6991 = vmatprep.subr.bf16.mxu0 %v10756_v1  ;;  %7807 = vmatprep.subr.bf16.mxu1 %v10759_v2  ;;  %v10844_v1 = vld [vmem:[%s14822_s1 + $0x15cc] ss:$16 sps:$4 sm:$0xff]   ;;  %v10839_v2 = vld [vmem:[%s14822_s1 + $0x15c0] ss:$16 sps:$4 sm:$0xff]  }
 0x282   :  { %6973 = vmatmul.mubr.bf16.vlgmr.msra.gmra.mrb[0].mxu0 %v8453_v4  ;;  %7789 = vmatmul.mubr.bf16.vlgmr.msra.gmra.mrb[0].mxu1 %v8453_v4  ;;  %v10842_v4 = vld [vmem:[%s14822_s1 + $0x15c8] ss:$16 sps:$4 sm:$0xff]  }
 0x283   :  { %6992 = vmatpush1.bf16.msra.mxu0 %v10754_v6  ;;  %7808 = vmatpush1.bf16.msra.mxu1 %v10757_v7  ;;  %v10851_v6 = vld [vmem:[%s14822_s1 + $0x15ec] ss:$16 sps:$4 sm:$0xff]   ;;  %v10846_v7 = vld [vmem:[%s14822_s1 + $0x15e0] ss:$16 sps:$4 sm:$0xff]  }
 0x284   :  { %6993 = vmatprep.subr.bf16.mxu0 %v10762_v8  ;;  %7809 = vmatprep.subr.bf16.mxu1 %v10765_v9  ;;  %v10849_v8 = vld [vmem:[%s14822_s1 + $0x15e8] ss:$16 sps:$4 sm:$0xff]   ;;  %v10854_v9 = vld [vmem:[%s14822_s1 + $0x1604] ss:$16 sps:$4 sm:$0xff]  }
 0x285   :  { %6982 = vmatprep.mubr.bf16.mxu0 %v8486_v10  ;;  %7798 = vmatprep.mubr.bf16.mxu1 %v8486_v10  ;;  %v10857_v10 = vld [vmem:[%s14822_s1 + $0x160c] ss:$16 sps:$4 sm:$0xff]  }
 0x287   :  { %6994 = vmatpush1.bf16.msra.mxu0 %v10760_v11  ;;  %7810 = vmatpush1.bf16.msra.mxu1 %v10763_v12  ;;  %v8455_v11 = vcombine.low %v13493_v16, %v13498_v17  ;;  %v59_v12 = vld [vmem:[%s14823_s0 + $0x150] sm:$0xff]  ;;  %v10863_v16 = vld [vmem:[%s14822_s1 + $0x162c] ss:$16 sps:$4 sm:$0xff]  }
 0x288   :  { %6995 = vmatprep.subr.bf16.mxu0 %v10768_v13  ;;  %7811 = vmatprep.subr.bf16.mxu1 %v10771_v14  ;;  %v10852_v13 = vld [vmem:[%s14822_s1 + $0x1600] ss:$16 sps:$4 sm:$0xff]   ;;  %v10855_v14 = vld [vmem:[%s14822_s1 + $0x1608] ss:$16 sps:$4 sm:$0xff]   ;;  %v8488_v17 = vcombine.high %v59_v12, %v59_v12 }
 0x28a   :  { %6983 = vmatmul.mubr.bf16.gmra.mrb[4].mxu0 %v8485_v15  ;;  %7799 = vmatmul.mubr.bf16.gmra.mrb[4].mxu1 %v8485_v15  ;;  %v10860_v15 = vld [vmem:[%s14822_s1 + $0x1624] ss:$16 sps:$4 sm:$0xff]  }
 0x28b   :  { %6996 = vmatpush1.bf16.msra.mxu0 %v10766_v18  ;;  %7812 = vmatpush1.bf16.msra.mxu1 %v10769_v19  ;;  %v10858_v18 = vld [vmem:[%s14822_s1 + $0x1620] ss:$16 sps:$4 sm:$0xff]   ;;  %v10861_v19 = vld [vmem:[%s14822_s1 + $0x1628] ss:$16 sps:$4 sm:$0xff]  }
 0x28c   :  { %6997 = vmatprep.subr.bf16.mxu0 %v10774_v20  ;;  %7813 = vmatprep.subr.bf16.mxu1 %v10777_v21  ;;  %v10866_v20 = vld [vmem:[%s14822_s1 + $0x1644] ss:$16 sps:$4 sm:$0xff]   ;;  %v10869_v21 = vld [vmem:[%s14822_s1 + $0x164c] ss:$16 sps:$4 sm:$0xff]  }
 0x28d   :  { %7023 = vmatprep.mubr.bf16.mxu0 %v8456_v22  ;;  %7839 = vmatprep.mubr.bf16.mxu1 %v8456_v22  ;;  %v8487_v22 = vcombine.low %v59_v12, %v59_v12  ;;  %v10946_v12 = vld [vmem:[%s14822_s1 + $0x17e4] ss:$16 sps:$4 sm:$0xff]  }
 0x28f   :  { %6998 = vmatpush1.bf16.msra.mxu0 %v10772_v23  ;;  %7814 = vmatpush1.bf16.msra.mxu1 %v10775_v24  ;;  %v13702_v23 = vld [vmem:[%s14823_s0 + $0x58] sm:$0xff] }
 0x290   :  { %6999 = vmatprep.subr.bf16.mxu0 %v10780_v25  ;;  %7815 = vmatprep.subr.bf16.mxu1 %v10783_v26  ;;  %v13707_v24 = vld [vmem:[%s14823_s0 + $0xd8] sm:$0xff]  ;;  %v10864_v25 = vld [vmem:[%s14822_s1 + $0x1640] ss:$16 sps:$4 sm:$0xff]  }
 0x291   :  { %v10867_v26 = vld [vmem:[%s14822_s1 + $0x1648] ss:$16 sps:$4 sm:$0xff]  }
 0x293   :  { %7000 = vmatpush1.bf16.msra.mxu0 %v10778_v27  ;;  %7816 = vmatpush1.bf16.msra.mxu1 %v10781_v28  ;;  %v10872_v27 = vld [vmem:[%s14822_s1 + $0x1664] ss:$16 sps:$4 sm:$0xff]   ;;  %v10875_v28 = vld [vmem:[%s14822_s1 + $0x166c] ss:$16 sps:$4 sm:$0xff]  }
 0x294   :  { %7001 = vmatprep.subr.bf16.mxu0 %v10786_v29  ;;  %7817 = vmatprep.subr.bf16.mxu1 %v10789_v30  ;;  %v8458_v29 = vcombine.high %v13702_v23, %v13707_v24  ;;  %v10870_v30 = vld [vmem:[%s14822_s1 + $0x1660] ss:$16 sps:$4 sm:$0xff]  }
 0x297   :  { %7002 = vmatpush1.bf16.msra.mxu0 %v10784_v31  ;;  %7818 = vmatpush1.bf16.msra.mxu1 %v10787_v32  ;;  %v10873_v31 = vld [vmem:[%s14822_s1 + $0x1668] ss:$16 sps:$4 sm:$0xff]   ;;  %v10878_v32 = vld [vmem:[%s14822_s1 + $0x1684] ss:$16 sps:$4 sm:$0xff]  }
 0x298   :  { %7003 = vmatprep.subr.bf16.mxu0 %v10792_v33  ;;  %7819 = vmatprep.subr.bf16.mxu1 %v10795_v34  ;;  %v10881_v33 = vld [vmem:[%s14822_s1 + $0x168c] ss:$16 sps:$4 sm:$0xff]   ;;  %v10876_v34 = vld [vmem:[%s14822_s1 + $0x1680] ss:$16 sps:$4 sm:$0xff]  }
 0x29b   :  { %7004 = vmatpush1.bf16.msra.mxu0 %v10790_v35  ;;  %7820 = vmatpush1.bf16.msra.mxu1 %v10793_v36  ;;  %v10879_v35 = vld [vmem:[%s14822_s1 + $0x1688] ss:$16 sps:$4 sm:$0xff]   ;;  %v10884_v36 = vld [vmem:[%s14822_s1 + $0x16a4] ss:$16 sps:$4 sm:$0xff]  }
 0x29c   :  { %7005 = vmatprep.subr.bf16.mxu0 %v10798_v37  ;;  %7821 = vmatprep.subr.bf16.mxu1 %v10801_v38  ;;  %v10887_v37 = vld [vmem:[%s14822_s1 + $0x16ac] ss:$16 sps:$4 sm:$0xff]   ;;  %v10882_v38 = vld [vmem:[%s14822_s1 + $0x16a0] ss:$16 sps:$4 sm:$0xff]  }
 0x29f   :  { %7006 = vmatpush1.bf16.msra.mxu0 %v10796_v39  ;;  %7822 = vmatpush1.bf16.msra.mxu1 %v10799_v40  ;;  %v10885_v39 = vld [vmem:[%s14822_s1 + $0x16a8] ss:$16 sps:$4 sm:$0xff]   ;;  %v10890_v40 = vld [vmem:[%s14822_s1 + $0x16c4] ss:$16 sps:$4 sm:$0xff]  }
 0x2a0   :  { %7007 = vmatprep.subr.bf16.mxu0 %v10804_v41  ;;  %7823 = vmatprep.subr.bf16.mxu1 %v10807_v42  ;;  %v10893_v41 = vld [vmem:[%s14822_s1 + $0x16cc] ss:$16 sps:$4 sm:$0xff]   ;;  %v10888_v42 = vld [vmem:[%s14822_s1 + $0x16c0] ss:$16 sps:$4 sm:$0xff]  }
 0x2a3   :  { %7008 = vmatpush1.bf16.msra.mxu0 %v10802_v43  ;;  %7824 = vmatpush1.bf16.msra.mxu1 %v10805_v46  ;;  %v10891_v43 = vld [vmem:[%s14822_s1 + $0x16c8] ss:$16 sps:$4 sm:$0xff]   ;;  %v10896_v46 = vld [vmem:[%s14822_s1 + $0x16e4] ss:$16 sps:$4 sm:$0xff]  }
 0x2a4   :  { %7009 = vmatprep.subr.bf16.mxu0 %v10810_v44  ;;  %7825 = vmatprep.subr.bf16.mxu1 %v10813_v45  ;;  %v10899_v44 = vld [vmem:[%s14822_s1 + $0x16ec] ss:$16 sps:$4 sm:$0xff]   ;;  %v10894_v45 = vld [vmem:[%s14822_s1 + $0x16e0] ss:$16 sps:$4 sm:$0xff]  }
 0x2a7   :  { %7010 = vmatpush1.bf16.msra.mxu0 %v10808_v47  ;;  %7826 = vmatpush1.bf16.msra.mxu1 %v10811_v48  ;;  %v10897_v47 = vld [vmem:[%s14822_s1 + $0x16e8] ss:$16 sps:$4 sm:$0xff]   ;;  %v10902_v48 = vld [vmem:[%s14822_s1 + $0x1704] ss:$16 sps:$4 sm:$0xff]  }
 0x2a8   :  { %7011 = vmatprep.subr.bf16.mxu0 %v10816_v49  ;;  %7827 = vmatprep.subr.bf16.mxu1 %v10819_v50  ;;  %v10905_v49 = vld [vmem:[%s14822_s1 + $0x170c] ss:$16 sps:$4 sm:$0xff]   ;;  %v10900_v50 = vld [vmem:[%s14822_s1 + $0x1700] ss:$16 sps:$4 sm:$0xff]  }
 0x2ab   :  { %7012 = vmatpush1.bf16.msra.mxu0 %v10814_v53  ;;  %7828 = vmatpush1.bf16.msra.mxu1 %v10817_v51  ;;  %v10903_v53 = vld [vmem:[%s14822_s1 + $0x1708] ss:$16 sps:$4 sm:$0xff]   ;;  %v10908_v51 = vld [vmem:[%s14822_s1 + $0x1724] ss:$16 sps:$4 sm:$0xff]  }
 0x2ac   :  { %7013 = vmatprep.subr.bf16.mxu0 %v10822_v52  ;;  %7829 = vmatprep.subr.bf16.mxu1 %v10825_v54  ;;  %v10911_v52 = vld [vmem:[%s14822_s1 + $0x172c] ss:$16 sps:$4 sm:$0xff]   ;;  %v10906_v54 = vld [vmem:[%s14822_s1 + $0x1720] ss:$16 sps:$4 sm:$0xff]  }
 0x2af   :  { %7014 = vmatpush1.bf16.msra.mxu0 %v10820_v55  ;;  %7830 = vmatpush1.bf16.msra.mxu1 %v10823_v56  ;;  %v10909_v55 = vld [vmem:[%s14822_s1 + $0x1728] ss:$16 sps:$4 sm:$0xff]   ;;  %v10914_v56 = vld [vmem:[%s14822_s1 + $0x1744] ss:$16 sps:$4 sm:$0xff]  }
 0x2b0   :  { %7015 = vmatprep.subr.bf16.mxu0 %v10828_v57  ;;  %7831 = vmatprep.subr.bf16.mxu1 %v10831_v60  ;;  %v10917_v57 = vld [vmem:[%s14822_s1 + $0x174c] ss:$16 sps:$4 sm:$0xff]   ;;  %v10912_v60 = vld [vmem:[%s14822_s1 + $0x1740] ss:$16 sps:$4 sm:$0xff]  }
 0x2b3   :  { %7016 = vmatpush1.bf16.msra.mxu0 %v10826_v58  ;;  %7832 = vmatpush1.bf16.msra.mxu1 %v10829_v59  ;;  %v10915_v58 = vld [vmem:[%s14822_s1 + $0x1748] ss:$16 sps:$4 sm:$0xff]   ;;  %v10920_v59 = vld [vmem:[%s14822_s1 + $0x1764] ss:$16 sps:$4 sm:$0xff]  }
 0x2b4   :  { %7017 = vmatprep.subr.bf16.mxu0 %v10834_v61  ;;  %7833 = vmatprep.subr.bf16.mxu1 %v10837_v62  ;;  %v10923_v61 = vld [vmem:[%s14822_s1 + $0x176c] ss:$16 sps:$4 sm:$0xff]   ;;  %v10918_v62 = vld [vmem:[%s14822_s1 + $0x1760] ss:$16 sps:$4 sm:$0xff]  }
 0x2b7   :  { %7018 = vmatpush1.bf16.msra.mxu0 %v10832_v63  ;;  %7834 = vmatpush1.bf16.msra.mxu1 %v10835_v0  ;;  %v10921_v63 = vld [vmem:[%s14822_s1 + $0x1768] ss:$16 sps:$4 sm:$0xff]   ;;  %v10926_v0 = vld [vmem:[%s14822_s1 + $0x1784] ss:$16 sps:$4 sm:$0xff]  }
 0x2b8   :  { %7019 = vmatprep.subr.bf16.mxu0 %v10841_v3  ;;  %7835 = vmatprep.subr.bf16.mxu1 %v10844_v1  ;;  %v10929_v3 = vld [vmem:[%s14822_s1 + $0x178c] ss:$16 sps:$4 sm:$0xff]   ;;  %v10924_v1 = vld [vmem:[%s14822_s1 + $0x1780] ss:$16 sps:$4 sm:$0xff]  }
 0x2bb   :  { %7020 = vmatpush1.bf16.msra.mxu0 %v10839_v2  ;;  %7836 = vmatpush1.bf16.msra.mxu1 %v10842_v4  ;;  %v10927_v2 = vld [vmem:[%s14822_s1 + $0x1788] ss:$16 sps:$4 sm:$0xff]   ;;  %v10932_v4 = vld [vmem:[%s14822_s1 + $0x17a4] ss:$16 sps:$4 sm:$0xff]  }
 0x2bc   :  { %7021 = vmatprep.subr.bf16.mxu0 %v10848_v5  ;;  %7837 = vmatprep.subr.bf16.mxu1 %v10851_v6  ;;  %v10935_v5 = vld [vmem:[%s14822_s1 + $0x17ac] ss:$16 sps:$4 sm:$0xff]   ;;  %v10930_v6 = vld [vmem:[%s14822_s1 + $0x17a0] ss:$16 sps:$4 sm:$0xff]  }
 0x2bf   :  { %7022 = vmatpush1.bf16.msra.mxu0 %v10846_v7  ;;  %7838 = vmatpush1.bf16.msra.mxu1 %v10849_v8  ;;  %v10933_v7 = vld [vmem:[%s14822_s1 + $0x17a8] ss:$16 sps:$4 sm:$0xff]   ;;  %v10939_v8 = vld [vmem:[%s14822_s1 + $0x17c4] ss:$16 sps:$4 sm:$0xff]  }
 0x2c0   :  { %7042 = vmatprep.subr.bf16.mxu0 %v10854_v9  ;;  %7858 = vmatprep.subr.bf16.mxu1 %v10857_v10  ;;  %v10942_v9 = vld [vmem:[%s14822_s1 + $0x17cc] ss:$16 sps:$4 sm:$0xff]   ;;  %v10937_v10 = vld [vmem:[%s14822_s1 + $0x17c0] ss:$16 sps:$4 sm:$0xff]  }
 0x2c2   :  { %7024 = vmatmul.mubr.bf16.vlgmr.msra.gmra.mrb[0].mxu0 %v8455_v11  ;;  %7840 = vmatmul.mubr.bf16.vlgmr.msra.gmra.mrb[0].mxu1 %v8455_v11  ;;  %v10940_v11 = vld [vmem:[%s14822_s1 + $0x17c8] ss:$16 sps:$4 sm:$0xff]  }
 0x2c3   :  { %7043 = vmatpush1.bf16.msra.mxu0 %v10852_v13  ;;  %7859 = vmatpush1.bf16.msra.mxu1 %v10855_v14  ;;  %v10949_v13 = vld [vmem:[%s14822_s1 + $0x17ec] ss:$16 sps:$4 sm:$0xff]   ;;  %v10944_v14 = vld [vmem:[%s14822_s1 + $0x17e0] ss:$16 sps:$4 sm:$0xff]  }
 0x2c4   :  { %7044 = vmatprep.subr.bf16.mxu0 %v10860_v15  ;;  %7860 = vmatprep.subr.bf16.mxu1 %v10863_v16  ;;  %v10947_v15 = vld [vmem:[%s14822_s1 + $0x17e8] ss:$16 sps:$4 sm:$0xff]   ;;  %v10952_v16 = vld [vmem:[%s14822_s1 + $0x1804] ss:$16 sps:$4 sm:$0xff]  }
 0x2c5   :  { %7033 = vmatprep.mubr.bf16.mxu0 %v8488_v17  ;;  %7849 = vmatprep.mubr.bf16.mxu1 %v8488_v17  ;;  %v10955_v17 = vld [vmem:[%s14822_s1 + $0x180c] ss:$16 sps:$4 sm:$0xff]  }
 0x2c7   :  { %7045 = vmatpush1.bf16.msra.mxu0 %v10858_v18  ;;  %7861 = vmatpush1.bf16.msra.mxu1 %v10861_v19  ;;  %v8457_v18 = vcombine.low %v13702_v23, %v13707_v24  ;;  %v60_v19 = vld [vmem:[%s14823_s0 + $0x158] sm:$0xff] }
 0x2c8   :  { %7046 = vmatprep.subr.bf16.mxu0 %v10866_v20  ;;  %7862 = vmatprep.subr.bf16.mxu1 %v10869_v21  ;;  %v10950_v20 = vld [vmem:[%s14822_s1 + $0x1800] ss:$16 sps:$4 sm:$0xff]   ;;  %v10953_v21 = vld [vmem:[%s14822_s1 + $0x1808] ss:$16 sps:$4 sm:$0xff]   ;;  %v10961_v23 = vld [vmem:[%s14822_s1 + $0x182c] ss:$16 sps:$4 sm:$0xff]   ;;  %v8490_v24 = vcombine.high %v60_v19, %v60_v19 }
 0x2ca   :  { %7034 = vmatmul.mubr.bf16.gmra.mrb[4].mxu0 %v8487_v22  ;;  %7850 = vmatmul.mubr.bf16.gmra.mrb[4].mxu1 %v8487_v22  ;;  %v10958_v22 = vld [vmem:[%s14822_s1 + $0x1824] ss:$16 sps:$4 sm:$0xff]  }
 0x2cb   :  { %7047 = vmatpush1.bf16.msra.mxu0 %v10864_v25  ;;  %7863 = vmatpush1.bf16.msra.mxu1 %v10867_v26  ;;  %v10956_v25 = vld [vmem:[%s14822_s1 + $0x1820] ss:$16 sps:$4 sm:$0xff]   ;;  %v10959_v26 = vld [vmem:[%s14822_s1 + $0x1828] ss:$16 sps:$4 sm:$0xff]  }
 0x2cc   :  { %7048 = vmatprep.subr.bf16.mxu0 %v10872_v27  ;;  %7864 = vmatprep.subr.bf16.mxu1 %v10875_v28  ;;  %v10964_v27 = vld [vmem:[%s14822_s1 + $0x1844] ss:$16 sps:$4 sm:$0xff]   ;;  %v10967_v28 = vld [vmem:[%s14822_s1 + $0x184c] ss:$16 sps:$4 sm:$0xff]  }
 0x2cd   :  { %7074 = vmatprep.mubr.bf16.mxu0 %v8458_v29  ;;  %7890 = vmatprep.mubr.bf16.mxu1 %v8458_v29  ;;  %v8489_v29 = vcombine.low %v60_v19, %v60_v19  ;;  %v11044_v19 = vld [vmem:[%s14822_s1 + $0x19e4] ss:$16 sps:$4 sm:$0xff]  }
 0x2cf   :  { %7049 = vmatpush1.bf16.msra.mxu0 %v10870_v30  ;;  %7865 = vmatpush1.bf16.msra.mxu1 %v10873_v31  ;;  %v13911_v30 = vld [vmem:[%s14823_s0 + $0x60] sm:$0xff] }
 0x2d0   :  { %7050 = vmatprep.subr.bf16.mxu0 %v10878_v32  ;;  %7866 = vmatprep.subr.bf16.mxu1 %v10881_v33  ;;  %v13916_v31 = vld [vmem:[%s14823_s0 + $0xe0] sm:$0xff]  ;;  %v10965_v33 = vld [vmem:[%s14822_s1 + $0x1848] ss:$16 sps:$4 sm:$0xff]  }
 0x2d1   :  { %v10962_v32 = vld [vmem:[%s14822_s1 + $0x1840] ss:$16 sps:$4 sm:$0xff]  }
 0x2d3   :  { %7051 = vmatpush1.bf16.msra.mxu0 %v10876_v34  ;;  %7867 = vmatpush1.bf16.msra.mxu1 %v10879_v35  ;;  %v10970_v34 = vld [vmem:[%s14822_s1 + $0x1864] ss:$16 sps:$4 sm:$0xff]   ;;  %v10973_v35 = vld [vmem:[%s14822_s1 + $0x186c] ss:$16 sps:$4 sm:$0xff]  }
 0x2d4   :  { %7052 = vmatprep.subr.bf16.mxu0 %v10884_v36  ;;  %7868 = vmatprep.subr.bf16.mxu1 %v10887_v37  ;;  %v8460_v36 = vcombine.high %v13911_v30, %v13916_v31  ;;  %v10968_v37 = vld [vmem:[%s14822_s1 + $0x1860] ss:$16 sps:$4 sm:$0xff]  }
 0x2d7   :  { %7053 = vmatpush1.bf16.msra.mxu0 %v10882_v38  ;;  %7869 = vmatpush1.bf16.msra.mxu1 %v10885_v39  ;;  %v10971_v38 = vld [vmem:[%s14822_s1 + $0x1868] ss:$16 sps:$4 sm:$0xff]   ;;  %v10976_v39 = vld [vmem:[%s14822_s1 + $0x1884] ss:$16 sps:$4 sm:$0xff]  }
 0x2d8   :  { %7054 = vmatprep.subr.bf16.mxu0 %v10890_v40  ;;  %7870 = vmatprep.subr.bf16.mxu1 %v10893_v41  ;;  %v10979_v40 = vld [vmem:[%s14822_s1 + $0x188c] ss:$16 sps:$4 sm:$0xff]   ;;  %v10974_v41 = vld [vmem:[%s14822_s1 + $0x1880] ss:$16 sps:$4 sm:$0xff]  }
 0x2db   :  { %7055 = vmatpush1.bf16.msra.mxu0 %v10888_v42  ;;  %7871 = vmatpush1.bf16.msra.mxu1 %v10891_v43  ;;  %v10977_v42 = vld [vmem:[%s14822_s1 + $0x1888] ss:$16 sps:$4 sm:$0xff]   ;;  %v10982_v43 = vld [vmem:[%s14822_s1 + $0x18a4] ss:$16 sps:$4 sm:$0xff]  }
 0x2dc   :  { %7056 = vmatprep.subr.bf16.mxu0 %v10896_v46  ;;  %7872 = vmatprep.subr.bf16.mxu1 %v10899_v44  ;;  %v10985_v46 = vld [vmem:[%s14822_s1 + $0x18ac] ss:$16 sps:$4 sm:$0xff]   ;;  %v10980_v44 = vld [vmem:[%s14822_s1 + $0x18a0] ss:$16 sps:$4 sm:$0xff]  }
 0x2df   :  { %7057 = vmatpush1.bf16.msra.mxu0 %v10894_v45  ;;  %7873 = vmatpush1.bf16.msra.mxu1 %v10897_v47  ;;  %v10983_v45 = vld [vmem:[%s14822_s1 + $0x18a8] ss:$16 sps:$4 sm:$0xff]   ;;  %v10988_v47 = vld [vmem:[%s14822_s1 + $0x18c4] ss:$16 sps:$4 sm:$0xff]  }
 0x2e0   :  { %7058 = vmatprep.subr.bf16.mxu0 %v10902_v48  ;;  %7874 = vmatprep.subr.bf16.mxu1 %v10905_v49  ;;  %v10991_v48 = vld [vmem:[%s14822_s1 + $0x18cc] ss:$16 sps:$4 sm:$0xff]   ;;  %v10986_v49 = vld [vmem:[%s14822_s1 + $0x18c0] ss:$16 sps:$4 sm:$0xff]  }
 0x2e3   :  { %7059 = vmatpush1.bf16.msra.mxu0 %v10900_v50  ;;  %7875 = vmatpush1.bf16.msra.mxu1 %v10903_v53  ;;  %v10989_v50 = vld [vmem:[%s14822_s1 + $0x18c8] ss:$16 sps:$4 sm:$0xff]   ;;  %v10994_v53 = vld [vmem:[%s14822_s1 + $0x18e4] ss:$16 sps:$4 sm:$0xff]  }
 0x2e4   :  { %7060 = vmatprep.subr.bf16.mxu0 %v10908_v51  ;;  %7876 = vmatprep.subr.bf16.mxu1 %v10911_v52  ;;  %v10997_v51 = vld [vmem:[%s14822_s1 + $0x18ec] ss:$16 sps:$4 sm:$0xff]   ;;  %v10992_v52 = vld [vmem:[%s14822_s1 + $0x18e0] ss:$16 sps:$4 sm:$0xff]  }
 0x2e7   :  { %7061 = vmatpush1.bf16.msra.mxu0 %v10906_v54  ;;  %7877 = vmatpush1.bf16.msra.mxu1 %v10909_v55  ;;  %v10995_v54 = vld [vmem:[%s14822_s1 + $0x18e8] ss:$16 sps:$4 sm:$0xff]   ;;  %v11000_v55 = vld [vmem:[%s14822_s1 + $0x1904] ss:$16 sps:$4 sm:$0xff]  }
 0x2e8   :  { %7062 = vmatprep.subr.bf16.mxu0 %v10914_v56  ;;  %7878 = vmatprep.subr.bf16.mxu1 %v10917_v57  ;;  %v11003_v56 = vld [vmem:[%s14822_s1 + $0x190c] ss:$16 sps:$4 sm:$0xff]   ;;  %v10998_v57 = vld [vmem:[%s14822_s1 + $0x1900] ss:$16 sps:$4 sm:$0xff]  }
 0x2eb   :  { %7063 = vmatpush1.bf16.msra.mxu0 %v10912_v60  ;;  %7879 = vmatpush1.bf16.msra.mxu1 %v10915_v58  ;;  %v11001_v60 = vld [vmem:[%s14822_s1 + $0x1908] ss:$16 sps:$4 sm:$0xff]   ;;  %v11006_v58 = vld [vmem:[%s14822_s1 + $0x1924] ss:$16 sps:$4 sm:$0xff]  }
 0x2ec   :  { %7064 = vmatprep.subr.bf16.mxu0 %v10920_v59  ;;  %7880 = vmatprep.subr.bf16.mxu1 %v10923_v61  ;;  %v11009_v59 = vld [vmem:[%s14822_s1 + $0x192c] ss:$16 sps:$4 sm:$0xff]   ;;  %v11004_v61 = vld [vmem:[%s14822_s1 + $0x1920] ss:$16 sps:$4 sm:$0xff]  }
 0x2ef   :  { %7065 = vmatpush1.bf16.msra.mxu0 %v10918_v62  ;;  %7881 = vmatpush1.bf16.msra.mxu1 %v10921_v63  ;;  %v11007_v62 = vld [vmem:[%s14822_s1 + $0x1928] ss:$16 sps:$4 sm:$0xff]   ;;  %v11012_v63 = vld [vmem:[%s14822_s1 + $0x1944] ss:$16 sps:$4 sm:$0xff]  }
 0x2f0   :  { %7066 = vmatprep.subr.bf16.mxu0 %v10926_v0  ;;  %7882 = vmatprep.subr.bf16.mxu1 %v10929_v3  ;;  %v11015_v0 = vld [vmem:[%s14822_s1 + $0x194c] ss:$16 sps:$4 sm:$0xff]   ;;  %v11010_v3 = vld [vmem:[%s14822_s1 + $0x1940] ss:$16 sps:$4 sm:$0xff]  }
 0x2f3   :  { %7067 = vmatpush1.bf16.msra.mxu0 %v10924_v1  ;;  %7883 = vmatpush1.bf16.msra.mxu1 %v10927_v2  ;;  %v11013_v1 = vld [vmem:[%s14822_s1 + $0x1948] ss:$16 sps:$4 sm:$0xff]   ;;  %v11018_v2 = vld [vmem:[%s14822_s1 + $0x1964] ss:$16 sps:$4 sm:$0xff]  }
 0x2f4   :  { %7068 = vmatprep.subr.bf16.mxu0 %v10932_v4  ;;  %7884 = vmatprep.subr.bf16.mxu1 %v10935_v5  ;;  %v11021_v4 = vld [vmem:[%s14822_s1 + $0x196c] ss:$16 sps:$4 sm:$0xff]   ;;  %v11016_v5 = vld [vmem:[%s14822_s1 + $0x1960] ss:$16 sps:$4 sm:$0xff]  }
 0x2f7   :  { %7069 = vmatpush1.bf16.msra.mxu0 %v10930_v6  ;;  %7885 = vmatpush1.bf16.msra.mxu1 %v10933_v7  ;;  %v11019_v6 = vld [vmem:[%s14822_s1 + $0x1968] ss:$16 sps:$4 sm:$0xff]   ;;  %v11024_v7 = vld [vmem:[%s14822_s1 + $0x1984] ss:$16 sps:$4 sm:$0xff]  }
 0x2f8   :  { %7070 = vmatprep.subr.bf16.mxu0 %v10939_v8  ;;  %7886 = vmatprep.subr.bf16.mxu1 %v10942_v9  ;;  %v11027_v8 = vld [vmem:[%s14822_s1 + $0x198c] ss:$16 sps:$4 sm:$0xff]   ;;  %v11022_v9 = vld [vmem:[%s14822_s1 + $0x1980] ss:$16 sps:$4 sm:$0xff]  }
 0x2fb   :  { %7071 = vmatpush1.bf16.msra.mxu0 %v10937_v10  ;;  %7887 = vmatpush1.bf16.msra.mxu1 %v10940_v11  ;;  %v11025_v10 = vld [vmem:[%s14822_s1 + $0x1988] ss:$16 sps:$4 sm:$0xff]   ;;  %v11030_v11 = vld [vmem:[%s14822_s1 + $0x19a4] ss:$16 sps:$4 sm:$0xff]  }
 0x2fc   :  { %7072 = vmatprep.subr.bf16.mxu0 %v10946_v12  ;;  %7888 = vmatprep.subr.bf16.mxu1 %v10949_v13  ;;  %v11033_v12 = vld [vmem:[%s14822_s1 + $0x19ac] ss:$16 sps:$4 sm:$0xff]   ;;  %v11028_v13 = vld [vmem:[%s14822_s1 + $0x19a0] ss:$16 sps:$4 sm:$0xff]  }
 0x2ff   :  { %7073 = vmatpush1.bf16.msra.mxu0 %v10944_v14  ;;  %7889 = vmatpush1.bf16.msra.mxu1 %v10947_v15  ;;  %v11031_v14 = vld [vmem:[%s14822_s1 + $0x19a8] ss:$16 sps:$4 sm:$0xff]   ;;  %v11037_v15 = vld [vmem:[%s14822_s1 + $0x19c4] ss:$16 sps:$4 sm:$0xff]  }
 0x300   :  { %7093 = vmatprep.subr.bf16.mxu0 %v10952_v16  ;;  %7909 = vmatprep.subr.bf16.mxu1 %v10955_v17  ;;  %v11040_v16 = vld [vmem:[%s14822_s1 + $0x19cc] ss:$16 sps:$4 sm:$0xff]   ;;  %v11035_v17 = vld [vmem:[%s14822_s1 + $0x19c0] ss:$16 sps:$4 sm:$0xff]  }
 0x302   :  { %7075 = vmatmul.mubr.bf16.vlgmr.msra.gmra.mrb[0].mxu0 %v8457_v18  ;;  %7891 = vmatmul.mubr.bf16.vlgmr.msra.gmra.mrb[0].mxu1 %v8457_v18  ;;  %v11038_v18 = vld [vmem:[%s14822_s1 + $0x19c8] ss:$16 sps:$4 sm:$0xff]  }
 0x303   :  { %7094 = vmatpush1.bf16.msra.mxu0 %v10950_v20  ;;  %7910 = vmatpush1.bf16.msra.mxu1 %v10953_v21  ;;  %v11047_v20 = vld [vmem:[%s14822_s1 + $0x19ec] ss:$16 sps:$4 sm:$0xff]   ;;  %v11042_v21 = vld [vmem:[%s14822_s1 + $0x19e0] ss:$16 sps:$4 sm:$0xff]  }
 0x304   :  { %7095 = vmatprep.subr.bf16.mxu0 %v10958_v22  ;;  %7911 = vmatprep.subr.bf16.mxu1 %v10961_v23  ;;  %v11045_v22 = vld [vmem:[%s14822_s1 + $0x19e8] ss:$16 sps:$4 sm:$0xff]   ;;  %v11050_v23 = vld [vmem:[%s14822_s1 + $0x1a04] ss:$16 sps:$4 sm:$0xff]  }
 0x305   :  { %7084 = vmatprep.mubr.bf16.mxu0 %v8490_v24  ;;  %7900 = vmatprep.mubr.bf16.mxu1 %v8490_v24  ;;  %v11053_v24 = vld [vmem:[%s14822_s1 + $0x1a0c] ss:$16 sps:$4 sm:$0xff]  }
 0x307   :  { %7096 = vmatpush1.bf16.msra.mxu0 %v10956_v25  ;;  %7912 = vmatpush1.bf16.msra.mxu1 %v10959_v26  ;;  %v8459_v25 = vcombine.low %v13911_v30, %v13916_v31  ;;  %v61_v26 = vld [vmem:[%s14823_s0 + $0x160] sm:$0xff]  ;;  %v11059_v30 = vld [vmem:[%s14822_s1 + $0x1a2c] ss:$16 sps:$4 sm:$0xff]  }
 0x308   :  { %7097 = vmatprep.subr.bf16.mxu0 %v10964_v27  ;;  %7913 = vmatprep.subr.bf16.mxu1 %v10967_v28  ;;  %v11048_v27 = vld [vmem:[%s14822_s1 + $0x1a00] ss:$16 sps:$4 sm:$0xff]   ;;  %v11051_v28 = vld [vmem:[%s14822_s1 + $0x1a08] ss:$16 sps:$4 sm:$0xff]   ;;  %v8492_v31 = vcombine.high %v61_v26, %v61_v26 }
 0x30a   :  { %7085 = vmatmul.mubr.bf16.gmra.mrb[4].mxu0 %v8489_v29  ;;  %7901 = vmatmul.mubr.bf16.gmra.mrb[4].mxu1 %v8489_v29  ;;  %v11056_v29 = vld [vmem:[%s14822_s1 + $0x1a24] ss:$16 sps:$4 sm:$0xff]  }
 0x30b   :  { %7098 = vmatpush1.bf16.msra.mxu0 %v10962_v32  ;;  %7914 = vmatpush1.bf16.msra.mxu1 %v10965_v33  ;;  %v11054_v32 = vld [vmem:[%s14822_s1 + $0x1a20] ss:$16 sps:$4 sm:$0xff]   ;;  %v11057_v33 = vld [vmem:[%s14822_s1 + $0x1a28] ss:$16 sps:$4 sm:$0xff]  }
 0x30c   :  { %7099 = vmatprep.subr.bf16.mxu0 %v10970_v34  ;;  %7915 = vmatprep.subr.bf16.mxu1 %v10973_v35  ;;  %v11062_v34 = vld [vmem:[%s14822_s1 + $0x1a44] ss:$16 sps:$4 sm:$0xff]   ;;  %v11065_v35 = vld [vmem:[%s14822_s1 + $0x1a4c] ss:$16 sps:$4 sm:$0xff]  }
 0x30d   :  { %7125 = vmatprep.mubr.bf16.mxu0 %v8460_v36  ;;  %7941 = vmatprep.mubr.bf16.mxu1 %v8460_v36  ;;  %v8491_v36 = vcombine.low %v61_v26, %v61_v26  ;;  %v11142_v26 = vld [vmem:[%s14822_s1 + $0x1be4] ss:$16 sps:$4 sm:$0xff]  }
 0x30f   :  { %7100 = vmatpush1.bf16.msra.mxu0 %v10968_v37  ;;  %7916 = vmatpush1.bf16.msra.mxu1 %v10971_v38  ;;  %v14120_v37 = vld [vmem:[%s14823_s0 + $0x68] sm:$0xff] }
 0x310   :  { %7101 = vmatprep.subr.bf16.mxu0 %v10976_v39  ;;  %7917 = vmatprep.subr.bf16.mxu1 %v10979_v40  ;;  %v14125_v38 = vld [vmem:[%s14823_s0 + $0xe8] sm:$0xff]  ;;  %v11060_v39 = vld [vmem:[%s14822_s1 + $0x1a40] ss:$16 sps:$4 sm:$0xff]  }
 0x311   :  { %v11063_v40 = vld [vmem:[%s14822_s1 + $0x1a48] ss:$16 sps:$4 sm:$0xff]  }
 0x313   :  { %7102 = vmatpush1.bf16.msra.mxu0 %v10974_v41  ;;  %7918 = vmatpush1.bf16.msra.mxu1 %v10977_v42  ;;  %v11068_v41 = vld [vmem:[%s14822_s1 + $0x1a64] ss:$16 sps:$4 sm:$0xff]   ;;  %v11071_v42 = vld [vmem:[%s14822_s1 + $0x1a6c] ss:$16 sps:$4 sm:$0xff]  }
 0x314   :  { %7103 = vmatprep.subr.bf16.mxu0 %v10982_v43  ;;  %7919 = vmatprep.subr.bf16.mxu1 %v10985_v46  ;;  %v8462_v43 = vcombine.high %v14120_v37, %v14125_v38  ;;  %v11066_v46 = vld [vmem:[%s14822_s1 + $0x1a60] ss:$16 sps:$4 sm:$0xff]  }
 0x317   :  { %7104 = vmatpush1.bf16.msra.mxu0 %v10980_v44  ;;  %7920 = vmatpush1.bf16.msra.mxu1 %v10983_v45  ;;  %v11069_v44 = vld [vmem:[%s14822_s1 + $0x1a68] ss:$16 sps:$4 sm:$0xff]   ;;  %v11074_v45 = vld [vmem:[%s14822_s1 + $0x1a84] ss:$16 sps:$4 sm:$0xff]  }
 0x318   :  { %7105 = vmatprep.subr.bf16.mxu0 %v10988_v47  ;;  %7921 = vmatprep.subr.bf16.mxu1 %v10991_v48  ;;  %v11077_v47 = vld [vmem:[%s14822_s1 + $0x1a8c] ss:$16 sps:$4 sm:$0xff]   ;;  %v11072_v48 = vld [vmem:[%s14822_s1 + $0x1a80] ss:$16 sps:$4 sm:$0xff]  }
 0x31b   :  { %7106 = vmatpush1.bf16.msra.mxu0 %v10986_v49  ;;  %7922 = vmatpush1.bf16.msra.mxu1 %v10989_v50  ;;  %v11075_v49 = vld [vmem:[%s14822_s1 + $0x1a88] ss:$16 sps:$4 sm:$0xff]   ;;  %v11080_v50 = vld [vmem:[%s14822_s1 + $0x1aa4] ss:$16 sps:$4 sm:$0xff]  }
 0x31c   :  { %7107 = vmatprep.subr.bf16.mxu0 %v10994_v53  ;;  %7923 = vmatprep.subr.bf16.mxu1 %v10997_v51  ;;  %v11083_v53 = vld [vmem:[%s14822_s1 + $0x1aac] ss:$16 sps:$4 sm:$0xff]   ;;  %v11078_v51 = vld [vmem:[%s14822_s1 + $0x1aa0] ss:$16 sps:$4 sm:$0xff]  }
 0x31f   :  { %7108 = vmatpush1.bf16.msra.mxu0 %v10992_v52  ;;  %7924 = vmatpush1.bf16.msra.mxu1 %v10995_v54  ;;  %v11081_v52 = vld [vmem:[%s14822_s1 + $0x1aa8] ss:$16 sps:$4 sm:$0xff]   ;;  %v11086_v54 = vld [vmem:[%s14822_s1 + $0x1ac4] ss:$16 sps:$4 sm:$0xff]  }
 0x320   :  { %7109 = vmatprep.subr.bf16.mxu0 %v11000_v55  ;;  %7925 = vmatprep.subr.bf16.mxu1 %v11003_v56  ;;  %v11089_v55 = vld [vmem:[%s14822_s1 + $0x1acc] ss:$16 sps:$4 sm:$0xff]   ;;  %v11084_v56 = vld [vmem:[%s14822_s1 + $0x1ac0] ss:$16 sps:$4 sm:$0xff]  }
 0x323   :  { %7110 = vmatpush1.bf16.msra.mxu0 %v10998_v57  ;;  %7926 = vmatpush1.bf16.msra.mxu1 %v11001_v60  ;;  %v11087_v57 = vld [vmem:[%s14822_s1 + $0x1ac8] ss:$16 sps:$4 sm:$0xff]   ;;  %v11092_v60 = vld [vmem:[%s14822_s1 + $0x1ae4] ss:$16 sps:$4 sm:$0xff]  }
 0x324   :  { %7111 = vmatprep.subr.bf16.mxu0 %v11006_v58  ;;  %7927 = vmatprep.subr.bf16.mxu1 %v11009_v59  ;;  %v11095_v58 = vld [vmem:[%s14822_s1 + $0x1aec] ss:$16 sps:$4 sm:$0xff]   ;;  %v11090_v59 = vld [vmem:[%s14822_s1 + $0x1ae0] ss:$16 sps:$4 sm:$0xff]  }
 0x327   :  { %7112 = vmatpush1.bf16.msra.mxu0 %v11004_v61  ;;  %7928 = vmatpush1.bf16.msra.mxu1 %v11007_v62  ;;  %v11093_v61 = vld [vmem:[%s14822_s1 + $0x1ae8] ss:$16 sps:$4 sm:$0xff]   ;;  %v11098_v62 = vld [vmem:[%s14822_s1 + $0x1b04] ss:$16 sps:$4 sm:$0xff]  }
 0x328   :  { %7113 = vmatprep.subr.bf16.mxu0 %v11012_v63  ;;  %7929 = vmatprep.subr.bf16.mxu1 %v11015_v0  ;;  %v11101_v63 = vld [vmem:[%s14822_s1 + $0x1b0c] ss:$16 sps:$4 sm:$0xff]   ;;  %v11096_v0 = vld [vmem:[%s14822_s1 + $0x1b00] ss:$16 sps:$4 sm:$0xff]  }
 0x32b   :  { %7114 = vmatpush1.bf16.msra.mxu0 %v11010_v3  ;;  %7930 = vmatpush1.bf16.msra.mxu1 %v11013_v1  ;;  %v11099_v3 = vld [vmem:[%s14822_s1 + $0x1b08] ss:$16 sps:$4 sm:$0xff]   ;;  %v11104_v1 = vld [vmem:[%s14822_s1 + $0x1b24] ss:$16 sps:$4 sm:$0xff]  }
 0x32c   :  { %7115 = vmatprep.subr.bf16.mxu0 %v11018_v2  ;;  %7931 = vmatprep.subr.bf16.mxu1 %v11021_v4  ;;  %v11107_v2 = vld [vmem:[%s14822_s1 + $0x1b2c] ss:$16 sps:$4 sm:$0xff]   ;;  %v11102_v4 = vld [vmem:[%s14822_s1 + $0x1b20] ss:$16 sps:$4 sm:$0xff]  }
 0x32f   :  { %7116 = vmatpush1.bf16.msra.mxu0 %v11016_v5  ;;  %7932 = vmatpush1.bf16.msra.mxu1 %v11019_v6  ;;  %v11105_v5 = vld [vmem:[%s14822_s1 + $0x1b28] ss:$16 sps:$4 sm:$0xff]   ;;  %v11110_v6 = vld [vmem:[%s14822_s1 + $0x1b44] ss:$16 sps:$4 sm:$0xff]  }
 0x330   :  { %7117 = vmatprep.subr.bf16.mxu0 %v11024_v7  ;;  %7933 = vmatprep.subr.bf16.mxu1 %v11027_v8  ;;  %v11113_v7 = vld [vmem:[%s14822_s1 + $0x1b4c] ss:$16 sps:$4 sm:$0xff]   ;;  %v11108_v8 = vld [vmem:[%s14822_s1 + $0x1b40] ss:$16 sps:$4 sm:$0xff]  }
 0x333   :  { %7118 = vmatpush1.bf16.msra.mxu0 %v11022_v9  ;;  %7934 = vmatpush1.bf16.msra.mxu1 %v11025_v10  ;;  %v11111_v9 = vld [vmem:[%s14822_s1 + $0x1b48] ss:$16 sps:$4 sm:$0xff]   ;;  %v11116_v10 = vld [vmem:[%s14822_s1 + $0x1b64] ss:$16 sps:$4 sm:$0xff]  }
 0x334   :  { %7119 = vmatprep.subr.bf16.mxu0 %v11030_v11  ;;  %7935 = vmatprep.subr.bf16.mxu1 %v11033_v12  ;;  %v11119_v11 = vld [vmem:[%s14822_s1 + $0x1b6c] ss:$16 sps:$4 sm:$0xff]   ;;  %v11114_v12 = vld [vmem:[%s14822_s1 + $0x1b60] ss:$16 sps:$4 sm:$0xff]  }
 0x337   :  { %7120 = vmatpush1.bf16.msra.mxu0 %v11028_v13  ;;  %7936 = vmatpush1.bf16.msra.mxu1 %v11031_v14  ;;  %v11117_v13 = vld [vmem:[%s14822_s1 + $0x1b68] ss:$16 sps:$4 sm:$0xff]   ;;  %v11122_v14 = vld [vmem:[%s14822_s1 + $0x1b84] ss:$16 sps:$4 sm:$0xff]  }
 0x338   :  { %7121 = vmatprep.subr.bf16.mxu0 %v11037_v15  ;;  %7937 = vmatprep.subr.bf16.mxu1 %v11040_v16  ;;  %v11125_v15 = vld [vmem:[%s14822_s1 + $0x1b8c] ss:$16 sps:$4 sm:$0xff]   ;;  %v11120_v16 = vld [vmem:[%s14822_s1 + $0x1b80] ss:$16 sps:$4 sm:$0xff]  }
 0x33b   :  { %7122 = vmatpush1.bf16.msra.mxu0 %v11035_v17  ;;  %7938 = vmatpush1.bf16.msra.mxu1 %v11038_v18  ;;  %v11123_v17 = vld [vmem:[%s14822_s1 + $0x1b88] ss:$16 sps:$4 sm:$0xff]   ;;  %v11128_v18 = vld [vmem:[%s14822_s1 + $0x1ba4] ss:$16 sps:$4 sm:$0xff]  }
 0x33c   :  { %7123 = vmatprep.subr.bf16.mxu0 %v11044_v19  ;;  %7939 = vmatprep.subr.bf16.mxu1 %v11047_v20  ;;  %v11131_v19 = vld [vmem:[%s14822_s1 + $0x1bac] ss:$16 sps:$4 sm:$0xff]   ;;  %v11126_v20 = vld [vmem:[%s14822_s1 + $0x1ba0] ss:$16 sps:$4 sm:$0xff]  }
 0x33f   :  { %7124 = vmatpush1.bf16.msra.mxu0 %v11042_v21  ;;  %7940 = vmatpush1.bf16.msra.mxu1 %v11045_v22  ;;  %v11129_v21 = vld [vmem:[%s14822_s1 + $0x1ba8] ss:$16 sps:$4 sm:$0xff]   ;;  %v11135_v22 = vld [vmem:[%s14822_s1 + $0x1bc4] ss:$16 sps:$4 sm:$0xff]  }
 0x340   :  { %7144 = vmatprep.subr.bf16.mxu0 %v11050_v23  ;;  %7960 = vmatprep.subr.bf16.mxu1 %v11053_v24  ;;  %v11138_v23 = vld [vmem:[%s14822_s1 + $0x1bcc] ss:$16 sps:$4 sm:$0xff]   ;;  %v11133_v24 = vld [vmem:[%s14822_s1 + $0x1bc0] ss:$16 sps:$4 sm:$0xff]  }
 0x342   :  { %7126 = vmatmul.mubr.bf16.vlgmr.msra.gmra.mrb[0].mxu0 %v8459_v25  ;;  %7942 = vmatmul.mubr.bf16.vlgmr.msra.gmra.mrb[0].mxu1 %v8459_v25  ;;  %v11136_v25 = vld [vmem:[%s14822_s1 + $0x1bc8] ss:$16 sps:$4 sm:$0xff]  }
 0x343   :  { %7145 = vmatpush1.bf16.msra.mxu0 %v11048_v27  ;;  %7961 = vmatpush1.bf16.msra.mxu1 %v11051_v28  ;;  %v11145_v27 = vld [vmem:[%s14822_s1 + $0x1bec] ss:$16 sps:$4 sm:$0xff]   ;;  %v11140_v28 = vld [vmem:[%s14822_s1 + $0x1be0] ss:$16 sps:$4 sm:$0xff]  }
 0x344   :  { %7146 = vmatprep.subr.bf16.mxu0 %v11056_v29  ;;  %7962 = vmatprep.subr.bf16.mxu1 %v11059_v30  ;;  %v11143_v29 = vld [vmem:[%s14822_s1 + $0x1be8] ss:$16 sps:$4 sm:$0xff]   ;;  %v11148_v30 = vld [vmem:[%s14822_s1 + $0x1c04] ss:$16 sps:$4 sm:$0xff]  }
 0x345   :  { %7135 = vmatprep.mubr.bf16.mxu0 %v8492_v31  ;;  %7951 = vmatprep.mubr.bf16.mxu1 %v8492_v31  ;;  %v11151_v31 = vld [vmem:[%s14822_s1 + $0x1c0c] ss:$16 sps:$4 sm:$0xff]  }
 0x347   :  { %7147 = vmatpush1.bf16.msra.mxu0 %v11054_v32  ;;  %7963 = vmatpush1.bf16.msra.mxu1 %v11057_v33  ;;  %v8461_v32 = vcombine.low %v14120_v37, %v14125_v38  ;;  %v62_v33 = vld [vmem:[%s14823_s0 + $0x168] sm:$0xff] }
 0x348   :  { %7148 = vmatprep.subr.bf16.mxu0 %v11062_v34  ;;  %7964 = vmatprep.subr.bf16.mxu1 %v11065_v35  ;;  %v11146_v34 = vld [vmem:[%s14822_s1 + $0x1c00] ss:$16 sps:$4 sm:$0xff]   ;;  %v11149_v35 = vld [vmem:[%s14822_s1 + $0x1c08] ss:$16 sps:$4 sm:$0xff]   ;;  %v11157_v37 = vld [vmem:[%s14822_s1 + $0x1c2c] ss:$16 sps:$4 sm:$0xff]   ;;  %v8494_v38 = vcombine.high %v62_v33, %v62_v33 }
 0x34a   :  { %7136 = vmatmul.mubr.bf16.gmra.mrb[4].mxu0 %v8491_v36  ;;  %7952 = vmatmul.mubr.bf16.gmra.mrb[4].mxu1 %v8491_v36  ;;  %v11154_v36 = vld [vmem:[%s14822_s1 + $0x1c24] ss:$16 sps:$4 sm:$0xff]  }
 0x34b   :  { %7149 = vmatpush1.bf16.msra.mxu0 %v11060_v39  ;;  %7965 = vmatpush1.bf16.msra.mxu1 %v11063_v40  ;;  %v11152_v39 = vld [vmem:[%s14822_s1 + $0x1c20] ss:$16 sps:$4 sm:$0xff]   ;;  %v11155_v40 = vld [vmem:[%s14822_s1 + $0x1c28] ss:$16 sps:$4 sm:$0xff]  }
 0x34c   :  { %7150 = vmatprep.subr.bf16.mxu0 %v11068_v41  ;;  %7966 = vmatprep.subr.bf16.mxu1 %v11071_v42  ;;  %v11160_v41 = vld [vmem:[%s14822_s1 + $0x1c44] ss:$16 sps:$4 sm:$0xff]   ;;  %v11163_v42 = vld [vmem:[%s14822_s1 + $0x1c4c] ss:$16 sps:$4 sm:$0xff]  }
 0x34d   :  { %7176 = vmatprep.mubr.bf16.mxu0 %v8462_v43  ;;  %7992 = vmatprep.mubr.bf16.mxu1 %v8462_v43  ;;  %v8493_v43 = vcombine.low %v62_v33, %v62_v33  ;;  %v11240_v33 = vld [vmem:[%s14822_s1 + $0x1de4] ss:$16 sps:$4 sm:$0xff]  }
 0x34f   :  { %7151 = vmatpush1.bf16.msra.mxu0 %v11066_v46  ;;  %7967 = vmatpush1.bf16.msra.mxu1 %v11069_v44  ;;  %v14329_v46 = vld [vmem:[%s14823_s0 + $0x70] sm:$0xff] }
 0x350   :  { %7152 = vmatprep.subr.bf16.mxu0 %v11074_v45  ;;  %7968 = vmatprep.subr.bf16.mxu1 %v11077_v47  ;;  %v14334_v44 = vld [vmem:[%s14823_s0 + $0xf0] sm:$0xff]  ;;  %v11161_v47 = vld [vmem:[%s14822_s1 + $0x1c48] ss:$16 sps:$4 sm:$0xff]  }
 0x351   :  { %v11158_v45 = vld [vmem:[%s14822_s1 + $0x1c40] ss:$16 sps:$4 sm:$0xff]  }
 0x353   :  { %7153 = vmatpush1.bf16.msra.mxu0 %v11072_v48  ;;  %7969 = vmatpush1.bf16.msra.mxu1 %v11075_v49  ;;  %v11166_v48 = vld [vmem:[%s14822_s1 + $0x1c64] ss:$16 sps:$4 sm:$0xff]   ;;  %v11169_v49 = vld [vmem:[%s14822_s1 + $0x1c6c] ss:$16 sps:$4 sm:$0xff]  }
 0x354   :  { %7154 = vmatprep.subr.bf16.mxu0 %v11080_v50  ;;  %7970 = vmatprep.subr.bf16.mxu1 %v11083_v53  ;;  %v8464_v50 = vcombine.high %v14329_v46, %v14334_v44  ;;  %v11164_v53 = vld [vmem:[%s14822_s1 + $0x1c60] ss:$16 sps:$4 sm:$0xff]  }
 0x357   :  { %7155 = vmatpush1.bf16.msra.mxu0 %v11078_v51  ;;  %7971 = vmatpush1.bf16.msra.mxu1 %v11081_v52  ;;  %v11167_v51 = vld [vmem:[%s14822_s1 + $0x1c68] ss:$16 sps:$4 sm:$0xff]   ;;  %v11172_v52 = vld [vmem:[%s14822_s1 + $0x1c84] ss:$16 sps:$4 sm:$0xff]  }
 0x358   :  { %7156 = vmatprep.subr.bf16.mxu0 %v11086_v54  ;;  %7972 = vmatprep.subr.bf16.mxu1 %v11089_v55  ;;  %v11175_v54 = vld [vmem:[%s14822_s1 + $0x1c8c] ss:$16 sps:$4 sm:$0xff]   ;;  %v11170_v55 = vld [vmem:[%s14822_s1 + $0x1c80] ss:$16 sps:$4 sm:$0xff]  }
 0x35b   :  { %7157 = vmatpush1.bf16.msra.mxu0 %v11084_v56  ;;  %7973 = vmatpush1.bf16.msra.mxu1 %v11087_v57  ;;  %v11173_v56 = vld [vmem:[%s14822_s1 + $0x1c88] ss:$16 sps:$4 sm:$0xff]   ;;  %v11178_v57 = vld [vmem:[%s14822_s1 + $0x1ca4] ss:$16 sps:$4 sm:$0xff]  }
 0x35c   :  { %7158 = vmatprep.subr.bf16.mxu0 %v11092_v60  ;;  %7974 = vmatprep.subr.bf16.mxu1 %v11095_v58  ;;  %v11181_v60 = vld [vmem:[%s14822_s1 + $0x1cac] ss:$16 sps:$4 sm:$0xff]   ;;  %v11176_v58 = vld [vmem:[%s14822_s1 + $0x1ca0] ss:$16 sps:$4 sm:$0xff]  }
 0x35f   :  { %7159 = vmatpush1.bf16.msra.mxu0 %v11090_v59  ;;  %7975 = vmatpush1.bf16.msra.mxu1 %v11093_v61  ;;  %v11179_v59 = vld [vmem:[%s14822_s1 + $0x1ca8] ss:$16 sps:$4 sm:$0xff]   ;;  %v11184_v61 = vld [vmem:[%s14822_s1 + $0x1cc4] ss:$16 sps:$4 sm:$0xff]  }
 0x360   :  { %7160 = vmatprep.subr.bf16.mxu0 %v11098_v62  ;;  %7976 = vmatprep.subr.bf16.mxu1 %v11101_v63  ;;  %v11187_v62 = vld [vmem:[%s14822_s1 + $0x1ccc] ss:$16 sps:$4 sm:$0xff]   ;;  %v11182_v63 = vld [vmem:[%s14822_s1 + $0x1cc0] ss:$16 sps:$4 sm:$0xff]  }
 0x363   :  { %7161 = vmatpush1.bf16.msra.mxu0 %v11096_v0  ;;  %7977 = vmatpush1.bf16.msra.mxu1 %v11099_v3  ;;  %v11185_v0 = vld [vmem:[%s14822_s1 + $0x1cc8] ss:$16 sps:$4 sm:$0xff]   ;;  %v11190_v3 = vld [vmem:[%s14822_s1 + $0x1ce4] ss:$16 sps:$4 sm:$0xff]  }
 0x364   :  { %7162 = vmatprep.subr.bf16.mxu0 %v11104_v1  ;;  %7978 = vmatprep.subr.bf16.mxu1 %v11107_v2  ;;  %v11193_v1 = vld [vmem:[%s14822_s1 + $0x1cec] ss:$16 sps:$4 sm:$0xff]   ;;  %v11188_v2 = vld [vmem:[%s14822_s1 + $0x1ce0] ss:$16 sps:$4 sm:$0xff]  }
 0x367   :  { %7163 = vmatpush1.bf16.msra.mxu0 %v11102_v4  ;;  %7979 = vmatpush1.bf16.msra.mxu1 %v11105_v5  ;;  %v11191_v4 = vld [vmem:[%s14822_s1 + $0x1ce8] ss:$16 sps:$4 sm:$0xff]   ;;  %v11196_v5 = vld [vmem:[%s14822_s1 + $0x1d04] ss:$16 sps:$4 sm:$0xff]  }
 0x368   :  { %7164 = vmatprep.subr.bf16.mxu0 %v11110_v6  ;;  %7980 = vmatprep.subr.bf16.mxu1 %v11113_v7  ;;  %v11199_v6 = vld [vmem:[%s14822_s1 + $0x1d0c] ss:$16 sps:$4 sm:$0xff]   ;;  %v11194_v7 = vld [vmem:[%s14822_s1 + $0x1d00] ss:$16 sps:$4 sm:$0xff]  }
 0x36b   :  { %7165 = vmatpush1.bf16.msra.mxu0 %v11108_v8  ;;  %7981 = vmatpush1.bf16.msra.mxu1 %v11111_v9  ;;  %v11197_v8 = vld [vmem:[%s14822_s1 + $0x1d08] ss:$16 sps:$4 sm:$0xff]   ;;  %v11202_v9 = vld [vmem:[%s14822_s1 + $0x1d24] ss:$16 sps:$4 sm:$0xff]  }
 0x36c   :  { %7166 = vmatprep.subr.bf16.mxu0 %v11116_v10  ;;  %7982 = vmatprep.subr.bf16.mxu1 %v11119_v11  ;;  %v11205_v10 = vld [vmem:[%s14822_s1 + $0x1d2c] ss:$16 sps:$4 sm:$0xff]   ;;  %v11200_v11 = vld [vmem:[%s14822_s1 + $0x1d20] ss:$16 sps:$4 sm:$0xff]  }
 0x36f   :  { %7167 = vmatpush1.bf16.msra.mxu0 %v11114_v12  ;;  %7983 = vmatpush1.bf16.msra.mxu1 %v11117_v13  ;;  %v11203_v12 = vld [vmem:[%s14822_s1 + $0x1d28] ss:$16 sps:$4 sm:$0xff]   ;;  %v11208_v13 = vld [vmem:[%s14822_s1 + $0x1d44] ss:$16 sps:$4 sm:$0xff]  }
 0x370   :  { %7168 = vmatprep.subr.bf16.mxu0 %v11122_v14  ;;  %7984 = vmatprep.subr.bf16.mxu1 %v11125_v15  ;;  %v11211_v14 = vld [vmem:[%s14822_s1 + $0x1d4c] ss:$16 sps:$4 sm:$0xff]   ;;  %v11206_v15 = vld [vmem:[%s14822_s1 + $0x1d40] ss:$16 sps:$4 sm:$0xff]  }
 0x373   :  { %7169 = vmatpush1.bf16.msra.mxu0 %v11120_v16  ;;  %7985 = vmatpush1.bf16.msra.mxu1 %v11123_v17  ;;  %v11209_v16 = vld [vmem:[%s14822_s1 + $0x1d48] ss:$16 sps:$4 sm:$0xff]   ;;  %v11214_v17 = vld [vmem:[%s14822_s1 + $0x1d64] ss:$16 sps:$4 sm:$0xff]  }
 0x374   :  { %7170 = vmatprep.subr.bf16.mxu0 %v11128_v18  ;;  %7986 = vmatprep.subr.bf16.mxu1 %v11131_v19  ;;  %v11217_v18 = vld [vmem:[%s14822_s1 + $0x1d6c] ss:$16 sps:$4 sm:$0xff]   ;;  %v11212_v19 = vld [vmem:[%s14822_s1 + $0x1d60] ss:$16 sps:$4 sm:$0xff]  }
 0x377   :  { %7171 = vmatpush1.bf16.msra.mxu0 %v11126_v20  ;;  %7987 = vmatpush1.bf16.msra.mxu1 %v11129_v21  ;;  %v11215_v20 = vld [vmem:[%s14822_s1 + $0x1d68] ss:$16 sps:$4 sm:$0xff]   ;;  %v11220_v21 = vld [vmem:[%s14822_s1 + $0x1d84] ss:$16 sps:$4 sm:$0xff]  }
 0x378   :  { %7172 = vmatprep.subr.bf16.mxu0 %v11135_v22  ;;  %7988 = vmatprep.subr.bf16.mxu1 %v11138_v23  ;;  %v11223_v22 = vld [vmem:[%s14822_s1 + $0x1d8c] ss:$16 sps:$4 sm:$0xff]   ;;  %v11218_v23 = vld [vmem:[%s14822_s1 + $0x1d80] ss:$16 sps:$4 sm:$0xff]  }
 0x37b   :  { %7173 = vmatpush1.bf16.msra.mxu0 %v11133_v24  ;;  %7989 = vmatpush1.bf16.msra.mxu1 %v11136_v25  ;;  %v11221_v24 = vld [vmem:[%s14822_s1 + $0x1d88] ss:$16 sps:$4 sm:$0xff]   ;;  %v11226_v25 = vld [vmem:[%s14822_s1 + $0x1da4] ss:$16 sps:$4 sm:$0xff]  }
 0x37c   :  { %7174 = vmatprep.subr.bf16.mxu0 %v11142_v26  ;;  %7990 = vmatprep.subr.bf16.mxu1 %v11145_v27  ;;  %v11229_v26 = vld [vmem:[%s14822_s1 + $0x1dac] ss:$16 sps:$4 sm:$0xff]   ;;  %v11224_v27 = vld [vmem:[%s14822_s1 + $0x1da0] ss:$16 sps:$4 sm:$0xff]  }
 0x37f   :  { %7175 = vmatpush1.bf16.msra.mxu0 %v11140_v28  ;;  %7991 = vmatpush1.bf16.msra.mxu1 %v11143_v29  ;;  %v11227_v28 = vld [vmem:[%s14822_s1 + $0x1da8] ss:$16 sps:$4 sm:$0xff]   ;;  %v11233_v29 = vld [vmem:[%s14822_s1 + $0x1dc4] ss:$16 sps:$4 sm:$0xff]  }
 0x380   :  { %7195 = vmatprep.subr.bf16.mxu0 %v11148_v30  ;;  %8011 = vmatprep.subr.bf16.mxu1 %v11151_v31  ;;  %v11236_v30 = vld [vmem:[%s14822_s1 + $0x1dcc] ss:$16 sps:$4 sm:$0xff]   ;;  %v11231_v31 = vld [vmem:[%s14822_s1 + $0x1dc0] ss:$16 sps:$4 sm:$0xff]  }
 0x382   :  { %7177 = vmatmul.mubr.bf16.vlgmr.msra.gmra.mrb[0].mxu0 %v8461_v32  ;;  %7993 = vmatmul.mubr.bf16.vlgmr.msra.gmra.mrb[0].mxu1 %v8461_v32  ;;  %v11234_v32 = vld [vmem:[%s14822_s1 + $0x1dc8] ss:$16 sps:$4 sm:$0xff]  }
 0x383   :  { %7196 = vmatpush1.bf16.msra.mxu0 %v11146_v34  ;;  %8012 = vmatpush1.bf16.msra.mxu1 %v11149_v35  ;;  %v11243_v34 = vld [vmem:[%s14822_s1 + $0x1dec] ss:$16 sps:$4 sm:$0xff]   ;;  %v11238_v35 = vld [vmem:[%s14822_s1 + $0x1de0] ss:$16 sps:$4 sm:$0xff]  }
 0x384   :  { %7197 = vmatprep.subr.bf16.mxu0 %v11154_v36  ;;  %8013 = vmatprep.subr.bf16.mxu1 %v11157_v37  ;;  %v11241_v36 = vld [vmem:[%s14822_s1 + $0x1de8] ss:$16 sps:$4 sm:$0xff]   ;;  %v11246_v37 = vld [vmem:[%s14822_s1 + $0x1e04] ss:$16 sps:$4 sm:$0xff]  }
 0x385   :  { %7186 = vmatprep.mubr.bf16.mxu0 %v8494_v38  ;;  %8002 = vmatprep.mubr.bf16.mxu1 %v8494_v38  ;;  %v11249_v38 = vld [vmem:[%s14822_s1 + $0x1e0c] ss:$16 sps:$4 sm:$0xff]  }
 0x387   :  { %7198 = vmatpush1.bf16.msra.mxu0 %v11152_v39  ;;  %8014 = vmatpush1.bf16.msra.mxu1 %v11155_v40  ;;  %v8463_v39 = vcombine.low %v14329_v46, %v14334_v44  ;;  %v63_v40 = vld [vmem:[%s14823_s0 + $0x170] sm:$0xff]  ;;  %v11255_v46 = vld [vmem:[%s14822_s1 + $0x1e2c] ss:$16 sps:$4 sm:$0xff]  }
 0x388   :  { %7199 = vmatprep.subr.bf16.mxu0 %v11160_v41  ;;  %8015 = vmatprep.subr.bf16.mxu1 %v11163_v42  ;;  %v11244_v41 = vld [vmem:[%s14822_s1 + $0x1e00] ss:$16 sps:$4 sm:$0xff]   ;;  %v11247_v42 = vld [vmem:[%s14822_s1 + $0x1e08] ss:$16 sps:$4 sm:$0xff]   ;;  %v8496_v44 = vcombine.high %v63_v40, %v63_v40 }
 0x38a   :  { %7187 = vmatmul.mubr.bf16.gmra.mrb[4].mxu0 %v8493_v43  ;;  %8003 = vmatmul.mubr.bf16.gmra.mrb[4].mxu1 %v8493_v43  ;;  %v11252_v43 = vld [vmem:[%s14822_s1 + $0x1e24] ss:$16 sps:$4 sm:$0xff]  }
 0x38b   :  { %7200 = vmatpush1.bf16.msra.mxu0 %v11158_v45  ;;  %8016 = vmatpush1.bf16.msra.mxu1 %v11161_v47  ;;  %v11250_v45 = vld [vmem:[%s14822_s1 + $0x1e20] ss:$16 sps:$4 sm:$0xff]   ;;  %v11253_v47 = vld [vmem:[%s14822_s1 + $0x1e28] ss:$16 sps:$4 sm:$0xff]  }
 0x38c   :  { %7201 = vmatprep.subr.bf16.mxu0 %v11166_v48  ;;  %8017 = vmatprep.subr.bf16.mxu1 %v11169_v49  ;;  %v11258_v48 = vld [vmem:[%s14822_s1 + $0x1e44] ss:$16 sps:$4 sm:$0xff]   ;;  %v11261_v49 = vld [vmem:[%s14822_s1 + $0x1e4c] ss:$16 sps:$4 sm:$0xff]  }
 0x38d   :  { %7227 = vmatprep.mubr.bf16.mxu0 %v8464_v50  ;;  %8043 = vmatprep.mubr.bf16.mxu1 %v8464_v50  ;;  %v8495_v50 = vcombine.low %v63_v40, %v63_v40  ;;  %v11338_v40 = vld [vmem:[%s14822_s1 + $0x1fe4] ss:$16 sps:$4 sm:$0xff]  }
 0x38f   :  { %7202 = vmatpush1.bf16.msra.mxu0 %v11164_v53  ;;  %8018 = vmatpush1.bf16.msra.mxu1 %v11167_v51  ;;  %v14538_v53 = vld [vmem:[%s14823_s0 + $0x78] sm:$0xff] }
 0x390   :  { %7203 = vmatprep.subr.bf16.mxu0 %v11172_v52  ;;  %8019 = vmatprep.subr.bf16.mxu1 %v11175_v54  ;;  %v14543_v51 = vld [vmem:[%s14823_s0 + $0xf8] sm:$0xff]  ;;  %v11256_v52 = vld [vmem:[%s14822_s1 + $0x1e40] ss:$16 sps:$4 sm:$0xff]  }
 0x391   :  { %v11259_v54 = vld [vmem:[%s14822_s1 + $0x1e48] ss:$16 sps:$4 sm:$0xff]  }
 0x393   :  { %7204 = vmatpush1.bf16.msra.mxu0 %v11170_v55  ;;  %8020 = vmatpush1.bf16.msra.mxu1 %v11173_v56  ;;  %v11264_v55 = vld [vmem:[%s14822_s1 + $0x1e64] ss:$16 sps:$4 sm:$0xff]   ;;  %v11267_v56 = vld [vmem:[%s14822_s1 + $0x1e6c] ss:$16 sps:$4 sm:$0xff]  }
 0x394   :  { %7205 = vmatprep.subr.bf16.mxu0 %v11178_v57  ;;  %8021 = vmatprep.subr.bf16.mxu1 %v11181_v60  ;;  %v8466_v57 = vcombine.high %v14538_v53, %v14543_v51  ;;  %v11262_v60 = vld [vmem:[%s14822_s1 + $0x1e60] ss:$16 sps:$4 sm:$0xff]  }
 0x397   :  { %7206 = vmatpush1.bf16.msra.mxu0 %v11176_v58  ;;  %8022 = vmatpush1.bf16.msra.mxu1 %v11179_v59  ;;  %v11265_v58 = vld [vmem:[%s14822_s1 + $0x1e68] ss:$16 sps:$4 sm:$0xff]   ;;  %v11270_v59 = vld [vmem:[%s14822_s1 + $0x1e84] ss:$16 sps:$4 sm:$0xff]  }
 0x398   :  { %7207 = vmatprep.subr.bf16.mxu0 %v11184_v61  ;;  %8023 = vmatprep.subr.bf16.mxu1 %v11187_v62  ;;  %v11273_v61 = vld [vmem:[%s14822_s1 + $0x1e8c] ss:$16 sps:$4 sm:$0xff]   ;;  %v11268_v62 = vld [vmem:[%s14822_s1 + $0x1e80] ss:$16 sps:$4 sm:$0xff]  }
 0x39b   :  { %7208 = vmatpush1.bf16.msra.mxu0 %v11182_v63  ;;  %8024 = vmatpush1.bf16.msra.mxu1 %v11185_v0  ;;  %v11271_v63 = vld [vmem:[%s14822_s1 + $0x1e88] ss:$16 sps:$4 sm:$0xff]   ;;  %v11276_v0 = vld [vmem:[%s14822_s1 + $0x1ea4] ss:$16 sps:$4 sm:$0xff]  }
 0x39c   :  { %7209 = vmatprep.subr.bf16.mxu0 %v11190_v3  ;;  %8025 = vmatprep.subr.bf16.mxu1 %v11193_v1  ;;  %v11279_v3 = vld [vmem:[%s14822_s1 + $0x1eac] ss:$16 sps:$4 sm:$0xff]   ;;  %v11274_v1 = vld [vmem:[%s14822_s1 + $0x1ea0] ss:$16 sps:$4 sm:$0xff]  }
 0x39f   :  { %7210 = vmatpush1.bf16.msra.mxu0 %v11188_v2  ;;  %8026 = vmatpush1.bf16.msra.mxu1 %v11191_v4  ;;  %v11277_v2 = vld [vmem:[%s14822_s1 + $0x1ea8] ss:$16 sps:$4 sm:$0xff]   ;;  %v11282_v4 = vld [vmem:[%s14822_s1 + $0x1ec4] ss:$16 sps:$4 sm:$0xff]  }
 0x3a0   :  { %7211 = vmatprep.subr.bf16.mxu0 %v11196_v5  ;;  %8027 = vmatprep.subr.bf16.mxu1 %v11199_v6  ;;  %v11285_v5 = vld [vmem:[%s14822_s1 + $0x1ecc] ss:$16 sps:$4 sm:$0xff]   ;;  %v11280_v6 = vld [vmem:[%s14822_s1 + $0x1ec0] ss:$16 sps:$4 sm:$0xff]  }
 0x3a3   :  { %7212 = vmatpush1.bf16.msra.mxu0 %v11194_v7  ;;  %8028 = vmatpush1.bf16.msra.mxu1 %v11197_v8  ;;  %v11283_v7 = vld [vmem:[%s14822_s1 + $0x1ec8] ss:$16 sps:$4 sm:$0xff]   ;;  %v11288_v8 = vld [vmem:[%s14822_s1 + $0x1ee4] ss:$16 sps:$4 sm:$0xff]  }
 0x3a4   :  { %7213 = vmatprep.subr.bf16.mxu0 %v11202_v9  ;;  %8029 = vmatprep.subr.bf16.mxu1 %v11205_v10  ;;  %v11291_v9 = vld [vmem:[%s14822_s1 + $0x1eec] ss:$16 sps:$4 sm:$0xff]   ;;  %v11286_v10 = vld [vmem:[%s14822_s1 + $0x1ee0] ss:$16 sps:$4 sm:$0xff]  }
 0x3a7   :  { %7214 = vmatpush1.bf16.msra.mxu0 %v11200_v11  ;;  %8030 = vmatpush1.bf16.msra.mxu1 %v11203_v12  ;;  %v11289_v11 = vld [vmem:[%s14822_s1 + $0x1ee8] ss:$16 sps:$4 sm:$0xff]   ;;  %v11294_v12 = vld [vmem:[%s14822_s1 + $0x1f04] ss:$16 sps:$4 sm:$0xff]  }
 0x3a8   :  { %7215 = vmatprep.subr.bf16.mxu0 %v11208_v13  ;;  %8031 = vmatprep.subr.bf16.mxu1 %v11211_v14  ;;  %v11297_v13 = vld [vmem:[%s14822_s1 + $0x1f0c] ss:$16 sps:$4 sm:$0xff]   ;;  %v11292_v14 = vld [vmem:[%s14822_s1 + $0x1f00] ss:$16 sps:$4 sm:$0xff]  }
 0x3ab   :  { %7216 = vmatpush1.bf16.msra.mxu0 %v11206_v15  ;;  %8032 = vmatpush1.bf16.msra.mxu1 %v11209_v16  ;;  %v11295_v15 = vld [vmem:[%s14822_s1 + $0x1f08] ss:$16 sps:$4 sm:$0xff]   ;;  %v11300_v16 = vld [vmem:[%s14822_s1 + $0x1f24] ss:$16 sps:$4 sm:$0xff]  }
 0x3ac   :  { %7217 = vmatprep.subr.bf16.mxu0 %v11214_v17  ;;  %8033 = vmatprep.subr.bf16.mxu1 %v11217_v18  ;;  %v11303_v17 = vld [vmem:[%s14822_s1 + $0x1f2c] ss:$16 sps:$4 sm:$0xff]   ;;  %v11298_v18 = vld [vmem:[%s14822_s1 + $0x1f20] ss:$16 sps:$4 sm:$0xff]  }
 0x3af   :  { %7218 = vmatpush1.bf16.msra.mxu0 %v11212_v19  ;;  %8034 = vmatpush1.bf16.msra.mxu1 %v11215_v20  ;;  %v11301_v19 = vld [vmem:[%s14822_s1 + $0x1f28] ss:$16 sps:$4 sm:$0xff]   ;;  %v11306_v20 = vld [vmem:[%s14822_s1 + $0x1f44] ss:$16 sps:$4 sm:$0xff]  }
 0x3b0   :  { %7219 = vmatprep.subr.bf16.mxu0 %v11220_v21  ;;  %8035 = vmatprep.subr.bf16.mxu1 %v11223_v22  ;;  %v11309_v21 = vld [vmem:[%s14822_s1 + $0x1f4c] ss:$16 sps:$4 sm:$0xff]   ;;  %v11304_v22 = vld [vmem:[%s14822_s1 + $0x1f40] ss:$16 sps:$4 sm:$0xff]  }
 0x3b3   :  { %7220 = vmatpush1.bf16.msra.mxu0 %v11218_v23  ;;  %8036 = vmatpush1.bf16.msra.mxu1 %v11221_v24  ;;  %v11307_v23 = vld [vmem:[%s14822_s1 + $0x1f48] ss:$16 sps:$4 sm:$0xff]   ;;  %v11312_v24 = vld [vmem:[%s14822_s1 + $0x1f64] ss:$16 sps:$4 sm:$0xff]  }
 0x3b4   :  { %7221 = vmatprep.subr.bf16.mxu0 %v11226_v25  ;;  %8037 = vmatprep.subr.bf16.mxu1 %v11229_v26  ;;  %v11315_v25 = vld [vmem:[%s14822_s1 + $0x1f6c] ss:$16 sps:$4 sm:$0xff]   ;;  %v11310_v26 = vld [vmem:[%s14822_s1 + $0x1f60] ss:$16 sps:$4 sm:$0xff]  }
 0x3b7   :  { %7222 = vmatpush1.bf16.msra.mxu0 %v11224_v27  ;;  %8038 = vmatpush1.bf16.msra.mxu1 %v11227_v28  ;;  %v11313_v27 = vld [vmem:[%s14822_s1 + $0x1f68] ss:$16 sps:$4 sm:$0xff]   ;;  %v11318_v28 = vld [vmem:[%s14822_s1 + $0x1f84] ss:$16 sps:$4 sm:$0xff]  }
 0x3b8   :  { %7223 = vmatprep.subr.bf16.mxu0 %v11233_v29  ;;  %8039 = vmatprep.subr.bf16.mxu1 %v11236_v30  ;;  %v11321_v29 = vld [vmem:[%s14822_s1 + $0x1f8c] ss:$16 sps:$4 sm:$0xff]   ;;  %v11316_v30 = vld [vmem:[%s14822_s1 + $0x1f80] ss:$16 sps:$4 sm:$0xff]  }
 0x3bb   :  { %7224 = vmatpush1.bf16.msra.mxu0 %v11231_v31  ;;  %8040 = vmatpush1.bf16.msra.mxu1 %v11234_v32  ;;  %v11319_v31 = vld [vmem:[%s14822_s1 + $0x1f88] ss:$16 sps:$4 sm:$0xff]   ;;  %v11324_v32 = vld [vmem:[%s14822_s1 + $0x1fa4] ss:$16 sps:$4 sm:$0xff]  }
 0x3bc   :  { %7225 = vmatprep.subr.bf16.mxu0 %v11240_v33  ;;  %8041 = vmatprep.subr.bf16.mxu1 %v11243_v34  ;;  %v11327_v33 = vld [vmem:[%s14822_s1 + $0x1fac] ss:$16 sps:$4 sm:$0xff]   ;;  %v11322_v34 = vld [vmem:[%s14822_s1 + $0x1fa0] ss:$16 sps:$4 sm:$0xff]  }
 0x3bf   :  { %7226 = vmatpush1.bf16.msra.mxu0 %v11238_v35  ;;  %8042 = vmatpush1.bf16.msra.mxu1 %v11241_v36  ;;  %v11325_v35 = vld [vmem:[%s14822_s1 + $0x1fa8] ss:$16 sps:$4 sm:$0xff]   ;;  %v11332_v36 = vld [vmem:[%s14822_s1 + $0x1fc4] ss:$16 sps:$4 sm:$0xff]  }
 0x3c0   :  { %7246 = vmatprep.subr.bf16.mxu0 %v11246_v37  ;;  %8062 = vmatprep.subr.bf16.mxu1 %v11249_v38  ;;  %v11335_v37 = vld [vmem:[%s14822_s1 + $0x1fcc] ss:$16 sps:$4 sm:$0xff]   ;;  %v11330_v38 = vld [vmem:[%s14822_s1 + $0x1fc0] ss:$16 sps:$4 sm:$0xff]  }
 0x3c2   :  { %7228 = vmatmul.mubr.bf16.vlgmr.msra.gmra.mrb[0].mxu0 %v8463_v39  ;;  %8044 = vmatmul.mubr.bf16.vlgmr.msra.gmra.mrb[0].mxu1 %v8463_v39  ;;  %v11333_v39 = vld [vmem:[%s14822_s1 + $0x1fc8] ss:$16 sps:$4 sm:$0xff]  }
 0x3c3   :  { %7247 = vmatpush1.bf16.msra.mxu0 %v11244_v41  ;;  %8063 = vmatpush1.bf16.msra.mxu1 %v11247_v42  ;;  %v11341_v41 = vld [vmem:[%s14822_s1 + $0x1fec] ss:$16 sps:$4 sm:$0xff]   ;;  %v11336_v42 = vld [vmem:[%s14822_s1 + $0x1fe0] ss:$16 sps:$4 sm:$0xff]  }
 0x3c4   :  { %7248 = vmatprep.subr.bf16.mxu0 %v11252_v43  ;;  %8064 = vmatprep.subr.bf16.mxu1 %v11255_v46  ;;  %v11339_v43 = vld [vmem:[%s14822_s1 + $0x1fe8] ss:$16 sps:$4 sm:$0xff]  }
 0x3c5   :  { %7237 = vmatprep.mubr.bf16.mxu0 %v8496_v44  ;;  %8053 = vmatprep.mubr.bf16.mxu1 %v8496_v44  ;;  %v64_v46 = vld [vmem:[%s14823_s0 + $0x178] sm:$0xff]  ;;  %v8465_v44 = vcombine.low %v14538_v53, %v14543_v51 }
 0x3c7   :  { %7249 = vmatpush1.bf16.msra.mxu0 %v11250_v45  ;;  %8065 = vmatpush1.bf16.msra.mxu1 %v11253_v47  ;;  %v8498_v45 = vcombine.high %v64_v46, %v64_v46  ;;  %v8497_v47 = vcombine.low %v64_v46, %v64_v46 }
 0x3c8   :  { %7250 = vmatprep.subr.bf16.mxu0 %v11258_v48  ;;  %8066 = vmatprep.subr.bf16.mxu1 %v11261_v49 }
 0x3ca   :  { %7238 = vmatmul.mubr.bf16.gmra.mrb[4].mxu0 %v8495_v50  ;;  %8054 = vmatmul.mubr.bf16.gmra.mrb[4].mxu1 %v8495_v50 }
 0x3cb   :  { %7251 = vmatpush1.bf16.msra.mxu0 %v11256_v52  ;;  %8067 = vmatpush1.bf16.msra.mxu1 %v11259_v54 }
 0x3cc   :  { %7252 = vmatprep.subr.bf16.mxu0 %v11264_v55  ;;  %8068 = vmatprep.subr.bf16.mxu1 %v11267_v56 }
 0x3cd   :  { %7278 = vmatprep.mubr.bf16.mxu0 %v8466_v57  ;;  %8094 = vmatprep.mubr.bf16.mxu1 %v8466_v57 }
 0x3cf   :  { %7253 = vmatpush1.bf16.msra.mxu0 %v11262_v60  ;;  %8069 = vmatpush1.bf16.msra.mxu1 %v11265_v58 }
 0x3d0   :  { %7254 = vmatprep.subr.bf16.mxu0 %v11270_v59  ;;  %8070 = vmatprep.subr.bf16.mxu1 %v11273_v61 }
 0x3d3   :  { %7255 = vmatpush1.bf16.msra.mxu0 %v11268_v62  ;;  %8071 = vmatpush1.bf16.msra.mxu1 %v11271_v63 }
 0x3d4   :  { %7256 = vmatprep.subr.bf16.mxu0 %v11276_v0  ;;  %8072 = vmatprep.subr.bf16.mxu1 %v11279_v3 }
 0x3d7   :  { %7257 = vmatpush1.bf16.msra.mxu0 %v11274_v1  ;;  %8073 = vmatpush1.bf16.msra.mxu1 %v11277_v2 }
 0x3d8   :  { %7258 = vmatprep.subr.bf16.mxu0 %v11282_v4  ;;  %8074 = vmatprep.subr.bf16.mxu1 %v11285_v5 }
 0x3db   :  { %7259 = vmatpush1.bf16.msra.mxu0 %v11280_v6  ;;  %8075 = vmatpush1.bf16.msra.mxu1 %v11283_v7 }
 0x3dc   :  { %7260 = vmatprep.subr.bf16.mxu0 %v11288_v8  ;;  %8076 = vmatprep.subr.bf16.mxu1 %v11291_v9 }
 0x3df   :  { %7261 = vmatpush1.bf16.msra.mxu0 %v11286_v10  ;;  %8077 = vmatpush1.bf16.msra.mxu1 %v11289_v11 }
 0x3e0   :  { %7262 = vmatprep.subr.bf16.mxu0 %v11294_v12  ;;  %8078 = vmatprep.subr.bf16.mxu1 %v11297_v13 }
 0x3e3   :  { %7263 = vmatpush1.bf16.msra.mxu0 %v11292_v14  ;;  %8079 = vmatpush1.bf16.msra.mxu1 %v11295_v15 }
 0x3e4   :  { %7264 = vmatprep.subr.bf16.mxu0 %v11300_v16  ;;  %8080 = vmatprep.subr.bf16.mxu1 %v11303_v17 }
 0x3e7   :  { %7265 = vmatpush1.bf16.msra.mxu0 %v11298_v18  ;;  %8081 = vmatpush1.bf16.msra.mxu1 %v11301_v19 }
 0x3e8   :  { %7266 = vmatprep.subr.bf16.mxu0 %v11306_v20  ;;  %8082 = vmatprep.subr.bf16.mxu1 %v11309_v21 }
 0x3eb   :  { %7267 = vmatpush1.bf16.msra.mxu0 %v11304_v22  ;;  %8083 = vmatpush1.bf16.msra.mxu1 %v11307_v23 }
 0x3ec   :  { %7268 = vmatprep.subr.bf16.mxu0 %v11312_v24  ;;  %8084 = vmatprep.subr.bf16.mxu1 %v11315_v25 }
 0x3ef   :  { %7269 = vmatpush1.bf16.msra.mxu0 %v11310_v26  ;;  %8085 = vmatpush1.bf16.msra.mxu1 %v11313_v27 }
 0x3f0   :  { %7270 = vmatprep.subr.bf16.mxu0 %v11318_v28  ;;  %8086 = vmatprep.subr.bf16.mxu1 %v11321_v29 }
 0x3f3   :  { %7271 = vmatpush1.bf16.msra.mxu0 %v11316_v30  ;;  %8087 = vmatpush1.bf16.msra.mxu1 %v11319_v31 }
 0x3f4   :  { %7272 = vmatprep.subr.bf16.mxu0 %v11324_v32  ;;  %8088 = vmatprep.subr.bf16.mxu1 %v11327_v33 }
 0x3f7   :  { %7273 = vmatpush1.bf16.msra.mxu0 %v11322_v34  ;;  %8089 = vmatpush1.bf16.msra.mxu1 %v11325_v35 }
 0x3f8   :  { %7274 = vmatprep.subr.bf16.mxu0 %v11332_v36  ;;  %8090 = vmatprep.subr.bf16.mxu1 %v11335_v37 }
 0x3fb   :  { %7275 = vmatpush1.bf16.msra.mxu0 %v11330_v38  ;;  %8091 = vmatpush1.bf16.msra.mxu1 %v11333_v39 }
 0x3fc   :  { %7276 = vmatprep.subr.bf16.mxu0 %v11338_v40  ;;  %8092 = vmatprep.subr.bf16.mxu1 %v11341_v41 }
 0x3ff   :  { %7277 = vmatpush1.bf16.msra.mxu0 %v11336_v42  ;;  %8093 = vmatpush1.bf16.msra.mxu1 %v11339_v43 }
 0x402   :  { %7279 = vmatmul.mubr.bf16.vlgmr.msra.gmra.mrb[0].mxu0 %v8465_v44  ;;  %8095 = vmatmul.mubr.bf16.vlgmr.msra.gmra.mrb[0].mxu1 %v8465_v44 }
 0x403   :  { %7288 = vmatprep.mubr.bf16.mxu0 %v8498_v45  ;;  %8104 = vmatprep.mubr.bf16.mxu1 %v8498_v45 }
 0x40a   :  { %7289 = vmatmul.mubr.bf16.gmra.mrb[4].mxu0 %v8497_v47  ;;  %8105 = vmatmul.mubr.bf16.gmra.mrb[4].mxu1 %v8497_v47 }
 0x4d5   :  { %v14714_v48 = vpop.f32.mrb[0].mxu0  ;;  %v14716_v49 = vpop.f32.mrb[0].mxu1 }
 0x4d6   :  { %v14718_v50 = vpop.f32.mrb[1].mxu0  ;;  %v14720_v52 = vpop.f32.mrb[1].mxu1  ;;  %v8149_v53 = vmul.f32 %v14714_v48, %v14714_v48  ;;  %v8151_v51 = vmul.f32 %v14716_v49, %v14716_v49 }
 0x4d7   :  { %v8150_v54 = vmul.f32 %v14718_v50, %v14718_v50  ;;  %v8152_v55 = vmul.f32 %v14720_v52, %v14720_v52  ;;  %v14730_v56 = vpop.f32.mrb[2].mxu0  ;;  %v14732_v57 = vpop.f32.mrb[2].mxu1 }
 0x4d8   :  { %v8113_v60 = vadd.f32 %v14730_v56, %v14714_v48  ;;  %v8153_v58 = vmul.f32 %v14730_v56, %v14730_v56  ;;  %v8129_v59 = vadd.f32 %v14732_v57, %v14716_v49  ;;  %v8155_v61 = vmul.f32 %v14732_v57, %v14732_v57  ;;  %v14742_v62 = vpop.f32.mrb[3].mxu0  ;;  %v14744_v63 = vpop.f32.mrb[3].mxu1 }
 0x4d9   :  { %v8121_v0 = vadd.f32 %v14742_v62, %v14718_v50  ;;  %v8154_v3 = vmul.f32 %v14742_v62, %v14742_v62  ;;  %v8137_v1 = vadd.f32 %v14744_v63, %v14720_v52  ;;  %v8156_v2 = vmul.f32 %v14744_v63, %v14744_v63 }
 0x4da   :  { %v8161_v4 = vadd.f32 %v8153_v58, %v8149_v53  ;;  %v8177_v5 = vadd.f32 %v8155_v61, %v8151_v51 }
 0x4db   :  { %v8169_v6 = vadd.f32 %v8154_v3, %v8150_v54  ;;  %v8185_v7 = vadd.f32 %v8156_v2, %v8152_v55 }
 0x4dd   :  { %v14754_v8 = vpop.f32.mrb[4].mxu0  ;;  %v14756_v9 = vpop.f32.mrb[4].mxu1 }
 0x4de   :  { %v8114_v10 = vadd.f32 %v8113_v60, %v14754_v8  ;;  %v8157_v11 = vmul.f32 %v14754_v8, %v14754_v8  ;;  %v8130_v12 = vadd.f32 %v8129_v59, %v14756_v9  ;;  %v8159_v13 = vmul.f32 %v14756_v9, %v14756_v9  ;;  %v14764_v14 = vpop.f32.mrb[5].mxu0  ;;  %v14766_v15 = vpop.f32.mrb[5].mxu1 }
 0x4df   :  { %v8122_v16 = vadd.f32 %v8121_v0, %v14764_v14  ;;  %v8158_v17 = vmul.f32 %v14764_v14, %v14764_v14  ;;  %v8138_v18 = vadd.f32 %v8137_v1, %v14766_v15  ;;  %v8160_v19 = vmul.f32 %v14766_v15, %v14766_v15  ;;  %v7294_v20 = vpop.f32.mrb[6].mxu0  ;;  %v8110_v21 = vpop.f32.mrb[6].mxu1 }
 0x4e0   :  { %v8115_v22 = vrot.slane %v8114_v10, 4  ;;  %v8162_v23 = vadd.f32 %v8161_v4, %v8157_v11  ;;  %v8131_v24 = vrot.slane %v8130_v12, 4  ;;  %v8178_v25 = vadd.f32 %v8177_v5, %v8159_v13  ;;  %v7295_v26 = vpop.f32.mrb[7].mxu0  ;;  %v8111_v27 = vpop.f32.mrb[7].mxu1 }
 0x4e1   :  { %v8123_v28 = vrot.slane %v8122_v16, 4  ;;  %v8170_v29 = vadd.f32 %v8169_v6, %v8158_v17  ;;  %v8139_v30 = vrot.slane %v8138_v18, 4  ;;  %v8186_v31 = vadd.f32 %v8185_v7, %v8160_v19 }
 0x4e2   :  { %v8116_v32 = vadd.f32 %v8115_v22, %v8114_v10  ;;  %v8163_v33 = vrot.slane %v8162_v23, 4  ;;  %v8132_v34 = vadd.f32 %v8131_v24, %v8130_v12  ;;  %v8179_v35 = vrot.slane %v8178_v25, 4 }
 0x4e3   :  { %v8124_v36 = vadd.f32 %v8123_v28, %v8122_v16  ;;  %v8171_v37 = vrot.slane %v8170_v29, 4  ;;  %v8140_v38 = vadd.f32 %v8139_v30, %v8138_v18  ;;  %v8187_v39 = vrot.slane %v8186_v31, 4 }
 0x4e4   :  { %v8117_v40 = vrot.slane %v8116_v32, 2  ;;  %v8164_v41 = vadd.f32 %v8163_v33, %v8162_v23  ;;  %v8133_v42 = vrot.slane %v8132_v34, 2  ;;  %v8180_v43 = vadd.f32 %v8179_v35, %v8178_v25 }
 0x4e5   :  { %v8125_v46 = vrot.slane %v8124_v36, 2  ;;  %v8172_v44 = vadd.f32 %v8171_v37, %v8170_v29  ;;  %v8141_v45 = vrot.slane %v8140_v38, 2  ;;  %v8188_v47 = vadd.f32 %v8187_v39, %v8186_v31 }
 0x4e6   :  { %v8118_v53 = vadd.f32 %v8117_v40, %v8116_v32  ;;  %v8165_v51 = vrot.slane %v8164_v41, 2  ;;  %v8134_v54 = vadd.f32 %v8133_v42, %v8132_v34  ;;  %v8181_v55 = vrot.slane %v8180_v43, 2 }
 0x4e7   :  { %v8126_v60 = vadd.f32 %v8125_v46, %v8124_v36  ;;  %v8173_v58 = vrot.slane %v8172_v44, 2  ;;  %v8142_v59 = vadd.f32 %v8141_v45, %v8140_v38  ;;  %v8189_v61 = vrot.slane %v8188_v47, 2 }
 0x4e8   :  { %v8119_v0 = vrot.slane %v8118_v53, 1  ;;  %v8166_v3 = vadd.f32 %v8165_v51, %v8164_v41  ;;  %v8135_v1 = vrot.slane %v8134_v54, 1  ;;  %v8182_v2 = vadd.f32 %v8181_v55, %v8180_v43 }
 0x4e9   :  { %v8127_v4 = vrot.slane %v8126_v60, 1  ;;  %v8174_v5 = vadd.f32 %v8173_v58, %v8172_v44  ;;  %v8143_v6 = vrot.slane %v8142_v59, 1  ;;  %v8190_v7 = vadd.f32 %v8189_v61, %v8188_v47 }
 0x4ea   :  { %v8120_v10 = vadd.f32 %v8119_v0, %v8118_v53  ;;  %v8167_v11 = vrot.slane %v8166_v3, 1  ;;  %v8136_v12 = vadd.f32 %v8135_v1, %v8134_v54  ;;  %v8183_v13 = vrot.slane %v8182_v2, 1 }
 0x4eb   :  { %v8128_v16 = vadd.f32 %v8127_v4, %v8126_v60  ;;  %v8175_v17 = vrot.slane %v8174_v5, 1  ;;  %v8144_v18 = vadd.f32 %v8143_v6, %v8142_v59  ;;  %v8191_v19 = vrot.slane %v8190_v7, 1 }
 0x4ec   :  { %v8145_v20 = vmul.f32 0.055555556, %v8120_v10  ;;  %v8168_v21 = vadd.f32 %v8167_v11, %v8166_v3  ;;  %v8147_v22 = vmul.f32 0.055555556, %v8136_v12  ;;  %v8184_v23 = vadd.f32 %v8183_v13, %v8182_v2 }
 0x4ed   :  { %v8146_v24 = vmul.f32 0.055555556, %v8128_v16  ;;  %v8176_v25 = vadd.f32 %v8175_v17, %v8174_v5  ;;  %v8148_v26 = vmul.f32 0.055555556, %v8144_v18  ;;  %v8192_v27 = vadd.f32 %v8191_v19, %v8190_v7  ;;  %v8209_v7 = vld [vmem:[%s14824_s2] sm:$0xf] }
 0x4ee   :  { %v8193_v28 = vmul.f32 0.055555556, %v8168_v21  ;;  %v8197_v29 = vmul.f32 %v8145_v20, %v8145_v20  ;;  %v8195_v30 = vmul.f32 0.055555556, %v8184_v23  ;;  %v8199_v31 = vmul.f32 %v8147_v22, %v8147_v22 }
 0x4ef   :  { %v8194_v32 = vmul.f32 0.055555556, %v8176_v25  ;;  %v8198_v33 = vmul.f32 %v8146_v24, %v8146_v24  ;;  %v8196_v34 = vmul.f32 0.055555556, %v8192_v27  ;;  %v8200_v35 = vmul.f32 %v8148_v26, %v8148_v26 }
 0x4f0   :  { %v8201_v36 = vsub.f32 %v8193_v28, %v8197_v29  ;;  %v8203_v37 = vsub.f32 %v8195_v30, %v8199_v31  ;;  %v11352_v53 = vmov 1966171168   ;;  %v8227_v54 = vlaneseq }
 0x4f1   :  { %v8202_v38 = vsub.f32 %v8194_v32, %v8198_v33  ;;  %v8204_v39 = vsub.f32 %v8196_v34, %v8200_v35  ;;  %v8225_v51 = vunpack.c.l.s4 %v11352_v53 }
 0x4f2   :  { %v8205_v40 = vmax.f32 %v8201_v36, 0.0  ;;  %v8207_v41 = vmax.f32 %v8203_v37, 0.0  ;;  %v8228_v60 = vshrl.u32 %v8227_v54, 7 }
 0x4f3   :  { %v8206_v42 = vmax.f32 %v8202_v38, 0.0  ;;  %v8208_v43 = vmax.f32 %v8204_v39, 0.0  ;;  %v8226_v55 = vunpack.c.0.s8 %v8225_v51 }
 0x4f4   :  { %v8210_v46 = vadd.f32 1e-05, %v8205_v40  ;;  %v8212_v44 = vadd.f32 1e-05, %v8207_v41  ;;  %v8252_v10 = vsub.s32 0, %v8228_v60  ;;  %v8256_v12 = vsub.s32 1, %v8228_v60 }
 0x4f5   :  { %v8211_v45 = vadd.f32 1e-05, %v8206_v42  ;;  %v8213_v47 = vadd.f32 1e-05, %v8208_v43  ;;  %v8229_v61 = vsub.s32 %v8226_v55, %v8228_v60  ;;  %v8260_v13 = vsub.s32 2, %v8228_v60 }
 0x4f6   :  { %11344 = vrsqrt.f32 %v8210_v46  ;;  %v8264_v16 = vsub.s32 3, %v8228_v60 }
 0x4f7   :  { %11346 = vrsqrt.f32 %v8212_v44 }
 0x4f8   :  { %11348 = vrsqrt.f32 %v8211_v45 }
 0x4f9   :  { %11350 = vrsqrt.f32 %v8213_v47 }
 0x500   :  { %v11345_v58 = vpop.eup %11344 }
 0x501   :  { %v11347_v59 = vpop.eup %11346 }
 0x502   :  { %v11349_v0 = vpop.eup %11348 }
 0x503   :  { %v11351_v3 = vpop.eup %11350  ;;  %v8222_v1 = vcombine.low %v11345_v58, %v11349_v0 }
 0x504   :  { %v8223_v2 = vcombine.low %v11347_v59, %v11351_v3 }
 0x505   :  { %v8230_v4 = vrot.slane %v8222_v1, %v8229_v61 }
 0x506   :  { %v8237_v5 = vrot.slane %v8223_v2, %v8229_v61 }
 0x508   :  { %v8238_v6 = vcombine.low %v8230_v4, %v8237_v5 }
 0x50a   :  { %v8245_v11 = vrot.slane %v8238_v6, %v8229_v61 }
 0x50c   :  { %v8247_v17 = vmul.f32 %v8245_v11, %v8209_v7 }
 0x50e   :  { %v8253_v18 = vrot.slane %v8247_v17, %v8252_v10  ;;  %v8257_v19 = vrot.slane %v8247_v17, %v8256_v12  ;;  %v8261_v21 = vrot.slane %v8247_v17, %v8260_v13  ;;  %v8265_v23 = vrot.slane %v8247_v17, %v8264_v16 }
 0x510   :  { %v8270_v25 = vmul.f32 %v8253_v18, %v8145_v20  ;;  %v8271_v27 = vmul.f32 %v8257_v19, %v8146_v24  ;;  %v8272_v28 = vmul.f32 %v8261_v21, %v8147_v22  ;;  %v8273_v29 = vmul.f32 %v8265_v23, %v8148_v26 }
 0x511   :  { %v8304_v30 = vmul.f32 %v8253_v18, %v14714_v48  ;;  %v8305_v31 = vmul.f32 %v8257_v19, %v14718_v50  ;;  %v8306_v32 = vmul.f32 %v8261_v21, %v14716_v49  ;;  %v8307_v33 = vmul.f32 %v8265_v23, %v14720_v52 }
 0x512   :  { %v8278_v34 = vcombine.low %v8270_v25, %v8271_v27  ;;  %v8279_v35 = vcombine.low %v8272_v28, %v8273_v29  ;;  %v8308_v36 = vmul.f32 %v8253_v18, %v14730_v56  ;;  %v8309_v37 = vmul.f32 %v8257_v19, %v14742_v62  ;;  %v8248_v56 = vld [vmem:[%s14825_s3] sm:$0xf] }
 0x513   :  { %v8310_v38 = vmul.f32 %v8261_v21, %v14732_v57  ;;  %v8311_v20 = vmul.f32 %v8265_v23, %v14744_v63  ;;  %v8312_v22 = vmul.f32 %v8253_v18, %v14754_v8  ;;  %v8313_v48 = vmul.f32 %v8257_v19, %v14764_v14 }
 0x514   :  { %v8286_v24 = vrot.slane %v8278_v34, %v8229_v61  ;;  %v8293_v50 = vrot.slane %v8279_v35, %v8229_v61  ;;  %v8314_v49 = vmul.f32 %v8261_v21, %v14756_v9  ;;  %v8315_v52 = vmul.f32 %v8265_v23, %v14766_v15 }
 0x516   :  { %v8294_v26 = vcombine.low %v8286_v24, %v8293_v50 }
 0x518   :  { %v8301_v62 = vrot.slane %v8294_v26, %v8229_v61 }
 0x51a   :  { %v8303_v39 = vsub.f32 %v8248_v56, %v8301_v62 }
 0x51c   :  { %v8320_v57 = vrot.slane %v8303_v39, %v8252_v10  ;;  %v8324_v40 = vrot.slane %v8303_v39, %v8256_v12  ;;  %v8328_v63 = vrot.slane %v8303_v39, %v8260_v13  ;;  %v8332_v41 = vrot.slane %v8303_v39, %v8264_v16 }
 0x51e   :  { %v8337_v8 = vadd.f32 %v8320_v57, %v8304_v30  ;;  %v8338_v42 = vadd.f32 %v8324_v40, %v8305_v31  ;;  %v8339_v14 = vadd.f32 %v8328_v63, %v8306_v32  ;;  %v8340_v43 = vadd.f32 %v8332_v41, %v8307_v33 }
 0x51f   :  { %v8341_v46 = vadd.f32 %v8320_v57, %v8308_v36  ;;  %v8342_v44 = vadd.f32 %v8324_v40, %v8309_v37  ;;  %v8343_v9 = vadd.f32 %v8328_v63, %v8310_v38  ;;  %v8344_v45 = vadd.f32 %v8332_v41, %v8311_v20 }
 0x520   :  { %v8345_v15 = vadd.f32 %v8320_v57, %v8312_v22  ;;  %v8346_v47 = vadd.f32 %v8324_v40, %v8313_v48  ;;  %v8347_v53 = vadd.f32 %v8328_v63, %v8314_v49  ;;  %v8348_v51 = vadd.f32 %v8332_v41, %v8315_v52 }
 0x521   :  { %vm8349_vm0 = vcmp.ge.f32.partialorder %v8337_v8, 0.0  ;;  %vm8350_vm1 = vcmp.ge.f32.partialorder %v8338_v42, 0.0  ;;  %vm8351_vm2 = vcmp.ge.f32.partialorder %v8339_v14, 0.0  ;;  %vm8352_vm3 = vcmp.ge.f32.partialorder %v8340_v43, 0.0 }
 0x522   :  { %vm8353_vm4 = vcmp.ge.f32.partialorder %v8341_v46, 0.0  ;;  %vm8354_vm5 = vcmp.ge.f32.partialorder %v8342_v44, 0.0  ;;  %vm8355_vm6 = vcmp.ge.f32.partialorder %v8343_v9, 0.0  ;;  %vm8356_vm7 = vcmp.ge.f32.partialorder %v8344_v45, 0.0 }
 0x523   :  { %vm8357_vm8 = vcmp.ge.f32.partialorder %v8345_v15, 0.0  ;;  %vm8358_vm9 = vcmp.ge.f32.partialorder %v8346_v47, 0.0  ;;  %vm8359_vm10 = vcmp.ge.f32.partialorder %v8347_v53, 0.0  ;;  %vm8360_vm11 = vcmp.ge.f32.partialorder %v8348_v51, 0.0 }
 0x524   :  { %v8361_v54 = vmul.f32 0.2, %v8337_v8  ;;  %v8362_v55 = vmul.f32 0.2, %v8338_v42  ;;  %v8363_v60 = vmul.f32 0.2, %v8339_v14 }
 0x525   :  { %v8364_v58 = vmul.f32 0.2, %v8340_v43  ;;  %v8365_v59 = vmul.f32 0.2, %v8341_v46  ;;  %v8366_v61 = vmul.f32 0.2, %v8342_v44 }
 0x526   :  { %v8367_v0 = vmul.f32 0.2, %v8343_v9  ;;  %v8368_v3 = vmul.f32 0.2, %v8344_v45  ;;  %v8369_v1 = vmul.f32 0.2, %v8345_v15  ;;  %v8373_v2 = vsel %vm8349_vm0, %v8337_v8, %v8361_v54 }
 0x527   :  { %v8370_v4 = vmul.f32 0.2, %v8346_v47  ;;  %v8371_v5 = vmul.f32 0.2, %v8347_v53  ;;  %v8372_v6 = vmul.f32 0.2, %v8348_v51  ;;  %v8374_v7 = vsel %vm8350_vm1, %v8338_v42, %v8362_v55 }
 0x528   :  { %v8375_v10 = vsel %vm8351_vm2, %v8339_v14, %v8363_v60  ;;  %v8376_v11 = vsel %vm8352_vm3, %v8340_v43, %v8364_v58  ;;  %v8377_v12 = vsel %vm8353_vm4, %v8341_v46, %v8365_v59  ;;  %v8378_v13 = vsel %vm8354_vm5, %v8342_v44, %v8366_v61 }
 0x529   :  { %v8379_v16 = vsel %vm8355_vm6, %v8343_v9, %v8367_v0  ;;  %v8380_v17 = vsel %vm8356_vm7, %v8344_v45, %v8368_v3  ;;  %v8381_v18 = vsel %vm8357_vm8, %v8345_v15, %v8369_v1  ;;  %v8382_v19 = vsel %vm8358_vm9, %v8346_v47, %v8370_v4 }
 0x52a   :  { %v8383_v21 = vsel %vm8359_vm10, %v8347_v53, %v8371_v5  ;;  %v8384_v23 = vsel %vm8360_vm11, %v8348_v51, %v8372_v6  ;;  %v9529_v25 = vpack.c.bf16 %v8374_v7, %v8373_v2  ;;  %v9530_v27 = vpack.c.bf16 %v8376_v11, %v8375_v10 }
 0x52b   :  { %v9531_v28 = vpack.c.bf16 %v8378_v13, %v8377_v12  ;;  %v9532_v29 = vpack.c.bf16 %v8380_v17, %v8379_v16  ;;  %v9533_v30 = vpack.c.bf16 %v8382_v19, %v8381_v18  ;;  %v9534_v31 = vpack.c.bf16 %v8384_v23, %v8383_v21 }
 0x52c   :  { %8425 = vst [vmem:[%s14826_s4] sm:$0xff] %v9529_v25  ;;  %8426 = vst [vmem:[%s14826_s4 + $0x8] sm:$0xff] %v9530_v27 }
 0x52d   :  { %8427 = vst [vmem:[%s14826_s4 + $0x10] sm:$0xff] %v9531_v28  ;;  %8428 = vst [vmem:[%s14826_s4 + $0x18] sm:$0xff] %v9532_v29 }
 0x52e   :  { %8429 = vst [vmem:[%s14826_s4 + $0x20] sm:$0xff] %v9533_v30  ;;  %8430 = vst [vmem:[%s14826_s4 + $0x28] sm:$0xff] %v9534_v31 }

// kernel: _lambda_.9
= control target key start
LH: loop header
LB: loop body
LE: loop exit
PB: predicated region body
PF: predicated region fallthrough
CT: control target
= control target key end

     0   :  { %s9199_s1 = inlined_call_operand.vmem [shape: bf16[8192,128], index: 1, kind: input, shape index: {}]   ;;  %s9200_s0 = inlined_call_operand.vmem [shape: bf16[8,8192], index: 0, kind: input, shape index: {}]   ;;  %s9201_s2 = inlined_call_operand.vmem [shape: f32[1,128], index: 2, kind: input, shape index: {}]   ;;  %s9202_s3 = inlined_call_operand.vmem [shape: bf16[8,128], index: 3, kind: output, shape index: {}]  }
   0x1   :  { %v6941_v0 = vld [vmem:[%s9199_s1 + $0x40] sm:$0xff]   ;;  %v6945_v4 = vld [vmem:[%s9199_s1 + $0x48] sm:$0xff]   ;;  %v6949_v8 = vld [vmem:[%s9199_s1 + $0x50] sm:$0xff]  }
   0x2   :  { %v6942_v1 = vld [vmem:[%s9199_s1 + $0xc0] sm:$0xff]   ;;  %6237 = vmatprep.subr.bf16.mxu0 %v6941_v0  ;;  %v6946_v5 = vld [vmem:[%s9199_s1 + $0xc8] sm:$0xff]   ;;  %v6950_v9 = vld [vmem:[%s9199_s1 + $0xd0] sm:$0xff]  }
   0x3   :  { %v6943_v2 = vld [vmem:[%s9199_s1] sm:$0xff]   ;;  %6259 = vmatprep.subr.bf16.mxu1 %v6942_v1  ;;  %v6947_v6 = vld [vmem:[%s9199_s1 + $0x8] sm:$0xff]   ;;  %v6951_v10 = vld [vmem:[%s9199_s1 + $0x10] sm:$0xff]  }
   0x4   :  { %v6944_v3 = vld [vmem:[%s9199_s1 + $0x80] sm:$0xff]   ;;  %6238 = vmatpush3.bf16.msra.mxu0 %v6943_v2  ;;  %v6948_v7 = vld [vmem:[%s9199_s1 + $0x88] sm:$0xff]   ;;  %v6952_v11 = vld [vmem:[%s9199_s1 + $0x90] sm:$0xff]  }
   0x5   :  { %6260 = vmatpush3.bf16.msra.mxu1 %v6944_v3  ;;  %6239 = vmatprep.subr.bf16.mxu0 %v6945_v4  ;;  %v6953_v12 = vld [vmem:[%s9199_s1 + $0x58] sm:$0xff]   ;;  %v6957_v16 = vld [vmem:[%s9199_s1 + $0x60] sm:$0xff]   ;;  %v6961_v20 = vld [vmem:[%s9199_s1 + $0x68] sm:$0xff]  }
   0x6   :  { %6261 = vmatprep.subr.bf16.mxu1 %v6946_v5  ;;  %v6954_v13 = vld [vmem:[%s9199_s1 + $0xd8] sm:$0xff]   ;;  %v6958_v17 = vld [vmem:[%s9199_s1 + $0xe0] sm:$0xff]   ;;  %v6962_v21 = vld [vmem:[%s9199_s1 + $0xe8] sm:$0xff]  }
   0x7   :  { %v6955_v14 = vld [vmem:[%s9199_s1 + $0x18] sm:$0xff]   ;;  %v6959_v18 = vld [vmem:[%s9199_s1 + $0x20] sm:$0xff]   ;;  %v6963_v22 = vld [vmem:[%s9199_s1 + $0x28] sm:$0xff]  }
   0x8   :  { %6240 = vmatpush3.bf16.msra.mxu0 %v6947_v6  ;;  %v6956_v15 = vld [vmem:[%s9199_s1 + $0x98] sm:$0xff]   ;;  %v6960_v19 = vld [vmem:[%s9199_s1 + $0xa0] sm:$0xff]   ;;  %v6964_v23 = vld [vmem:[%s9199_s1 + $0xa8] sm:$0xff]  }
   0x9   :  { %6262 = vmatpush3.bf16.msra.mxu1 %v6948_v7  ;;  %6241 = vmatprep.subr.bf16.mxu0 %v6949_v8  ;;  %v6965_v24 = vld [vmem:[%s9199_s1 + $0x70] sm:$0xff]   ;;  %v6969_v28 = vld [vmem:[%s9199_s1 + $0x78] sm:$0xff]   ;;  %v15_v32 = vld [vmem:[%s9200_s0] sm:$0xff] }
   0xa   :  { %6263 = vmatprep.subr.bf16.mxu1 %v6950_v9  ;;  %v6966_v25 = vld [vmem:[%s9199_s1 + $0xf0] sm:$0xff]   ;;  %v6970_v29 = vld [vmem:[%s9199_s1 + $0xf8] sm:$0xff]   ;;  %v16_v33 = vld [vmem:[%s9200_s0 + $0x8] sm:$0xff]  ;;  %v5661_v34 = vcombine.low %v15_v32, %v15_v32  ;;  %v5662_v35 = vcombine.high %v15_v32, %v15_v32 }
   0xb   :  { %v6967_v26 = vld [vmem:[%s9199_s1 + $0x30] sm:$0xff]   ;;  %v6971_v30 = vld [vmem:[%s9199_s1 + $0x38] sm:$0xff]   ;;  %v5663_v36 = vcombine.low %v16_v33, %v16_v33  ;;  %v5664_v37 = vcombine.high %v16_v33, %v16_v33  ;;  %v6977_v38 = vld [vmem:[%s9199_s1 + $0x140] sm:$0xff]  }
   0xc   :  { %6242 = vmatpush3.bf16.msra.mxu0 %v6951_v10  ;;  %v6968_v27 = vld [vmem:[%s9199_s1 + $0xb0] sm:$0xff]   ;;  %v6972_v31 = vld [vmem:[%s9199_s1 + $0xb8] sm:$0xff]   ;;  %v6978_v39 = vld [vmem:[%s9199_s1 + $0x1c0] sm:$0xff]   ;;  %4406 = vmatprep.mubr.bf16.mxu0 %v5662_v35 }
   0xd   :  { %6264 = vmatpush3.bf16.msra.mxu1 %v6952_v11  ;;  %6243 = vmatprep.subr.bf16.mxu0 %v6953_v12  ;;  %v6979_v40 = vld [vmem:[%s9199_s1 + $0x100] sm:$0xff]   ;;  %v6981_v42 = vld [vmem:[%s9199_s1 + $0x148] sm:$0xff]   ;;  %v6985_v46 = vld [vmem:[%s9199_s1 + $0x150] sm:$0xff]  }
   0xe   :  { %6265 = vmatprep.subr.bf16.mxu1 %v6954_v13  ;;  %4446 = vmatprep.mubr.bf16.mxu1 %v5664_v37  ;;  %v6980_v41 = vld [vmem:[%s9199_s1 + $0x180] sm:$0xff]   ;;  %v6982_v43 = vld [vmem:[%s9199_s1 + $0x1c8] sm:$0xff]   ;;  %v6986_v47 = vld [vmem:[%s9199_s1 + $0x1d0] sm:$0xff]  }
   0xf   :  { %v6983_v44 = vld [vmem:[%s9199_s1 + $0x108] sm:$0xff]   ;;  %v6987_v48 = vld [vmem:[%s9199_s1 + $0x110] sm:$0xff]   ;;  %v6989_v50 = vld [vmem:[%s9199_s1 + $0x158] sm:$0xff]  }
  0x10   :  { %6244 = vmatpush3.bf16.msra.mxu0 %v6955_v14  ;;  %v6984_v45 = vld [vmem:[%s9199_s1 + $0x188] sm:$0xff]   ;;  %v6988_v49 = vld [vmem:[%s9199_s1 + $0x190] sm:$0xff]   ;;  %v6990_v51 = vld [vmem:[%s9199_s1 + $0x1d8] sm:$0xff]  }
  0x11   :  { %6266 = vmatpush3.bf16.msra.mxu1 %v6956_v15  ;;  %6245 = vmatprep.subr.bf16.mxu0 %v6957_v16  ;;  %v6991_v52 = vld [vmem:[%s9199_s1 + $0x118] sm:$0xff]   ;;  %v6993_v54 = vld [vmem:[%s9199_s1 + $0x160] sm:$0xff]   ;;  %v6997_v58 = vld [vmem:[%s9199_s1 + $0x168] sm:$0xff]  }
  0x12   :  { %6267 = vmatprep.subr.bf16.mxu1 %v6958_v17  ;;  %v6992_v53 = vld [vmem:[%s9199_s1 + $0x198] sm:$0xff]   ;;  %v6994_v55 = vld [vmem:[%s9199_s1 + $0x1e0] sm:$0xff]   ;;  %v6998_v59 = vld [vmem:[%s9199_s1 + $0x1e8] sm:$0xff]  }
  0x13   :  { %v6995_v56 = vld [vmem:[%s9199_s1 + $0x120] sm:$0xff]   ;;  %v6999_v60 = vld [vmem:[%s9199_s1 + $0x128] sm:$0xff]   ;;  %v7001_v62 = vld [vmem:[%s9199_s1 + $0x170] sm:$0xff]  }
  0x14   :  { %6246 = vmatpush3.bf16.msra.mxu0 %v6959_v18  ;;  %v6996_v57 = vld [vmem:[%s9199_s1 + $0x1a0] sm:$0xff]   ;;  %v7000_v61 = vld [vmem:[%s9199_s1 + $0x1a8] sm:$0xff]   ;;  %v7002_v63 = vld [vmem:[%s9199_s1 + $0x1f0] sm:$0xff]  }
  0x15   :  { %6268 = vmatpush3.bf16.msra.mxu1 %v6960_v19  ;;  %6247 = vmatprep.subr.bf16.mxu0 %v6961_v20  ;;  %v7003_v0 = vld [vmem:[%s9199_s1 + $0x130] sm:$0xff]   ;;  %v7005_v2 = vld [vmem:[%s9199_s1 + $0x178] sm:$0xff]   ;;  %v7013_v12 = vld [vmem:[%s9199_s1 + $0x240] sm:$0xff]  }
  0x16   :  { %6269 = vmatprep.subr.bf16.mxu1 %v6962_v21  ;;  %v7004_v1 = vld [vmem:[%s9199_s1 + $0x1b0] sm:$0xff]   ;;  %v7006_v3 = vld [vmem:[%s9199_s1 + $0x1f8] sm:$0xff]   ;;  %v7014_v13 = vld [vmem:[%s9199_s1 + $0x2c0] sm:$0xff]  }
  0x17   :  { %v7007_v4 = vld [vmem:[%s9199_s1 + $0x138] sm:$0xff]   ;;  %v17_v6 = vld [vmem:[%s9200_s0 + $0x10] sm:$0xff]  ;;  %v7015_v14 = vld [vmem:[%s9199_s1 + $0x200] sm:$0xff]  }
  0x18   :  { %6248 = vmatpush3.bf16.msra.mxu0 %v6963_v22  ;;  %v7008_v5 = vld [vmem:[%s9199_s1 + $0x1b8] sm:$0xff]   ;;  %v5665_v7 = vcombine.low %v17_v6, %v17_v6  ;;  %v5666_v8 = vcombine.high %v17_v6, %v17_v6  ;;  %v7016_v15 = vld [vmem:[%s9199_s1 + $0x280] sm:$0xff]   ;;  %v7017_v16 = vld [vmem:[%s9199_s1 + $0x248] sm:$0xff]  }
  0x19   :  { %6270 = vmatpush3.bf16.msra.mxu1 %v6964_v23  ;;  %6249 = vmatprep.subr.bf16.mxu0 %v6965_v24  ;;  %v18_v9 = vld [vmem:[%s9200_s0 + $0x18] sm:$0xff]  ;;  %v7018_v17 = vld [vmem:[%s9199_s1 + $0x2c8] sm:$0xff]   ;;  %v7021_v20 = vld [vmem:[%s9199_s1 + $0x250] sm:$0xff]  }
  0x1a   :  { %6271 = vmatprep.subr.bf16.mxu1 %v6966_v25  ;;  %v5667_v10 = vcombine.low %v18_v9, %v18_v9  ;;  %v5668_v11 = vcombine.high %v18_v9, %v18_v9  ;;  %v7019_v18 = vld [vmem:[%s9199_s1 + $0x208] sm:$0xff]   ;;  %v7022_v21 = vld [vmem:[%s9199_s1 + $0x2d0] sm:$0xff]   ;;  %v7025_v24 = vld [vmem:[%s9199_s1 + $0x258] sm:$0xff]  }
  0x1b   :  { %v7020_v19 = vld [vmem:[%s9199_s1 + $0x288] sm:$0xff]   ;;  %v7023_v22 = vld [vmem:[%s9199_s1 + $0x210] sm:$0xff]   ;;  %v7026_v25 = vld [vmem:[%s9199_s1 + $0x2d8] sm:$0xff]  }
  0x1c   :  { %6250 = vmatpush3.bf16.msra.mxu0 %v6967_v26  ;;  %v7024_v23 = vld [vmem:[%s9199_s1 + $0x290] sm:$0xff]   ;;  %v7027_v26 = vld [vmem:[%s9199_s1 + $0x218] sm:$0xff]   ;;  %v7033_v32 = vld [vmem:[%s9199_s1 + $0x268] sm:$0xff]  }
  0x1d   :  { %6272 = vmatpush3.bf16.msra.mxu1 %v6968_v27  ;;  %6251 = vmatprep.subr.bf16.mxu0 %v6969_v28  ;;  %v7028_v27 = vld [vmem:[%s9199_s1 + $0x298] sm:$0xff]   ;;  %v7029_v28 = vld [vmem:[%s9199_s1 + $0x260] sm:$0xff]   ;;  %v7034_v33 = vld [vmem:[%s9199_s1 + $0x2e8] sm:$0xff]  }
  0x1e   :  { %6273 = vmatprep.subr.bf16.mxu1 %v6970_v29  ;;  %v7030_v29 = vld [vmem:[%s9199_s1 + $0x2e0] sm:$0xff]   ;;  %v7036_v35 = vld [vmem:[%s9199_s1 + $0x2a8] sm:$0xff]   ;;  %v7038_v37 = vld [vmem:[%s9199_s1 + $0x2f0] sm:$0xff]  }
  0x1f   :  { %v7069_v6 = vld [vmem:[%s9199_s1 + $0x368] sm:$0xff]  }
  0x20   :  { %6252 = vmatpush3.bf16.msra.mxu0 %v6971_v30  ;;  %v7031_v30 = vld [vmem:[%s9199_s1 + $0x220] sm:$0xff]   ;;  %v7072_v9 = vld [vmem:[%s9199_s1 + $0x3a8] sm:$0xff]  }
  0x21   :  { %6274 = vmatpush3.bf16.msra.mxu1 %v6972_v31  ;;  %6281 = vmatprep.subr.bf16.mxu0 %v6977_v38  ;;  %v7032_v31 = vld [vmem:[%s9199_s1 + $0x2a0] sm:$0xff]   ;;  %v7039_v38 = vld [vmem:[%s9199_s1 + $0x230] sm:$0xff]  }
  0x22   :  { %6303 = vmatprep.subr.bf16.mxu1 %v6978_v39  ;;  %v7040_v39 = vld [vmem:[%s9199_s1 + $0x2b0] sm:$0xff]  }
  0x23   :  { %4407 = vmatmul.mubr.bf16.vlgmr.msra.gmra.mrb[0].mxu0 %v5661_v34  ;;  %v7035_v34 = vld [vmem:[%s9199_s1 + $0x228] sm:$0xff]  }
  0x24   :  { %4447 = vmatmul.mubr.bf16.vlgmr.msra.gmra.mrb[0].mxu1 %v5663_v36  ;;  %6282 = vmatpush3.bf16.msra.mxu0 %v6979_v40  ;;  %v7037_v36 = vld [vmem:[%s9199_s1 + $0x270] sm:$0xff]   ;;  %v7041_v40 = vld [vmem:[%s9199_s1 + $0x278] sm:$0xff]  }
  0x25   :  { %6304 = vmatpush3.bf16.msra.mxu1 %v6980_v41  ;;  %6283 = vmatprep.subr.bf16.mxu0 %v6981_v42  ;;  %v7042_v41 = vld [vmem:[%s9199_s1 + $0x2f8] sm:$0xff]  }
  0x26   :  { %6305 = vmatprep.subr.bf16.mxu1 %v6982_v43  ;;  %4486 = vmatprep.mubr.bf16.mxu0 %v5666_v8  ;;  %v7043_v42 = vld [vmem:[%s9199_s1 + $0x238] sm:$0xff]   ;;  %v7071_v8 = vld [vmem:[%s9199_s1 + $0x328] sm:$0xff]  }
  0x27   :  { %4526 = vmatprep.mubr.bf16.mxu1 %v5668_v11  ;;  %v7044_v43 = vld [vmem:[%s9199_s1 + $0x2b8] sm:$0xff]   ;;  %v7074_v11 = vld [vmem:[%s9199_s1 + $0x3f0] sm:$0xff]  }
  0x28   :  { %6284 = vmatpush3.bf16.msra.mxu0 %v6983_v44  ;;  %v19_v44 = vld [vmem:[%s9200_s0 + $0x20] sm:$0xff] }
  0x29   :  { %6306 = vmatpush3.bf16.msra.mxu1 %v6984_v45  ;;  %6285 = vmatprep.subr.bf16.mxu0 %v6985_v46  ;;  %v20_v45 = vld [vmem:[%s9200_s0 + $0x28] sm:$0xff]  ;;  %v5669_v46 = vcombine.low %v19_v44, %v19_v44 }
  0x2a   :  { %6307 = vmatprep.subr.bf16.mxu1 %v6986_v47  ;;  %v5670_v47 = vcombine.high %v19_v44, %v19_v44  ;;  %v7105_v44 = vld [vmem:[%s9199_s1 + $0x468] sm:$0xff]  }
  0x2c   :  { %6286 = vmatpush3.bf16.msra.mxu0 %v6987_v48  ;;  %v5671_v48 = vcombine.low %v20_v45, %v20_v45 }
  0x2d   :  { %6308 = vmatpush3.bf16.msra.mxu1 %v6988_v49  ;;  %6287 = vmatprep.subr.bf16.mxu0 %v6989_v50  ;;  %v5672_v49 = vcombine.high %v20_v45, %v20_v45  ;;  %v7049_v50 = vld [vmem:[%s9199_s1 + $0x340] sm:$0xff]   ;;  %v7106_v45 = vld [vmem:[%s9199_s1 + $0x4e8] sm:$0xff]  }
  0x2e   :  { %6309 = vmatprep.subr.bf16.mxu1 %v6990_v51  ;;  %v7050_v51 = vld [vmem:[%s9199_s1 + $0x3c0] sm:$0xff]  }
  0x30   :  { %6288 = vmatpush3.bf16.msra.mxu0 %v6991_v52  ;;  %v7051_v52 = vld [vmem:[%s9199_s1 + $0x300] sm:$0xff]  }
  0x31   :  { %6310 = vmatpush3.bf16.msra.mxu1 %v6992_v53  ;;  %6289 = vmatprep.subr.bf16.mxu0 %v6993_v54  ;;  %v7052_v53 = vld [vmem:[%s9199_s1 + $0x380] sm:$0xff]   ;;  %v7053_v54 = vld [vmem:[%s9199_s1 + $0x348] sm:$0xff]  }
  0x32   :  { %6311 = vmatprep.subr.bf16.mxu1 %v6994_v55  ;;  %v7054_v55 = vld [vmem:[%s9199_s1 + $0x3c8] sm:$0xff]  }
  0x34   :  { %6290 = vmatpush3.bf16.msra.mxu0 %v6995_v56  ;;  %v7055_v56 = vld [vmem:[%s9199_s1 + $0x308] sm:$0xff]  }
  0x35   :  { %6312 = vmatpush3.bf16.msra.mxu1 %v6996_v57  ;;  %6291 = vmatprep.subr.bf16.mxu0 %v6997_v58  ;;  %v7056_v57 = vld [vmem:[%s9199_s1 + $0x388] sm:$0xff]   ;;  %v7057_v58 = vld [vmem:[%s9199_s1 + $0x350] sm:$0xff]  }
  0x36   :  { %6313 = vmatprep.subr.bf16.mxu1 %v6998_v59  ;;  %v7058_v59 = vld [vmem:[%s9199_s1 + $0x3d0] sm:$0xff]  }
  0x38   :  { %6292 = vmatpush3.bf16.msra.mxu0 %v6999_v60  ;;  %v7059_v60 = vld [vmem:[%s9199_s1 + $0x310] sm:$0xff]  }
  0x39   :  { %6314 = vmatpush3.bf16.msra.mxu1 %v7000_v61  ;;  %6293 = vmatprep.subr.bf16.mxu0 %v7001_v62  ;;  %v7060_v61 = vld [vmem:[%s9199_s1 + $0x390] sm:$0xff]   ;;  %v7061_v62 = vld [vmem:[%s9199_s1 + $0x358] sm:$0xff]  }
  0x3a   :  { %6315 = vmatprep.subr.bf16.mxu1 %v7002_v63  ;;  %v7062_v63 = vld [vmem:[%s9199_s1 + $0x3d8] sm:$0xff]  }
  0x3c   :  { %6294 = vmatpush3.bf16.msra.mxu0 %v7003_v0  ;;  %v7063_v0 = vld [vmem:[%s9199_s1 + $0x318] sm:$0xff]  }
  0x3d   :  { %6316 = vmatpush3.bf16.msra.mxu1 %v7004_v1  ;;  %6295 = vmatprep.subr.bf16.mxu0 %v7005_v2  ;;  %v7064_v1 = vld [vmem:[%s9199_s1 + $0x398] sm:$0xff]   ;;  %v7065_v2 = vld [vmem:[%s9199_s1 + $0x360] sm:$0xff]  }
  0x3e   :  { %6317 = vmatprep.subr.bf16.mxu1 %v7006_v3  ;;  %v7066_v3 = vld [vmem:[%s9199_s1 + $0x3e0] sm:$0xff]  }
  0x40   :  { %6296 = vmatpush3.bf16.msra.mxu0 %v7007_v4  ;;  %v7067_v4 = vld [vmem:[%s9199_s1 + $0x320] sm:$0xff]  }
  0x41   :  { %6318 = vmatpush3.bf16.msra.mxu1 %v7008_v5  ;;  %6325 = vmatprep.subr.bf16.mxu0 %v7013_v12  ;;  %v7068_v5 = vld [vmem:[%s9199_s1 + $0x3a0] sm:$0xff]   ;;  %v7075_v12 = vld [vmem:[%s9199_s1 + $0x330] sm:$0xff]  }
  0x42   :  { %6347 = vmatprep.subr.bf16.mxu1 %v7014_v13  ;;  %v7076_v13 = vld [vmem:[%s9199_s1 + $0x3b0] sm:$0xff]  }
  0x43   :  { %4487 = vmatmul.mubr.bf16.vlgmr.msra.gmra.mrb[4].mxu0 %v5665_v7  ;;  %v7070_v7 = vld [vmem:[%s9199_s1 + $0x3e8] sm:$0xff]  }
  0x44   :  { %4527 = vmatmul.mubr.bf16.vlgmr.msra.gmra.mrb[4].mxu1 %v5667_v10  ;;  %6326 = vmatpush3.bf16.msra.mxu0 %v7015_v14  ;;  %v7073_v10 = vld [vmem:[%s9199_s1 + $0x370] sm:$0xff]   ;;  %v7077_v14 = vld [vmem:[%s9199_s1 + $0x378] sm:$0xff]  }
  0x45   :  { %6348 = vmatpush3.bf16.msra.mxu1 %v7016_v15  ;;  %6327 = vmatprep.subr.bf16.mxu0 %v7017_v16  ;;  %v7078_v15 = vld [vmem:[%s9199_s1 + $0x3f8] sm:$0xff]  }
  0x46   :  { %6349 = vmatprep.subr.bf16.mxu1 %v7018_v17  ;;  %4566 = vmatprep.mubr.bf16.mxu0 %v5670_v47  ;;  %v7079_v16 = vld [vmem:[%s9199_s1 + $0x338] sm:$0xff]   ;;  %v7108_v47 = vld [vmem:[%s9199_s1 + $0x4a8] sm:$0xff]  }
  0x47   :  { %4606 = vmatprep.mubr.bf16.mxu1 %v5672_v49  ;;  %v7080_v17 = vld [vmem:[%s9199_s1 + $0x3b8] sm:$0xff]   ;;  %v7110_v49 = vld [vmem:[%s9199_s1 + $0x4f0] sm:$0xff]  }
  0x48   :  { %6328 = vmatpush3.bf16.msra.mxu0 %v7019_v18  ;;  %v21_v18 = vld [vmem:[%s9200_s0 + $0x30] sm:$0xff] }
  0x49   :  { %6350 = vmatpush3.bf16.msra.mxu1 %v7020_v19  ;;  %6329 = vmatprep.subr.bf16.mxu0 %v7021_v20  ;;  %v22_v19 = vld [vmem:[%s9200_s0 + $0x38] sm:$0xff]  ;;  %v5673_v20 = vcombine.low %v21_v18, %v21_v18 }
  0x4a   :  { %6351 = vmatprep.subr.bf16.mxu1 %v7022_v21  ;;  %v5674_v21 = vcombine.high %v21_v18, %v21_v18  ;;  %v7141_v18 = vld [vmem:[%s9199_s1 + $0x568] sm:$0xff]  }
  0x4c   :  { %6330 = vmatpush3.bf16.msra.mxu0 %v7023_v22  ;;  %v5675_v22 = vcombine.low %v22_v19, %v22_v19 }
  0x4d   :  { %6352 = vmatpush3.bf16.msra.mxu1 %v7024_v23  ;;  %6331 = vmatprep.subr.bf16.mxu0 %v7025_v24  ;;  %v7085_v23 = vld [vmem:[%s9199_s1 + $0x440] sm:$0xff]   ;;  %v5676_v24 = vcombine.high %v22_v19, %v22_v19  ;;  %v7142_v19 = vld [vmem:[%s9199_s1 + $0x5e8] sm:$0xff]  }
  0x4e   :  { %6353 = vmatprep.subr.bf16.mxu1 %v7026_v25  ;;  %v7086_v25 = vld [vmem:[%s9199_s1 + $0x4c0] sm:$0xff]  }
  0x50   :  { %6332 = vmatpush3.bf16.msra.mxu0 %v7027_v26  ;;  %v7087_v26 = vld [vmem:[%s9199_s1 + $0x400] sm:$0xff]  }
  0x51   :  { %6354 = vmatpush3.bf16.msra.mxu1 %v7028_v27  ;;  %6333 = vmatprep.subr.bf16.mxu0 %v7029_v28  ;;  %v7088_v27 = vld [vmem:[%s9199_s1 + $0x480] sm:$0xff]   ;;  %v7089_v28 = vld [vmem:[%s9199_s1 + $0x448] sm:$0xff]  }
  0x52   :  { %6355 = vmatprep.subr.bf16.mxu1 %v7030_v29  ;;  %v7090_v29 = vld [vmem:[%s9199_s1 + $0x4c8] sm:$0xff]  }
  0x54   :  { %6334 = vmatpush3.bf16.msra.mxu0 %v7031_v30  ;;  %v7091_v30 = vld [vmem:[%s9199_s1 + $0x408] sm:$0xff]  }
  0x55   :  { %6356 = vmatpush3.bf16.msra.mxu1 %v7032_v31  ;;  %6335 = vmatprep.subr.bf16.mxu0 %v7033_v32  ;;  %v7092_v31 = vld [vmem:[%s9199_s1 + $0x488] sm:$0xff]   ;;  %v7093_v32 = vld [vmem:[%s9199_s1 + $0x450] sm:$0xff]  }
  0x56   :  { %6357 = vmatprep.subr.bf16.mxu1 %v7034_v33  ;;  %v7094_v33 = vld [vmem:[%s9199_s1 + $0x4d0] sm:$0xff]  }
  0x58   :  { %6336 = vmatpush3.bf16.msra.mxu0 %v7035_v34  ;;  %v7095_v34 = vld [vmem:[%s9199_s1 + $0x410] sm:$0xff]  }
  0x59   :  { %6358 = vmatpush3.bf16.msra.mxu1 %v7036_v35  ;;  %6337 = vmatprep.subr.bf16.mxu0 %v7037_v36  ;;  %v7096_v35 = vld [vmem:[%s9199_s1 + $0x490] sm:$0xff]   ;;  %v7097_v36 = vld [vmem:[%s9199_s1 + $0x458] sm:$0xff]  }
  0x5a   :  { %6359 = vmatprep.subr.bf16.mxu1 %v7038_v37  ;;  %v7098_v37 = vld [vmem:[%s9199_s1 + $0x4d8] sm:$0xff]  }
  0x5c   :  { %6338 = vmatpush3.bf16.msra.mxu0 %v7039_v38  ;;  %v7099_v38 = vld [vmem:[%s9199_s1 + $0x418] sm:$0xff]  }
  0x5d   :  { %6360 = vmatpush3.bf16.msra.mxu1 %v7040_v39  ;;  %6339 = vmatprep.subr.bf16.mxu0 %v7041_v40  ;;  %v7100_v39 = vld [vmem:[%s9199_s1 + $0x498] sm:$0xff]   ;;  %v7101_v40 = vld [vmem:[%s9199_s1 + $0x460] sm:$0xff]  }
  0x5e   :  { %6361 = vmatprep.subr.bf16.mxu1 %v7042_v41  ;;  %v7102_v41 = vld [vmem:[%s9199_s1 + $0x4e0] sm:$0xff]  }
  0x60   :  { %6340 = vmatpush3.bf16.msra.mxu0 %v7043_v42  ;;  %v7103_v42 = vld [vmem:[%s9199_s1 + $0x420] sm:$0xff]  }
  0x61   :  { %6362 = vmatpush3.bf16.msra.mxu1 %v7044_v43  ;;  %6369 = vmatprep.subr.bf16.mxu0 %v7049_v50  ;;  %v7104_v43 = vld [vmem:[%s9199_s1 + $0x4a0] sm:$0xff]   ;;  %v7111_v50 = vld [vmem:[%s9199_s1 + $0x430] sm:$0xff]  }
  0x62   :  { %6391 = vmatprep.subr.bf16.mxu1 %v7050_v51  ;;  %v7112_v51 = vld [vmem:[%s9199_s1 + $0x4b0] sm:$0xff]  }
  0x63   :  { %4567 = vmatmul.mubr.bf16.vlgmr.msra.gmra.mrb[8].mxu0 %v5669_v46  ;;  %v7107_v46 = vld [vmem:[%s9199_s1 + $0x428] sm:$0xff]  }
  0x64   :  { %4607 = vmatmul.mubr.bf16.vlgmr.msra.gmra.mrb[8].mxu1 %v5671_v48  ;;  %6370 = vmatpush3.bf16.msra.mxu0 %v7051_v52  ;;  %v7109_v48 = vld [vmem:[%s9199_s1 + $0x470] sm:$0xff]   ;;  %v7113_v52 = vld [vmem:[%s9199_s1 + $0x478] sm:$0xff]  }
  0x65   :  { %6392 = vmatpush3.bf16.msra.mxu1 %v7052_v53  ;;  %6371 = vmatprep.subr.bf16.mxu0 %v7053_v54  ;;  %v7114_v53 = vld [vmem:[%s9199_s1 + $0x4f8] sm:$0xff]  }
  0x66   :  { %6393 = vmatprep.subr.bf16.mxu1 %v7054_v55  ;;  %4646 = vmatprep.mubr.bf16.mxu0 %v5674_v21  ;;  %v7115_v54 = vld [vmem:[%s9199_s1 + $0x438] sm:$0xff]   ;;  %v7144_v21 = vld [vmem:[%s9199_s1 + $0x5a8] sm:$0xff]  }
  0x67   :  { %4686 = vmatprep.mubr.bf16.mxu1 %v5676_v24  ;;  %v7116_v55 = vld [vmem:[%s9199_s1 + $0x4b8] sm:$0xff]   ;;  %v7147_v24 = vld [vmem:[%s9199_s1 + $0x530] sm:$0xff]  }
  0x68   :  { %6372 = vmatpush3.bf16.msra.mxu0 %v7055_v56  ;;  %v23_v56 = vld [vmem:[%s9200_s0 + $0x40] sm:$0xff] }
  0x69   :  { %6394 = vmatpush3.bf16.msra.mxu1 %v7056_v57  ;;  %6373 = vmatprep.subr.bf16.mxu0 %v7057_v58  ;;  %v5677_v57 = vcombine.low %v23_v56, %v23_v56  ;;  %v5678_v58 = vcombine.high %v23_v56, %v23_v56  ;;  %v7177_v56 = vld [vmem:[%s9199_s1 + $0x668] sm:$0xff]  }
  0x6a   :  { %6395 = vmatprep.subr.bf16.mxu1 %v7058_v59  ;;  %v24_v59 = vld [vmem:[%s9200_s0 + $0x48] sm:$0xff] }
  0x6c   :  { %6374 = vmatpush3.bf16.msra.mxu0 %v7059_v60  ;;  %v5679_v60 = vcombine.low %v24_v59, %v24_v59 }
  0x6d   :  { %6396 = vmatpush3.bf16.msra.mxu1 %v7060_v61  ;;  %6375 = vmatprep.subr.bf16.mxu0 %v7061_v62  ;;  %v5680_v61 = vcombine.high %v24_v59, %v24_v59  ;;  %v7121_v62 = vld [vmem:[%s9199_s1 + $0x540] sm:$0xff]   ;;  %v7180_v59 = vld [vmem:[%s9199_s1 + $0x6a8] sm:$0xff]  }
  0x6e   :  { %6397 = vmatprep.subr.bf16.mxu1 %v7062_v63  ;;  %v7122_v63 = vld [vmem:[%s9199_s1 + $0x5c0] sm:$0xff]  }
  0x70   :  { %6376 = vmatpush3.bf16.msra.mxu0 %v7063_v0  ;;  %v7123_v0 = vld [vmem:[%s9199_s1 + $0x500] sm:$0xff]  }
  0x71   :  { %6398 = vmatpush3.bf16.msra.mxu1 %v7064_v1  ;;  %6377 = vmatprep.subr.bf16.mxu0 %v7065_v2  ;;  %v7124_v1 = vld [vmem:[%s9199_s1 + $0x580] sm:$0xff]   ;;  %v7125_v2 = vld [vmem:[%s9199_s1 + $0x548] sm:$0xff]  }
  0x72   :  { %6399 = vmatprep.subr.bf16.mxu1 %v7066_v3  ;;  %v7126_v3 = vld [vmem:[%s9199_s1 + $0x5c8] sm:$0xff]  }
  0x74   :  { %6378 = vmatpush3.bf16.msra.mxu0 %v7067_v4  ;;  %v7127_v4 = vld [vmem:[%s9199_s1 + $0x508] sm:$0xff]  }
  0x75   :  { %6400 = vmatpush3.bf16.msra.mxu1 %v7068_v5  ;;  %6379 = vmatprep.subr.bf16.mxu0 %v7069_v6  ;;  %v7128_v5 = vld [vmem:[%s9199_s1 + $0x588] sm:$0xff]   ;;  %v7129_v6 = vld [vmem:[%s9199_s1 + $0x550] sm:$0xff]  }
  0x76   :  { %6401 = vmatprep.subr.bf16.mxu1 %v7070_v7  ;;  %v7130_v7 = vld [vmem:[%s9199_s1 + $0x5d0] sm:$0xff]  }
  0x78   :  { %6380 = vmatpush3.bf16.msra.mxu0 %v7071_v8  ;;  %v7131_v8 = vld [vmem:[%s9199_s1 + $0x510] sm:$0xff]  }
  0x79   :  { %6402 = vmatpush3.bf16.msra.mxu1 %v7072_v9  ;;  %6381 = vmatprep.subr.bf16.mxu0 %v7073_v10  ;;  %v7132_v9 = vld [vmem:[%s9199_s1 + $0x590] sm:$0xff]   ;;  %v7133_v10 = vld [vmem:[%s9199_s1 + $0x558] sm:$0xff]  }
  0x7a   :  { %6403 = vmatprep.subr.bf16.mxu1 %v7074_v11  ;;  %v7134_v11 = vld [vmem:[%s9199_s1 + $0x5d8] sm:$0xff]  }
  0x7c   :  { %6382 = vmatpush3.bf16.msra.mxu0 %v7075_v12  ;;  %v7135_v12 = vld [vmem:[%s9199_s1 + $0x518] sm:$0xff]  }
  0x7d   :  { %6404 = vmatpush3.bf16.msra.mxu1 %v7076_v13  ;;  %6383 = vmatprep.subr.bf16.mxu0 %v7077_v14  ;;  %v7136_v13 = vld [vmem:[%s9199_s1 + $0x598] sm:$0xff]   ;;  %v7137_v14 = vld [vmem:[%s9199_s1 + $0x560] sm:$0xff]  }
  0x7e   :  { %6405 = vmatprep.subr.bf16.mxu1 %v7078_v15  ;;  %v7138_v15 = vld [vmem:[%s9199_s1 + $0x5e0] sm:$0xff]  }
  0x80   :  { %6384 = vmatpush3.bf16.msra.mxu0 %v7079_v16  ;;  %v7139_v16 = vld [vmem:[%s9199_s1 + $0x520] sm:$0xff]  }
  0x81   :  { %6406 = vmatpush3.bf16.msra.mxu1 %v7080_v17  ;;  %6413 = vmatprep.subr.bf16.mxu0 %v7085_v23  ;;  %v7140_v17 = vld [vmem:[%s9199_s1 + $0x5a0] sm:$0xff]   ;;  %v7146_v23 = vld [vmem:[%s9199_s1 + $0x5f0] sm:$0xff]  }
  0x82   :  { %6435 = vmatprep.subr.bf16.mxu1 %v7086_v25  ;;  %v7148_v25 = vld [vmem:[%s9199_s1 + $0x5b0] sm:$0xff]  }
  0x83   :  { %4647 = vmatmul.mubr.bf16.vlgmr.msra.gmra.mrb[12].mxu0 %v5673_v20  ;;  %v7143_v20 = vld [vmem:[%s9199_s1 + $0x528] sm:$0xff]  }
  0x84   :  { %4687 = vmatmul.mubr.bf16.vlgmr.msra.gmra.mrb[12].mxu1 %v5675_v22  ;;  %6414 = vmatpush3.bf16.msra.mxu0 %v7087_v26  ;;  %v7145_v22 = vld [vmem:[%s9199_s1 + $0x570] sm:$0xff]   ;;  %v7149_v26 = vld [vmem:[%s9199_s1 + $0x578] sm:$0xff]  }
  0x85   :  { %6436 = vmatpush3.bf16.msra.mxu1 %v7088_v27  ;;  %6415 = vmatprep.subr.bf16.mxu0 %v7089_v28  ;;  %v7150_v27 = vld [vmem:[%s9199_s1 + $0x5f8] sm:$0xff]  }
  0x86   :  { %6437 = vmatprep.subr.bf16.mxu1 %v7090_v29  ;;  %4726 = vmatprep.mubr.bf16.mxu0 %v5678_v58  ;;  %v7151_v28 = vld [vmem:[%s9199_s1 + $0x538] sm:$0xff]   ;;  %v7179_v58 = vld [vmem:[%s9199_s1 + $0x628] sm:$0xff]  }
  0x87   :  { %4766 = vmatprep.mubr.bf16.mxu1 %v5680_v61  ;;  %v7152_v29 = vld [vmem:[%s9199_s1 + $0x5b8] sm:$0xff]   ;;  %v7182_v61 = vld [vmem:[%s9199_s1 + $0x6f0] sm:$0xff]  }
  0x88   :  { %6416 = vmatpush3.bf16.msra.mxu0 %v7091_v30  ;;  %v25_v30 = vld [vmem:[%s9200_s0 + $0x50] sm:$0xff] }
  0x89   :  { %6438 = vmatpush3.bf16.msra.mxu1 %v7092_v31  ;;  %6417 = vmatprep.subr.bf16.mxu0 %v7093_v32  ;;  %v26_v31 = vld [vmem:[%s9200_s0 + $0x58] sm:$0xff]  ;;  %v5681_v32 = vcombine.low %v25_v30, %v25_v30 }
  0x8a   :  { %6439 = vmatprep.subr.bf16.mxu1 %v7094_v33  ;;  %v5682_v33 = vcombine.high %v25_v30, %v25_v30  ;;  %v7212_v30 = vld [vmem:[%s9199_s1 + $0x7a0] sm:$0xff]  }
  0x8c   :  { %6418 = vmatpush3.bf16.msra.mxu0 %v7095_v34  ;;  %v5683_v34 = vcombine.low %v26_v31, %v26_v31 }
  0x8d   :  { %6440 = vmatpush3.bf16.msra.mxu1 %v7096_v35  ;;  %6419 = vmatprep.subr.bf16.mxu0 %v7097_v36  ;;  %v5684_v35 = vcombine.high %v26_v31, %v26_v31  ;;  %v7157_v36 = vld [vmem:[%s9199_s1 + $0x640] sm:$0xff]  }
  0x8e   :  { %6441 = vmatprep.subr.bf16.mxu1 %v7098_v37  ;;  %v7158_v37 = vld [vmem:[%s9199_s1 + $0x6c0] sm:$0xff]  }
  0x90   :  { %6420 = vmatpush3.bf16.msra.mxu0 %v7099_v38  ;;  %v7159_v38 = vld [vmem:[%s9199_s1 + $0x600] sm:$0xff]  }
  0x91   :  { %6442 = vmatpush3.bf16.msra.mxu1 %v7100_v39  ;;  %6421 = vmatprep.subr.bf16.mxu0 %v7101_v40  ;;  %v7160_v39 = vld [vmem:[%s9199_s1 + $0x680] sm:$0xff]   ;;  %v7161_v40 = vld [vmem:[%s9199_s1 + $0x648] sm:$0xff]  }
  0x92   :  { %6443 = vmatprep.subr.bf16.mxu1 %v7102_v41  ;;  %v7162_v41 = vld [vmem:[%s9199_s1 + $0x6c8] sm:$0xff]  }
  0x94   :  { %6422 = vmatpush3.bf16.msra.mxu0 %v7103_v42  ;;  %v7163_v42 = vld [vmem:[%s9199_s1 + $0x608] sm:$0xff]  }
  0x95   :  { %6444 = vmatpush3.bf16.msra.mxu1 %v7104_v43  ;;  %6423 = vmatprep.subr.bf16.mxu0 %v7105_v44  ;;  %v7164_v43 = vld [vmem:[%s9199_s1 + $0x688] sm:$0xff]   ;;  %v7165_v44 = vld [vmem:[%s9199_s1 + $0x650] sm:$0xff]  }
  0x96   :  { %6445 = vmatprep.subr.bf16.mxu1 %v7106_v45  ;;  %v7166_v45 = vld [vmem:[%s9199_s1 + $0x6d0] sm:$0xff]  }
  0x98   :  { %6424 = vmatpush3.bf16.msra.mxu0 %v7107_v46  ;;  %v7167_v46 = vld [vmem:[%s9199_s1 + $0x610] sm:$0xff]  }
  0x99   :  { %6446 = vmatpush3.bf16.msra.mxu1 %v7108_v47  ;;  %6425 = vmatprep.subr.bf16.mxu0 %v7109_v48  ;;  %v7168_v47 = vld [vmem:[%s9199_s1 + $0x690] sm:$0xff]   ;;  %v7169_v48 = vld [vmem:[%s9199_s1 + $0x658] sm:$0xff]  }
  0x9a   :  { %6447 = vmatprep.subr.bf16.mxu1 %v7110_v49  ;;  %v7170_v49 = vld [vmem:[%s9199_s1 + $0x6d8] sm:$0xff]  }
  0x9c   :  { %6426 = vmatpush3.bf16.msra.mxu0 %v7111_v50  ;;  %v7171_v50 = vld [vmem:[%s9199_s1 + $0x618] sm:$0xff]  }
  0x9d   :  { %6448 = vmatpush3.bf16.msra.mxu1 %v7112_v51  ;;  %6427 = vmatprep.subr.bf16.mxu0 %v7113_v52  ;;  %v7172_v51 = vld [vmem:[%s9199_s1 + $0x698] sm:$0xff]   ;;  %v7173_v52 = vld [vmem:[%s9199_s1 + $0x660] sm:$0xff]  }
  0x9e   :  { %6449 = vmatprep.subr.bf16.mxu1 %v7114_v53  ;;  %v7174_v53 = vld [vmem:[%s9199_s1 + $0x6e0] sm:$0xff]  }
  0xa0   :  { %6428 = vmatpush3.bf16.msra.mxu0 %v7115_v54  ;;  %v7175_v54 = vld [vmem:[%s9199_s1 + $0x620] sm:$0xff]  }
  0xa1   :  { %6450 = vmatpush3.bf16.msra.mxu1 %v7116_v55  ;;  %6457 = vmatprep.subr.bf16.mxu0 %v7121_v62  ;;  %v7176_v55 = vld [vmem:[%s9199_s1 + $0x6a0] sm:$0xff]   ;;  %v7183_v62 = vld [vmem:[%s9199_s1 + $0x630] sm:$0xff]  }
  0xa2   :  { %6479 = vmatprep.subr.bf16.mxu1 %v7122_v63  ;;  %v7184_v63 = vld [vmem:[%s9199_s1 + $0x6b0] sm:$0xff]  }
  0xa3   :  { %4727 = vmatmul.mubr.bf16.vlgmr.msra.gmra.mrb[16].mxu0 %v5677_v57  ;;  %v7178_v57 = vld [vmem:[%s9199_s1 + $0x6e8] sm:$0xff]  }
  0xa4   :  { %4767 = vmatmul.mubr.bf16.vlgmr.msra.gmra.mrb[16].mxu1 %v5679_v60  ;;  %6458 = vmatpush3.bf16.msra.mxu0 %v7123_v0  ;;  %v7181_v60 = vld [vmem:[%s9199_s1 + $0x670] sm:$0xff]   ;;  %v7185_v0 = vld [vmem:[%s9199_s1 + $0x678] sm:$0xff]  }
  0xa5   :  { %6480 = vmatpush3.bf16.msra.mxu1 %v7124_v1  ;;  %6459 = vmatprep.subr.bf16.mxu0 %v7125_v2  ;;  %v7186_v1 = vld [vmem:[%s9199_s1 + $0x6f8] sm:$0xff]  }
  0xa6   :  { %6481 = vmatprep.subr.bf16.mxu1 %v7126_v3  ;;  %4806 = vmatprep.mubr.bf16.mxu0 %v5682_v33  ;;  %v7187_v2 = vld [vmem:[%s9199_s1 + $0x638] sm:$0xff]  }
  0xa7   :  { %4846 = vmatprep.mubr.bf16.mxu1 %v5684_v35  ;;  %v7188_v3 = vld [vmem:[%s9199_s1 + $0x6b8] sm:$0xff]  }
  0xa8   :  { %6460 = vmatpush3.bf16.msra.mxu0 %v7127_v4  ;;  %v27_v4 = vld [vmem:[%s9200_s0 + $0x60] sm:$0xff] }
  0xa9   :  { %6482 = vmatpush3.bf16.msra.mxu1 %v7128_v5  ;;  %6461 = vmatprep.subr.bf16.mxu0 %v7129_v6  ;;  %v28_v5 = vld [vmem:[%s9200_s0 + $0x68] sm:$0xff]  ;;  %v5685_v6 = vcombine.low %v27_v4, %v27_v4 }
  0xaa   :  { %6483 = vmatprep.subr.bf16.mxu1 %v7130_v7  ;;  %v5686_v7 = vcombine.high %v27_v4, %v27_v4  ;;  %v7236_v4 = vld [vmem:[%s9199_s1 + $0x888] sm:$0xff]  }
  0xac   :  { %6462 = vmatpush3.bf16.msra.mxu0 %v7131_v8  ;;  %v5687_v8 = vcombine.low %v28_v5, %v28_v5 }
  0xad   :  { %6484 = vmatpush3.bf16.msra.mxu1 %v7132_v9  ;;  %6463 = vmatprep.subr.bf16.mxu0 %v7133_v10  ;;  %v7193_v9 = vld [vmem:[%s9199_s1 + $0x740] sm:$0xff]   ;;  %v5688_v10 = vcombine.high %v28_v5, %v28_v5  ;;  %v7237_v5 = vld [vmem:[%s9199_s1 + $0x850] sm:$0xff]  }
  0xae   :  { %6485 = vmatprep.subr.bf16.mxu1 %v7134_v11  ;;  %v7194_v11 = vld [vmem:[%s9199_s1 + $0x7c0] sm:$0xff]  }
  0xb0   :  { %6464 = vmatpush3.bf16.msra.mxu0 %v7135_v12  ;;  %v7195_v12 = vld [vmem:[%s9199_s1 + $0x700] sm:$0xff]  }
  0xb1   :  { %6486 = vmatpush3.bf16.msra.mxu1 %v7136_v13  ;;  %6465 = vmatprep.subr.bf16.mxu0 %v7137_v14  ;;  %v7196_v13 = vld [vmem:[%s9199_s1 + $0x780] sm:$0xff]   ;;  %v7197_v14 = vld [vmem:[%s9199_s1 + $0x748] sm:$0xff]  }
  0xb2   :  { %6487 = vmatprep.subr.bf16.mxu1 %v7138_v15  ;;  %v7198_v15 = vld [vmem:[%s9199_s1 + $0x7c8] sm:$0xff]  }
  0xb4   :  { %6466 = vmatpush3.bf16.msra.mxu0 %v7139_v16  ;;  %v7199_v16 = vld [vmem:[%s9199_s1 + $0x708] sm:$0xff]  }
  0xb5   :  { %6488 = vmatpush3.bf16.msra.mxu1 %v7140_v17  ;;  %6467 = vmatprep.subr.bf16.mxu0 %v7141_v18  ;;  %v7200_v17 = vld [vmem:[%s9199_s1 + $0x788] sm:$0xff]   ;;  %v7201_v18 = vld [vmem:[%s9199_s1 + $0x750] sm:$0xff]  }
  0xb6   :  { %6489 = vmatprep.subr.bf16.mxu1 %v7142_v19  ;;  %v7202_v19 = vld [vmem:[%s9199_s1 + $0x7d0] sm:$0xff]  }
  0xb8   :  { %6468 = vmatpush3.bf16.msra.mxu0 %v7143_v20  ;;  %v7203_v20 = vld [vmem:[%s9199_s1 + $0x710] sm:$0xff]  }
  0xb9   :  { %6490 = vmatpush3.bf16.msra.mxu1 %v7144_v21  ;;  %6469 = vmatprep.subr.bf16.mxu0 %v7145_v22  ;;  %v7204_v21 = vld [vmem:[%s9199_s1 + $0x790] sm:$0xff]   ;;  %v7205_v22 = vld [vmem:[%s9199_s1 + $0x758] sm:$0xff]  }
  0xba   :  { %6491 = vmatprep.subr.bf16.mxu1 %v7146_v23  ;;  %v7206_v23 = vld [vmem:[%s9199_s1 + $0x7d8] sm:$0xff]  }
  0xbc   :  { %6470 = vmatpush3.bf16.msra.mxu0 %v7147_v24  ;;  %v7207_v24 = vld [vmem:[%s9199_s1 + $0x718] sm:$0xff]  }
  0xbd   :  { %6492 = vmatpush3.bf16.msra.mxu1 %v7148_v25  ;;  %6471 = vmatprep.subr.bf16.mxu0 %v7149_v26  ;;  %v7208_v25 = vld [vmem:[%s9199_s1 + $0x798] sm:$0xff]   ;;  %v7209_v26 = vld [vmem:[%s9199_s1 + $0x760] sm:$0xff]  }
  0xbe   :  { %6493 = vmatprep.subr.bf16.mxu1 %v7150_v27  ;;  %v7210_v27 = vld [vmem:[%s9199_s1 + $0x7e0] sm:$0xff]  }
  0xc0   :  { %6472 = vmatpush3.bf16.msra.mxu0 %v7151_v28  ;;  %v7211_v28 = vld [vmem:[%s9199_s1 + $0x720] sm:$0xff]  }
  0xc1   :  { %6494 = vmatpush3.bf16.msra.mxu1 %v7152_v29  ;;  %6501 = vmatprep.subr.bf16.mxu0 %v7157_v36 }
  0xc2   :  { %6523 = vmatprep.subr.bf16.mxu1 %v7158_v37  ;;  %v7213_v37 = vld [vmem:[%s9199_s1 + $0x768] sm:$0xff]  }
  0xc3   :  { %4807 = vmatmul.mubr.bf16.vlgmr.msra.gmra.mrb[20].mxu0 %v5681_v32  ;;  %v5660_v32 = vld [vmem:[%s9201_s2] ss:$0 sm:$0xff] }
  0xc4   :  { %4847 = vmatmul.mubr.bf16.vlgmr.msra.gmra.mrb[20].mxu1 %v5683_v34  ;;  %6502 = vmatpush3.bf16.msra.mxu0 %v7159_v38 }
  0xc5   :  { %6524 = vmatpush3.bf16.msra.mxu1 %v7160_v39  ;;  %6503 = vmatprep.subr.bf16.mxu0 %v7161_v40  ;;  %v7214_v39 = vld [vmem:[%s9199_s1 + $0x7e8] sm:$0xff]  }
  0xc6   :  { %6525 = vmatprep.subr.bf16.mxu1 %v7162_v41  ;;  %4886 = vmatprep.mubr.bf16.mxu0 %v5686_v7  ;;  %v7239_v7 = vld [vmem:[%s9199_s1 + $0x810] sm:$0xff]  }
  0xc7   :  { %4926 = vmatprep.mubr.bf16.mxu1 %v5688_v10  ;;  %v7242_v10 = vld [vmem:[%s9199_s1 + $0x8d8] sm:$0xff]  }
  0xc8   :  { %6504 = vmatpush3.bf16.msra.mxu0 %v7163_v42  ;;  %v7215_v42 = vld [vmem:[%s9199_s1 + $0x728] sm:$0xff]  }
  0xc9   :  { %6526 = vmatpush3.bf16.msra.mxu1 %v7164_v43  ;;  %6505 = vmatprep.subr.bf16.mxu0 %v7165_v44  ;;  %v7216_v44 = vld [vmem:[%s9199_s1 + $0x7a8] sm:$0xff]  }
  0xca   :  { %6527 = vmatprep.subr.bf16.mxu1 %v7166_v45 }
  0xcc   :  { %6506 = vmatpush3.bf16.msra.mxu0 %v7167_v46 }
  0xcd   :  { %6528 = vmatpush3.bf16.msra.mxu1 %v7168_v47  ;;  %6507 = vmatprep.subr.bf16.mxu0 %v7169_v48  ;;  %v7217_v47 = vld [vmem:[%s9199_s1 + $0x770] sm:$0xff]  }
  0xce   :  { %6529 = vmatprep.subr.bf16.mxu1 %v7170_v49  ;;  %v7218_v48 = vld [vmem:[%s9199_s1 + $0x7f0] sm:$0xff]  }
  0xcf   :  { %v7219_v49 = vld [vmem:[%s9199_s1 + $0x730] sm:$0xff]  }
  0xd0   :  { %6508 = vmatpush3.bf16.msra.mxu0 %v7171_v50  ;;  %v7220_v50 = vld [vmem:[%s9199_s1 + $0x7b0] sm:$0xff]  }
  0xd1   :  { %6530 = vmatpush3.bf16.msra.mxu1 %v7172_v51  ;;  %6509 = vmatprep.subr.bf16.mxu0 %v7173_v52  ;;  %v7221_v51 = vld [vmem:[%s9199_s1 + $0x778] sm:$0xff]  }
  0xd2   :  { %6531 = vmatprep.subr.bf16.mxu1 %v7174_v53  ;;  %v7222_v52 = vld [vmem:[%s9199_s1 + $0x7f8] sm:$0xff]  }
  0xd3   :  { %v7223_v53 = vld [vmem:[%s9199_s1 + $0x738] sm:$0xff]  }
  0xd4   :  { %6510 = vmatpush3.bf16.msra.mxu0 %v7175_v54  ;;  %v7224_v54 = vld [vmem:[%s9199_s1 + $0x7b8] sm:$0xff]  }
  0xd5   :  { %6532 = vmatpush3.bf16.msra.mxu1 %v7176_v55  ;;  %6511 = vmatprep.subr.bf16.mxu0 %v7177_v56  ;;  %v29_v55 = vld [vmem:[%s9200_s0 + $0x70] sm:$0xff]  ;;  %v30_v56 = vld [vmem:[%s9200_s0 + $0x78] sm:$0xff] }
  0xd6   :  { %6533 = vmatprep.subr.bf16.mxu1 %v7178_v57  ;;  %v5689_v57 = vcombine.low %v29_v55, %v29_v55 }
  0xd8   :  { %6512 = vmatpush3.bf16.msra.mxu0 %v7179_v58  ;;  %v5690_v58 = vcombine.high %v29_v55, %v29_v55  ;;  %v7273_v55 = vld [vmem:[%s9199_s1 + $0x950] sm:$0xff]  }
  0xd9   :  { %6534 = vmatpush3.bf16.msra.mxu1 %v7180_v59  ;;  %6513 = vmatprep.subr.bf16.mxu0 %v7181_v60  ;;  %v5691_v59 = vcombine.low %v30_v56, %v30_v56  ;;  %v5692_v60 = vcombine.high %v30_v56, %v30_v56  ;;  %v7274_v56 = vld [vmem:[%s9199_s1 + $0x9d0] sm:$0xff]  }
  0xda   :  { %6535 = vmatprep.subr.bf16.mxu1 %v7182_v61  ;;  %v7229_v61 = vld [vmem:[%s9199_s1 + $0x840] sm:$0xff]  }
  0xdc   :  { %6514 = vmatpush3.bf16.msra.mxu0 %v7183_v62  ;;  %v7230_v62 = vld [vmem:[%s9199_s1 + $0x8c0] sm:$0xff]  }
  0xdd   :  { %6536 = vmatpush3.bf16.msra.mxu1 %v7184_v63  ;;  %6515 = vmatprep.subr.bf16.mxu0 %v7185_v0  ;;  %v7231_v63 = vld [vmem:[%s9199_s1 + $0x800] sm:$0xff]  }
  0xde   :  { %6537 = vmatprep.subr.bf16.mxu1 %v7186_v1  ;;  %v7232_v0 = vld [vmem:[%s9199_s1 + $0x880] sm:$0xff]   ;;  %v7233_v1 = vld [vmem:[%s9199_s1 + $0x848] sm:$0xff]  }
  0xe0   :  { %6516 = vmatpush3.bf16.msra.mxu0 %v7187_v2  ;;  %v7234_v2 = vld [vmem:[%s9199_s1 + $0x8c8] sm:$0xff]  }
  0xe1   :  { %6538 = vmatpush3.bf16.msra.mxu1 %v7188_v3  ;;  %6545 = vmatprep.subr.bf16.mxu0 %v7193_v9  ;;  %v7235_v3 = vld [vmem:[%s9199_s1 + $0x808] sm:$0xff]   ;;  %v7241_v9 = vld [vmem:[%s9199_s1 + $0x858] sm:$0xff]  }
  0xe2   :  { %6567 = vmatprep.subr.bf16.mxu1 %v7194_v11  ;;  %v7243_v11 = vld [vmem:[%s9199_s1 + $0x818] sm:$0xff]  }
  0xe3   :  { %4887 = vmatmul.mubr.bf16.vlgmr.msra.gmra.mrb[24].mxu0 %v5685_v6  ;;  %v7238_v6 = vld [vmem:[%s9199_s1 + $0x8d0] sm:$0xff]  }
  0xe4   :  { %4927 = vmatmul.mubr.bf16.vlgmr.msra.gmra.mrb[24].mxu1 %v5687_v8  ;;  %6546 = vmatpush3.bf16.msra.mxu0 %v7195_v12  ;;  %v7240_v8 = vld [vmem:[%s9199_s1 + $0x890] sm:$0xff]   ;;  %v7244_v12 = vld [vmem:[%s9199_s1 + $0x898] sm:$0xff]  }
  0xe5   :  { %6568 = vmatpush3.bf16.msra.mxu1 %v7196_v13  ;;  %6547 = vmatprep.subr.bf16.mxu0 %v7197_v14  ;;  %v7245_v13 = vld [vmem:[%s9199_s1 + $0x860] sm:$0xff]  }
  0xe6   :  { %6569 = vmatprep.subr.bf16.mxu1 %v7198_v15  ;;  %4966 = vmatprep.mubr.bf16.mxu0 %v5690_v58  ;;  %v7246_v14 = vld [vmem:[%s9199_s1 + $0x8e0] sm:$0xff]   ;;  %v7276_v58 = vld [vmem:[%s9199_s1 + $0x990] sm:$0xff]  }
  0xe7   :  { %5006 = vmatprep.mubr.bf16.mxu1 %v5692_v60  ;;  %v7247_v15 = vld [vmem:[%s9199_s1 + $0x820] sm:$0xff]   ;;  %v7278_v60 = vld [vmem:[%s9199_s1 + $0x9d8] sm:$0xff]  }
  0xe8   :  { %6548 = vmatpush3.bf16.msra.mxu0 %v7199_v16 }
  0xe9   :  { %6570 = vmatpush3.bf16.msra.mxu1 %v7200_v17  ;;  %6549 = vmatprep.subr.bf16.mxu0 %v7201_v18  ;;  %v7248_v17 = vld [vmem:[%s9199_s1 + $0x8a0] sm:$0xff]  }
  0xea   :  { %6571 = vmatprep.subr.bf16.mxu1 %v7202_v19 }
  0xec   :  { %6550 = vmatpush3.bf16.msra.mxu0 %v7203_v20 }
  0xed   :  { %6572 = vmatpush3.bf16.msra.mxu1 %v7204_v21  ;;  %6551 = vmatprep.subr.bf16.mxu0 %v7205_v22 }
  0xee   :  { %6573 = vmatprep.subr.bf16.mxu1 %v7206_v23  ;;  %v7249_v23 = vld [vmem:[%s9199_s1 + $0x868] sm:$0xff]  }
  0xf0   :  { %6552 = vmatpush3.bf16.msra.mxu0 %v7207_v24 }
  0xf1   :  { %6574 = vmatpush3.bf16.msra.mxu1 %v7208_v25  ;;  %6553 = vmatprep.subr.bf16.mxu0 %v7209_v26  ;;  %v7250_v25 = vld [vmem:[%s9199_s1 + $0x8e8] sm:$0xff]  }
  0xf2   :  { %6575 = vmatprep.subr.bf16.mxu1 %v7210_v27 }
  0xf4   :  { %6554 = vmatpush3.bf16.msra.mxu0 %v7211_v28  ;;  %v7251_v28 = vld [vmem:[%s9199_s1 + $0x828] sm:$0xff]  }
  0xf5   :  { %6576 = vmatpush3.bf16.msra.mxu1 %v7212_v30  ;;  %6555 = vmatprep.subr.bf16.mxu0 %v7213_v37  ;;  %v7252_v30 = vld [vmem:[%s9199_s1 + $0x8a8] sm:$0xff]   ;;  %v7257_v37 = vld [vmem:[%s9199_s1 + $0x878] sm:$0xff]  }
  0xf6   :  { %v6253_v29 = vpop.f32.mrb[0].mxu0  ;;  %6577 = vmatprep.subr.bf16.mxu1 %v7214_v39  ;;  %v7259_v39 = vld [vmem:[%s9199_s1 + $0x838] sm:$0xff]  }
  0xf7   :  { %v6275_v31 = vpop.f32.mrb[0].mxu1  ;;  %v6254_v33 = vpop.f32.mrb[1].mxu0 }
  0xf8   :  { %v6276_v34 = vpop.f32.mrb[1].mxu1  ;;  %v6255_v35 = vadd.f32 %v6254_v33, %v6253_v29  ;;  %v6256_v38 = vpop.f32.mrb[2].mxu0  ;;  %6556 = vmatpush3.bf16.msra.mxu0 %v7215_v42  ;;  %v7253_v33 = vld [vmem:[%s9199_s1 + $0x870] sm:$0xff]   ;;  %v32_v42 = vld [vmem:[%s9200_s0 + $0x88] sm:$0xff] }
  0xf9   :  { %v6277_v36 = vadd.f32 %v6276_v34, %v6275_v31  ;;  %v6278_v40 = vpop.f32.mrb[2].mxu1  ;;  %v6257_v43 = vpop.f32.mrb[3].mxu0  ;;  %6578 = vmatpush3.bf16.msra.mxu1 %v7216_v44  ;;  %6557 = vmatprep.subr.bf16.mxu0 %v7217_v47  ;;  %v7254_v34 = vld [vmem:[%s9199_s1 + $0x8f0] sm:$0xff]   ;;  %v7258_v38 = vld [vmem:[%s9199_s1 + $0x8f8] sm:$0xff]   ;;  %v7265_v47 = vld [vmem:[%s9199_s1 + $0x940] sm:$0xff]  }
  0xfa   :  { %v4409_v41 = vadd.f32 %v6255_v35, %v5660_v32  ;;  %v6279_v45 = vpop.f32.mrb[3].mxu1  ;;  %6579 = vmatprep.subr.bf16.mxu1 %v7218_v48  ;;  %v7255_v35 = vld [vmem:[%s9199_s1 + $0x830] sm:$0xff]   ;;  %v7260_v40 = vld [vmem:[%s9199_s1 + $0x8b8] sm:$0xff]   ;;  %v7266_v48 = vld [vmem:[%s9199_s1 + $0x9c0] sm:$0xff]  }
  0xfb   :  { %v5695_v45 = vcombine.low %v32_v42, %v32_v42 }
  0xfc   :  { %v8326_v46 = vadd.f32 %v6277_v36, %v4409_v41  ;;  %6558 = vmatpush3.bf16.msra.mxu0 %v7219_v49  ;;  %v7256_v36 = vld [vmem:[%s9199_s1 + $0x8b0] sm:$0xff]   ;;  %v31_v41 = vld [vmem:[%s9200_s0 + $0x80] sm:$0xff] }
  0xfd   :  { %6580 = vmatpush3.bf16.msra.mxu1 %v7220_v50  ;;  %6559 = vmatprep.subr.bf16.mxu0 %v7221_v51  ;;  %v5693_v43 = vcombine.low %v31_v41, %v31_v41  ;;  %v5694_v44 = vcombine.high %v31_v41, %v31_v41  ;;  %v7267_v49 = vld [vmem:[%s9199_s1 + $0x900] sm:$0xff]   ;;  %v7269_v51 = vld [vmem:[%s9199_s1 + $0x948] sm:$0xff]   ;;  %v7309_v41 = vld [vmem:[%s9199_s1 + $0xa50] sm:$0xff]  }
  0xfe   :  { %6581 = vmatprep.subr.bf16.mxu1 %v7222_v52  ;;  %v7268_v50 = vld [vmem:[%s9199_s1 + $0x980] sm:$0xff]   ;;  %v7270_v52 = vld [vmem:[%s9199_s1 + $0x9c8] sm:$0xff]  }
 0x100   :  { %6560 = vmatpush3.bf16.msra.mxu0 %v7223_v53  ;;  %v7271_v53 = vld [vmem:[%s9199_s1 + $0x908] sm:$0xff]  }
 0x101   :  { %6582 = vmatpush3.bf16.msra.mxu1 %v7224_v54  ;;  %6589 = vmatprep.subr.bf16.mxu0 %v7229_v61  ;;  %v7272_v54 = vld [vmem:[%s9199_s1 + $0x988] sm:$0xff]   ;;  %v7279_v61 = vld [vmem:[%s9199_s1 + $0x918] sm:$0xff]  }
 0x102   :  { %6611 = vmatprep.subr.bf16.mxu1 %v7230_v62  ;;  %v7280_v62 = vld [vmem:[%s9199_s1 + $0x998] sm:$0xff]  }
 0x103   :  { %4967 = vmatmul.mubr.bf16.vlgmr.msra.gmra.mrb[28].mxu0 %v5689_v57  ;;  %v7275_v57 = vld [vmem:[%s9199_s1 + $0x910] sm:$0xff]  }
 0x104   :  { %5007 = vmatmul.mubr.bf16.vlgmr.msra.gmra.mrb[28].mxu1 %v5691_v59  ;;  %6590 = vmatpush3.bf16.msra.mxu0 %v7231_v63  ;;  %v7277_v59 = vld [vmem:[%s9199_s1 + $0x958] sm:$0xff]   ;;  %v7281_v63 = vld [vmem:[%s9199_s1 + $0x960] sm:$0xff]  }
 0x105   :  { %6612 = vmatpush3.bf16.msra.mxu1 %v7232_v0  ;;  %6591 = vmatprep.subr.bf16.mxu0 %v7233_v1  ;;  %v7282_v0 = vld [vmem:[%s9199_s1 + $0x9e0] sm:$0xff]  }
 0x106   :  { %6613 = vmatprep.subr.bf16.mxu1 %v7234_v2  ;;  %5046 = vmatprep.mubr.bf16.mxu0 %v5694_v44  ;;  %v7283_v2 = vld [vmem:[%s9199_s1 + $0x920] sm:$0xff]   ;;  %v7312_v44 = vld [vmem:[%s9199_s1 + $0xa90] sm:$0xff]  }
 0x108   :  { %6592 = vmatpush3.bf16.msra.mxu0 %v7235_v3 }
 0x109   :  { %6614 = vmatpush3.bf16.msra.mxu1 %v7236_v4  ;;  %6593 = vmatprep.subr.bf16.mxu0 %v7237_v5  ;;  %v7284_v4 = vld [vmem:[%s9199_s1 + $0x9a0] sm:$0xff]  }
 0x10a   :  { %6615 = vmatprep.subr.bf16.mxu1 %v7238_v6 }
 0x10c   :  { %6594 = vmatpush3.bf16.msra.mxu0 %v7239_v7 }
 0x10d   :  { %6616 = vmatpush3.bf16.msra.mxu1 %v7240_v8  ;;  %6595 = vmatprep.subr.bf16.mxu0 %v7241_v9  ;;  %v7285_v8 = vld [vmem:[%s9199_s1 + $0x968] sm:$0xff]  }
 0x10e   :  { %6617 = vmatprep.subr.bf16.mxu1 %v7242_v10  ;;  %v7286_v10 = vld [vmem:[%s9199_s1 + $0x9e8] sm:$0xff]  }
 0x110   :  { %6596 = vmatpush3.bf16.msra.mxu0 %v7243_v11 }
 0x111   :  { %6618 = vmatpush3.bf16.msra.mxu1 %v7244_v12  ;;  %6597 = vmatprep.subr.bf16.mxu0 %v7245_v13 }
 0x112   :  { %6619 = vmatprep.subr.bf16.mxu1 %v7246_v14  ;;  %v7287_v14 = vld [vmem:[%s9199_s1 + $0x928] sm:$0xff]  }
 0x114   :  { %6598 = vmatpush3.bf16.msra.mxu0 %v7247_v15  ;;  %v7288_v15 = vld [vmem:[%s9199_s1 + $0x9a8] sm:$0xff]  }
 0x115   :  { %6620 = vmatpush3.bf16.msra.mxu1 %v7248_v17  ;;  %6599 = vmatprep.subr.bf16.mxu0 %v7249_v23  ;;  %v7293_v23 = vld [vmem:[%s9199_s1 + $0x978] sm:$0xff]  }
 0x116   :  { %v6297_v16 = vpop.f32.mrb[4].mxu0  ;;  %6621 = vmatprep.subr.bf16.mxu1 %v7250_v25  ;;  %v7295_v25 = vld [vmem:[%s9199_s1 + $0x938] sm:$0xff]  }
 0x117   :  { %v6319_v18 = vpop.f32.mrb[4].mxu1  ;;  %v6298_v19 = vpop.f32.mrb[5].mxu0 }
 0x118   :  { %v6320_v20 = vpop.f32.mrb[5].mxu1  ;;  %v6299_v21 = vadd.f32 %v6298_v19, %v6297_v16  ;;  %v6300_v24 = vpop.f32.mrb[6].mxu0  ;;  %6600 = vmatpush3.bf16.msra.mxu0 %v7251_v28  ;;  %v7289_v19 = vld [vmem:[%s9199_s1 + $0x970] sm:$0xff]   ;;  %v34_v28 = vld [vmem:[%s9200_s0 + $0x98] sm:$0xff] }
 0x119   :  { %v6321_v22 = vadd.f32 %v6320_v20, %v6319_v18  ;;  %v6322_v26 = vpop.f32.mrb[6].mxu1  ;;  %v6301_v29 = vpop.f32.mrb[7].mxu0  ;;  %6622 = vmatpush3.bf16.msra.mxu1 %v7252_v30  ;;  %6601 = vmatprep.subr.bf16.mxu0 %v7253_v33  ;;  %v7290_v20 = vld [vmem:[%s9199_s1 + $0x9f0] sm:$0xff]   ;;  %v7294_v24 = vld [vmem:[%s9199_s1 + $0x9f8] sm:$0xff]   ;;  %v5700_v33 = vcombine.high %v34_v28, %v34_v28 }
 0x11a   :  { %v4489_v27 = vadd.f32 %v6299_v21, %v8326_v46  ;;  %v6323_v31 = vpop.f32.mrb[7].mxu1  ;;  %6623 = vmatprep.subr.bf16.mxu1 %v7254_v34  ;;  %v5696_v46 = vcombine.high %v32_v42, %v32_v42  ;;  %v7291_v21 = vld [vmem:[%s9199_s1 + $0x930] sm:$0xff]   ;;  %v7296_v26 = vld [vmem:[%s9199_s1 + $0x9b8] sm:$0xff]   ;;  %v7302_v34 = vld [vmem:[%s9199_s1 + $0xac0] sm:$0xff]  }
 0x11b   :  { %v5699_v31 = vcombine.low %v34_v28, %v34_v28  ;;  %v7310_v42 = vld [vmem:[%s9199_s1 + $0xad0] sm:$0xff]  }
 0x11c   :  { %v8431_v32 = vadd.f32 %v6321_v22, %v4489_v27  ;;  %6602 = vmatpush3.bf16.msra.mxu0 %v7255_v35  ;;  %5086 = vmatprep.mubr.bf16.mxu1 %v5696_v46  ;;  %v7292_v22 = vld [vmem:[%s9199_s1 + $0x9b0] sm:$0xff]   ;;  %v7303_v35 = vld [vmem:[%s9199_s1 + $0xa00] sm:$0xff]   ;;  %v7314_v46 = vld [vmem:[%s9199_s1 + $0xad8] sm:$0xff]  }
 0x11d   :  { %6624 = vmatpush3.bf16.msra.mxu1 %v7256_v36  ;;  %6603 = vmatprep.subr.bf16.mxu0 %v7257_v37  ;;  %v33_v27 = vld [vmem:[%s9200_s0 + $0x90] sm:$0xff]  ;;  %v7304_v36 = vld [vmem:[%s9199_s1 + $0xa80] sm:$0xff]   ;;  %v7305_v37 = vld [vmem:[%s9199_s1 + $0xa48] sm:$0xff]  }
 0x11e   :  { %6625 = vmatprep.subr.bf16.mxu1 %v7258_v38  ;;  %v5697_v29 = vcombine.low %v33_v27, %v33_v27  ;;  %v5698_v30 = vcombine.high %v33_v27, %v33_v27  ;;  %v7306_v38 = vld [vmem:[%s9199_s1 + $0xac8] sm:$0xff]   ;;  %v7345_v27 = vld [vmem:[%s9199_s1 + $0xb50] sm:$0xff]  }
 0x11f   :  { %v7346_v28 = vld [vmem:[%s9199_s1 + $0xbd0] sm:$0xff]  }
 0x120   :  { %6604 = vmatpush3.bf16.msra.mxu0 %v7259_v39  ;;  %v7307_v39 = vld [vmem:[%s9199_s1 + $0xa08] sm:$0xff]  }
 0x121   :  { %6626 = vmatpush3.bf16.msra.mxu1 %v7260_v40  ;;  %6633 = vmatprep.subr.bf16.mxu0 %v7265_v47  ;;  %v7308_v40 = vld [vmem:[%s9199_s1 + $0xa88] sm:$0xff]   ;;  %v7315_v47 = vld [vmem:[%s9199_s1 + $0xa18] sm:$0xff]  }
 0x122   :  { %6655 = vmatprep.subr.bf16.mxu1 %v7266_v48  ;;  %v7316_v48 = vld [vmem:[%s9199_s1 + $0xa98] sm:$0xff]  }
 0x123   :  { %5047 = vmatmul.mubr.bf16.vlgmr.msra.gmra.mrb[32].mxu0 %v5693_v43  ;;  %v7311_v43 = vld [vmem:[%s9199_s1 + $0xa10] sm:$0xff]  }
 0x124   :  { %5087 = vmatmul.mubr.bf16.vlgmr.msra.gmra.mrb[32].mxu1 %v5695_v45  ;;  %6634 = vmatpush3.bf16.msra.mxu0 %v7267_v49  ;;  %v7313_v45 = vld [vmem:[%s9199_s1 + $0xa58] sm:$0xff]   ;;  %v7317_v49 = vld [vmem:[%s9199_s1 + $0xa60] sm:$0xff]  }
 0x125   :  { %6656 = vmatpush3.bf16.msra.mxu1 %v7268_v50  ;;  %6635 = vmatprep.subr.bf16.mxu0 %v7269_v51  ;;  %v7318_v50 = vld [vmem:[%s9199_s1 + $0xae0] sm:$0xff]  }
 0x126   :  { %6657 = vmatprep.subr.bf16.mxu1 %v7270_v52  ;;  %5126 = vmatprep.mubr.bf16.mxu0 %v5698_v30  ;;  %v7319_v52 = vld [vmem:[%s9199_s1 + $0xa20] sm:$0xff]   ;;  %v7348_v30 = vld [vmem:[%s9199_s1 + $0xb90] sm:$0xff]  }
 0x127   :  { %5166 = vmatprep.mubr.bf16.mxu1 %v5700_v33  ;;  %v7351_v33 = vld [vmem:[%s9199_s1 + $0xb18] sm:$0xff]  }
 0x128   :  { %6636 = vmatpush3.bf16.msra.mxu0 %v7271_v53 }
 0x129   :  { %6658 = vmatpush3.bf16.msra.mxu1 %v7272_v54  ;;  %6637 = vmatprep.subr.bf16.mxu0 %v7273_v55  ;;  %v7320_v54 = vld [vmem:[%s9199_s1 + $0xaa0] sm:$0xff]  }
 0x12a   :  { %6659 = vmatprep.subr.bf16.mxu1 %v7274_v56 }
 0x12c   :  { %6638 = vmatpush3.bf16.msra.mxu0 %v7275_v57  ;;  %v7321_v57 = vld [vmem:[%s9199_s1 + $0xa68] sm:$0xff]  }
 0x12d   :  { %6660 = vmatpush3.bf16.msra.mxu1 %v7276_v58  ;;  %6639 = vmatprep.subr.bf16.mxu0 %v7277_v59 }
 0x12e   :  { %6661 = vmatprep.subr.bf16.mxu1 %v7278_v60  ;;  %v7322_v60 = vld [vmem:[%s9199_s1 + $0xae8] sm:$0xff]  }
 0x130   :  { %6640 = vmatpush3.bf16.msra.mxu0 %v7279_v61 }
 0x131   :  { %6662 = vmatpush3.bf16.msra.mxu1 %v7280_v62  ;;  %6641 = vmatprep.subr.bf16.mxu0 %v7281_v63  ;;  %v7323_v63 = vld [vmem:[%s9199_s1 + $0xa28] sm:$0xff]  }
 0x132   :  { %6663 = vmatprep.subr.bf16.mxu1 %v7282_v0 }
 0x134   :  { %6642 = vmatpush3.bf16.msra.mxu0 %v7283_v2 }
 0x135   :  { %6664 = vmatpush3.bf16.msra.mxu1 %v7284_v4  ;;  %6643 = vmatprep.subr.bf16.mxu0 %v7285_v8  ;;  %v7325_v4 = vld [vmem:[%s9199_s1 + $0xa70] sm:$0xff]  }
 0x136   :  { %v6341_v1 = vpop.f32.mrb[8].mxu0  ;;  %6665 = vmatprep.subr.bf16.mxu1 %v7286_v10  ;;  %v7328_v8 = vld [vmem:[%s9199_s1 + $0xab0] sm:$0xff]   ;;  %v7330_v10 = vld [vmem:[%s9199_s1 + $0xaf8] sm:$0xff]  }
 0x137   :  { %v6363_v3 = vpop.f32.mrb[8].mxu1  ;;  %v6342_v5 = vpop.f32.mrb[9].mxu0 }
 0x138   :  { %v6343_v6 = vadd.f32 %v6342_v5, %v6341_v1  ;;  %v6364_v7 = vpop.f32.mrb[9].mxu1  ;;  %v6344_v11 = vpop.f32.mrb[10].mxu0  ;;  %6644 = vmatpush3.bf16.msra.mxu0 %v7287_v14  ;;  %v7324_v1 = vld [vmem:[%s9199_s1 + $0xaa8] sm:$0xff]  }
 0x139   :  { %v6365_v9 = vadd.f32 %v6364_v7, %v6363_v3  ;;  %v6366_v13 = vpop.f32.mrb[10].mxu1  ;;  %v6345_v16 = vpop.f32.mrb[11].mxu0  ;;  %6666 = vmatpush3.bf16.msra.mxu1 %v7288_v15  ;;  %6645 = vmatprep.subr.bf16.mxu0 %v7289_v19  ;;  %v7327_v7 = vld [vmem:[%s9199_s1 + $0xa30] sm:$0xff]   ;;  %v7331_v11 = vld [vmem:[%s9199_s1 + $0xa38] sm:$0xff]   ;;  %v7337_v19 = vld [vmem:[%s9199_s1 + $0xb40] sm:$0xff]  }
 0x13a   :  { %v4569_v12 = vadd.f32 %v6343_v6, %v8431_v32  ;;  %v6367_v18 = vpop.f32.mrb[11].mxu1  ;;  %6667 = vmatprep.subr.bf16.mxu1 %v7290_v20  ;;  %v7301_v32 = vld [vmem:[%s9199_s1 + $0xa40] sm:$0xff]   ;;  %v7326_v6 = vld [vmem:[%s9199_s1 + $0xaf0] sm:$0xff]   ;;  %v36_v16 = vld [vmem:[%s9200_s0 + $0xa8] sm:$0xff] }
 0x13b   :  { %v35_v13 = vld [vmem:[%s9200_s0 + $0xa0] sm:$0xff]  ;;  %v5704_v18 = vcombine.high %v36_v16, %v36_v16 }
 0x13c   :  { %v8536_v17 = vadd.f32 %v6365_v9, %v4569_v12  ;;  %6646 = vmatpush3.bf16.msra.mxu0 %v7291_v21  ;;  %v7329_v9 = vld [vmem:[%s9199_s1 + $0xa78] sm:$0xff]   ;;  %v5701_v14 = vcombine.low %v35_v13, %v35_v13  ;;  %v5702_v15 = vcombine.high %v35_v13, %v35_v13  ;;  %v7338_v20 = vld [vmem:[%s9199_s1 + $0xbc0] sm:$0xff]   ;;  %v7381_v13 = vld [vmem:[%s9199_s1 + $0xc50] sm:$0xff]  }
 0x13d   :  { %6668 = vmatpush3.bf16.msra.mxu1 %v7292_v22  ;;  %6647 = vmatprep.subr.bf16.mxu0 %v7293_v23  ;;  %v7332_v12 = vld [vmem:[%s9199_s1 + $0xab8] sm:$0xff]   ;;  %v7339_v21 = vld [vmem:[%s9199_s1 + $0xb00] sm:$0xff]   ;;  %v7341_v23 = vld [vmem:[%s9199_s1 + $0xb48] sm:$0xff]  }
 0x13e   :  { %6669 = vmatprep.subr.bf16.mxu1 %v7294_v24  ;;  %v7340_v22 = vld [vmem:[%s9199_s1 + $0xb80] sm:$0xff]   ;;  %v7342_v24 = vld [vmem:[%s9199_s1 + $0xbc8] sm:$0xff]  }
 0x140   :  { %6648 = vmatpush3.bf16.msra.mxu0 %v7295_v25  ;;  %v7343_v25 = vld [vmem:[%s9199_s1 + $0xb08] sm:$0xff]  }
 0x141   :  { %6670 = vmatpush3.bf16.msra.mxu1 %v7296_v26  ;;  %6677 = vmatprep.subr.bf16.mxu0 %v7301_v32  ;;  %v7344_v26 = vld [vmem:[%s9199_s1 + $0xb88] sm:$0xff]   ;;  %v7350_v32 = vld [vmem:[%s9199_s1 + $0xbd8] sm:$0xff]  }
 0x142   :  { %6699 = vmatprep.subr.bf16.mxu1 %v7302_v34  ;;  %v7352_v34 = vld [vmem:[%s9199_s1 + $0xb98] sm:$0xff]  }
 0x143   :  { %5127 = vmatmul.mubr.bf16.vlgmr.msra.gmra.mrb[36].mxu0 %v5697_v29  ;;  %v7347_v29 = vld [vmem:[%s9199_s1 + $0xb10] sm:$0xff]  }
 0x144   :  { %5167 = vmatmul.mubr.bf16.vlgmr.msra.gmra.mrb[36].mxu1 %v5699_v31  ;;  %6678 = vmatpush3.bf16.msra.mxu0 %v7303_v35  ;;  %v7349_v31 = vld [vmem:[%s9199_s1 + $0xb58] sm:$0xff]   ;;  %v7353_v35 = vld [vmem:[%s9199_s1 + $0xb60] sm:$0xff]  }
 0x145   :  { %6700 = vmatpush3.bf16.msra.mxu1 %v7304_v36  ;;  %6679 = vmatprep.subr.bf16.mxu0 %v7305_v37  ;;  %v7354_v36 = vld [vmem:[%s9199_s1 + $0xbe0] sm:$0xff]  }
 0x146   :  { %6701 = vmatprep.subr.bf16.mxu1 %v7306_v38  ;;  %5206 = vmatprep.mubr.bf16.mxu0 %v5702_v15  ;;  %v7355_v38 = vld [vmem:[%s9199_s1 + $0xb20] sm:$0xff]   ;;  %v7383_v15 = vld [vmem:[%s9199_s1 + $0xc10] sm:$0xff]  }
 0x147   :  { %5246 = vmatprep.mubr.bf16.mxu1 %v5704_v18  ;;  %v7386_v18 = vld [vmem:[%s9199_s1 + $0xcd8] sm:$0xff]  }
 0x148   :  { %6680 = vmatpush3.bf16.msra.mxu0 %v7307_v39 }
 0x149   :  { %6702 = vmatpush3.bf16.msra.mxu1 %v7308_v40  ;;  %6681 = vmatprep.subr.bf16.mxu0 %v7309_v41  ;;  %v7356_v40 = vld [vmem:[%s9199_s1 + $0xba0] sm:$0xff]  }
 0x14a   :  { %6703 = vmatprep.subr.bf16.mxu1 %v7310_v42 }
 0x14c   :  { %6682 = vmatpush3.bf16.msra.mxu0 %v7311_v43  ;;  %v7357_v43 = vld [vmem:[%s9199_s1 + $0xb68] sm:$0xff]  }
 0x14d   :  { %6704 = vmatpush3.bf16.msra.mxu1 %v7312_v44  ;;  %6683 = vmatprep.subr.bf16.mxu0 %v7313_v45 }
 0x14e   :  { %6705 = vmatprep.subr.bf16.mxu1 %v7314_v46  ;;  %v7358_v46 = vld [vmem:[%s9199_s1 + $0xbe8] sm:$0xff]  }
 0x150   :  { %6684 = vmatpush3.bf16.msra.mxu0 %v7315_v47 }
 0x151   :  { %6706 = vmatpush3.bf16.msra.mxu1 %v7316_v48  ;;  %6685 = vmatprep.subr.bf16.mxu0 %v7317_v49  ;;  %v7359_v49 = vld [vmem:[%s9199_s1 + $0xb28] sm:$0xff]  }
 0x152   :  { %6707 = vmatprep.subr.bf16.mxu1 %v7318_v50 }
 0x154   :  { %6686 = vmatpush3.bf16.msra.mxu0 %v7319_v52 }
 0x155   :  { %6708 = vmatpush3.bf16.msra.mxu1 %v7320_v54  ;;  %6687 = vmatprep.subr.bf16.mxu0 %v7321_v57  ;;  %v7361_v54 = vld [vmem:[%s9199_s1 + $0xb70] sm:$0xff]  }
 0x156   :  { %v6385_v51 = vpop.f32.mrb[12].mxu0  ;;  %6709 = vmatprep.subr.bf16.mxu1 %v7322_v60  ;;  %v7363_v57 = vld [vmem:[%s9199_s1 + $0xb30] sm:$0xff]   ;;  %v7366_v60 = vld [vmem:[%s9199_s1 + $0xbf8] sm:$0xff]  }
 0x157   :  { %v6407_v53 = vpop.f32.mrb[12].mxu1  ;;  %v6386_v55 = vpop.f32.mrb[13].mxu0 }
 0x158   :  { %v6408_v56 = vpop.f32.mrb[13].mxu1  ;;  %v6387_v58 = vadd.f32 %v6386_v55, %v6385_v51  ;;  %v6388_v61 = vpop.f32.mrb[14].mxu0  ;;  %6688 = vmatpush3.bf16.msra.mxu0 %v7323_v63  ;;  %v7360_v51 = vld [vmem:[%s9199_s1 + $0xba8] sm:$0xff]   ;;  %v37_v63 = vld [vmem:[%s9200_s0 + $0xb0] sm:$0xff] }
 0x159   :  { %v6409_v59 = vadd.f32 %v6408_v56, %v6407_v53  ;;  %v6410_v62 = vpop.f32.mrb[14].mxu1  ;;  %v6389_v2 = vpop.f32.mrb[15].mxu0  ;;  %6710 = vmatpush3.bf16.msra.mxu1 %v7324_v1  ;;  %6689 = vmatprep.subr.bf16.mxu0 %v7325_v4  ;;  %v7362_v56 = vld [vmem:[%s9199_s1 + $0xbf0] sm:$0xff]   ;;  %v7367_v61 = vld [vmem:[%s9199_s1 + $0xb38] sm:$0xff]   ;;  %v5705_v1 = vcombine.low %v37_v63, %v37_v63 }
 0x15a   :  { %v4649_v0 = vadd.f32 %v6387_v58, %v8536_v17  ;;  %v6411_v3 = vpop.f32.mrb[15].mxu1  ;;  %6711 = vmatprep.subr.bf16.mxu1 %v7326_v6  ;;  %v5703_v17 = vcombine.low %v36_v16, %v36_v16  ;;  %v7364_v58 = vld [vmem:[%s9199_s1 + $0xbb0] sm:$0xff]   ;;  %v7368_v62 = vld [vmem:[%s9199_s1 + $0xbb8] sm:$0xff]   ;;  %v5706_v2 = vcombine.high %v37_v63, %v37_v63  ;;  %v7374_v6 = vld [vmem:[%s9199_s1 + $0xcc0] sm:$0xff]  }
 0x15b   :  { %v7384_v16 = vld [vmem:[%s9199_s1 + $0xc90] sm:$0xff]  }
 0x15c   :  { %v8644_v5 = vadd.f32 %v6409_v59, %v4649_v0  ;;  %6690 = vmatpush3.bf16.msra.mxu0 %v7327_v7  ;;  %v7365_v59 = vld [vmem:[%s9199_s1 + $0xb78] sm:$0xff]   ;;  %v7375_v7 = vld [vmem:[%s9199_s1 + $0xc00] sm:$0xff]   ;;  %v7417_v63 = vld [vmem:[%s9199_s1 + $0xd50] sm:$0xff]  }
 0x15d   :  { %6712 = vmatpush3.bf16.msra.mxu1 %v7328_v8  ;;  %6691 = vmatprep.subr.bf16.mxu0 %v7329_v9  ;;  %v38_v0 = vld [vmem:[%s9200_s0 + $0xb8] sm:$0xff]  ;;  %v7376_v8 = vld [vmem:[%s9199_s1 + $0xc80] sm:$0xff]   ;;  %v7377_v9 = vld [vmem:[%s9199_s1 + $0xc48] sm:$0xff]  }
 0x15e   :  { %6713 = vmatprep.subr.bf16.mxu1 %v7330_v10  ;;  %v5707_v3 = vcombine.low %v38_v0, %v38_v0  ;;  %v5708_v4 = vcombine.high %v38_v0, %v38_v0  ;;  %v7378_v10 = vld [vmem:[%s9199_s1 + $0xcc8] sm:$0xff]   ;;  %v7418_v0 = vld [vmem:[%s9199_s1 + $0xdd0] sm:$0xff]  }
 0x160   :  { %6692 = vmatpush3.bf16.msra.mxu0 %v7331_v11  ;;  %v7379_v11 = vld [vmem:[%s9199_s1 + $0xc08] sm:$0xff]  }
 0x161   :  { %6714 = vmatpush3.bf16.msra.mxu1 %v7332_v12  ;;  %6721 = vmatprep.subr.bf16.mxu0 %v7337_v19  ;;  %v7380_v12 = vld [vmem:[%s9199_s1 + $0xc88] sm:$0xff]   ;;  %v7387_v19 = vld [vmem:[%s9199_s1 + $0xc18] sm:$0xff]  }
 0x162   :  { %6743 = vmatprep.subr.bf16.mxu1 %v7338_v20  ;;  %v7388_v20 = vld [vmem:[%s9199_s1 + $0xc98] sm:$0xff]  }
 0x163   :  { %5207 = vmatmul.mubr.bf16.vlgmr.msra.gmra.mrb[40].mxu0 %v5701_v14  ;;  %v7382_v14 = vld [vmem:[%s9199_s1 + $0xcd0] sm:$0xff]  }
 0x164   :  { %5247 = vmatmul.mubr.bf16.vlgmr.msra.gmra.mrb[40].mxu1 %v5703_v17  ;;  %6722 = vmatpush3.bf16.msra.mxu0 %v7339_v21  ;;  %v7385_v17 = vld [vmem:[%s9199_s1 + $0xc58] sm:$0xff]   ;;  %v7389_v21 = vld [vmem:[%s9199_s1 + $0xc60] sm:$0xff]  }
 0x165   :  { %6744 = vmatpush3.bf16.msra.mxu1 %v7340_v22  ;;  %6723 = vmatprep.subr.bf16.mxu0 %v7341_v23  ;;  %v7390_v22 = vld [vmem:[%s9199_s1 + $0xce0] sm:$0xff]  }
 0x166   :  { %6745 = vmatprep.subr.bf16.mxu1 %v7342_v24  ;;  %5286 = vmatprep.mubr.bf16.mxu0 %v5706_v2  ;;  %v7391_v24 = vld [vmem:[%s9199_s1 + $0xc20] sm:$0xff]   ;;  %v7420_v2 = vld [vmem:[%s9199_s1 + $0xd90] sm:$0xff]  }
 0x167   :  { %5326 = vmatprep.mubr.bf16.mxu1 %v5708_v4  ;;  %v7422_v4 = vld [vmem:[%s9199_s1 + $0xdd8] sm:$0xff]  }
 0x168   :  { %6724 = vmatpush3.bf16.msra.mxu0 %v7343_v25 }
 0x169   :  { %6746 = vmatpush3.bf16.msra.mxu1 %v7344_v26  ;;  %6725 = vmatprep.subr.bf16.mxu0 %v7345_v27  ;;  %v7392_v26 = vld [vmem:[%s9199_s1 + $0xca0] sm:$0xff]  }
 0x16a   :  { %6747 = vmatprep.subr.bf16.mxu1 %v7346_v28 }
 0x16c   :  { %6726 = vmatpush3.bf16.msra.mxu0 %v7347_v29 }
 0x16d   :  { %6748 = vmatpush3.bf16.msra.mxu1 %v7348_v30  ;;  %6727 = vmatprep.subr.bf16.mxu0 %v7349_v31  ;;  %v7393_v30 = vld [vmem:[%s9199_s1 + $0xc68] sm:$0xff]  }
 0x16e   :  { %6749 = vmatprep.subr.bf16.mxu1 %v7350_v32  ;;  %v7394_v32 = vld [vmem:[%s9199_s1 + $0xce8] sm:$0xff]  }
 0x170   :  { %6728 = vmatpush3.bf16.msra.mxu0 %v7351_v33 }
 0x171   :  { %6750 = vmatpush3.bf16.msra.mxu1 %v7352_v34  ;;  %6729 = vmatprep.subr.bf16.mxu0 %v7353_v35 }
 0x172   :  { %6751 = vmatprep.subr.bf16.mxu1 %v7354_v36  ;;  %v7395_v36 = vld [vmem:[%s9199_s1 + $0xc28] sm:$0xff]  }
 0x174   :  { %6730 = vmatpush3.bf16.msra.mxu0 %v7355_v38 }
 0x175   :  { %6752 = vmatpush3.bf16.msra.mxu1 %v7356_v40  ;;  %6731 = vmatprep.subr.bf16.mxu0 %v7357_v43  ;;  %v7399_v43 = vld [vmem:[%s9199_s1 + $0xc30] sm:$0xff]  }
 0x176   :  { %v6429_v37 = vpop.f32.mrb[16].mxu0  ;;  %6753 = vmatprep.subr.bf16.mxu1 %v7358_v46  ;;  %v7402_v46 = vld [vmem:[%s9199_s1 + $0xcf8] sm:$0xff]  }
 0x177   :  { %v6451_v39 = vpop.f32.mrb[16].mxu1  ;;  %v6430_v41 = vpop.f32.mrb[17].mxu0 }
 0x178   :  { %v6452_v42 = vpop.f32.mrb[17].mxu1  ;;  %v6431_v44 = vadd.f32 %v6430_v41, %v6429_v37  ;;  %v6432_v47 = vpop.f32.mrb[18].mxu0  ;;  %6732 = vmatpush3.bf16.msra.mxu0 %v7359_v49  ;;  %v7396_v37 = vld [vmem:[%s9199_s1 + $0xca8] sm:$0xff]   ;;  %v7397_v41 = vld [vmem:[%s9199_s1 + $0xc70] sm:$0xff]   ;;  %v39_v49 = vld [vmem:[%s9200_s0 + $0xc0] sm:$0xff] }
 0x179   :  { %v6453_v45 = vadd.f32 %v6452_v42, %v6451_v39  ;;  %v6454_v48 = vpop.f32.mrb[18].mxu1  ;;  %v6433_v52 = vpop.f32.mrb[19].mxu0  ;;  %6754 = vmatpush3.bf16.msra.mxu1 %v7360_v51  ;;  %6733 = vmatprep.subr.bf16.mxu0 %v7361_v54  ;;  %v7398_v42 = vld [vmem:[%s9199_s1 + $0xcf0] sm:$0xff]   ;;  %v7403_v47 = vld [vmem:[%s9199_s1 + $0xc38] sm:$0xff]   ;;  %v5709_v51 = vcombine.low %v39_v49, %v39_v49  ;;  %v7409_v54 = vld [vmem:[%s9199_s1 + $0xd40] sm:$0xff]  }
 0x17a   :  { %v4729_v50 = vadd.f32 %v6431_v44, %v8644_v5  ;;  %v6455_v53 = vpop.f32.mrb[19].mxu1  ;;  %6755 = vmatprep.subr.bf16.mxu1 %v7362_v56  ;;  %v7373_v5 = vld [vmem:[%s9199_s1 + $0xc40] sm:$0xff]   ;;  %v7400_v44 = vld [vmem:[%s9199_s1 + $0xcb0] sm:$0xff]   ;;  %v7404_v48 = vld [vmem:[%s9199_s1 + $0xcb8] sm:$0xff]   ;;  %v5710_v52 = vcombine.high %v39_v49, %v39_v49 }
 0x17b   :  { %v7410_v56 = vld [vmem:[%s9199_s1 + $0xdc0] sm:$0xff]   ;;  %v7453_v49 = vld [vmem:[%s9199_s1 + $0xe50] sm:$0xff]  }
 0x17c   :  { %v8749_v55 = vadd.f32 %v6453_v45, %v4729_v50  ;;  %6734 = vmatpush3.bf16.msra.mxu0 %v7363_v57  ;;  %v7401_v45 = vld [vmem:[%s9199_s1 + $0xc78] sm:$0xff]   ;;  %v40_v50 = vld [vmem:[%s9200_s0 + $0xc8] sm:$0xff]  ;;  %v7411_v57 = vld [vmem:[%s9199_s1 + $0xd00] sm:$0xff]  }
 0x17d   :  { %6756 = vmatpush3.bf16.msra.mxu1 %v7364_v58  ;;  %6735 = vmatprep.subr.bf16.mxu0 %v7365_v59  ;;  %v5711_v53 = vcombine.low %v40_v50, %v40_v50  ;;  %v7412_v58 = vld [vmem:[%s9199_s1 + $0xd80] sm:$0xff]   ;;  %v7413_v59 = vld [vmem:[%s9199_s1 + $0xd48] sm:$0xff]  }
 0x17e   :  { %6757 = vmatprep.subr.bf16.mxu1 %v7366_v60  ;;  %v7414_v60 = vld [vmem:[%s9199_s1 + $0xdc8] sm:$0xff]  }
 0x180   :  { %6736 = vmatpush3.bf16.msra.mxu0 %v7367_v61  ;;  %v7415_v61 = vld [vmem:[%s9199_s1 + $0xd08] sm:$0xff]  }
 0x181   :  { %6758 = vmatpush3.bf16.msra.mxu1 %v7368_v62  ;;  %6765 = vmatprep.subr.bf16.mxu0 %v7373_v5  ;;  %v7416_v62 = vld [vmem:[%s9199_s1 + $0xd88] sm:$0xff]   ;;  %v7423_v5 = vld [vmem:[%s9199_s1 + $0xd18] sm:$0xff]  }
 0x182   :  { %6787 = vmatprep.subr.bf16.mxu1 %v7374_v6  ;;  %v7424_v6 = vld [vmem:[%s9199_s1 + $0xd98] sm:$0xff]  }
 0x183   :  { %5287 = vmatmul.mubr.bf16.vlgmr.msra.gmra.mrb[44].mxu0 %v5705_v1  ;;  %v7419_v1 = vld [vmem:[%s9199_s1 + $0xd10] sm:$0xff]  }
 0x184   :  { %5327 = vmatmul.mubr.bf16.vlgmr.msra.gmra.mrb[44].mxu1 %v5707_v3  ;;  %6766 = vmatpush3.bf16.msra.mxu0 %v7375_v7  ;;  %v7421_v3 = vld [vmem:[%s9199_s1 + $0xd58] sm:$0xff]   ;;  %v7425_v7 = vld [vmem:[%s9199_s1 + $0xd60] sm:$0xff]  }
 0x185   :  { %6788 = vmatpush3.bf16.msra.mxu1 %v7376_v8  ;;  %6767 = vmatprep.subr.bf16.mxu0 %v7377_v9  ;;  %v7426_v8 = vld [vmem:[%s9199_s1 + $0xde0] sm:$0xff]  }
 0x186   :  { %6789 = vmatprep.subr.bf16.mxu1 %v7378_v10  ;;  %5366 = vmatprep.mubr.bf16.mxu0 %v5710_v52  ;;  %v7427_v10 = vld [vmem:[%s9199_s1 + $0xd20] sm:$0xff]   ;;  %v7456_v52 = vld [vmem:[%s9199_s1 + $0xe90] sm:$0xff]  }
 0x188   :  { %6768 = vmatpush3.bf16.msra.mxu0 %v7379_v11 }
 0x189   :  { %6790 = vmatpush3.bf16.msra.mxu1 %v7380_v12  ;;  %6769 = vmatprep.subr.bf16.mxu0 %v7381_v13  ;;  %v7428_v12 = vld [vmem:[%s9199_s1 + $0xda0] sm:$0xff]  }
 0x18a   :  { %6791 = vmatprep.subr.bf16.mxu1 %v7382_v14 }
 0x18c   :  { %6770 = vmatpush3.bf16.msra.mxu0 %v7383_v15  ;;  %v7429_v15 = vld [vmem:[%s9199_s1 + $0xd68] sm:$0xff]  }
 0x18d   :  { %6792 = vmatpush3.bf16.msra.mxu1 %v7384_v16  ;;  %6771 = vmatprep.subr.bf16.mxu0 %v7385_v17 }
 0x18e   :  { %6793 = vmatprep.subr.bf16.mxu1 %v7386_v18  ;;  %v7430_v18 = vld [vmem:[%s9199_s1 + $0xde8] sm:$0xff]  }
 0x190   :  { %6772 = vmatpush3.bf16.msra.mxu0 %v7387_v19 }
 0x191   :  { %6794 = vmatpush3.bf16.msra.mxu1 %v7388_v20  ;;  %6773 = vmatprep.subr.bf16.mxu0 %v7389_v21  ;;  %v7431_v21 = vld [vmem:[%s9199_s1 + $0xd28] sm:$0xff]  }
 0x192   :  { %6795 = vmatprep.subr.bf16.mxu1 %v7390_v22 }
 0x194   :  { %6774 = vmatpush3.bf16.msra.mxu0 %v7391_v24 }
 0x195   :  { %6796 = vmatpush3.bf16.msra.mxu1 %v7392_v26  ;;  %6775 = vmatprep.subr.bf16.mxu0 %v7393_v30  ;;  %v7433_v26 = vld [vmem:[%s9199_s1 + $0xd70] sm:$0xff]  }
 0x196   :  { %v6473_v23 = vpop.f32.mrb[20].mxu0  ;;  %6797 = vmatprep.subr.bf16.mxu1 %v7394_v32  ;;  %v7436_v30 = vld [vmem:[%s9199_s1 + $0xdb0] sm:$0xff]   ;;  %v7438_v32 = vld [vmem:[%s9199_s1 + $0xdf8] sm:$0xff]  }
 0x197   :  { %v6495_v25 = vpop.f32.mrb[20].mxu1  ;;  %v6474_v27 = vpop.f32.mrb[21].mxu0 }
 0x198   :  { %v6475_v28 = vadd.f32 %v6474_v27, %v6473_v23  ;;  %v6496_v29 = vpop.f32.mrb[21].mxu1  ;;  %v6476_v33 = vpop.f32.mrb[22].mxu0  ;;  %6776 = vmatpush3.bf16.msra.mxu0 %v7395_v36  ;;  %v7432_v23 = vld [vmem:[%s9199_s1 + $0xda8] sm:$0xff]  }
 0x199   :  { %v6497_v31 = vadd.f32 %v6496_v29, %v6495_v25  ;;  %v6498_v35 = vpop.f32.mrb[22].mxu1  ;;  %v6477_v38 = vpop.f32.mrb[23].mxu0  ;;  %6798 = vmatpush3.bf16.msra.mxu1 %v7396_v37  ;;  %6777 = vmatprep.subr.bf16.mxu0 %v7397_v41  ;;  %v7435_v29 = vld [vmem:[%s9199_s1 + $0xd30] sm:$0xff]   ;;  %v7439_v33 = vld [vmem:[%s9199_s1 + $0xd38] sm:$0xff]   ;;  %v7445_v41 = vld [vmem:[%s9199_s1 + $0xe40] sm:$0xff]  }
 0x19a   :  { %v4809_v34 = vadd.f32 %v6475_v28, %v8749_v55  ;;  %v6499_v40 = vpop.f32.mrb[23].mxu1  ;;  %6799 = vmatprep.subr.bf16.mxu1 %v7398_v42  ;;  %v5712_v55 = vcombine.high %v40_v50, %v40_v50  ;;  %v7434_v28 = vld [vmem:[%s9199_s1 + $0xdf0] sm:$0xff]   ;;  %v42_v38 = vld [vmem:[%s9200_s0 + $0xd8] sm:$0xff]  ;;  %v7446_v42 = vld [vmem:[%s9199_s1 + $0xec0] sm:$0xff]  }
 0x19b   :  { %v41_v35 = vld [vmem:[%s9200_s0 + $0xd0] sm:$0xff]  ;;  %v5716_v40 = vcombine.high %v42_v38, %v42_v38 }
 0x19c   :  { %v8851_v39 = vadd.f32 %v6497_v31, %v4809_v34  ;;  %6778 = vmatpush3.bf16.msra.mxu0 %v7399_v43  ;;  %5406 = vmatprep.mubr.bf16.mxu1 %v5712_v55  ;;  %v7437_v31 = vld [vmem:[%s9199_s1 + $0xd78] sm:$0xff]   ;;  %v5713_v36 = vcombine.low %v41_v35, %v41_v35  ;;  %v5714_v37 = vcombine.high %v41_v35, %v41_v35  ;;  %v7447_v43 = vld [vmem:[%s9199_s1 + $0xe00] sm:$0xff]   ;;  %v7454_v50 = vld [vmem:[%s9199_s1 + $0xed0] sm:$0xff]  }
 0x19d   :  { %6800 = vmatpush3.bf16.msra.mxu1 %v7400_v44  ;;  %6779 = vmatprep.subr.bf16.mxu0 %v7401_v45  ;;  %v7440_v34 = vld [vmem:[%s9199_s1 + $0xdb8] sm:$0xff]   ;;  %v7448_v44 = vld [vmem:[%s9199_s1 + $0xe80] sm:$0xff]   ;;  %v7449_v45 = vld [vmem:[%s9199_s1 + $0xe48] sm:$0xff]  }
 0x19e   :  { %6801 = vmatprep.subr.bf16.mxu1 %v7402_v46  ;;  %v7450_v46 = vld [vmem:[%s9199_s1 + $0xec8] sm:$0xff]   ;;  %v7459_v55 = vld [vmem:[%s9199_s1 + $0xe18] sm:$0xff]   ;;  %v7489_v35 = vld [vmem:[%s9199_s1 + $0xf50] sm:$0xff]  }
 0x1a0   :  { %6780 = vmatpush3.bf16.msra.mxu0 %v7403_v47  ;;  %v7451_v47 = vld [vmem:[%s9199_s1 + $0xe08] sm:$0xff]  }
 0x1a1   :  { %6802 = vmatpush3.bf16.msra.mxu1 %v7404_v48  ;;  %6809 = vmatprep.subr.bf16.mxu0 %v7409_v54  ;;  %v7452_v48 = vld [vmem:[%s9199_s1 + $0xe88] sm:$0xff]   ;;  %v7458_v54 = vld [vmem:[%s9199_s1 + $0xed8] sm:$0xff]  }
 0x1a2   :  { %6831 = vmatprep.subr.bf16.mxu1 %v7410_v56  ;;  %v7460_v56 = vld [vmem:[%s9199_s1 + $0xe98] sm:$0xff]  }
 0x1a3   :  { %5367 = vmatmul.mubr.bf16.vlgmr.msra.gmra.mrb[48].mxu0 %v5709_v51  ;;  %v7455_v51 = vld [vmem:[%s9199_s1 + $0xe10] sm:$0xff]  }
 0x1a4   :  { %5407 = vmatmul.mubr.bf16.vlgmr.msra.gmra.mrb[48].mxu1 %v5711_v53  ;;  %6810 = vmatpush3.bf16.msra.mxu0 %v7411_v57  ;;  %v7457_v53 = vld [vmem:[%s9199_s1 + $0xe58] sm:$0xff]   ;;  %v7461_v57 = vld [vmem:[%s9199_s1 + $0xe60] sm:$0xff]  }
 0x1a5   :  { %6832 = vmatpush3.bf16.msra.mxu1 %v7412_v58  ;;  %6811 = vmatprep.subr.bf16.mxu0 %v7413_v59  ;;  %v7462_v58 = vld [vmem:[%s9199_s1 + $0xee0] sm:$0xff]  }
 0x1a6   :  { %6833 = vmatprep.subr.bf16.mxu1 %v7414_v60  ;;  %5446 = vmatprep.mubr.bf16.mxu0 %v5714_v37  ;;  %v7463_v60 = vld [vmem:[%s9199_s1 + $0xe20] sm:$0xff]   ;;  %v7491_v37 = vld [vmem:[%s9199_s1 + $0xf10] sm:$0xff]  }
 0x1a7   :  { %5486 = vmatprep.mubr.bf16.mxu1 %v5716_v40  ;;  %v7494_v40 = vld [vmem:[%s9199_s1 + $0xfd8] sm:$0xff]  }
 0x1a8   :  { %6812 = vmatpush3.bf16.msra.mxu0 %v7415_v61 }
 0x1a9   :  { %6834 = vmatpush3.bf16.msra.mxu1 %v7416_v62  ;;  %6813 = vmatprep.subr.bf16.mxu0 %v7417_v63  ;;  %v7464_v62 = vld [vmem:[%s9199_s1 + $0xea0] sm:$0xff]  }
 0x1aa   :  { %6835 = vmatprep.subr.bf16.mxu1 %v7418_v0 }
 0x1ac   :  { %6814 = vmatpush3.bf16.msra.mxu0 %v7419_v1  ;;  %v7465_v1 = vld [vmem:[%s9199_s1 + $0xe68] sm:$0xff]  }
 0x1ad   :  { %6836 = vmatpush3.bf16.msra.mxu1 %v7420_v2  ;;  %6815 = vmatprep.subr.bf16.mxu0 %v7421_v3 }
 0x1ae   :  { %6837 = vmatprep.subr.bf16.mxu1 %v7422_v4  ;;  %v7466_v4 = vld [vmem:[%s9199_s1 + $0xee8] sm:$0xff]  }
 0x1b0   :  { %6816 = vmatpush3.bf16.msra.mxu0 %v7423_v5 }
 0x1b1   :  { %6838 = vmatpush3.bf16.msra.mxu1 %v7424_v6  ;;  %6817 = vmatprep.subr.bf16.mxu0 %v7425_v7  ;;  %v7467_v7 = vld [vmem:[%s9199_s1 + $0xe28] sm:$0xff]  }
 0x1b2   :  { %6839 = vmatprep.subr.bf16.mxu1 %v7426_v8 }
 0x1b4   :  { %6818 = vmatpush3.bf16.msra.mxu0 %v7427_v10 }
 0x1b5   :  { %6840 = vmatpush3.bf16.msra.mxu1 %v7428_v12  ;;  %6819 = vmatprep.subr.bf16.mxu0 %v7429_v15  ;;  %v7469_v12 = vld [vmem:[%s9199_s1 + $0xe70] sm:$0xff]  }
 0x1b6   :  { %v6517_v9 = vpop.f32.mrb[24].mxu0  ;;  %6841 = vmatprep.subr.bf16.mxu1 %v7430_v18  ;;  %v7471_v15 = vld [vmem:[%s9199_s1 + $0xe30] sm:$0xff]   ;;  %v7474_v18 = vld [vmem:[%s9199_s1 + $0xef8] sm:$0xff]  }
 0x1b7   :  { %v6539_v11 = vpop.f32.mrb[24].mxu1  ;;  %v6518_v13 = vpop.f32.mrb[25].mxu0 }
 0x1b8   :  { %v6540_v14 = vpop.f32.mrb[25].mxu1  ;;  %v6519_v16 = vadd.f32 %v6518_v13, %v6517_v9  ;;  %v6520_v19 = vpop.f32.mrb[26].mxu0  ;;  %6820 = vmatpush3.bf16.msra.mxu0 %v7431_v21  ;;  %v7468_v9 = vld [vmem:[%s9199_s1 + $0xea8] sm:$0xff]   ;;  %v43_v21 = vld [vmem:[%s9200_s0 + $0xe0] sm:$0xff] }
 0x1b9   :  { %v6541_v17 = vadd.f32 %v6540_v14, %v6539_v11  ;;  %v6542_v20 = vpop.f32.mrb[26].mxu1  ;;  %v6521_v24 = vpop.f32.mrb[27].mxu0  ;;  %6842 = vmatpush3.bf16.msra.mxu1 %v7432_v23  ;;  %6821 = vmatprep.subr.bf16.mxu0 %v7433_v26  ;;  %v7470_v14 = vld [vmem:[%s9199_s1 + $0xef0] sm:$0xff]   ;;  %v7475_v19 = vld [vmem:[%s9199_s1 + $0xe38] sm:$0xff]   ;;  %v5717_v23 = vcombine.low %v43_v21, %v43_v21 }
 0x1ba   :  { %v4889_v22 = vadd.f32 %v6519_v16, %v8851_v39  ;;  %v6543_v25 = vpop.f32.mrb[27].mxu1  ;;  %6843 = vmatprep.subr.bf16.mxu1 %v7434_v28  ;;  %v5715_v39 = vcombine.low %v42_v38, %v42_v38  ;;  %v7472_v16 = vld [vmem:[%s9199_s1 + $0xeb0] sm:$0xff]   ;;  %v7476_v20 = vld [vmem:[%s9199_s1 + $0xeb8] sm:$0xff]   ;;  %v5718_v24 = vcombine.high %v43_v21, %v43_v21  ;;  %v7482_v28 = vld [vmem:[%s9199_s1 + $0xfc0] sm:$0xff]  }
 0x1bb   :  { %v7492_v38 = vld [vmem:[%s9199_s1 + $0xf90] sm:$0xff]  }
 0x1bc   :  { %v8959_v27 = vadd.f32 %v6541_v17, %v4889_v22  ;;  %6822 = vmatpush3.bf16.msra.mxu0 %v7435_v29  ;;  %v7473_v17 = vld [vmem:[%s9199_s1 + $0xe78] sm:$0xff]   ;;  %v44_v22 = vld [vmem:[%s9200_s0 + $0xe8] sm:$0xff]  ;;  %v7483_v29 = vld [vmem:[%s9199_s1 + $0xf00] sm:$0xff]  }
 0x1bd   :  { %6844 = vmatpush3.bf16.msra.mxu1 %v7436_v30  ;;  %6823 = vmatprep.subr.bf16.mxu0 %v7437_v31  ;;  %v5719_v25 = vcombine.low %v44_v22, %v44_v22  ;;  %v5720_v26 = vcombine.high %v44_v22, %v44_v22  ;;  %v7484_v30 = vld [vmem:[%s9199_s1 + $0xf80] sm:$0xff]   ;;  %v7485_v31 = vld [vmem:[%s9199_s1 + $0xf48] sm:$0xff]  }
 0x1be   :  { %6845 = vmatprep.subr.bf16.mxu1 %v7438_v32  ;;  %v7486_v32 = vld [vmem:[%s9199_s1 + $0xfc8] sm:$0xff]  }
 0x1c0   :  { %6824 = vmatpush3.bf16.msra.mxu0 %v7439_v33  ;;  %v7487_v33 = vld [vmem:[%s9199_s1 + $0xf08] sm:$0xff]  }
 0x1c1   :  { %6846 = vmatpush3.bf16.msra.mxu1 %v7440_v34  ;;  %6853 = vmatprep.subr.bf16.mxu0 %v7445_v41  ;;  %v7488_v34 = vld [vmem:[%s9199_s1 + $0xf88] sm:$0xff]   ;;  %v7495_v41 = vld [vmem:[%s9199_s1 + $0xf18] sm:$0xff]  }
 0x1c2   :  { %6875 = vmatprep.subr.bf16.mxu1 %v7446_v42  ;;  %v7496_v42 = vld [vmem:[%s9199_s1 + $0xf98] sm:$0xff]  }
 0x1c3   :  { %5447 = vmatmul.mubr.bf16.vlgmr.msra.gmra.mrb[52].mxu0 %v5713_v36  ;;  %v7490_v36 = vld [vmem:[%s9199_s1 + $0xfd0] sm:$0xff]  }
 0x1c4   :  { %5487 = vmatmul.mubr.bf16.vlgmr.msra.gmra.mrb[52].mxu1 %v5715_v39  ;;  %6854 = vmatpush3.bf16.msra.mxu0 %v7447_v43  ;;  %v7493_v39 = vld [vmem:[%s9199_s1 + $0xf58] sm:$0xff]   ;;  %v7497_v43 = vld [vmem:[%s9199_s1 + $0xf60] sm:$0xff]  }
 0x1c5   :  { %6876 = vmatpush3.bf16.msra.mxu1 %v7448_v44  ;;  %6855 = vmatprep.subr.bf16.mxu0 %v7449_v45  ;;  %v7498_v44 = vld [vmem:[%s9199_s1 + $0xfe0] sm:$0xff]  }
 0x1c6   :  { %6877 = vmatprep.subr.bf16.mxu1 %v7450_v46  ;;  %5526 = vmatprep.mubr.bf16.mxu0 %v5718_v24  ;;  %v7499_v45 = vld [vmem:[%s9199_s1 + $0xf20] sm:$0xff]  }
 0x1c7   :  { %5566 = vmatprep.mubr.bf16.mxu1 %v5720_v26 }
 0x1c8   :  { %6856 = vmatpush3.bf16.msra.mxu0 %v7451_v47  ;;  %v7500_v47 = vld [vmem:[%s9199_s1 + $0xfa0] sm:$0xff]  }
 0x1c9   :  { %6878 = vmatpush3.bf16.msra.mxu1 %v7452_v48  ;;  %6857 = vmatprep.subr.bf16.mxu0 %v7453_v49 }
 0x1ca   :  { %6879 = vmatprep.subr.bf16.mxu1 %v7454_v50 }
 0x1cc   :  { %6858 = vmatpush3.bf16.msra.mxu0 %v7455_v51 }
 0x1cd   :  { %6880 = vmatpush3.bf16.msra.mxu1 %v7456_v52  ;;  %6859 = vmatprep.subr.bf16.mxu0 %v7457_v53  ;;  %v7501_v53 = vld [vmem:[%s9199_s1 + $0xf68] sm:$0xff]  }
 0x1ce   :  { %6881 = vmatprep.subr.bf16.mxu1 %v7458_v54 }
 0x1d0   :  { %6860 = vmatpush3.bf16.msra.mxu0 %v7459_v55  ;;  %v7502_v55 = vld [vmem:[%s9199_s1 + $0xfe8] sm:$0xff]  }
 0x1d1   :  { %6882 = vmatpush3.bf16.msra.mxu1 %v7460_v56  ;;  %6861 = vmatprep.subr.bf16.mxu0 %v7461_v57 }
 0x1d2   :  { %6883 = vmatprep.subr.bf16.mxu1 %v7462_v58  ;;  %v7503_v58 = vld [vmem:[%s9199_s1 + $0xf28] sm:$0xff]  }
 0x1d4   :  { %6862 = vmatpush3.bf16.msra.mxu0 %v7463_v60  ;;  %v7504_v60 = vld [vmem:[%s9199_s1 + $0xfa8] sm:$0xff]  }
 0x1d5   :  { %6884 = vmatpush3.bf16.msra.mxu1 %v7464_v62  ;;  %6863 = vmatprep.subr.bf16.mxu0 %v7465_v1  ;;  %v7507_v1 = vld [vmem:[%s9199_s1 + $0xf30] sm:$0xff]  }
 0x1d6   :  { %v6561_v59 = vpop.f32.mrb[28].mxu0  ;;  %6885 = vmatprep.subr.bf16.mxu1 %v7466_v4  ;;  %v7510_v4 = vld [vmem:[%s9199_s1 + $0xff8] sm:$0xff]  }
 0x1d7   :  { %v6583_v61 = vpop.f32.mrb[28].mxu1  ;;  %v6562_v63 = vpop.f32.mrb[29].mxu0 }
 0x1d8   :  { %v6584_v0 = vpop.f32.mrb[29].mxu1  ;;  %v6563_v2 = vadd.f32 %v6562_v63, %v6561_v59  ;;  %v6564_v5 = vpop.f32.mrb[30].mxu0  ;;  %6864 = vmatpush3.bf16.msra.mxu0 %v7467_v7  ;;  %v7505_v63 = vld [vmem:[%s9199_s1 + $0xf70] sm:$0xff]  }
 0x1d9   :  { %v6585_v3 = vadd.f32 %v6584_v0, %v6583_v61  ;;  %v6586_v6 = vpop.f32.mrb[30].mxu1  ;;  %v6565_v10 = vpop.f32.mrb[31].mxu0  ;;  %6886 = vmatpush3.bf16.msra.mxu1 %v7468_v9  ;;  %6865 = vmatprep.subr.bf16.mxu0 %v7469_v12  ;;  %v7506_v0 = vld [vmem:[%s9199_s1 + $0xff0] sm:$0xff]   ;;  %v7511_v5 = vld [vmem:[%s9199_s1 + $0xf38] sm:$0xff]  }
 0x1da   :  { %v4969_v8 = vadd.f32 %v6563_v2, %v8959_v27  ;;  %v6587_v11 = vpop.f32.mrb[31].mxu1  ;;  %6887 = vmatprep.subr.bf16.mxu1 %v7470_v14  ;;  %v7481_v27 = vld [vmem:[%s9199_s1 + $0xf40] sm:$0xff]   ;;  %v7508_v2 = vld [vmem:[%s9199_s1 + $0xfb0] sm:$0xff]   ;;  %v7512_v6 = vld [vmem:[%s9199_s1 + $0xfb8] sm:$0xff]  }
 0x1db   :  { %v45_v7 = vld [vmem:[%s9200_s0 + $0xf0] sm:$0xff] }
 0x1dc   :  { %v9064_v13 = vadd.f32 %v6585_v3, %v4969_v8  ;;  %6866 = vmatpush3.bf16.msra.mxu0 %v7471_v15  ;;  %v7509_v3 = vld [vmem:[%s9199_s1 + $0xf78] sm:$0xff]   ;;  %v5721_v9 = vcombine.low %v45_v7, %v45_v7  ;;  %v5722_v10 = vcombine.high %v45_v7, %v45_v7 }
 0x1dd   :  { %6888 = vmatpush3.bf16.msra.mxu1 %v7472_v16  ;;  %6867 = vmatprep.subr.bf16.mxu0 %v7473_v17  ;;  %v46_v8 = vld [vmem:[%s9200_s0 + $0xf8] sm:$0xff] }
 0x1de   :  { %6889 = vmatprep.subr.bf16.mxu1 %v7474_v18  ;;  %v5723_v11 = vcombine.low %v46_v8, %v46_v8  ;;  %v5724_v12 = vcombine.high %v46_v8, %v46_v8 }
 0x1e0   :  { %6868 = vmatpush3.bf16.msra.mxu0 %v7475_v19 }
 0x1e1   :  { %6890 = vmatpush3.bf16.msra.mxu1 %v7476_v20  ;;  %6897 = vmatprep.subr.bf16.mxu0 %v7481_v27 }
 0x1e2   :  { %6919 = vmatprep.subr.bf16.mxu1 %v7482_v28 }
 0x1e3   :  { %5527 = vmatmul.mubr.bf16.vlgmr.msra.gmra.mrb[56].mxu0 %v5717_v23 }
 0x1e4   :  { %5567 = vmatmul.mubr.bf16.vlgmr.msra.gmra.mrb[56].mxu1 %v5719_v25  ;;  %6898 = vmatpush3.bf16.msra.mxu0 %v7483_v29 }
 0x1e5   :  { %6920 = vmatpush3.bf16.msra.mxu1 %v7484_v30  ;;  %6899 = vmatprep.subr.bf16.mxu0 %v7485_v31 }
 0x1e6   :  { %6921 = vmatprep.subr.bf16.mxu1 %v7486_v32  ;;  %5606 = vmatprep.mubr.bf16.mxu0 %v5722_v10 }
 0x1e7   :  { %5646 = vmatprep.mubr.bf16.mxu1 %v5724_v12 }
 0x1e8   :  { %6900 = vmatpush3.bf16.msra.mxu0 %v7487_v33 }
 0x1e9   :  { %6922 = vmatpush3.bf16.msra.mxu1 %v7488_v34  ;;  %6901 = vmatprep.subr.bf16.mxu0 %v7489_v35 }
 0x1ea   :  { %6923 = vmatprep.subr.bf16.mxu1 %v7490_v36 }
 0x1ec   :  { %6902 = vmatpush3.bf16.msra.mxu0 %v7491_v37 }
 0x1ed   :  { %6924 = vmatpush3.bf16.msra.mxu1 %v7492_v38  ;;  %6903 = vmatprep.subr.bf16.mxu0 %v7493_v39 }
 0x1ee   :  { %6925 = vmatprep.subr.bf16.mxu1 %v7494_v40 }
 0x1f0   :  { %6904 = vmatpush3.bf16.msra.mxu0 %v7495_v41 }
 0x1f1   :  { %6926 = vmatpush3.bf16.msra.mxu1 %v7496_v42  ;;  %6905 = vmatprep.subr.bf16.mxu0 %v7497_v43 }
 0x1f2   :  { %6927 = vmatprep.subr.bf16.mxu1 %v7498_v44 }
 0x1f4   :  { %6906 = vmatpush3.bf16.msra.mxu0 %v7499_v45 }
 0x1f5   :  { %6928 = vmatpush3.bf16.msra.mxu1 %v7500_v47  ;;  %6907 = vmatprep.subr.bf16.mxu0 %v7501_v53 }
 0x1f6   :  { %v6605_v46 = vpop.f32.mrb[32].mxu0  ;;  %6929 = vmatprep.subr.bf16.mxu1 %v7502_v55 }
 0x1f7   :  { %v6627_v48 = vpop.f32.mrb[32].mxu1  ;;  %v6606_v49 = vpop.f32.mrb[33].mxu0 }
 0x1f8   :  { %v6628_v50 = vpop.f32.mrb[33].mxu1  ;;  %v6607_v51 = vadd.f32 %v6606_v49, %v6605_v46  ;;  %v6608_v54 = vpop.f32.mrb[34].mxu0  ;;  %6908 = vmatpush3.bf16.msra.mxu0 %v7503_v58 }
 0x1f9   :  { %v6629_v52 = vadd.f32 %v6628_v50, %v6627_v48  ;;  %v6630_v56 = vpop.f32.mrb[34].mxu1  ;;  %v6609_v59 = vpop.f32.mrb[35].mxu0  ;;  %6930 = vmatpush3.bf16.msra.mxu1 %v7504_v60  ;;  %6909 = vmatprep.subr.bf16.mxu0 %v7505_v63 }
 0x1fa   :  { %v5049_v57 = vadd.f32 %v6607_v51, %v9064_v13  ;;  %v6631_v61 = vpop.f32.mrb[35].mxu1  ;;  %6931 = vmatprep.subr.bf16.mxu1 %v7506_v0 }
 0x1fc   :  { %v5089_v62 = vadd.f32 %v6629_v52, %v5049_v57  ;;  %6910 = vmatpush3.bf16.msra.mxu0 %v7507_v1 }
 0x1fd   :  { %6932 = vmatpush3.bf16.msra.mxu1 %v7508_v2  ;;  %6911 = vmatprep.subr.bf16.mxu0 %v7509_v3 }
 0x1fe   :  { %6933 = vmatprep.subr.bf16.mxu1 %v7510_v4 }
 0x200   :  { %6912 = vmatpush3.bf16.msra.mxu0 %v7511_v5 }
 0x201   :  { %6934 = vmatpush3.bf16.msra.mxu1 %v7512_v6 }
 0x203   :  { %5607 = vmatmul.mubr.bf16.vlgmr.msra.gmra.mrb[60].mxu0 %v5721_v9 }
 0x204   :  { %5647 = vmatmul.mubr.bf16.vlgmr.msra.gmra.mrb[60].mxu1 %v5723_v11 }
 0x216   :  { %v6649_v13 = vpop.f32.mrb[36].mxu0 }
 0x217   :  { %v6671_v14 = vpop.f32.mrb[36].mxu1  ;;  %v6650_v15 = vpop.f32.mrb[37].mxu0 }
 0x218   :  { %v6651_v16 = vadd.f32 %v6650_v15, %v6649_v13  ;;  %v6672_v17 = vpop.f32.mrb[37].mxu1  ;;  %v6652_v18 = vpop.f32.mrb[38].mxu0 }
 0x219   :  { %v6673_v19 = vadd.f32 %v6672_v17, %v6671_v14  ;;  %v6674_v20 = vpop.f32.mrb[38].mxu1  ;;  %v6653_v21 = vpop.f32.mrb[39].mxu0 }
 0x21a   :  { %v5129_v22 = vadd.f32 %v6651_v16, %v5089_v62  ;;  %v6675_v23 = vpop.f32.mrb[39].mxu1 }
 0x21c   :  { %v5169_v24 = vadd.f32 %v6673_v19, %v5129_v22 }
 0x236   :  { %v6693_v25 = vpop.f32.mrb[40].mxu0 }
 0x237   :  { %v6715_v26 = vpop.f32.mrb[40].mxu1  ;;  %v6694_v27 = vpop.f32.mrb[41].mxu0 }
 0x238   :  { %v6716_v28 = vpop.f32.mrb[41].mxu1  ;;  %v6695_v29 = vadd.f32 %v6694_v27, %v6693_v25  ;;  %v6696_v31 = vpop.f32.mrb[42].mxu0 }
 0x239   :  { %v6717_v30 = vadd.f32 %v6716_v28, %v6715_v26  ;;  %v6718_v32 = vpop.f32.mrb[42].mxu1  ;;  %v6697_v33 = vpop.f32.mrb[43].mxu0 }
 0x23a   :  { %v6719_v34 = vpop.f32.mrb[43].mxu1  ;;  %v5209_v35 = vadd.f32 %v6695_v29, %v5169_v24 }
 0x23c   :  { %v5249_v36 = vadd.f32 %v6717_v30, %v5209_v35 }
 0x256   :  { %v6737_v37 = vpop.f32.mrb[44].mxu0 }
 0x257   :  { %v6759_v38 = vpop.f32.mrb[44].mxu1  ;;  %v6738_v39 = vpop.f32.mrb[45].mxu0 }
 0x258   :  { %v6739_v40 = vadd.f32 %v6738_v39, %v6737_v37  ;;  %v6760_v41 = vpop.f32.mrb[45].mxu1  ;;  %v6740_v42 = vpop.f32.mrb[46].mxu0 }
 0x259   :  { %v6761_v43 = vadd.f32 %v6760_v41, %v6759_v38  ;;  %v6762_v44 = vpop.f32.mrb[46].mxu1  ;;  %v6741_v45 = vpop.f32.mrb[47].mxu0 }
 0x25a   :  { %v5289_v46 = vadd.f32 %v6739_v40, %v5249_v36  ;;  %v6763_v47 = vpop.f32.mrb[47].mxu1 }
 0x25c   :  { %v5329_v48 = vadd.f32 %v6761_v43, %v5289_v46 }
 0x276   :  { %v6781_v49 = vpop.f32.mrb[48].mxu0 }
 0x277   :  { %v6803_v50 = vpop.f32.mrb[48].mxu1  ;;  %v6782_v51 = vpop.f32.mrb[49].mxu0 }
 0x278   :  { %v6783_v52 = vadd.f32 %v6782_v51, %v6781_v49  ;;  %v6804_v53 = vpop.f32.mrb[49].mxu1  ;;  %v6784_v54 = vpop.f32.mrb[50].mxu0 }
 0x279   :  { %v6805_v55 = vadd.f32 %v6804_v53, %v6803_v50  ;;  %v6806_v56 = vpop.f32.mrb[50].mxu1  ;;  %v6785_v57 = vpop.f32.mrb[51].mxu0 }
 0x27a   :  { %v5369_v58 = vadd.f32 %v6783_v52, %v5329_v48  ;;  %v6807_v59 = vpop.f32.mrb[51].mxu1 }
 0x27c   :  { %v5409_v60 = vadd.f32 %v6805_v55, %v5369_v58 }
 0x296   :  { %v6825_v61 = vpop.f32.mrb[52].mxu0 }
 0x297   :  { %v6847_v62 = vpop.f32.mrb[52].mxu1  ;;  %v6826_v63 = vpop.f32.mrb[53].mxu0 }
 0x298   :  { %v6848_v0 = vpop.f32.mrb[53].mxu1  ;;  %v6827_v1 = vadd.f32 %v6826_v63, %v6825_v61  ;;  %v6828_v3 = vpop.f32.mrb[54].mxu0 }
 0x299   :  { %v6849_v2 = vadd.f32 %v6848_v0, %v6847_v62  ;;  %v6850_v4 = vpop.f32.mrb[54].mxu1  ;;  %v6829_v5 = vpop.f32.mrb[55].mxu0 }
 0x29a   :  { %v6851_v6 = vpop.f32.mrb[55].mxu1  ;;  %v5449_v7 = vadd.f32 %v6827_v1, %v5409_v60 }
 0x29c   :  { %v5489_v8 = vadd.f32 %v6849_v2, %v5449_v7 }
 0x2b6   :  { %v6869_v9 = vpop.f32.mrb[56].mxu0 }
 0x2b7   :  { %v6891_v10 = vpop.f32.mrb[56].mxu1  ;;  %v6870_v11 = vpop.f32.mrb[57].mxu0 }
 0x2b8   :  { %v6871_v12 = vadd.f32 %v6870_v11, %v6869_v9  ;;  %v6892_v13 = vpop.f32.mrb[57].mxu1  ;;  %v6872_v14 = vpop.f32.mrb[58].mxu0 }
 0x2b9   :  { %v6893_v15 = vadd.f32 %v6892_v13, %v6891_v10  ;;  %v6894_v16 = vpop.f32.mrb[58].mxu1  ;;  %v6873_v17 = vpop.f32.mrb[59].mxu0 }
 0x2ba   :  { %v5529_v18 = vadd.f32 %v6871_v12, %v5489_v8  ;;  %v6895_v19 = vpop.f32.mrb[59].mxu1 }
 0x2bc   :  { %v5569_v20 = vadd.f32 %v6893_v15, %v5529_v18 }
 0x2d6   :  { %v6913_v21 = vpop.f32.mrb[60].mxu0 }
 0x2d7   :  { %v6935_v22 = vpop.f32.mrb[60].mxu1  ;;  %v6914_v23 = vpop.f32.mrb[61].mxu0 }
 0x2d8   :  { %v6915_v24 = vadd.f32 %v6914_v23, %v6913_v21  ;;  %v6936_v25 = vpop.f32.mrb[61].mxu1  ;;  %v6916_v26 = vpop.f32.mrb[62].mxu0 }
 0x2d9   :  { %v6937_v27 = vadd.f32 %v6936_v25, %v6935_v22  ;;  %v6938_v28 = vpop.f32.mrb[62].mxu1  ;;  %v6917_v29 = vpop.f32.mrb[63].mxu0 }
 0x2da   :  { %v5609_v30 = vadd.f32 %v6915_v24, %v5569_v20  ;;  %v6939_v31 = vpop.f32.mrb[63].mxu1 }
 0x2dc   :  { %v5649_v32 = vadd.f32 %v6937_v27, %v5609_v30 }
 0x2de   :  { %v5654_v33 = vpack.c.bf16 %v5649_v32, %v5649_v32 }
 0x2e0   :  { %5655 = vst [vmem:[%s9202_s3] sm:$0xf] %v5654_v33 }

</bundles_post_ra>
